<compile_context>
chip_gen: v6e
topology: v6e:2x2x1
jax: 0.10.0
libtpu: 0.0.40
codegen_flags: <defaults>
</compile_context>

<pallas_src>
import functools

import jax
import jax.numpy as jnp
import numpy as np
from jax import lax
from jax.experimental import pallas as pl
from jax.experimental.pallas import tpu as pltpu

BN_EPS = 1e-5


# --------------------------------------------------------------------------
# Fused StageV2 kernel (one batch element per grid step)
# --------------------------------------------------------------------------
def _stagev2_kernel(xpp_ref, mask_ref,
                    wL1_ref, shL1_ref,
                    wR1_ref, shR1_ref,
                    wR2_ref, shR2_ref,
                    wfinL_ref, wfinR_ref, shfin_ref,
                    o_ref, *, hout, wout, cin, mid):
    # xpp_ref : (4, hp2, wp2, cin)  zero-padded input, space-to-depth phases
    # mask_ref: (4, hp2, wp2, 1)    1 inside the image, 0 on the padding halo
    # wL1/wR2 : (9, C)              depthwise 3x3 weights (BN scale folded)
    # wR1     : (cin, mid)          first right 1x1 (BN scale folded)
    # wfinL/R : (cin|mid, 2*mid)    final 1x1s, concat+shuffle folded in cols
    # sh*     : (1, C)              folded BN shifts
    hp2, wp2 = hout + 1, wout + 1

    xpp = xpp_ref[...].astype(jnp.float32)                    # (4,hp2,wp2,cin)
    wL1 = wL1_ref[...]
    wR2 = wR2_ref[...]

    # ---- right branch stage 1: 1x1 conv + BN + ReLU on all 4 phases (one matmul)
    xflat = xpp.reshape(4 * hp2 * wp2, cin)
    r = jnp.dot(xflat, wR1_ref[...], preferred_element_type=jnp.float32)
    r = jnp.maximum(r + shR1_ref[...], 0.0)
    # zero the padding halo so the next depthwise conv sees true zero-padding
    r = r.reshape(4, hp2, wp2, mid) * mask_ref[...]

    # ---- both depthwise 3x3 / stride-2 convs (+ folded BN shift)
    # tap (di, dj): padded coords (2i+di, 2j+dj) -> phase (di%2, dj%2),
    # contiguous slice offset (di//2, dj//2).
    acc_l = jnp.zeros((hout, wout, cin), jnp.float32)
    acc_r = jnp.zeros((hout, wout, mid), jnp.float32)
    for di in range(3):
        for dj in range(3):
            f = (di % 2) * 2 + (dj % 2)
            rr, cc = di // 2, dj // 2
            t = di * 3 + dj
            acc_l = acc_l + xpp[f, rr:rr + hout, cc:cc + wout, :] * wL1[t:t + 1, :]
            acc_r = acc_r + r[f, rr:rr + hout, cc:cc + wout, :] * wR2[t:t + 1, :]
    left_pre = acc_l + shL1_ref[...]                          # (hout, wout, cin)
    right_pre = acc_r + shR2_ref[...]                         # (hout, wout, mid)

    # ---- final 1x1 convs + BN + ReLU, fused with concat + channel shuffle
    lp = left_pre.reshape(hout * wout, cin)
    rp = right_pre.reshape(hout * wout, mid)
    out = jnp.dot(lp, wfinL_ref[...], preferred_element_type=jnp.float32)
    out = out + jnp.dot(rp, wfinR_ref[...], preferred_element_type=jnp.float32)
    out = jnp.maximum(out + shfin_ref[...], 0.0)              # (hout*wout, 2*mid)
    o_ref[...] = out[None].astype(o_ref.dtype)


# --------------------------------------------------------------------------
# Parameter construction (deterministic, matches nn.Module shapes)
# --------------------------------------------------------------------------
def _bn_params(key, c):
    k1, k2, k3, k4 = jax.random.split(key, 4)
    gamma = jax.random.uniform(k1, (c,), jnp.float32, 0.5, 1.5)
    beta = 0.1 * jax.random.normal(k2, (c,), jnp.float32)
    mean = 0.1 * jax.random.normal(k3, (c,), jnp.float32)
    var = jax.random.uniform(k4, (c,), jnp.float32, 0.5, 1.5)
    return dict(gamma=gamma, beta=beta, mean=mean, var=var)


def _bn_fold(p):
    scale = p["gamma"] / jnp.sqrt(p["var"] + BN_EPS)
    shift = p["beta"] - p["mean"] * scale
    return scale, shift


def init_stagev2_params(key, in_planes, out_planes):
    mid = out_planes // 2
    keys = jax.random.split(key, 10)
    return {
        # PyTorch conv weight layouts (OIHW / depthwise (C,1,3,3))
        "convL1": 0.1 * jax.random.normal(keys[0], (in_planes, 1, 3, 3), jnp.float32),
        "convL2": 0.1 * jax.random.normal(keys[1], (mid, in_planes, 1, 1), jnp.float32),
        "convR1": 0.1 * jax.random.normal(keys[2], (mid, in_planes, 1, 1), jnp.float32),
        "convR2": 0.1 * jax.random.normal(keys[3], (mid, 1, 3, 3), jnp.float32),
        "convR3": 0.1 * jax.random.normal(keys[4], (mid, mid, 1, 1), jnp.float32),
        "bnL1": _bn_params(keys[5], in_planes),
        "bnL2": _bn_params(keys[6], mid),
        "bnR1": _bn_params(keys[7], mid),
        "bnR2": _bn_params(keys[8], mid),
        "bnR3": _bn_params(keys[9], mid),
    }


# --------------------------------------------------------------------------
# StageV2 forward (single fused Pallas kernel)
# --------------------------------------------------------------------------
def stagev2_forward(x_nchw, params, *, shuffle=True):
    b, cin, h, w = x_nchw.shape
    # TODO(synk): odd spatial sizes need a different phase decomposition.
    assert h % 2 == 0 and w % 2 == 0, "even H, W required"
    mid = params["convL2"].shape[0]
    cout = 2 * mid
    hout, wout = h // 2, w // 2
    hp2, wp2 = hout + 1, wout + 1

    # ---- fold eval-mode BatchNorm into the conv weights ---------------------
    sL1, bL1 = _bn_fold(params["bnL1"])
    sL2, bL2 = _bn_fold(params["bnL2"])
    sR1, bR1 = _bn_fold(params["bnR1"])
    sR2, bR2 = _bn_fold(params["bnR2"])
    sR3, bR3 = _bn_fold(params["bnR3"])

    # depthwise 3x3 weights -> (9, C), BN scale folded per channel
    wL1 = (params["convL1"][:, 0] * sL1[:, None, None]).reshape(cin, 9).T
    wR2 = (params["convR2"][:, 0] * sR2[:, None, None]).reshape(mid, 9).T
    # 1x1 weights as (Cin, Cout), BN scale folded into the output columns
    wR1 = params["convR1"][:, :, 0, 0].T * sR1[None, :]          # (cin, mid)
    wL2 = params["convL2"][:, :, 0, 0].T * sL2[None, :]          # (cin, mid)
    wR3 = params["convR3"][:, :, 0, 0].T * sR3[None, :]          # (mid, mid)

    # fuse concat + channel shuffle into the final 1x1 weight columns
    if shuffle:
        src = np.array([2 * (k % mid) + k // mid for k in range(cout)])
    else:
        src = np.arange(cout)
    fullL = jnp.concatenate([wL2, jnp.zeros((cin, mid), wL2.dtype)], axis=1)
    fullR = jnp.concatenate([jnp.zeros((mid, mid), wR3.dtype), wR3], axis=1)
    shf = jnp.concatenate([bL2, bR3])
    wfinL = fullL[:, src]                                        # (cin, cout)
    wfinR = fullR[:, src]                                        # (mid, cout)
    shfin = shf[src].reshape(1, cout)

    # ---- input relayout: NCHW -> zero-padded NHWC -> 4 space-to-depth phases
    xt = jnp.transpose(x_nchw, (0, 2, 3, 1))                     # (B,H,W,C)
    xp = jnp.pad(xt, ((0, 0), (1, 1), (1, 1), (0, 0)))           # (B,H+2,W+2,C)
    xpp = xp.reshape(b, hp2, 2, wp2, 2, cin)
    xpp = xpp.transpose(0, 2, 4, 1, 3, 5).reshape(b * 4, hp2, wp2, cin)

    # halo mask: exactly one padded row and one padded column per phase plane
    mask_np = np.ones((4, hp2, wp2, 1), np.float32)
    for p in (0, 1):
        for q in (0, 1):
            f = p * 2 + q
            mask_np[f, p * (hp2 - 1), :, 0] = 0.0
            mask_np[f, :, q * (wp2 - 1), 0] = 0.0
    mask = jnp.asarray(mask_np)

    kern = functools.partial(_stagev2_kernel, hout=hout, wout=wout,
                             cin=cin, mid=mid)
    full2d = lambda i: (0, 0)
    out = pl.pallas_call(
        kern,
        out_shape=jax.ShapeDtypeStruct((b, hout * wout, cout), x_nchw.dtype),
        grid=(b,),
        in_specs=[
            pl.BlockSpec((4, hp2, wp2, cin), lambda i: (i, 0, 0, 0)),   # xpp
            pl.BlockSpec((4, hp2, wp2, 1), lambda i: (0, 0, 0, 0)),     # mask
            pl.BlockSpec((9, cin), full2d),                             # wL1
            pl.BlockSpec((1, cin), full2d),                             # shiftL1
            pl.BlockSpec((cin, mid), full2d),                           # wR1
            pl.BlockSpec((1, mid), full2d),                             # shiftR1
            pl.BlockSpec((9, mid), full2d),                             # wR2
            pl.BlockSpec((1, mid), full2d),                             # shiftR2
            pl.BlockSpec((cin, cout), full2d),                          # wfinL
            pl.BlockSpec((mid, cout), full2d),                          # wfinR
            pl.BlockSpec((1, cout), full2d),                            # shift_fin
        ],
        out_specs=pl.BlockSpec((1, hout * wout, cout), lambda i: (i, 0, 0)),
        compiler_params=pltpu.CompilerParams(
            dimension_semantics=("parallel",)),
    )(xpp, mask,
      wL1, bL1.reshape(1, cin),
      wR1, bR1.reshape(1, mid),
      wR2, bR2.reshape(1, mid),
      wfinL, wfinR, shfin)

    out = out.reshape(b, hout, wout, cout)
    return jnp.transpose(out, (0, 3, 1, 2))                     # back to NCHW


# --------------------------------------------------------------------------
# Pure-JAX reference (mirrors the PyTorch forward, NCHW) for validation
# --------------------------------------------------------------------------
def _ref_conv(x, w, stride, padding, groups):
    return lax.conv_general_dilated(
        x, w, window_strides=(stride, stride),
        padding=((padding, padding), (padding, padding)),
        dimension_numbers=("NCHW", "OIHW", "NCHW"),
        feature_group_count=groups)


def _ref_bn(x, p):
    s = (p["gamma"] / jnp.sqrt(p["var"] + BN_EPS))[None, :, None, None]
    bsh = (p["beta"] - p["mean"] * p["gamma"] / jnp.sqrt(p["var"] + BN_EPS))[None, :, None, None]
    return x * s + bsh


def stagev2_reference(x, params, *, shuffle=True):
    in_planes = x.shape[1]
    mid = params["convL2"].shape[0]
    left = _ref_bn(_ref_conv(x, params["convL1"], 2, 1, in_planes), params["bnL1"])
    left = jax.nn.relu(_ref_bn(_ref_conv(left, params["convL2"], 1, 0, 1), params["bnL2"]))
    right = jax.nn.relu(_ref_bn(_ref_conv(x, params["convR1"], 1, 0, 1), params["bnR1"]))
    right = _ref_bn(_ref_conv(right, params["convR2"], 2, 1, mid), params["bnR2"])
    right = jax.nn.relu(_ref_bn(_ref_conv(right, params["convR3"], 1, 0, 1), params["bnR3"]))
    out = jnp.concatenate([left, right], axis=1)
    if shuffle:
        b, c, h, w = out.shape
        out = out.reshape(b, mid, 2, h, w).transpose(0, 2, 1, 3, 4).reshape(b, c, h, w)
    return out


# --------------------------------------------------------------------------
if __name__ == "__main__":
    B, IN_PLANES, OUT_PLANES, H, W = 2, 4, 8, 16, 16
    SHUFFLE = True

    key = jax.random.PRNGKey(0)
    k_x, k_p = jax.random.split(key)
    x = jax.random.normal(k_x, (B, IN_PLANES, H, W), jnp.float32)   # NCHW like PyTorch
    params = init_stagev2_params(k_p, IN_PLANES, OUT_PLANES)

    out = jax.block_until_ready(stagev2_forward(x, params, shuffle=SHUFFLE))

    ref = jax.block_until_ready(stagev2_reference(x, params, shuffle=SHUFFLE))
    assert out.shape == (B, OUT_PLANES, H // 2, W // 2), out.shape
    np.testing.assert_allclose(np.asarray(out), np.asarray(ref), rtol=1e-4, atol=1e-4)

    print("KERNEL_OK")
</pallas_src>

<mosaic_0001>
module attributes {stable_mosaic.version = 11 : i64} {
  func.func @_stagev2_kernel(%arg0: i32, %arg1: memref<4x9x9x4xf32, #tpu.memory_space<vmem>>, %arg2: memref<4x9x9x1xf32, #tpu.memory_space<vmem>>, %arg3: memref<9x4xf32, #tpu.memory_space<vmem>>, %arg4: memref<1x4xf32, #tpu.memory_space<vmem>>, %arg5: memref<4x4xf32, #tpu.memory_space<vmem>>, %arg6: memref<1x4xf32, #tpu.memory_space<vmem>>, %arg7: memref<9x4xf32, #tpu.memory_space<vmem>>, %arg8: memref<1x4xf32, #tpu.memory_space<vmem>>, %arg9: memref<4x8xf32, #tpu.memory_space<vmem>>, %arg10: memref<4x8xf32, #tpu.memory_space<vmem>>, %arg11: memref<1x8xf32, #tpu.memory_space<vmem>>, %arg12: memref<1x64x8xf32, #tpu.memory_space<vmem>>) attributes {dimension_semantics = [#tpu.dimension_semantics<parallel>], iteration_bounds = array<i64: 2>, scalar_prefetch = 0 : i64, scratch_operands = 0 : i64, tpu.core_type = #tpu.core_type<tc>, window_params = [{transform_indices = @transform_0, window_bounds = array<i64: 4, 9, 9, 4>}, {pipeline_mode = #tpu.pipeline_mode<synchronous>, transform_indices = @transform_1, window_bounds = array<i64: 4, 9, 9, 1>}, {pipeline_mode = #tpu.pipeline_mode<synchronous>, transform_indices = @transform_2, window_bounds = array<i64: 9, 4>}, {pipeline_mode = #tpu.pipeline_mode<synchronous>, transform_indices = @transform_3, window_bounds = array<i64: 1, 4>}, {pipeline_mode = #tpu.pipeline_mode<synchronous>, transform_indices = @transform_4, window_bounds = array<i64: 4, 4>}, {pipeline_mode = #tpu.pipeline_mode<synchronous>, transform_indices = @transform_5, window_bounds = array<i64: 1, 4>}, {pipeline_mode = #tpu.pipeline_mode<synchronous>, transform_indices = @transform_6, window_bounds = array<i64: 9, 4>}, {pipeline_mode = #tpu.pipeline_mode<synchronous>, transform_indices = @transform_7, window_bounds = array<i64: 1, 4>}, {pipeline_mode = #tpu.pipeline_mode<synchronous>, transform_indices = @transform_8, window_bounds = array<i64: 4, 8>}, {pipeline_mode = #tpu.pipeline_mode<synchronous>, transform_indices = @transform_9, window_bounds = array<i64: 4, 8>}, {pipeline_mode = #tpu.pipeline_mode<synchronous>, transform_indices = @transform_10, window_bounds = array<i64: 1, 8>}, {transform_indices = @transform_11, window_bounds = array<i64: 1, 64, 8>}]} {
    %c0 = arith.constant 0 : index
    %c0_0 = arith.constant 0 : index
    %c0_1 = arith.constant 0 : index
    %c0_2 = arith.constant 0 : index
    %0 = vector.load %arg1[%c0, %c0_0, %c0_1, %c0_2] : memref<4x9x9x4xf32, #tpu.memory_space<vmem>>, vector<4x9x9x4xf32>
    %c0_3 = arith.constant 0 : index
    %c0_4 = arith.constant 0 : index
    %1 = vector.load %arg3[%c0_3, %c0_4] : memref<9x4xf32, #tpu.memory_space<vmem>>, vector<9x4xf32>
    %c0_5 = arith.constant 0 : index
    %c0_6 = arith.constant 0 : index
    %2 = vector.load %arg7[%c0_5, %c0_6] : memref<9x4xf32, #tpu.memory_space<vmem>>, vector<9x4xf32>
    %3 = vector.shape_cast %0 : vector<4x9x9x4xf32> to vector<324x4xf32>
    %c0_7 = arith.constant 0 : index
    %c0_8 = arith.constant 0 : index
    %4 = vector.load %arg5[%c0_7, %c0_8] : memref<4x4xf32, #tpu.memory_space<vmem>>, vector<4x4xf32>
    %cst = arith.constant dense<0.000000e+00> : vector<324x4xf32>
    %5 = tpu.matmul %3, %4, %cst {dimension_numbers = #tpu.dot_dimension_numbers<[1], [0], [0], [1], [0, 0, 1, 1], [], []>} : vector<324x4xf32>, vector<4x4xf32>, vector<324x4xf32> -> vector<324x4xf32>
    %c0_9 = arith.constant 0 : index
    %c0_10 = arith.constant 0 : index
    %6 = vector.load %arg6[%c0_9, %c0_10] : memref<1x4xf32, #tpu.memory_space<vmem>>, vector<1x4xf32>
    %7 = vector.broadcast %6 : vector<1x4xf32> to vector<324x4xf32>
    %8 = arith.addf %5, %7 : vector<324x4xf32>
    %cst_11 = arith.constant 0.000000e+00 : f32
    %9 = vector.broadcast %cst_11 : f32 to vector<324x4xf32>
    %10 = arith.maximumf %8, %9 : vector<324x4xf32>
    %11 = vector.shape_cast %10 : vector<324x4xf32> to vector<4x9x9x4xf32>
    %c0_12 = arith.constant 0 : index
    %c0_13 = arith.constant 0 : index
    %c0_14 = arith.constant 0 : index
    %c0_15 = arith.constant 0 : index
    %12 = vector.load %arg2[%c0_12, %c0_13, %c0_14, %c0_15] : memref<4x9x9x1xf32, #tpu.memory_space<vmem>>, vector<4x9x9x1xf32>
    %13 = vector.broadcast %12 : vector<4x9x9x1xf32> to vector<4x9x9x4xf32>
    %14 = arith.mulf %11, %13 : vector<4x9x9x4xf32>
    %cst_16 = arith.constant 0.000000e+00 : f32
    %15 = vector.broadcast %cst_16 : f32 to vector<8x8x4xf32>
    %cst_17 = arith.constant 0.000000e+00 : f32
    %16 = vector.broadcast %cst_17 : f32 to vector<8x8x4xf32>
    %17 = vector.extract_strided_slice %0 {offsets = [0, 0, 0, 0], sizes = [1, 8, 8, 4], strides = [1, 1, 1, 1]} : vector<4x9x9x4xf32> to vector<1x8x8x4xf32>
    %18 = vector.shape_cast %17 : vector<1x8x8x4xf32> to vector<8x8x4xf32>
    %19 = vector.extract_strided_slice %1 {offsets = [0, 0], sizes = [1, 4], strides = [1, 1]} : vector<9x4xf32> to vector<1x4xf32>
    %20 = vector.shape_cast %19 : vector<1x4xf32> to vector<1x1x4xf32>
    %21 = vector.broadcast %20 : vector<1x1x4xf32> to vector<8x8x4xf32>
    %22 = arith.mulf %18, %21 : vector<8x8x4xf32>
    %23 = arith.addf %15, %22 : vector<8x8x4xf32>
    %24 = vector.extract_strided_slice %14 {offsets = [0, 0, 0, 0], sizes = [1, 8, 8, 4], strides = [1, 1, 1, 1]} : vector<4x9x9x4xf32> to vector<1x8x8x4xf32>
    %25 = vector.shape_cast %24 : vector<1x8x8x4xf32> to vector<8x8x4xf32>
    %26 = vector.extract_strided_slice %2 {offsets = [0, 0], sizes = [1, 4], strides = [1, 1]} : vector<9x4xf32> to vector<1x4xf32>
    %27 = vector.shape_cast %26 : vector<1x4xf32> to vector<1x1x4xf32>
    %28 = vector.broadcast %27 : vector<1x1x4xf32> to vector<8x8x4xf32>
    %29 = arith.mulf %25, %28 : vector<8x8x4xf32>
    %30 = arith.addf %16, %29 : vector<8x8x4xf32>
    %31 = vector.extract_strided_slice %0 {offsets = [1, 0, 0, 0], sizes = [1, 8, 8, 4], strides = [1, 1, 1, 1]} : vector<4x9x9x4xf32> to vector<1x8x8x4xf32>
    %32 = vector.shape_cast %31 : vector<1x8x8x4xf32> to vector<8x8x4xf32>
    %33 = vector.extract_strided_slice %1 {offsets = [1, 0], sizes = [1, 4], strides = [1, 1]} : vector<9x4xf32> to vector<1x4xf32>
    %34 = vector.shape_cast %33 : vector<1x4xf32> to vector<1x1x4xf32>
    %35 = vector.broadcast %34 : vector<1x1x4xf32> to vector<8x8x4xf32>
    %36 = arith.mulf %32, %35 : vector<8x8x4xf32>
    %37 = arith.addf %23, %36 : vector<8x8x4xf32>
    %38 = vector.extract_strided_slice %14 {offsets = [1, 0, 0, 0], sizes = [1, 8, 8, 4], strides = [1, 1, 1, 1]} : vector<4x9x9x4xf32> to vector<1x8x8x4xf32>
    %39 = vector.shape_cast %38 : vector<1x8x8x4xf32> to vector<8x8x4xf32>
    %40 = vector.extract_strided_slice %2 {offsets = [1, 0], sizes = [1, 4], strides = [1, 1]} : vector<9x4xf32> to vector<1x4xf32>
    %41 = vector.shape_cast %40 : vector<1x4xf32> to vector<1x1x4xf32>
    %42 = vector.broadcast %41 : vector<1x1x4xf32> to vector<8x8x4xf32>
    %43 = arith.mulf %39, %42 : vector<8x8x4xf32>
    %44 = arith.addf %30, %43 : vector<8x8x4xf32>
    %45 = vector.extract_strided_slice %0 {offsets = [0, 0, 1, 0], sizes = [1, 8, 8, 4], strides = [1, 1, 1, 1]} : vector<4x9x9x4xf32> to vector<1x8x8x4xf32>
    %46 = vector.shape_cast %45 : vector<1x8x8x4xf32> to vector<8x8x4xf32>
    %47 = vector.extract_strided_slice %1 {offsets = [2, 0], sizes = [1, 4], strides = [1, 1]} : vector<9x4xf32> to vector<1x4xf32>
    %48 = vector.shape_cast %47 : vector<1x4xf32> to vector<1x1x4xf32>
    %49 = vector.broadcast %48 : vector<1x1x4xf32> to vector<8x8x4xf32>
    %50 = arith.mulf %46, %49 : vector<8x8x4xf32>
    %51 = arith.addf %37, %50 : vector<8x8x4xf32>
    %52 = vector.extract_strided_slice %14 {offsets = [0, 0, 1, 0], sizes = [1, 8, 8, 4], strides = [1, 1, 1, 1]} : vector<4x9x9x4xf32> to vector<1x8x8x4xf32>
    %53 = vector.shape_cast %52 : vector<1x8x8x4xf32> to vector<8x8x4xf32>
    %54 = vector.extract_strided_slice %2 {offsets = [2, 0], sizes = [1, 4], strides = [1, 1]} : vector<9x4xf32> to vector<1x4xf32>
    %55 = vector.shape_cast %54 : vector<1x4xf32> to vector<1x1x4xf32>
    %56 = vector.broadcast %55 : vector<1x1x4xf32> to vector<8x8x4xf32>
    %57 = arith.mulf %53, %56 : vector<8x8x4xf32>
    %58 = arith.addf %44, %57 : vector<8x8x4xf32>
    %59 = vector.extract_strided_slice %0 {offsets = [2, 0, 0, 0], sizes = [1, 8, 8, 4], strides = [1, 1, 1, 1]} : vector<4x9x9x4xf32> to vector<1x8x8x4xf32>
    %60 = vector.shape_cast %59 : vector<1x8x8x4xf32> to vector<8x8x4xf32>
    %61 = vector.extract_strided_slice %1 {offsets = [3, 0], sizes = [1, 4], strides = [1, 1]} : vector<9x4xf32> to vector<1x4xf32>
    %62 = vector.shape_cast %61 : vector<1x4xf32> to vector<1x1x4xf32>
    %63 = vector.broadcast %62 : vector<1x1x4xf32> to vector<8x8x4xf32>
    %64 = arith.mulf %60, %63 : vector<8x8x4xf32>
    %65 = arith.addf %51, %64 : vector<8x8x4xf32>
    %66 = vector.extract_strided_slice %14 {offsets = [2, 0, 0, 0], sizes = [1, 8, 8, 4], strides = [1, 1, 1, 1]} : vector<4x9x9x4xf32> to vector<1x8x8x4xf32>
    %67 = vector.shape_cast %66 : vector<1x8x8x4xf32> to vector<8x8x4xf32>
    %68 = vector.extract_strided_slice %2 {offsets = [3, 0], sizes = [1, 4], strides = [1, 1]} : vector<9x4xf32> to vector<1x4xf32>
    %69 = vector.shape_cast %68 : vector<1x4xf32> to vector<1x1x4xf32>
    %70 = vector.broadcast %69 : vector<1x1x4xf32> to vector<8x8x4xf32>
    %71 = arith.mulf %67, %70 : vector<8x8x4xf32>
    %72 = arith.addf %58, %71 : vector<8x8x4xf32>
    %73 = vector.extract_strided_slice %0 {offsets = [3, 0, 0, 0], sizes = [1, 8, 8, 4], strides = [1, 1, 1, 1]} : vector<4x9x9x4xf32> to vector<1x8x8x4xf32>
    %74 = vector.shape_cast %73 : vector<1x8x8x4xf32> to vector<8x8x4xf32>
    %75 = vector.extract_strided_slice %1 {offsets = [4, 0], sizes = [1, 4], strides = [1, 1]} : vector<9x4xf32> to vector<1x4xf32>
    %76 = vector.shape_cast %75 : vector<1x4xf32> to vector<1x1x4xf32>
    %77 = vector.broadcast %76 : vector<1x1x4xf32> to vector<8x8x4xf32>
    %78 = arith.mulf %74, %77 : vector<8x8x4xf32>
    %79 = arith.addf %65, %78 : vector<8x8x4xf32>
    %80 = vector.extract_strided_slice %14 {offsets = [3, 0, 0, 0], sizes = [1, 8, 8, 4], strides = [1, 1, 1, 1]} : vector<4x9x9x4xf32> to vector<1x8x8x4xf32>
    %81 = vector.shape_cast %80 : vector<1x8x8x4xf32> to vector<8x8x4xf32>
    %82 = vector.extract_strided_slice %2 {offsets = [4, 0], sizes = [1, 4], strides = [1, 1]} : vector<9x4xf32> to vector<1x4xf32>
    %83 = vector.shape_cast %82 : vector<1x4xf32> to vector<1x1x4xf32>
    %84 = vector.broadcast %83 : vector<1x1x4xf32> to vector<8x8x4xf32>
    %85 = arith.mulf %81, %84 : vector<8x8x4xf32>
    %86 = arith.addf %72, %85 : vector<8x8x4xf32>
    %87 = vector.extract_strided_slice %0 {offsets = [2, 0, 1, 0], sizes = [1, 8, 8, 4], strides = [1, 1, 1, 1]} : vector<4x9x9x4xf32> to vector<1x8x8x4xf32>
    %88 = vector.shape_cast %87 : vector<1x8x8x4xf32> to vector<8x8x4xf32>
    %89 = vector.extract_strided_slice %1 {offsets = [5, 0], sizes = [1, 4], strides = [1, 1]} : vector<9x4xf32> to vector<1x4xf32>
    %90 = vector.shape_cast %89 : vector<1x4xf32> to vector<1x1x4xf32>
    %91 = vector.broadcast %90 : vector<1x1x4xf32> to vector<8x8x4xf32>
    %92 = arith.mulf %88, %91 : vector<8x8x4xf32>
    %93 = arith.addf %79, %92 : vector<8x8x4xf32>
    %94 = vector.extract_strided_slice %14 {offsets = [2, 0, 1, 0], sizes = [1, 8, 8, 4], strides = [1, 1, 1, 1]} : vector<4x9x9x4xf32> to vector<1x8x8x4xf32>
    %95 = vector.shape_cast %94 : vector<1x8x8x4xf32> to vector<8x8x4xf32>
    %96 = vector.extract_strided_slice %2 {offsets = [5, 0], sizes = [1, 4], strides = [1, 1]} : vector<9x4xf32> to vector<1x4xf32>
    %97 = vector.shape_cast %96 : vector<1x4xf32> to vector<1x1x4xf32>
    %98 = vector.broadcast %97 : vector<1x1x4xf32> to vector<8x8x4xf32>
    %99 = arith.mulf %95, %98 : vector<8x8x4xf32>
    %100 = arith.addf %86, %99 : vector<8x8x4xf32>
    %101 = vector.extract_strided_slice %0 {offsets = [0, 1, 0, 0], sizes = [1, 8, 8, 4], strides = [1, 1, 1, 1]} : vector<4x9x9x4xf32> to vector<1x8x8x4xf32>
    %102 = vector.shape_cast %101 : vector<1x8x8x4xf32> to vector<8x8x4xf32>
    %103 = vector.extract_strided_slice %1 {offsets = [6, 0], sizes = [1, 4], strides = [1, 1]} : vector<9x4xf32> to vector<1x4xf32>
    %104 = vector.shape_cast %103 : vector<1x4xf32> to vector<1x1x4xf32>
    %105 = vector.broadcast %104 : vector<1x1x4xf32> to vector<8x8x4xf32>
    %106 = arith.mulf %102, %105 : vector<8x8x4xf32>
    %107 = arith.addf %93, %106 : vector<8x8x4xf32>
    %108 = vector.extract_strided_slice %14 {offsets = [0, 1, 0, 0], sizes = [1, 8, 8, 4], strides = [1, 1, 1, 1]} : vector<4x9x9x4xf32> to vector<1x8x8x4xf32>
    %109 = vector.shape_cast %108 : vector<1x8x8x4xf32> to vector<8x8x4xf32>
    %110 = vector.extract_strided_slice %2 {offsets = [6, 0], sizes = [1, 4], strides = [1, 1]} : vector<9x4xf32> to vector<1x4xf32>
    %111 = vector.shape_cast %110 : vector<1x4xf32> to vector<1x1x4xf32>
    %112 = vector.broadcast %111 : vector<1x1x4xf32> to vector<8x8x4xf32>
    %113 = arith.mulf %109, %112 : vector<8x8x4xf32>
    %114 = arith.addf %100, %113 : vector<8x8x4xf32>
    %115 = vector.extract_strided_slice %0 {offsets = [1, 1, 0, 0], sizes = [1, 8, 8, 4], strides = [1, 1, 1, 1]} : vector<4x9x9x4xf32> to vector<1x8x8x4xf32>
    %116 = vector.shape_cast %115 : vector<1x8x8x4xf32> to vector<8x8x4xf32>
    %117 = vector.extract_strided_slice %1 {offsets = [7, 0], sizes = [1, 4], strides = [1, 1]} : vector<9x4xf32> to vector<1x4xf32>
    %118 = vector.shape_cast %117 : vector<1x4xf32> to vector<1x1x4xf32>
    %119 = vector.broadcast %118 : vector<1x1x4xf32> to vector<8x8x4xf32>
    %120 = arith.mulf %116, %119 : vector<8x8x4xf32>
    %121 = arith.addf %107, %120 : vector<8x8x4xf32>
    %122 = vector.extract_strided_slice %14 {offsets = [1, 1, 0, 0], sizes = [1, 8, 8, 4], strides = [1, 1, 1, 1]} : vector<4x9x9x4xf32> to vector<1x8x8x4xf32>
    %123 = vector.shape_cast %122 : vector<1x8x8x4xf32> to vector<8x8x4xf32>
    %124 = vector.extract_strided_slice %2 {offsets = [7, 0], sizes = [1, 4], strides = [1, 1]} : vector<9x4xf32> to vector<1x4xf32>
    %125 = vector.shape_cast %124 : vector<1x4xf32> to vector<1x1x4xf32>
    %126 = vector.broadcast %125 : vector<1x1x4xf32> to vector<8x8x4xf32>
    %127 = arith.mulf %123, %126 : vector<8x8x4xf32>
    %128 = arith.addf %114, %127 : vector<8x8x4xf32>
    %129 = vector.extract_strided_slice %0 {offsets = [0, 1, 1, 0], sizes = [1, 8, 8, 4], strides = [1, 1, 1, 1]} : vector<4x9x9x4xf32> to vector<1x8x8x4xf32>
    %130 = vector.shape_cast %129 : vector<1x8x8x4xf32> to vector<8x8x4xf32>
    %131 = vector.extract_strided_slice %1 {offsets = [8, 0], sizes = [1, 4], strides = [1, 1]} : vector<9x4xf32> to vector<1x4xf32>
    %132 = vector.shape_cast %131 : vector<1x4xf32> to vector<1x1x4xf32>
    %133 = vector.broadcast %132 : vector<1x1x4xf32> to vector<8x8x4xf32>
    %134 = arith.mulf %130, %133 : vector<8x8x4xf32>
    %135 = arith.addf %121, %134 : vector<8x8x4xf32>
    %136 = vector.extract_strided_slice %14 {offsets = [0, 1, 1, 0], sizes = [1, 8, 8, 4], strides = [1, 1, 1, 1]} : vector<4x9x9x4xf32> to vector<1x8x8x4xf32>
    %137 = vector.shape_cast %136 : vector<1x8x8x4xf32> to vector<8x8x4xf32>
    %138 = vector.extract_strided_slice %2 {offsets = [8, 0], sizes = [1, 4], strides = [1, 1]} : vector<9x4xf32> to vector<1x4xf32>
    %139 = vector.shape_cast %138 : vector<1x4xf32> to vector<1x1x4xf32>
    %140 = vector.broadcast %139 : vector<1x1x4xf32> to vector<8x8x4xf32>
    %141 = arith.mulf %137, %140 : vector<8x8x4xf32>
    %142 = arith.addf %128, %141 : vector<8x8x4xf32>
    %c0_18 = arith.constant 0 : index
    %c0_19 = arith.constant 0 : index
    %143 = vector.load %arg4[%c0_18, %c0_19] : memref<1x4xf32, #tpu.memory_space<vmem>>, vector<1x4xf32>
    %144 = vector.shape_cast %143 : vector<1x4xf32> to vector<1x1x4xf32>
    %145 = vector.broadcast %144 : vector<1x1x4xf32> to vector<8x8x4xf32>
    %146 = arith.addf %135, %145 : vector<8x8x4xf32>
    %c0_20 = arith.constant 0 : index
    %c0_21 = arith.constant 0 : index
    %147 = vector.load %arg8[%c0_20, %c0_21] : memref<1x4xf32, #tpu.memory_space<vmem>>, vector<1x4xf32>
    %148 = vector.shape_cast %147 : vector<1x4xf32> to vector<1x1x4xf32>
    %149 = vector.broadcast %148 : vector<1x1x4xf32> to vector<8x8x4xf32>
    %150 = arith.addf %142, %149 : vector<8x8x4xf32>
    %151 = vector.shape_cast %146 : vector<8x8x4xf32> to vector<64x4xf32>
    %152 = vector.shape_cast %150 : vector<8x8x4xf32> to vector<64x4xf32>
    %c0_22 = arith.constant 0 : index
    %c0_23 = arith.constant 0 : index
    %153 = vector.load %arg9[%c0_22, %c0_23] : memref<4x8xf32, #tpu.memory_space<vmem>>, vector<4x8xf32>
    %cst_24 = arith.constant dense<0.000000e+00> : vector<64x8xf32>
    %154 = tpu.matmul %151, %153, %cst_24 {dimension_numbers = #tpu.dot_dimension_numbers<[1], [0], [0], [1], [0, 0, 1, 1], [], []>} : vector<64x4xf32>, vector<4x8xf32>, vector<64x8xf32> -> vector<64x8xf32>
    %c0_25 = arith.constant 0 : index
    %c0_26 = arith.constant 0 : index
    %155 = vector.load %arg10[%c0_25, %c0_26] : memref<4x8xf32, #tpu.memory_space<vmem>>, vector<4x8xf32>
    %cst_27 = arith.constant dense<0.000000e+00> : vector<64x8xf32>
    %156 = tpu.matmul %152, %155, %cst_27 {dimension_numbers = #tpu.dot_dimension_numbers<[1], [0], [0], [1], [0, 0, 1, 1], [], []>} : vector<64x4xf32>, vector<4x8xf32>, vector<64x8xf32> -> vector<64x8xf32>
    %157 = arith.addf %154, %156 : vector<64x8xf32>
    %c0_28 = arith.constant 0 : index
    %c0_29 = arith.constant 0 : index
    %158 = vector.load %arg11[%c0_28, %c0_29] : memref<1x8xf32, #tpu.memory_space<vmem>>, vector<1x8xf32>
    %159 = vector.broadcast %158 : vector<1x8xf32> to vector<64x8xf32>
    %160 = arith.addf %157, %159 : vector<64x8xf32>
    %cst_30 = arith.constant 0.000000e+00 : f32
    %161 = vector.broadcast %cst_30 : f32 to vector<64x8xf32>
    %162 = arith.maximumf %160, %161 : vector<64x8xf32>
    %163 = vector.shape_cast %162 : vector<64x8xf32> to vector<1x64x8xf32>
    %c0_31 = arith.constant 0 : index
    %c0_32 = arith.constant 0 : index
    %c0_33 = arith.constant 0 : index
    %164 = vector.load %arg12[%c0_31, %c0_32, %c0_33] : memref<1x64x8xf32, #tpu.memory_space<vmem>>, vector<1x64x8xf32>
    tpu.vector_store %arg12[%c0_31, %c0_32, %c0_33], %163 {strides = array<i32>} : memref<1x64x8xf32, #tpu.memory_space<vmem>>, vector<1x64x8xf32>,
    return
  }
  func.func @transform_0(%arg0: i32) -> (i32, i32, i32, i32) {
    %c0_i32 = arith.constant 0 : i32
    %c0_i32_0 = arith.constant 0 : i32
    %c0_i32_1 = arith.constant 0 : i32
    %c0_i32_2 = arith.constant 0 : i32
    return %arg0, %c0_i32, %c0_i32_0, %c0_i32_1 : i32, i32, i32, i32
  }
  func.func @transform_1(%arg0: i32) -> (i32, i32, i32, i32) {
    %c0_i32 = arith.constant 0 : i32
    %c0_i32_0 = arith.constant 0 : i32
    %c0_i32_1 = arith.constant 0 : i32
    %c0_i32_2 = arith.constant 0 : i32
    %c0_i32_3 = arith.constant 0 : i32
    return %c0_i32, %c0_i32_0, %c0_i32_1, %c0_i32_2 : i32, i32, i32, i32
  }
  func.func @transform_2(%arg0: i32) -> (i32, i32) {
    %c0_i32 = arith.constant 0 : i32
    %c0_i32_0 = arith.constant 0 : i32
    %c0_i32_1 = arith.constant 0 : i32
    return %c0_i32, %c0_i32_0 : i32, i32
  }
  func.func @transform_3(%arg0: i32) -> (i32, i32) {
    %c0_i32 = arith.constant 0 : i32
    %c0_i32_0 = arith.constant 0 : i32
    %c0_i32_1 = arith.constant 0 : i32
    return %c0_i32, %c0_i32_0 : i32, i32
  }
  func.func @transform_4(%arg0: i32) -> (i32, i32) {
    %c0_i32 = arith.constant 0 : i32
    %c0_i32_0 = arith.constant 0 : i32
    %c0_i32_1 = arith.constant 0 : i32
    return %c0_i32, %c0_i32_0 : i32, i32
  }
  func.func @transform_5(%arg0: i32) -> (i32, i32) {
    %c0_i32 = arith.constant 0 : i32
    %c0_i32_0 = arith.constant 0 : i32
    %c0_i32_1 = arith.constant 0 : i32
    return %c0_i32, %c0_i32_0 : i32, i32
  }
  func.func @transform_6(%arg0: i32) -> (i32, i32) {
    %c0_i32 = arith.constant 0 : i32
    %c0_i32_0 = arith.constant 0 : i32
    %c0_i32_1 = arith.constant 0 : i32
    return %c0_i32, %c0_i32_0 : i32, i32
  }
  func.func @transform_7(%arg0: i32) -> (i32, i32) {
    %c0_i32 = arith.constant 0 : i32
    %c0_i32_0 = arith.constant 0 : i32
    %c0_i32_1 = arith.constant 0 : i32
    return %c0_i32, %c0_i32_0 : i32, i32
  }
  func.func @transform_8(%arg0: i32) -> (i32, i32) {
    %c0_i32 = arith.constant 0 : i32
    %c0_i32_0 = arith.constant 0 : i32
    %c0_i32_1 = arith.constant 0 : i32
    return %c0_i32, %c0_i32_0 : i32, i32
  }
  func.func @transform_9(%arg0: i32) -> (i32, i32) {
    %c0_i32 = arith.constant 0 : i32
    %c0_i32_0 = arith.constant 0 : i32
    %c0_i32_1 = arith.constant 0 : i32
    return %c0_i32, %c0_i32_0 : i32, i32
  }
  func.func @transform_10(%arg0: i32) -> (i32, i32) {
    %c0_i32 = arith.constant 0 : i32
    %c0_i32_0 = arith.constant 0 : i32
    %c0_i32_1 = arith.constant 0 : i32
    return %c0_i32, %c0_i32_0 : i32, i32
  }
  func.func @transform_11(%arg0: i32) -> (i32, i32, i32) {
    %c0_i32 = arith.constant 0 : i32
    %c0_i32_0 = arith.constant 0 : i32
    %c0_i32_1 = arith.constant 0 : i32
    return %arg0, %c0_i32, %c0_i32_0 : i32, i32, i32
  }
}

</mosaic_0001>

<bundles_post_ra>
// kernel: tpu_custom_call.1
= control target key start
LH: loop header
LB: loop body
LE: loop exit
PB: predicated region body
PF: predicated region fallthrough
CT: control target
= control target key end

     0   :  { %s12945_s17 = smov 0   ;;  %s18214_s0 = inlined_call_operand.vmem [shape: f32[8,9,9,4], index: 0, kind: input, shape index: {}]   ;;  %s18215_s1 = inlined_call_operand.vmem [shape: f32[4,9,9,1], index: 1, kind: input, shape index: {}]   ;;  %s18216_s2 = inlined_call_operand.vmem [shape: f32[9,4], index: 2, kind: input, shape index: {}]   ;;  %s18217_s3 = inlined_call_operand.vmem [shape: f32[1,4], index: 3, kind: input, shape index: {}]   ;;  %s18218_s4 = inlined_call_operand.vmem [shape: f32[4,4], index: 4, kind: input, shape index: {}]   ;;  %s18219_s5 = inlined_call_operand.vmem [shape: f32[1,4], index: 5, kind: input, shape index: {}]   ;;  %s18220_s6 = inlined_call_operand.vmem [shape: f32[9,4], index: 6, kind: input, shape index: {}]   ;;  %s18221_s7 = inlined_call_operand.vmem [shape: f32[1,4], index: 7, kind: input, shape index: {}]   ;;  %s18222_s8 = inlined_call_operand.vmem [shape: f32[4,8], index: 8, kind: input, shape index: {}]   ;;  %s18223_s9 = inlined_call_operand.vmem [shape: f32[4,8], index: 9, kind: input, shape index: {}]   ;;  %s18224_s10 = inlined_call_operand.vmem [shape: f32[1,8], index: 10, kind: input, shape index: {}]   ;;  %s18225_s11 = inlined_call_operand.vmem [shape: f32[2,64,8], index: 11, kind: output, shape index: {}]  }
   0x1 LB: > { %s12951_s18 = sadd.s32 4294967295, %s12879_s17   ;;  %p12411_p0 = scmp.ge.s32.totalorder %s12879_s17, 1  ;;  %s12879_s17 = sphi %s12945_s17, %s21_s17  }
   0x2   : > { %p339_p1 = scmp.lt.s32.totalorder %s12879_s17, 3 }
   0x4   : > { %p340_p2 = pnand %p12411_p0, %p339_p1 }
   0x6   : > { %343 = sbr.rel (%p340_p2) target bundleno = 1234 (0x4d2), region = 64 }
   0xb   : > { %v7416_v0 = vld [vmem:[%s18215_s1] sm:$0xff]  ;;  %v7418_v1 = vld [vmem:[%s18215_s1 + $0x10] sm:$0xff]  ;;  %v544_v2 = vlaneseq  ;;  %v12881_v3 = vmov 0   ;;  %vm4883_vm0 = vcmask 1043456   ;;  %s12412_s25 = sshll.u32 %s12951_s18, 2  ;;  %v18226_v5 = vmov 0.0  }
   0xc   : > { %12768 = vset.pattern.permute.xlu0 %v12881_v3  ;;  %12769 = vset.pattern.permute.xlu1 %v12881_v3  ;;  %v2808_v4 = vld [vmem:[%s18218_s4] sm:$0xf]  ;;  %p381_p3 = scmp.lt.s32.totalorder %s12412_s25, 7  ;;  %v12883_v6 = vmov 1966171168   ;;  %v7434_v9 = vld [vmem:[%s18215_s1 + $0x90] sm:$0xff] }
   0xd   : > { %7469 = vperm.xlu0 %12768, %v7416_v0   ;;  %12600 = vmatprep.subr.mxu0 %v18226_v5  ;;  %v542_v7 = vunpack.c.l.s4 %v12883_v6  ;;  %v12966_v8 = vshrl.u32 %v544_v2, 7  ;;  %v7435_v11 = vld [vmem:[%s18215_s1 + $0xa0] sm:$0xff]  ;;  %vm12884_vm1 = vmmov 0   ;;  %v7417_v13 = vld [vmem:[%s18215_s1 + $0x8] sm:$0x1]  ;;  %v7436_v33 = vld [vmem:[%s18215_s1 + $0xb0] sm:$0xff] }
   0xe   : > { %12753 = vmatprep.subr.mxu1 %v18226_v5  ;;  %7477 = vperm.xlu1 %12769, %v7418_v1   ;;  %s20048_s25 = smov (!%p381_p3, %s12412_s25), 7  ;;  %v7419_v14 = vld [vmem:[%s18215_s1 + $0x18] sm:$0x1]  ;;  %v7420_v28 = vld [vmem:[%s18215_s1 + $0x20] sm:$0xff]  ;;  %v7422_v51 = vld [vmem:[%s18215_s1 + $0x30] sm:$0xff]  ;;  %vm4800_vm2 = vcmask 31744  }
   0xf   : > { %12601 = vmatpush3.msk.msra.mxu0 %vm4883_vm0, %v2808_v4  ;;  %12754 = vmatpush3.msk.msra.mxu1 %vm4883_vm0, %v2808_v4  ;;  %v543_v10 = vunpack.c.0.s8 %v542_v7  ;;  %s12755_s30 = smul.u32 144, %s20048_s25  ;;  %v7443_v46 = vld [vmem:[%s18215_s1 + $0x120] sm:$0xff]  ;;  %v7445_v6 = vld [vmem:[%s18215_s1 + $0x130] sm:$0xff]  ;;  %vm9861_vm3 = vcmask 1046528   ;;  %p387_p4 = scmp.lt.s32.totalorder %s12951_s18, 1  ;;  %vm12343_vm4 = vcmask 64512  }
  0x10   : > { %12602 = vmatprep.mubr.msk.f32.mxu0 %vm12884_vm1, %v18226_v5  ;;  %12677 = vmatprep.mubr.msk.f32.mxu1 %vm12884_vm1, %v18226_v5  ;;  %v7437_v0 = vld [vmem:[%s18215_s1 + $0xc0] sm:$0xff] }
  0x11   : > { %7541 = vperm.xlu0 %12768, %v7434_v9   ;;  %v12982_v12 = vsub.s32 %v543_v10, %v12966_v8  ;;  %s12990_s16 = scalar_lea.vmem %s18214_s0, %s12755_s30  ;;  %s20050_s18 = smov (!%p387_p4, %s12951_s18), 1 }
  0x12   : > { %7545 = vperm.xlu1 %12769, %v7435_v11   ;;  %v392_v15 = vld [vmem:[%s12990_s16] sm:$0xff]  ;;  %v12863_v17 = vld.sshfl [vmem:[%s12990_s16 + $0x168] sm:$0x1 pattern:$0x75316420]  ;;  %v13000_v20 = vld [vmem:[%s12990_s16 + $0x170] sm:$0xff] }
  0x13   : > { %18641 = vst [vmem:[#allocation2_spill] sm:$0xff] %v12982_v12  ;;  %v436_v16 = vld [vmem:[%s12990_s16 + $0x160] sm:$0xff]  ;;  %v540_v18 = vcombine.high %v392_v15, %v392_v15  ;;  %v547_v19 = vrot.slane %v392_v15, %v12982_v12  ;;  %v13004_v23 = vld [vmem:[%s12990_s16 + $0x8] sm:$0x1]  ;;  %v13007_v24 = vld [vmem:[%s12990_s16 + $0x10] sm:$0xff]  ;;  %v13011_v25 = vrot.slane %v13000_v20, %v12982_v12  ;;  %v1988_v36 = vrot.slane %v12863_v17, %v12982_v12  ;;  %s12539_s22 = sshll.u32 %s20050_s18, 6 }
  0x14   : > { %v1926_v21 = vcombine.high %v436_v16, %v436_v16  ;;  %v1933_v22 = vrot.slane %v436_v16, %v12982_v12  ;;  %v595_v26 = vrot.slane %v13004_v23, %v12982_v12  ;;  %v603_v27 = vcombine.high %v13007_v24, %v13007_v24  ;;  %s18193_s25 = scalar_lea.vmem %s18225_s11, %s12539_s22 }
  0x15   : > { %7473 = vperm.xlu0 %12768, %v7417_v13   ;;  %v554_v29 = vrot.slane %v540_v18, %v12982_v12  ;;  %v555_v30 = vcombine.high %v547_v19, %v547_v19  ;;  %v563_v31 = vrot.slane %v547_v19, %v12982_v12  ;;  %v13032_v37 = vrot.slane %v13011_v25, %v12982_v12  ;;  %v13079_v19 = vld [vmem:[%s18216_s2] sm:$0xff] }
  0x16   : > { %7481 = vperm.xlu1 %12769, %v7419_v14   ;;  %v1940_v32 = vrot.slane %v1926_v21, %v12982_v12  ;;  %v1941_v34 = vcombine.high %v1933_v22, %v1933_v22  ;;  %v13027_v35 = vrot.slane %v1933_v22, %v12982_v12  ;;  %v602_v45 = vrot.slane %v595_v26, %v12982_v12  ;;  %v7421_v26 = vld [vmem:[%s18215_s1 + $0x28] sm:$0x1] }
  0x17   : > { %v556_v38 = vcombine.high %v554_v29, %v554_v29  ;;  %v570_v39 = vrot.slane %v554_v29, %v12982_v12  ;;  %v577_v40 = vrot.slane %v555_v30, %v12982_v12  ;;  %v4044_v44 = vcombine.low %v1988_v36, %v13032_v37 }
  0x18   : > { %v1942_v41 = vcombine.high %v1940_v32, %v1940_v32  ;;  %v1956_v42 = vrot.slane %v1940_v32, %v12982_v12  ;;  %v13038_v43 = vrot.slane %v1941_v34, %v12982_v12  ;;  %v610_v54 = vrot.slane %v13007_v24, %v12982_v12 }
  0x19   : > { %7485 = vperm.xlu0 %12768, %v7420_v28   ;;  %v584_v47 = vrot.slane %v556_v38, %v12982_v12  ;;  %v2816_v48 = vcombine.low %v563_v31, %v577_v40  ;;  %v12436_v49 = vcombine.high %v563_v31, %v577_v40  ;;  %v4072_v53 = vrot.slane %v4044_v44, %v12982_v12  ;;  %v7459_v31 = vld [vmem:[%s18215_s1 + $0x1b0] sm:$0xff]  ;;  %v13095_v38 = vld.sshfl [vmem:[%s12990_s16 + $0x178] sm:$0x1 pattern:$0x75316420] }
  0x1a   : > { %7549 = vperm.xlu1 %12769, %v7436_v33   ;;  %v1970_v50 = vrot.slane %v1942_v41, %v12982_v12  ;;  %v12458_v52 = vcombine.high %v13027_v35, %v13038_v43  ;;  %v617_v55 = vrot.slane %v603_v27, %v12982_v12  ;;  %v618_v63 = vcombine.high %v610_v54, %v610_v54 }
  0x1b   : > { %v2818_v56 = vcombine.low %v570_v39, %v584_v47  ;;  %v12437_v57 = vcombine.high %v570_v39, %v584_v47  ;;  %v2826_v58 = vrot.slane %v2816_v48, %v12982_v12  ;;  %v2833_v59 = vrot.slane %v12436_v49, %v12982_v12  ;;  %v13107_v48 = vld [vmem:[%s12990_s16 + $0x18] sm:$0x1] }
  0x1c   : > { %v4042_v60 = vcombine.low %v1956_v42, %v1970_v50  ;;  %v12459_v61 = vcombine.high %v1956_v42, %v1970_v50  ;;  %v4051_v62 = vrot.slane %v12458_v52, %v12982_v12  ;;  %v619_v4 = vcombine.high %v617_v55, %v617_v55  ;;  %v396_v52 = vld [vmem:[%s12990_s16 + $0x20] sm:$0xff] }
  0x1d   : > { %7577 = vperm.xlu0 %12768, %v7443_v46   ;;  %v2840_v1 = vrot.slane %v2818_v56, %v12982_v12  ;;  %v2847_v2 = vrot.slane %v12437_v57, %v12982_v12  ;;  %v2848_v3 = vcombine.low %v2826_v58, %v2833_v59  ;;  %v626_v10 = vrot.slane %v610_v54, %v12982_v12 }
  0x1e   : > { %7493 = vperm.xlu1 %12769, %v7422_v51   ;;  %v4058_v7 = vrot.slane %v4042_v60, %v12982_v12  ;;  %v4065_v9 = vrot.slane %v12459_v61, %v12982_v12  ;;  %v633_v11 = vrot.slane %v617_v55, %v12982_v12  ;;  %v640_v15 = vrot.slane %v618_v63, %v12982_v12 }
  0x1f   : > { %v2849_v13 = vcombine.low %v2840_v1, %v2847_v2  ;;  %v2856_v14 = vrot.slane %v2848_v3, %v12982_v12  ;;  %v13074_v16 = vrot.slane %v619_v4, %v12982_v12  ;;  %v648_v21 = vcombine.high %v626_v10, %v626_v10  ;;  %v7424_v4 = vld [vmem:[%s18215_s1 + $0x40] sm:$0xff] }
  0x20   : > { %v4073_v17 = vcombine.low %v4051_v62, %v4058_v7  ;;  %v4074_v18 = vcombine.low %v4065_v9, %v4072_v53  ;;  %v649_v22 = vcombine.high %v633_v11, %v633_v11  ;;  %v650_v28 = vcombine.high %v640_v15, %v640_v15  ;;  %v7423_v53 = vld [vmem:[%s18215_s1 + $0x38] sm:$0x1] }
  0x21   : > { %7553 = vperm.xlu0 %12768, %v7437_v0   ;;  %v2863_v27 = vrot.slane %v2849_v13, %v12982_v12  ;;  %v2865_v29 = vcombine.low %v602_v45, %v626_v10  ;;  %v13086_v30 = vsub.s32 2, %v12966_v8  ;;  %v2866_v34 = vcombine.low %v640_v15, %v648_v21 }
  0x22   : > { %7585 = vperm.xlu1 %12769, %v7445_v6   ;;  %v4081_v32 = vrot.slane %v4073_v17, %v12982_v12  ;;  %v4088_v33 = vrot.slane %v4074_v18, %v12982_v12  ;;  %v2868_v36 = vcombine.low %v13074_v16, %v649_v22  ;;  %v2867_v40 = vcombine.low %v650_v28, %v633_v11  ;;  %v440_v22 = vld [vmem:[%s12990_s16 + $0x180] sm:$0xff] }
  0x23   : > { %18642 = vst [vmem:[#allocation3_spill] sm:$0xff] %v13086_v30  ;;  %v2864_v39 = vcombine.low %v2856_v14, %v2863_v27  ;;  %v2875_v41 = vrot.slane %v2865_v29, %v12982_v12  ;;  %v13100_v42 = vrot.slane %v13079_v19, %v13086_v30  ;;  %v2882_v45 = vrot.slane %v2866_v34, %v12982_v12 }
  0x24   : > { %v4089_v44 = vcombine.low %v4081_v32, %v4088_v33  ;;  %v2896_v46 = vrot.slane %v2868_v36, %v12982_v12  ;;  %v1989_v47 = vcombine.high %v13000_v20, %v13000_v20  ;;  %v2889_v49 = vrot.slane %v2867_v40, %v12982_v12  ;;  %v7444_v32 = vld [vmem:[%s18215_s1 + $0x128] sm:$0x1] }
  0x25   : > { %18643 = vst [vmem:[#allocation4_spill] sm:$0xff] %v13100_v42  ;;  %7489 = vperm.xlu0 %12768, %v7421_v26   ;;  %12603 = vmatmul.mubr.msk.f32.vlgmr.msra.gmra.mxu0 %vm4800_vm2, %v2864_v39  ;;  %v2004_v50 = vcombine.high %v13011_v25, %v13011_v25  ;;  %v2034_v51 = vcombine.high %v13032_v37, %v13032_v37  ;;  %v13126_v25 = vsub.s32 4, %v12966_v8  ;;  %v7460_v37 = vld [vmem:[%s18215_s1 + $0x1c0] sm:$0xff]  ;;  %v7438_v26 = vld [vmem:[%s18215_s1 + $0xd0] sm:$0xff] }
  0x26   : > { %7641 = vperm.xlu1 %12769, %v7459_v31   ;;  %12678 = vmatmul.mubr.msk.f32.vlgmr.msra.gmra.mxu1 %vm4800_vm2, %v4089_v44  ;;  %v2897_v20 = vcombine.low %v2875_v41, %v2882_v45  ;;  %v2003_v54 = vrot.slane %v1989_v47, %v12982_v12  ;;  %v651_v55 = vcombine.high %v13074_v16, %v13074_v16 }
  0x27   : > { %12605 = vmatprep.mubr.msk.f32.mxu0 %vm12884_vm1, %v18226_v5  ;;  %18644 = vst [vmem:[#allocation5_spill] sm:$0xff] %v13126_v25  ;;  %12680 = vmatprep.mubr.msk.f32.mxu1 %vm12884_vm1, %v18226_v5  ;;  %v2898_v56 = vcombine.low %v2889_v49, %v2896_v46  ;;  %v2026_v57 = vrot.slane %v2004_v50, %v12982_v12  ;;  %v7447_v49 = vld [vmem:[%s18215_s1 + $0x140] sm:$0xff] }
  0x28   : > { %v2051_v58 = vrot.slane %v13095_v38, %v12982_v12  ;;  %v658_v59 = vrot.slane %v13107_v48, %v12982_v12  ;;  %v2905_v60 = vrot.slane %v2897_v20, %v12982_v12  ;;  %v2005_v61 = vcombine.high %v2003_v54, %v2003_v54 }
  0x29   : > { %v2019_v62 = vrot.slane %v2003_v54, %v12982_v12  ;;  %v666_v63 = vcombine.high %v396_v52, %v396_v52  ;;  %7497 = vperm.xlu0 %12768, %v7423_v53   ;;  %v2912_v0 = vrot.slane %v2898_v56, %v12982_v12  ;;  %v2036_v1 = vcombine.high %v2026_v57, %v2026_v57  ;;  %v7426_v53 = vld [vmem:[%s18215_s1 + $0x50] sm:$0xff] }
  0x2a   : > { %v4090_v2 = vcombine.low %v2026_v57, %v2034_v51  ;;  %v665_v3 = vrot.slane %v658_v59, %v12982_v12  ;;  %7645 = vperm.xlu1 %12769, %v7460_v37   ;;  %v2033_v6 = vrot.slane %v2005_v61, %v12982_v12  ;;  %v673_v9 = vrot.slane %v396_v52, %v12982_v12  ;;  %v13188_v52 = vld [vmem:[%s12990_s16 + $0x28] sm:$0x1] }
  0x2b   : > { %v2035_v7 = vcombine.high %v2019_v62, %v2019_v62  ;;  %v680_v10 = vrot.slane %v666_v63, %v12982_v12  ;;  %v2913_v11 = vcombine.low %v2905_v60, %v2912_v0  ;;  %v4091_v13 = vcombine.low %v2036_v1, %v2019_v62  ;;  %v398_v0 = vld [vmem:[%s12990_s16 + $0x30] sm:$0xff] }
  0x2c   : > { %v4100_v14 = vrot.slane %v4090_v2, %v12982_v12  ;;  %v2914_v15 = vcombine.low %v651_v55, %v665_v3  ;;  %v2037_v16 = vcombine.high %v2033_v6, %v2033_v6  ;;  %v681_v18 = vcombine.high %v673_v9, %v673_v9 }
  0x2d   : > { %v4092_v17 = vcombine.low %v2033_v6, %v2035_v7  ;;  %v682_v21 = vcombine.high %v680_v10, %v680_v10  ;;  %7501 = vperm.xlu0 %12768, %v7424_v4   ;;  %12606 = vmatmul.mubr.msk.f32.gmra.mxu0 %vm4800_vm2, %v2913_v11  ;;  %v13156_v27 = vmul.f32 %v13100_v42, %v13004_v23  ;;  %v13194_v20 = vsub.s32 1, %v12966_v8 }
  0x2e   : > { %v4107_v28 = vrot.slane %v4091_v13, %v12982_v12  ;;  %v689_v29 = vrot.slane %v673_v9, %v12982_v12  ;;  %v13161_v31 = vrot.slane %v680_v10, %v12982_v12  ;;  %v4093_v33 = vcombine.low %v2037_v16, %v2051_v58  ;;  %12608 = vmatprep.mubr.msk.f32.mxu0 %vm12884_vm1, %v18226_v5 }
  0x2f   : > { %18645 = vst [vmem:[#allocation6_spill] sm:$0xff] %v13156_v27  ;;  %v4114_v34 = vrot.slane %v4092_v17, %v12982_v12  ;;  %v703_v23 = vrot.slane %v681_v18, %v12982_v12  ;;  %v13171_v36 = vrot.slane %v682_v21, %v12982_v12  ;;  %v2924_v39 = vrot.slane %v2914_v15, %v12982_v12 }
  0x30   : > { %v4122_v38 = vcombine.low %v4100_v14, %v4107_v28  ;;  %v2052_v40 = vcombine.high %v440_v22, %v440_v22  ;;  %v13176_v41 = vrot.slane %v13079_v19, %v13126_v25  ;;  %7557 = vperm.xlu1 %12769, %v7438_v26   ;;  %v4121_v44 = vrot.slane %v4093_v33, %v12982_v12  ;;  %v7449_v33 = vld [vmem:[%s18215_s1 + $0x150] sm:$0xff] }
  0x31   : > { %v2915_v45 = vcombine.low %v689_v29, %v703_v23  ;;  %v12438_v46 = vcombine.high %v689_v29, %v703_v23  ;;  %v2917_v47 = vcombine.low %v13161_v31, %v13171_v36  ;;  %7581 = vperm.xlu0 %12768, %v7444_v32   ;;  %v2059_v19 = vrot.slane %v440_v22, %v12982_v12  ;;  %v7446_v22 = vld [vmem:[%s18215_s1 + $0x138] sm:$0x1] }
  0x32   : > { %18646 = vst [vmem:[#allocation7_spill] sm:$0xff] %v13176_v41  ;;  %v4130_v51 = vrot.slane %v4122_v38, %v12982_v12  ;;  %18647 = vst [vmem:[#allocation8_spill] sm:$0xff] %v13194_v20  ;;  %v4123_v54 = vcombine.low %v4114_v34, %v4121_v44  ;;  %v13201_v57 = vmul.f32 %v13100_v42, %v13007_v24  ;;  %v7439_v24 = vld [vmem:[%s18215_s1 + $0xe0] sm:$0xff] }
  0x33   : > { %v2931_v55 = vrot.slane %v2915_v45, %v12982_v12  ;;  %v2938_v37 = vrot.slane %v12438_v46, %v12982_v12  ;;  %v2945_v56 = vrot.slane %v2917_v47, %v12982_v12  ;;  %v2066_v58 = vrot.slane %v2052_v40, %v12982_v12  ;;  %v12865_v38 = vld.sshfl [vmem:[%s12990_s16 + $0x188] sm:$0x1 pattern:$0x75316420] }
  0x34   : > { %v2067_v59 = vcombine.high %v2059_v19, %v2059_v19  ;;  %v2075_v60 = vrot.slane %v2059_v19, %v12982_v12  ;;  %7593 = vperm.xlu1 %12769, %v7447_v49   ;;  %v4137_v61 = vrot.slane %v4123_v54, %v12982_v12  ;;  %v721_v1 = vrot.slane %v13188_v52, %v12982_v12 }
  0x35   : > { %v2946_v62 = vcombine.low %v2924_v39, %v2931_v55  ;;  %v2947_v63 = vcombine.low %v2938_v37, %v2945_v56  ;;  %7509 = vperm.xlu0 %12768, %v7426_v53   ;;  %v2068_v2 = vcombine.high %v2066_v58, %v2066_v58  ;;  %v2082_v3 = vrot.slane %v2066_v58, %v12982_v12  ;;  %v442_v39 = vld [vmem:[%s12990_s16 + $0x190] sm:$0xff]  ;;  %v7425_v53 = vld [vmem:[%s18215_s1 + $0x48] sm:$0x1] }
  0x36   : > { %v2089_v4 = vrot.slane %v2067_v59, %v12982_v12  ;;  %v729_v6 = vcombine.high %v398_v0, %v398_v0  ;;  %v4138_v7 = vcombine.low %v4130_v51, %v4137_v61  ;;  %v13218_v11 = vmul.f32 %v13100_v42, %v13107_v48  ;;  %v7461_v56 = vld [vmem:[%s18215_s1 + $0x1d0] sm:$0xff] }
  0x37   : > { %v2954_v9 = vrot.slane %v2946_v62, %v12982_v12  ;;  %v2961_v10 = vrot.slane %v2947_v63, %v12982_v12  ;;  %v2096_v13 = vrot.slane %v2068_v2, %v12982_v12  ;;  %v736_v16 = vrot.slane %v398_v0, %v12982_v12 }
  0x38   : > { %v4139_v14 = vcombine.low %v2075_v60, %v2089_v4  ;;  %v12460_v15 = vcombine.high %v2075_v60, %v2089_v4  ;;  %7561 = vperm.xlu1 %12769, %v7439_v24   ;;  %12681 = vmatmul.mubr.msk.f32.gmra.mxu1 %vm4800_vm2, %v4138_v7  ;;  %v728_v18 = vrot.slane %v721_v1, %v12982_v12  ;;  %v9866_v40 = vrot.slane %v13218_v11, 1 }
  0x39   : > { %v2962_v17 = vcombine.low %v2954_v9, %v2961_v10  ;;  %v743_v21 = vrot.slane %v729_v6, %v12982_v12  ;;  %v12439_v48 = vcombine.high %v13161_v31, %v13171_v36  ;;  %12683 = vmatprep.mubr.msk.f32.mxu1 %vm12884_vm1, %v18226_v5  ;;  %v4141_v26 = vcombine.low %v2082_v3, %v2096_v13 }
  0x3a   : > { %v12461_v28 = vcombine.high %v2082_v3, %v2096_v13  ;;  %v4149_v29 = vrot.slane %v4139_v14, %v12982_v12  ;;  %v4156_v32 = vrot.slane %v12460_v15, %v12982_v12  ;;  %v9865_v31 = vrot.slane %v13201_v57, 1  ;;  %7589 = vperm.xlu0 %12768, %v7446_v22  }
  0x3b   : > { %12609 = vmatmul.mubr.msk.f32.gmra.mxu0 %vm4800_vm2, %v2962_v17  ;;  %v744_v34 = vcombine.high %v736_v16, %v736_v16  ;;  %v752_v23 = vrot.slane %v736_v16, %v12982_v12  ;;  %v13241_v36 = vrot.slane %v743_v21, %v12982_v12  ;;  %v4163_v44 = vrot.slane %v4141_v26, %v12982_v12  ;;  %v13275_v16 = vld [vmem:[%s12990_s16 + $0x38] sm:$0x1] }
  0x3c   : > { %v4170_v45 = vrot.slane %v12461_v28, %v12982_v12  ;;  %v4171_v46 = vcombine.low %v4149_v29, %v4156_v32  ;;  %12611 = vmatprep.mubr.msk.f32.mxu0 %vm12884_vm1, %v18226_v5  ;;  %v2973_v19 = vrot.slane %v12439_v48, %v12982_v12  ;;  %7601 = vperm.xlu1 %12769, %v7449_v33   ;;  %v13287_v28 = vld [vmem:[%s12990_s16 + $0x40] sm:$0xff] }
  0x3d   : > { %v766_v47 = vrot.slane %v744_v34, %v12982_v12  ;;  %v774_v49 = vcombine.high %v752_v23, %v752_v23  ;;  %v2964_v51 = vcombine.low %v728_v18, %v752_v23  ;;  %v2115_v37 = vcombine.high %v442_v39, %v442_v39  ;;  %v7427_v18 = vld [vmem:[%s18215_s1 + $0x58] sm:$0x1]  ;;  %v7462_v29 = vld [vmem:[%s18215_s1 + $0x1e0] sm:$0xff] }
  0x3e   : > { %v4172_v54 = vcombine.low %v4163_v44, %v4170_v45  ;;  %v4179_v55 = vrot.slane %v4171_v46, %v12982_v12  ;;  %v13262_v61 = vmul.f32 %v13100_v42, %v13188_v52  ;;  %v2114_v63 = vrot.slane %v12865_v38, %v12982_v12  ;;  %7505 = vperm.xlu0 %12768, %v7425_v53  }
  0x3f   : > { %v776_v58 = vcombine.high %v766_v47, %v766_v47  ;;  %v2965_v59 = vcombine.low %v766_v47, %v774_v49  ;;  %v2980_v60 = vrot.slane %v2964_v51, %v12982_v12  ;;  %v2122_v0 = vrot.slane %v442_v39, %v12982_v12 }
  0x40   : > { %18648 = vst [vmem:[#allocation9_spill] sm:$0xff] %v13262_v61  ;;  %v4186_v62 = vrot.slane %v4172_v54, %v12982_v12  ;;  %v2129_v1 = vrot.slane %v2115_v37, %v12982_v12  ;;  %v745_v4 = vcombine.high %v743_v21, %v743_v21  ;;  %7649 = vperm.xlu1 %12769, %v7461_v56   ;;  %v12866_v37 = vld.sshfl [vmem:[%s12990_s16 + $0x198] sm:$0x1 pattern:$0x75316420] }
  0x41   : > { %v2966_v24 = vcombine.low %v776_v58, %v13241_v36  ;;  %v2987_v2 = vrot.slane %v2965_v59, %v12982_v12  ;;  %v2995_v3 = vcombine.low %v2973_v19, %v2980_v60  ;;  %v2130_v7 = vcombine.high %v2122_v0, %v2122_v0 }
  0x42   : > { %v4187_v6 = vcombine.low %v4179_v55, %v4186_v62  ;;  %v2131_v9 = vcombine.high %v2129_v1, %v2129_v1  ;;  %v2138_v10 = vrot.slane %v2122_v0, %v12982_v12  ;;  %v2145_v15 = vrot.slane %v2129_v1, %v12982_v12  ;;  %7513 = vperm.xlu0 %12768, %v7427_v18   ;;  %v444_v62 = vld [vmem:[%s12990_s16 + $0x1a0] sm:$0xff]  ;;  %v7448_v18 = vld [vmem:[%s18215_s1 + $0x148] sm:$0x1] }
  0x43   : > { %v2994_v13 = vrot.slane %v2966_v24, %v12982_v12  ;;  %v3003_v14 = vrot.slane %v2995_v3, %v12982_v12  ;;  %v773_v17 = vrot.slane %v745_v4, %v12982_v12  ;;  %v2152_v21 = vrot.slane %v2130_v7, %v12982_v12 }
  0x44   : > { %12684 = vmatmul.mubr.msk.f32.gmra.mxu1 %vm4800_vm2, %v4187_v6  ;;  %v13284_v48 = vrot.slane %v2131_v9, %v12982_v12  ;;  %v2160_v22 = vcombine.high %v2138_v10, %v2138_v10  ;;  %v4188_v26 = vcombine.low %v2114_v63, %v2138_v10  ;;  %v2161_v33 = vcombine.high %v2145_v15, %v2145_v15 }
  0x45   : > { %12686 = vmatprep.mubr.msk.f32.mxu1 %vm12884_vm1, %v18226_v5  ;;  %v2996_v32 = vcombine.low %v2987_v2, %v2994_v13  ;;  %v775_v34 = vcombine.high %v13241_v36, %v13241_v36  ;;  %v777_v23 = vcombine.high %v773_v17, %v773_v17  ;;  %v2162_v38 = vcombine.high %v2152_v21, %v2152_v21  ;;  %v7428_v36 = vld [vmem:[%s18215_s1 + $0x60] sm:$0xff] }
  0x46   : > { %v4189_v39 = vcombine.low %v2152_v21, %v2160_v22  ;;  %v4198_v44 = vrot.slane %v4188_v26, %v12982_v12  ;;  %v784_v45 = vrot.slane %v13275_v16, %v12982_v12  ;;  %v4191_v47 = vcombine.low %v13284_v48, %v2161_v33  ;;  %7653 = vperm.xlu1 %12769, %v7462_v29   ;;  %v7440_v21 = vld [vmem:[%s18215_s1 + $0xf0] sm:$0xff] }
  0x47   : > { %v3010_v46 = vrot.slane %v2996_v32, %v12982_v12  ;;  %v799_v49 = vrot.slane %v13287_v28, %v12982_v12  ;;  %v3012_v51 = vcombine.low %v773_v17, %v775_v34  ;;  %v13311_v19 = vsel %vm9861_vm3, %v9865_v31, %v9866_v40  ;;  %7517 = vperm.xlu0 %12768, %v7428_v36   ;;  %v13352_v33 = vld [vmem:[%s12990_s16 + $0x50] sm:$0xff] }
  0x48   : > { %18649 = vst [vmem:[#allocation10_spill] sm:$0xff] %v13311_v19  ;;  %v4190_v53 = vcombine.low %v2162_v38, %v2145_v15  ;;  %v4205_v54 = vrot.slane %v4189_v39, %v12982_v12  ;;  %v791_v55 = vrot.slane %v784_v45, %v12982_v12  ;;  %v4219_v58 = vrot.slane %v4191_v47, %v12982_v12 }
  0x49   : > { %v3011_v56 = vcombine.low %v3003_v14, %v3010_v46  ;;  %v807_v59 = vcombine.high %v799_v49, %v799_v49  ;;  %v815_v60 = vrot.slane %v799_v49, %v12982_v12  ;;  %v3022_v31 = vrot.slane %v3012_v51, %v12982_v12 }
  0x4a   : > { %v4212_v11 = vrot.slane %v4190_v53, %v12982_v12  ;;  %v4220_v63 = vcombine.low %v4198_v44, %v4205_v54  ;;  %v3013_v57 = vcombine.low %v777_v23, %v791_v55  ;;  %v2163_v1 = vcombine.high %v13284_v48, %v13284_v48  ;;  %v12514_v48 = vld [vmem:[%s18216_s2 + $0x8] ss:$0 sm:$0xff]  ;;  %7565 = vperm.xlu1 %12769, %v7440_v21  }
  0x4b   : > { %12612 = vmatmul.mubr.msk.f32.gmra.mxu0 %vm4800_vm2, %v3011_v56  ;;  %v829_v0 = vrot.slane %v807_v59, %v12982_v12  ;;  %v2178_v4 = vcombine.high %v444_v62, %v444_v62  ;;  %v2177_v9 = vrot.slane %v12866_v37, %v12982_v12  ;;  %v2185_v10 = vrot.slane %v444_v62, %v12982_v12  ;;  %v12425_v62 = vld.sshfl [vmem:[%s12990_s16 + $0x1a8] sm:$0x1 pattern:$0x75316420] }
  0x4c   : > { %v4221_v24 = vcombine.low %v4212_v11, %v4219_v58  ;;  %v4228_v2 = vrot.slane %v4220_v63, %v12982_v12  ;;  %12614 = vmatprep.mubr.msk.f32.mxu0 %vm12884_vm1, %v18226_v5  ;;  %v3029_v3 = vrot.slane %v3013_v57, %v12982_v12  ;;  %v792_v17 = vcombine.high %v13287_v28, %v13287_v28  ;;  %v13349_v28 = vld [vmem:[%s12990_s16 + $0x48] sm:$0x1] }
  0x4d   : > { %v3014_v6 = vcombine.low %v815_v60, %v829_v0  ;;  %v12440_v7 = vcombine.high %v815_v60, %v829_v0  ;;  %v2192_v15 = vrot.slane %v2178_v4, %v12982_v12  ;;  %v2193_v29 = vcombine.high %v2185_v10, %v2185_v10  ;;  %7597 = vperm.xlu0 %12768, %v7448_v18  }
  0x4e   : > { %v4235_v13 = vrot.slane %v4221_v24, %v12982_v12  ;;  %v3044_v14 = vcombine.low %v3022_v31, %v3029_v3  ;;  %v2201_v32 = vrot.slane %v2185_v10, %v12982_v12  ;;  %v4237_v46 = vcombine.low %v2163_v1, %v2177_v9  ;;  %v446_v3 = vld [vmem:[%s12990_s16 + $0x1b0] sm:$0xff] }
  0x4f   : > { %v3036_v22 = vrot.slane %v3014_v6, %v12982_v12  ;;  %v3043_v26 = vrot.slane %v12440_v7, %v12982_v12  ;;  %v2194_v38 = vcombine.high %v2192_v15, %v2192_v15  ;;  %v13356_v39 = vrot.slane %v2192_v15, %v12982_v12 }
  0x50   : > { %v4236_v34 = vcombine.low %v4228_v2, %v4235_v13  ;;  %v3052_v23 = vrot.slane %v3044_v14, %v12982_v12  ;;  %v2215_v45 = vrot.slane %v2193_v29, %v12982_v12  ;;  %v806_v47 = vrot.slane %v792_v17, %v12982_v12 }
  0x51   : > { %v3045_v44 = vcombine.low %v3036_v22, %v3043_v26  ;;  %v13361_v49 = vmul.f32 %v12514_v48, %v13188_v52  ;;  %v13365_v51 = vrot.slane %v2194_v38, %v12982_v12  ;;  %v847_v36 = vrot.slane %v13349_v28, %v12982_v12 }
  0x52   : > { %12687 = vmatmul.mubr.msk.f32.gmra.mxu1 %vm4800_vm2, %v4236_v34  ;;  %v862_v53 = vrot.slane %v13352_v33, %v12982_v12  ;;  %v4238_v55 = vcombine.low %v2201_v32, %v2215_v45  ;;  %v12462_v52 = vcombine.high %v2201_v32, %v2215_v45  ;;  %v4247_v37 = vrot.slane %v4237_v46, %v12982_v12  ;;  %v7430_v34 = vld [vmem:[%s18215_s1 + $0x70] sm:$0xff] }
  0x53   : > { %18650 = vst [vmem:[#allocation11_spill] sm:$0xff] %v13361_v49  ;;  %12689 = vmatprep.mubr.msk.f32.mxu1 %vm12884_vm1, %v18226_v5  ;;  %v3059_v54 = vrot.slane %v3045_v44, %v12982_v12  ;;  %v4240_v56 = vcombine.low %v13356_v39, %v13365_v51  ;;  %v808_v58 = vcombine.high %v806_v47, %v806_v47 }
  0x54   : > { %v822_v59 = vrot.slane %v806_v47, %v12982_v12  ;;  %v854_v60 = vrot.slane %v847_v36, %v12982_v12  ;;  %v4254_v63 = vrot.slane %v4238_v55, %v12982_v12  ;;  %v4261_v57 = vrot.slane %v12462_v52, %v12982_v12  ;;  %7525 = vperm.xlu0 %12768, %v7430_v34  }
  0x55   : > { %v3060_v11 = vcombine.low %v3052_v23, %v3059_v54  ;;  %v870_v31 = vcombine.high %v862_v53, %v862_v53  ;;  %v4268_v1 = vrot.slane %v4240_v56, %v12982_v12  ;;  %v836_v24 = vrot.slane %v808_v58, %v12982_v12  ;;  %v7451_v23 = vld [vmem:[%s18215_s1 + $0x160] sm:$0xff]  ;;  %v13420_v56 = vld [vmem:[%s12990_s16 + $0x58] sm:$0x1] }
  0x56   : > { %v878_v2 = vrot.slane %v862_v53, %v12982_v12  ;;  %v4269_v4 = vcombine.low %v4247_v37, %v4254_v63  ;;  %v2240_v7 = vrot.slane %v12425_v62, %v12982_v12  ;;  %v2241_v9 = vcombine.high %v446_v3, %v446_v3  ;;  %7609 = vperm.xlu1 %12769, %v7451_v23   ;;  %v13423_v58 = vld [vmem:[%s12990_s16 + $0x60] sm:$0xff] }
  0x57   : > { %12615 = vmatmul.mubr.msk.f32.gmra.mxu0 %vm4800_vm2, %v3060_v11  ;;  %v13389_v6 = vrot.slane %v870_v31, %v12982_v12  ;;  %v4270_v10 = vcombine.low %v4261_v57, %v4268_v1  ;;  %v3061_v14 = vcombine.low %v822_v59, %v836_v24  ;;  %v12441_v15 = vcombine.high %v822_v59, %v836_v24  ;;  %v13471_v23 = vld [vmem:[%s12990_s16 + $0x1c0] sm:$0xff] }
  0x58   : > { %12617 = vmatprep.mubr.msk.f32.mxu0 %vm12884_vm1, %v18226_v5  ;;  %v900_v13 = vcombine.high %v878_v2, %v878_v2  ;;  %v4277_v17 = vrot.slane %v4269_v4, %v12982_v12  ;;  %v3063_v18 = vcombine.low %v854_v60, %v878_v2  ;;  %v2248_v21 = vrot.slane %v446_v3, %v12982_v12  ;;  %v7450_v2 = vld [vmem:[%s18215_s1 + $0x158] sm:$0x1]  ;;  %v7441_v3 = vld [vmem:[%s18215_s1 + $0x100] sm:$0xff] }
  0x59   : > { %v13397_v48 = vrot.slane %v2241_v9, %v12982_v12  ;;  %v4284_v22 = vrot.slane %v4270_v10, %v12982_v12  ;;  %v3071_v29 = vrot.slane %v3061_v14, %v12982_v12  ;;  %v3078_v32 = vrot.slane %v12441_v15, %v12982_v12  ;;  %7605 = vperm.xlu0 %12768, %v7450_v2  }
  0x5a   : > { %v3064_v26 = vcombine.low %v13389_v6, %v900_v13  ;;  %v3085_v38 = vrot.slane %v3063_v18, %v12982_v12  ;;  %v2256_v44 = vcombine.high %v2248_v21, %v2248_v21  ;;  %v2264_v45 = vrot.slane %v2248_v21, %v12982_v12  ;;  %7569 = vperm.xlu1 %12769, %v7441_v3  }
  0x5b   : > { %v13413_v46 = vrot.slane %v13397_v48, %v12982_v12  ;;  %v4285_v47 = vcombine.low %v4277_v17, %v4284_v22  ;;  %v3093_v53 = vcombine.low %v3071_v29, %v3078_v32  ;;  %v12463_v54 = vcombine.high %v13356_v39, %v13365_v51 }
  0x5c   : > { %v3092_v36 = vrot.slane %v3064_v26, %v12982_v12  ;;  %v2278_v55 = vrot.slane %v2256_v44, %v12982_v12  ;;  %v2286_v52 = vcombine.high %v2264_v45, %v2264_v45  ;;  %v4287_v37 = vcombine.low %v2240_v7, %v2264_v45  ;;  %v12426_v26 = vld.sshfl [vmem:[%s12990_s16 + $0x1b8] sm:$0x1 pattern:$0x75316420]  ;;  %v7453_v44 = vld [vmem:[%s18215_s1 + $0x170] sm:$0xff] }
  0x5d   : > { %v855_v59 = vcombine.high %v13352_v33, %v13352_v33  ;;  %v13429_v60 = vmul.f32 %v13100_v42, %v13275_v16  ;;  %12690 = vmatmul.mubr.msk.f32.gmra.mxu1 %vm4800_vm2, %v4285_v47  ;;  %v3101_v39 = vrot.slane %v3093_v53, %v12982_v12  ;;  %v4296_v51 = vrot.slane %v12463_v54, %v12982_v12 }
  0x5e   : > { %v3094_v62 = vcombine.low %v3085_v38, %v3092_v36  ;;  %12692 = vmatprep.mubr.msk.f32.mxu1 %vm12884_vm1, %v18226_v5  ;;  %v2288_v11 = vcombine.high %v2278_v55, %v2278_v55  ;;  %v4288_v63 = vcombine.low %v2278_v55, %v2286_v52  ;;  %v4303_v57 = vrot.slane %v4287_v37, %v12982_v12  ;;  %v7429_v38 = vld [vmem:[%s18215_s1 + $0x68] sm:$0x1] }
  0x5f   : > { %18651 = vst [vmem:[#allocation12_spill] sm:$0xff] %v13429_v60  ;;  %v869_v33 = vrot.slane %v855_v59, %v12982_v12  ;;  %v902_v16 = vcombine.high %v13389_v6, %v13389_v6  ;;  %v910_v1 = vrot.slane %v13420_v56, %v12982_v12  ;;  %v925_v24 = vrot.slane %v13423_v58, %v12982_v12  ;;  %v13998_v60 = vld.sshfl [vmem:[%s12990_s16 + $0x108] sm:$0x1 pattern:$0x75316420] }
  0x60   : > { %v3108_v31 = vrot.slane %v3094_v62, %v12982_v12  ;;  %v4289_v4 = vcombine.low %v2288_v11, %v13413_v46  ;;  %v4310_v7 = vrot.slane %v4288_v63, %v12982_v12  ;;  %v4318_v6 = vcombine.low %v4296_v51, %v4303_v57  ;;  %7521 = vperm.xlu0 %12768, %v7429_v38   ;;  %v12867_v63 = vld.sshfl [vmem:[%s12990_s16 + $0x68] sm:$0x1 pattern:$0x75316420] }
  0x61   : > { %v871_v9 = vcombine.high %v869_v33, %v869_v33  ;;  %v13455_v13 = vmul.f32 %v13100_v42, %v13349_v28  ;;  %v885_v14 = vrot.slane %v869_v33, %v12982_v12  ;;  %v933_v15 = vcombine.high %v925_v24, %v925_v24  ;;  %7617 = vperm.xlu1 %12769, %v7453_v44  }
  0x62   : > { %v3109_v10 = vcombine.low %v3101_v39, %v3108_v31  ;;  %v4317_v17 = vrot.slane %v4289_v4, %v12982_v12  ;;  %v917_v21 = vrot.slane %v910_v1, %v12982_v12  ;;  %v13462_v22 = vrot.slane %v925_v24, %v12982_v12 }
  0x63   : > { %18652 = vst [vmem:[#allocation13_spill] sm:$0xff] %v13455_v13  ;;  %v899_v18 = vrot.slane %v871_v9, %v12982_v12  ;;  %v4326_v29 = vrot.slane %v4318_v6, %v12982_v12  ;;  %v901_v28 = vcombine.high %v885_v14, %v885_v14  ;;  %v13468_v32 = vrot.slane %v933_v15, %v12982_v12 }
  0x64   : > { %12618 = vmatmul.mubr.msk.f32.gmra.mxu0 %vm4800_vm2, %v3109_v10  ;;  %v3110_v34 = vcombine.low %v902_v16, %v885_v14  ;;  %v4319_v45 = vcombine.low %v4310_v7, %v4317_v17  ;;  %v2257_v36 = vcombine.high %v13397_v48, %v13397_v48  ;;  %v2287_v53 = vcombine.high %v13413_v46, %v13413_v46  ;;  %v7431_v7 = vld [vmem:[%s18215_s1 + $0x78] sm:$0x1]  ;;  %v7463_v10 = vld [vmem:[%s18215_s1 + $0x1f0] sm:$0xff] }
  0x65   : > { %12620 = vmatprep.mubr.msk.f32.mxu0 %vm12884_vm1, %v18226_v5  ;;  %v903_v47 = vcombine.high %v899_v18, %v899_v18  ;;  %v3111_v54 = vcombine.low %v899_v18, %v901_v28  ;;  %v3113_v55 = vcombine.low %v13462_v22, %v13468_v32  ;;  %v2303_v37 = vrot.slane %v12426_v26, %v12982_v12 }
  0x66   : > { %v3120_v52 = vrot.slane %v3110_v34, %v12982_v12  ;;  %v4333_v59 = vrot.slane %v4319_v45, %v12982_v12  ;;  %v2285_v39 = vrot.slane %v2257_v36, %v12982_v12  ;;  %v2311_v48 = vrot.slane %v13471_v23, %v12982_v12  ;;  %v406_v34 = vld [vmem:[%s12990_s16 + $0x70] sm:$0xff]  ;;  %7529 = vperm.xlu0 %12768, %v7431_v7  }
  0x67   : > { %v3112_v62 = vcombine.low %v903_v47, %v917_v21  ;;  %v3127_v46 = vrot.slane %v3111_v54, %v12982_v12  ;;  %v3141_v51 = vrot.slane %v3113_v55, %v12982_v12  ;;  %v13497_v11 = vmul.f32 %v13176_v41, %v13471_v23  ;;  %7657 = vperm.xlu1 %12769, %v7463_v10  }
  0x68   : > { %v918_v57 = vcombine.high %v13423_v58, %v13423_v58  ;;  %v4334_v33 = vcombine.low %v4326_v29, %v4333_v59  ;;  %v2289_v16 = vcombine.high %v2285_v39, %v2285_v39  ;;  %v2319_v1 = vcombine.high %v2311_v48, %v2311_v48 }
  0x69   : > { %18653 = vst [vmem:[#allocation14_spill] sm:$0xff] %v13497_v11  ;;  %v3134_v31 = vrot.slane %v3112_v62, %v12982_v12  ;;  %v3142_v24 = vcombine.low %v3120_v52, %v3127_v46  ;;  %v2327_v2 = vrot.slane %v2311_v48, %v12982_v12  ;;  %v4335_v3 = vcombine.low %v2285_v39, %v2287_v53  ;;  %v12427_v52 = vld.sshfl [vmem:[%s12990_s16 + $0x1c8] sm:$0x1 pattern:$0x75316420]  ;;  %v13534_v48 = vld [vmem:[%s12990_s16 + $0x1d0] sm:$0xff] }
  0x6a   : > { %v932_v4 = vrot.slane %v918_v57, %v12982_v12  ;;  %12693 = vmatmul.mubr.msk.f32.gmra.mxu1 %vm4800_vm2, %v4334_v33  ;;  %v2341_v58 = vrot.slane %v2319_v1, %v12982_v12  ;;  %v4336_v9 = vcombine.low %v2289_v16, %v2303_v37  ;;  %v980_v44 = vrot.slane %v12867_v63, %v12982_v12  ;;  %v7452_v63 = vld [vmem:[%s18215_s1 + $0x168] sm:$0x1]  ;;  %v7464_v57 = vld [vmem:[%s18215_s1 + $0x200] sm:$0xff] }
  0x6b   : > { %v3143_v6 = vcombine.low %v3134_v31, %v3141_v51  ;;  %12695 = vmatprep.mubr.msk.f32.mxu1 %vm12884_vm1, %v18226_v5  ;;  %v3150_v14 = vrot.slane %v3142_v24, %v12982_v12  ;;  %v4345_v15 = vrot.slane %v4335_v3, %v12982_v12  ;;  %v988_v45 = vrot.slane %v406_v34, %v12982_v12 }
  0x6c   : > { %v934_v17 = vcombine.high %v932_v4, %v932_v4  ;;  %v948_v18 = vrot.slane %v932_v4, %v12982_v12  ;;  %v4337_v26 = vcombine.low %v2327_v2, %v2341_v58  ;;  %v12464_v29 = vcombine.high %v2327_v2, %v2341_v58  ;;  %7613 = vperm.xlu0 %12768, %v7452_v63  }
  0x6d   : > { %v3157_v21 = vrot.slane %v3143_v6, %v12982_v12  ;;  %v4352_v28 = vrot.slane %v4336_v9, %v12982_v12  ;;  %v12442_v47 = vcombine.high %v13462_v22, %v13468_v32  ;;  %v13530_v37 = vrot.slane %v988_v45, %v12982_v12  ;;  %7661 = vperm.xlu1 %12769, %v7464_v57  }
  0x6e   : > { %v962_v38 = vrot.slane %v934_v17, %v12982_v12  ;;  %v4359_v53 = vrot.slane %v4337_v26, %v12982_v12  ;;  %v4366_v54 = vrot.slane %v12464_v29, %v12982_v12  ;;  %v13539_v22 = vmul.f32 %v13100_v42, %v13420_v56 }
  0x6f   : > { %v3158_v36 = vcombine.low %v3150_v14, %v3157_v21  ;;  %v4367_v55 = vcombine.low %v4345_v15, %v4352_v28  ;;  %v3169_v39 = vrot.slane %v12442_v47, %v12982_v12  ;;  %v2304_v51 = vcombine.high %v13471_v23, %v13471_v23 }
  0x70   : > { %v3160_v59 = vcombine.low %v948_v18, %v962_v38  ;;  %v12443_v62 = vcombine.high %v948_v18, %v962_v38  ;;  %18654 = vst [vmem:[#allocation15_spill] sm:$0xff] %v13539_v22  ;;  %v4368_v32 = vcombine.low %v4359_v53, %v4366_v54  ;;  %v3162_v56 = vcombine.low %v980_v44, %v13530_v37  ;;  %v7454_v38 = vld [vmem:[%s18215_s1 + $0x178] sm:$0x1]  ;;  %v7455_v44 = vld [vmem:[%s18215_s1 + $0x180] sm:$0xff] }
  0x71   : > { %12621 = vmatmul.mubr.msk.f32.gmra.mxu0 %vm4800_vm2, %v3158_v36  ;;  %v4375_v46 = vrot.slane %v4367_v55, %v12982_v12  ;;  %v2366_v16 = vrot.slane %v12427_v52, %v12982_v12  ;;  %v2318_v24 = vrot.slane %v2304_v51, %v12982_v12  ;;  %v2374_v2 = vrot.slane %v13534_v48, %v12982_v12  ;;  %v12868_v53 = vld.sshfl [vmem:[%s12990_s16 + $0x78] sm:$0x1 pattern:$0x75316420] }
  0x72   : > { %12623 = vmatprep.mubr.msk.f32.mxu0 %vm12884_vm1, %v18226_v5  ;;  %v3176_v33 = vrot.slane %v3160_v59, %v12982_v12  ;;  %v3183_v31 = vrot.slane %v12443_v62, %v12982_v12  ;;  %v4382_v1 = vrot.slane %v4368_v32, %v12982_v12  ;;  %v3190_v3 = vrot.slane %v3162_v56, %v12982_v12 }
  0x73   : > { %v981_v7 = vcombine.high %v406_v34, %v406_v34  ;;  %v996_v6 = vcombine.high %v988_v45, %v988_v45  ;;  %v2320_v9 = vcombine.high %v2318_v24, %v2318_v24  ;;  %v2334_v10 = vrot.slane %v2318_v24, %v12982_v12  ;;  %7621 = vperm.xlu0 %12768, %v7454_v38  }
  0x74   : > { %v3191_v4 = vcombine.low %v3169_v39, %v3176_v33  ;;  %v4383_v58 = vcombine.low %v4375_v46, %v4382_v1  ;;  %v2382_v14 = vcombine.high %v2374_v2, %v2374_v2  ;;  %v3192_v15 = vcombine.low %v3183_v31, %v3190_v3  ;;  %7625 = vperm.xlu1 %12769, %v7455_v44  }
  0x75   : > { %v2390_v18 = vrot.slane %v2374_v2, %v12982_v12  ;;  %v995_v21 = vrot.slane %v981_v7, %v12982_v12  ;;  %v2348_v26 = vrot.slane %v2320_v9, %v12982_v12  ;;  %v1018_v28 = vrot.slane %v996_v6, %v12982_v12  ;;  %v7457_v7 = vld [vmem:[%s18215_s1 + $0x190] sm:$0xff] }
  0x76   : > { %v3199_v17 = vrot.slane %v3191_v4, %v12982_v12  ;;  %12696 = vmatmul.mubr.msk.f32.gmra.mxu1 %vm4800_vm2, %v4383_v58  ;;  %v13569_v29 = vrot.slane %v2382_v14, %v12982_v12  ;;  %v1026_v34 = vcombine.high %v13530_v37, %v13530_v37  ;;  %v3206_v45 = vrot.slane %v3192_v15, %v12982_v12  ;;  %v7465_v4 = vld [vmem:[%s18215_s1 + $0x210] sm:$0xff]  ;;  %v13606_v14 = vld [vmem:[%s12990_s16 + $0x1e0] sm:$0xff] }
  0x77   : > { %12698 = vmatprep.mubr.msk.f32.mxu1 %vm12884_vm1, %v18226_v5  ;;  %v2412_v47 = vcombine.high %v2390_v18, %v2390_v18  ;;  %v4386_v36 = vcombine.low %v2366_v16, %v2390_v18  ;;  %v997_v54 = vcombine.high %v995_v21, %v995_v21  ;;  %v4384_v55 = vcombine.low %v2334_v10, %v2348_v26 }
  0x78   : > { %v12465_v52 = vcombine.high %v2334_v10, %v2348_v26  ;;  %v1011_v37 = vrot.slane %v995_v21, %v12982_v12  ;;  %v1028_v59 = vcombine.high %v1018_v28, %v1018_v28  ;;  %v3207_v62 = vcombine.low %v3199_v17, %v3206_v45  ;;  %v12428_v10 = vld.sshfl [vmem:[%s12990_s16 + $0x1d8] sm:$0x1 pattern:$0x75316420]  ;;  %v408_v17 = vld [vmem:[%s12990_s16 + $0x80] sm:$0xff]  ;;  %7665 = vperm.xlu0 %12768, %v7465_v4  }
  0x79   : > { %v4387_v39 = vcombine.low %v13569_v29, %v2412_v47  ;;  %v4408_v32 = vrot.slane %v4386_v36, %v12982_v12  ;;  %v1025_v46 = vrot.slane %v997_v54, %v12982_v12  ;;  %v4394_v51 = vrot.slane %v4384_v55, %v12982_v12  ;;  %7633 = vperm.xlu1 %12769, %v7457_v7  }
  0x7a   : > { %v4401_v63 = vrot.slane %v12465_v52, %v12982_v12  ;;  %v1027_v57 = vcombine.high %v1011_v37, %v1011_v37  ;;  %12624 = vmatmul.mubr.msk.f32.gmra.mxu0 %vm4800_vm2, %v3207_v62  ;;  %v3208_v31 = vcombine.low %v1018_v28, %v1026_v34  ;;  %v3209_v16 = vcombine.low %v1028_v59, %v1011_v37 }
  0x7b   : > { %v4415_v56 = vrot.slane %v4387_v39, %v12982_v12  ;;  %v1029_v33 = vcombine.high %v1025_v46, %v1025_v46  ;;  %12626 = vmatprep.mubr.msk.f32.mxu0 %vm12884_vm1, %v18226_v5  ;;  %v1043_v2 = vrot.slane %v12868_v53, %v12982_v12  ;;  %v2367_v15 = vcombine.high %v13534_v48, %v13534_v48 }
  0x7c   : > { %v4416_v24 = vcombine.low %v4394_v51, %v4401_v63  ;;  %v3210_v3 = vcombine.low %v1025_v46, %v1027_v57  ;;  %v3218_v58 = vrot.slane %v3208_v31, %v12982_v12  ;;  %v3225_v9 = vrot.slane %v3209_v16, %v12982_v12 }
  0x7d   : > { %v4417_v6 = vcombine.low %v4408_v32, %v4415_v56  ;;  %v3211_v26 = vcombine.low %v1029_v33, %v1043_v2  ;;  %v2381_v44 = vrot.slane %v2367_v15, %v12982_v12  ;;  %v2414_v45 = vcombine.high %v13569_v29, %v13569_v29  ;;  %v7456_v32 = vld [vmem:[%s18215_s1 + $0x188] sm:$0x1]  ;;  %v7466_v56 = vld [vmem:[%s18215_s1 + $0x220] sm:$0xff] }
  0x7e   : > { %v4424_v21 = vrot.slane %v4416_v24, %v12982_v12  ;;  %v3232_v28 = vrot.slane %v3210_v3, %v12982_v12  ;;  %v3240_v38 = vcombine.low %v3218_v58, %v3225_v9  ;;  %v2429_v47 = vrot.slane %v12428_v10, %v12982_v12  ;;  %7629 = vperm.xlu0 %12768, %v7456_v32  }
  0x7f   : > { %v4431_v34 = vrot.slane %v4417_v6, %v12982_v12  ;;  %v3239_v48 = vrot.slane %v3211_v26, %v12982_v12  ;;  %v2437_v36 = vrot.slane %v13606_v14, %v12982_v12  ;;  %v1044_v53 = vcombine.high %v408_v17, %v408_v17  ;;  %v12429_v6 = vld.sshfl [vmem:[%s12990_s16 + $0x1e8] sm:$0x1 pattern:$0x75316420]  ;;  %7669 = vperm.xlu1 %12769, %v7466_v56  }
  0x80   : > { %v3248_v55 = vrot.slane %v3240_v38, %v12982_v12  ;;  %v2383_v52 = vcombine.high %v2381_v44, %v2381_v44  ;;  %v2397_v37 = vrot.slane %v2381_v44, %v12982_v12  ;;  %v1051_v29 = vrot.slane %v408_v17, %v12982_v12 }
  0x81   : > { %v4432_v54 = vcombine.low %v4424_v21, %v4431_v34  ;;  %v3241_v59 = vcombine.low %v3232_v28, %v3239_v48  ;;  %v2445_v62 = vcombine.high %v2437_v36, %v2437_v36  ;;  %v13625_v39 = vrot.slane %v2437_v36, %v12982_v12 }
  0x82   : > { %v2411_v46 = vrot.slane %v2383_v52, %v12982_v12  ;;  %v2413_v51 = vcombine.high %v2397_v37, %v2397_v37  ;;  %v4433_v63 = vcombine.low %v2414_v45, %v2397_v37  ;;  %v1058_v57 = vrot.slane %v1044_v53, %v12982_v12 }
  0x83   : > { %12699 = vmatmul.mubr.msk.f32.gmra.mxu1 %vm4800_vm2, %v4432_v54  ;;  %v3255_v33 = vrot.slane %v3241_v59, %v12982_v12  ;;  %v2467_v31 = vrot.slane %v2445_v62, %v12982_v12  ;;  %v1059_v16 = vcombine.high %v1051_v29, %v1051_v29  ;;  %v1067_v24 = vrot.slane %v1051_v29, %v12982_v12  ;;  %v454_v54 = vld [vmem:[%s12990_s16 + $0x1f0] sm:$0xff]  ;;  %v12869_v59 = vld.sshfl [vmem:[%s12990_s16 + $0x88] sm:$0x1 pattern:$0x75316420] }
  0x84   : > { %12701 = vmatprep.mubr.msk.f32.mxu1 %vm12884_vm1, %v18226_v5  ;;  %v2415_v2 = vcombine.high %v2411_v46, %v2411_v46  ;;  %v4434_v3 = vcombine.low %v2411_v46, %v2413_v51  ;;  %v4443_v4 = vrot.slane %v4433_v63, %v12982_v12  ;;  %v1060_v7 = vcombine.high %v1058_v57, %v1058_v57  ;;  %v410_v51 = vld [vmem:[%s12990_s16 + $0x90] sm:$0xff]  ;;  %v7432_v63 = vld [vmem:[%s18215_s1 + $0x80] sm:$0xff] }
  0x85   : > { %v3256_v58 = vcombine.low %v3248_v55, %v3255_v33  ;;  %v4436_v9 = vcombine.low %v13625_v39, %v2467_v31  ;;  %v1074_v10 = vrot.slane %v1058_v57, %v12982_v12  ;;  %v1081_v15 = vrot.slane %v1059_v16, %v12982_v12  ;;  %v7458_v57 = vld [vmem:[%s18215_s1 + $0x198] sm:$0x1]  ;;  %7533 = vperm.xlu0 %12768, %v7432_v63  }
  0x86   : > { %v4435_v17 = vcombine.low %v2415_v2, %v2429_v47  ;;  %v4450_v21 = vrot.slane %v4434_v3, %v12982_v12  ;;  %v1088_v26 = vrot.slane %v1060_v7, %v12982_v12  ;;  %v2430_v28 = vcombine.high %v13606_v14, %v13606_v14  ;;  %7637 = vperm.xlu1 %12769, %v7458_v57  }
  0x87   : > { %12627 = vmatmul.mubr.msk.f32.gmra.mxu0 %vm4800_vm2, %v3256_v58  ;;  %v4464_v34 = vrot.slane %v4436_v9, %v12982_v12  ;;  %v3257_v38 = vcombine.low %v1067_v24, %v1081_v15  ;;  %v12444_v44 = vcombine.high %v1067_v24, %v1081_v15  ;;  %v2492_v45 = vrot.slane %v12429_v6, %v12982_v12 }
  0x88   : > { %v4457_v48 = vrot.slane %v4435_v17, %v12982_v12  ;;  %v4465_v47 = vcombine.low %v4443_v4, %v4450_v21  ;;  %12629 = vmatprep.mubr.msk.f32.mxu0 %vm12884_vm1, %v18226_v5  ;;  %v3259_v36 = vcombine.low %v1074_v10, %v1088_v26  ;;  %v12445_v53 = vcombine.high %v1074_v10, %v1088_v26 }
  0x89   : > { %v3267_v14 = vrot.slane %v3257_v38, %v12982_v12  ;;  %v3274_v55 = vrot.slane %v12444_v44, %v12982_v12  ;;  %v2444_v52 = vrot.slane %v2430_v28, %v12982_v12  ;;  %v13662_v37 = vrot.slane %v454_v54, %v12982_v12  ;;  %v13695_v44 = vld [vmem:[%s18216_s2] sm:$0xff] }
  0x8a   : > { %v4466_v62 = vcombine.low %v4457_v48, %v4464_v34  ;;  %v4473_v29 = vrot.slane %v4465_v47, %v12982_v12  ;;  %v3281_v32 = vrot.slane %v3259_v36, %v12982_v12  ;;  %v3288_v46 = vrot.slane %v12445_v53, %v12982_v12 }
  0x8b   : > { %v3289_v56 = vcombine.low %v3267_v14, %v3274_v55  ;;  %v2446_v33 = vcombine.high %v2444_v52, %v2444_v52  ;;  %v2460_v16 = vrot.slane %v2444_v52, %v12982_v12  ;;  %v13678_v24 = vrot.slane %v13662_v37, %v12982_v12  ;;  %v7433_v55 = vld [vmem:[%s18215_s1 + $0x88] sm:$0x1] }
  0x8c   : > { %v4480_v2 = vrot.slane %v4466_v62, %v12982_v12  ;;  %v3290_v3 = vcombine.low %v3281_v32, %v3288_v46  ;;  %v12466_v4 = vcombine.high %v13625_v39, %v2467_v31  ;;  %v1107_v9 = vcombine.high %v410_v51, %v410_v51  ;;  %7537 = vperm.xlu0 %12768, %v7433_v55  }
  0x8d   : > { %v3297_v7 = vrot.slane %v3289_v56, %v12982_v12  ;;  %v2474_v6 = vrot.slane %v2446_v33, %v12982_v12  ;;  %v4485_v58 = vcombine.low %v2492_v45, %v13678_v24  ;;  %v1106_v21 = vrot.slane %v12869_v59, %v12982_v12 }
  0x8e   : > { %v4481_v10 = vcombine.low %v4473_v29, %v4480_v2  ;;  %v3304_v15 = vrot.slane %v3290_v3, %v12982_v12  ;;  %v4492_v17 = vrot.slane %v12466_v4, %v12982_v12  ;;  %v1114_v39 = vrot.slane %v410_v51, %v12982_v12  ;;  %v7442_v29 = vld [vmem:[%s18215_s1 + $0x110] sm:$0xff] }
  0x8f   : > { %v4483_v26 = vcombine.low %v2460_v16, %v2474_v6  ;;  %v12467_v28 = vcombine.high %v2460_v16, %v2474_v6  ;;  %v4513_v34 = vrot.slane %v4485_v58, %v12982_v12  ;;  %v1121_v38 = vrot.slane %v1107_v9, %v12982_v12  ;;  %7573 = vperm.xlu1 %12769, %v7442_v29   ;;  %v12430_v9 = vld.sshfl [vmem:[%s12990_s16 + $0x1f8] sm:$0x1 pattern:$0x75316420] }
  0x90   : > { %12702 = vmatmul.mubr.msk.f32.gmra.mxu1 %vm4800_vm2, %v4481_v10  ;;  %v3305_v31 = vcombine.low %v3297_v7, %v3304_v15  ;;  %v13699_v45 = vrot.slane %v13695_v44, %v13194_v20  ;;  %v2493_v48 = vcombine.high %v454_v54, %v454_v54  ;;  %v1122_v53 = vcombine.high %v1114_v39, %v1114_v39 }
  0x91   : > { %12704 = vmatprep.mubr.msk.f32.mxu1 %vm12884_vm1, %v18226_v5  ;;  %v4499_v47 = vrot.slane %v4483_v26, %v12982_v12  ;;  %v4506_v36 = vrot.slane %v12467_v28, %v12982_v12  ;;  %v1130_v14 = vrot.slane %v1114_v39, %v12982_v12  ;;  %v1123_v52 = vcombine.high %v1121_v38, %v1121_v38 }
  0x92   : > { %18655 = vst [vmem:[#allocation16_spill] sm:$0xff] %v13699_v45  ;;  %12630 = vmatmul.mubr.msk.f32.gmra.mxu0 %vm4800_vm2, %v3305_v31  ;;  %v1137_v59 = vrot.slane %v1121_v38, %v12982_v12  ;;  %v13712_v54 = vmul.f32 %v13699_v45, %v410_v51  ;;  %v2507_v62 = vrot.slane %v2493_v48, %v12982_v12  ;;  %v12416_v38 = vld.sshfl [vmem:[%s12990_s16 + $0x98] sm:$0x1 pattern:$0x75316420] }
  0x93   : > { %v4514_v32 = vcombine.low %v4492_v17, %v4499_v47  ;;  %v4515_v46 = vcombine.low %v4506_v36, %v4513_v34  ;;  %12632 = vmatprep.mubr.msk.f32.mxu0 %vm12884_vm1, %v18226_v5  ;;  %v1144_v63 = vrot.slane %v1122_v53, %v12982_v12  ;;  %v1152_v57 = vcombine.high %v1130_v14, %v1130_v14 }
  0x94   : > { %18656 = vst [vmem:[#allocation17_spill] sm:$0xff] %v13712_v54  ;;  %v1151_v56 = vrot.slane %v1123_v52, %v12982_v12  ;;  %v1153_v33 = vcombine.high %v1137_v59, %v1137_v59  ;;  %v3306_v51 = vcombine.low %v1106_v21, %v1130_v14  ;;  %v2508_v16 = vcombine.high %v13662_v37, %v13662_v37  ;;  %v412_v14 = vld [vmem:[%s12990_s16 + $0xa0] sm:$0xff] }
  0x95   : > { %v4522_v2 = vrot.slane %v4514_v32, %v12982_v12  ;;  %v4529_v3 = vrot.slane %v4515_v46, %v12982_v12  ;;  %v1154_v4 = vcombine.high %v1144_v63, %v1144_v63  ;;  %v3307_v7 = vcombine.low %v1144_v63, %v1152_v57  ;;  %v13744_v63 = vpop.permute.xlu0 %7469 }
  0x96   : > { %v3309_v6 = vcombine.low %v1151_v56, %v1153_v33  ;;  %v3316_v58 = vrot.slane %v3306_v51, %v12982_v12  ;;  %v2509_v10 = vcombine.high %v2507_v62, %v2507_v62  ;;  %v2523_v15 = vrot.slane %v2507_v62, %v12982_v12 }
  0x97   : > { %v4530_v17 = vcombine.low %v4522_v2, %v4529_v3  ;;  %v3308_v21 = vcombine.low %v1154_v4, %v1137_v59  ;;  %v3323_v37 = vrot.slane %v3307_v7, %v12982_v12  ;;  %v2530_v26 = vrot.slane %v2508_v16, %v12982_v12 }
  0x98   : > { %v3337_v28 = vrot.slane %v3309_v6, %v12982_v12  ;;  %v2537_v34 = vrot.slane %v2509_v10, %v12982_v12  ;;  %v2538_v39 = vcombine.high %v13678_v24, %v13678_v24  ;;  %v2539_v31 = vcombine.high %v2523_v15, %v2523_v15  ;;  %v456_v10 = vld [vmem:[%s12990_s16 + $0x200] sm:$0xff] }
  0x99   : > { %12705 = vmatmul.mubr.msk.f32.gmra.mxu1 %vm4800_vm2, %v4530_v17  ;;  %v3330_v48 = vrot.slane %v3308_v21, %v12982_v12  ;;  %v3338_v47 = vcombine.low %v3316_v58, %v3323_v37  ;;  %v2540_v36 = vcombine.high %v2530_v26, %v2530_v26  ;;  %v2555_v53 = vrot.slane %v12430_v9, %v12982_v12 }
  0x9a   : > { %12707 = vmatprep.mubr.msk.f32.mxu1 %vm12884_vm1, %v18226_v5  ;;  %v2541_v55 = vcombine.high %v2537_v34, %v2537_v34  ;;  %v4531_v52 = vcombine.low %v2530_v26, %v2538_v39  ;;  %v4533_v59 = vcombine.low %v2537_v34, %v2539_v31  ;;  %v1155_v62 = vcombine.high %v1151_v56, %v1151_v56  ;;  %v13760_v26 = vld.sshfl [vmem:[%s12990_s16 + $0xa8] sm:$0x1 pattern:$0x75316420] }
  0x9b   : > { %v3339_v29 = vcombine.low %v3330_v48, %v3337_v28  ;;  %v3346_v24 = vrot.slane %v3338_v47, %v12982_v12  ;;  %v4532_v32 = vcombine.low %v2540_v36, %v2523_v15  ;;  %v1169_v46 = vrot.slane %v12416_v38, %v12982_v12 }
  0x9c   : > { %v4534_v57 = vcombine.low %v2541_v55, %v2555_v53  ;;  %v4541_v33 = vrot.slane %v4531_v52, %v12982_v12  ;;  %v4555_v51 = vrot.slane %v4533_v59, %v12982_v12  ;;  %v1170_v16 = vcombine.high %v412_v14, %v412_v14  ;;  %v13773_v53 = vpop.permute.xlu0 %7541 }
  0x9d   : > { %v3353_v2 = vrot.slane %v3339_v29, %v12982_v12  ;;  %v4548_v56 = vrot.slane %v4532_v32, %v12982_v12  ;;  %v1177_v3 = vrot.slane %v412_v14, %v12982_v12  ;;  %v3355_v4 = vcombine.low %v1155_v62, %v1169_v46  ;;  %18659 = vst [vmem:[#allocation20_spill] sm:$0xff] %v13773_v53 }
  0x9e   : > { %v4562_v7 = vrot.slane %v4534_v57, %v12982_v12  ;;  %v1184_v6 = vrot.slane %v1170_v16, %v12982_v12  ;;  %v13754_v58 = vsub.s32 0, %v12966_v8  ;;  %v9620_v9 = vmul.f32 %v13699_v45, %v412_v14  ;;  %v414_v16 = vld [vmem:[%s12990_s16 + $0xb0] sm:$0xff] }
  0x9f   : > { %v3354_v15 = vcombine.low %v3346_v24, %v3353_v2  ;;  %v4563_v17 = vcombine.low %v4541_v33, %v4548_v56  ;;  %v1185_v21 = vcombine.high %v1177_v3, %v1177_v3  ;;  %v1193_v37 = vrot.slane %v1177_v3, %v12982_v12 }
  0xa0   : > { %18657 = vst [vmem:[#allocation18_spill] sm:$0xff] %v13754_v58  ;;  %v4564_v28 = vcombine.low %v4555_v51, %v4562_v7  ;;  %v1186_v34 = vcombine.high %v1184_v6, %v1184_v6  ;;  %v13763_v39 = vrot.slane %v1184_v6, %v12982_v12  ;;  %v3365_v31 = vrot.slane %v3355_v4, %v12982_v12 }
  0xa1   : > { %12633 = vmatmul.mubr.msk.f32.gmra.mxu0 %vm4800_vm2, %v3354_v15  ;;  %v4571_v38 = vrot.slane %v4563_v17, %v12982_v12  ;;  %v1207_v48 = vrot.slane %v1185_v21, %v12982_v12  ;;  %v13771_v47 = vrot.slane %v13695_v44, %v13754_v58  ;;  %v2556_v36 = vcombine.high %v456_v10, %v456_v10  ;;  %v12807_v44 = vld [vmem:[%s12990_s16 + $0x10] sm:$0xff] }
  0xa2   : > { %v4578_v14 = vrot.slane %v4564_v28, %v12982_v12  ;;  %12635 = vmatprep.mubr.msk.f32.mxu0 %vm12884_vm1, %v18226_v5  ;;  %v1214_v55 = vrot.slane %v1186_v34, %v12982_v12  ;;  %v2563_v52 = vrot.slane %v456_v10, %v12982_v12  ;;  %v1232_v59 = vrot.slane %v13760_v26, %v12982_v12  ;;  %v13801_v26 = vpop.permute.xlu0 %7473 }
  0xa3   : > { %18658 = vst [vmem:[#allocation19_spill] sm:$0xff] %v13771_v47  ;;  %v3356_v62 = vcombine.low %v1193_v37, %v1207_v48  ;;  %v12446_v29 = vcombine.high %v1193_v37, %v1207_v48  ;;  %v9410_v24 = vmul.f32 %v12807_v44, %v13771_v47  ;;  %v2570_v32 = vrot.slane %v2556_v36, %v12982_v12  ;;  %v14068_v47 = vld [vmem:[%s12990_s16 + $0x130] sm:$0xff] }
  0xa4   : > { %v4579_v46 = vcombine.low %v4571_v38, %v4578_v14  ;;  %v3358_v57 = vcombine.low %v13763_v39, %v1214_v55  ;;  %v2571_v33 = vcombine.high %v2563_v52, %v2563_v52  ;;  %v2579_v51 = vrot.slane %v2563_v52, %v12982_v12 }
  0xa5   : > { %v3372_v2 = vrot.slane %v3356_v62, %v12982_v12  ;;  %v3379_v56 = vrot.slane %v12446_v29, %v12982_v12  ;;  %v13790_v3 = vadd.f32 %v9620_v9, %v9410_v24  ;;  %v2572_v4 = vcombine.high %v2570_v32, %v2570_v32 }
  0xa6   : > { %12708 = vmatmul.mubr.msk.f32.gmra.mxu1 %vm4800_vm2, %v4579_v46  ;;  %v3386_v7 = vrot.slane %v3358_v57, %v12982_v12  ;;  %v2586_v6 = vrot.slane %v2570_v32, %v12982_v12  ;;  %v2593_v10 = vrot.slane %v2571_v33, %v12982_v12  ;;  %v1233_v15 = vcombine.high %v414_v16, %v414_v16  ;;  %v458_v33 = vld [vmem:[%s12990_s16 + $0x210] sm:$0xff] }
  0xa7   : > { %18660 = vst [vmem:[#allocation21_spill] sm:$0xff] %v13790_v3  ;;  %12710 = vmatprep.mubr.msk.f32.mxu1 %vm12884_vm1, %v18226_v5  ;;  %v3387_v17 = vcombine.low %v3365_v31, %v3372_v2  ;;  %v2600_v21 = vrot.slane %v2572_v4, %v12982_v12  ;;  %v1240_v9 = vrot.slane %v414_v16, %v12982_v12 }
  0xa8   : > { %v12447_v37 = vcombine.high %v13763_v39, %v1214_v55  ;;  %v3388_v28 = vcombine.low %v3379_v56, %v3386_v7  ;;  %v4580_v34 = vcombine.low %v2579_v51, %v2593_v10  ;;  %v12468_v38 = vcombine.high %v2579_v51, %v2593_v10  ;;  %v12431_v55 = vld.sshfl [vmem:[%s12990_s16 + $0x208] sm:$0x1 pattern:$0x75316420] }
  0xa9   : > { %v1247_v48 = vrot.slane %v1233_v15, %v12982_v12  ;;  %v3395_v36 = vrot.slane %v3387_v17, %v12982_v12  ;;  %v4582_v14 = vcombine.low %v2586_v6, %v2600_v21  ;;  %v12469_v52 = vcombine.high %v2586_v6, %v2600_v21  ;;  %v13817_v15 = vpop.permute.xlu0 %7485 }
  0xaa   : > { %v1248_v31 = vcombine.high %v1240_v9, %v1240_v9  ;;  %v3402_v62 = vrot.slane %v3388_v28, %v12982_v12  ;;  %v4590_v29 = vrot.slane %v4580_v34, %v12982_v12  ;;  %v4597_v44 = vrot.slane %v12468_v38, %v12982_v12 }
  0xab   : > { %v1256_v39 = vrot.slane %v1240_v9, %v12982_v12  ;;  %v4604_v24 = vrot.slane %v4582_v14, %v12982_v12  ;;  %v4611_v32 = vrot.slane %v12469_v52, %v12982_v12  ;;  %v1263_v46 = vrot.slane %v1247_v48, %v12982_v12 }
  0xac   : > { %v1270_v57 = vrot.slane %v1248_v31, %v12982_v12  ;;  %v3403_v51 = vcombine.low %v3395_v36, %v3402_v62  ;;  %v4612_v16 = vcombine.low %v4590_v29, %v4597_v44  ;;  %v3414_v6 = vrot.slane %v12447_v37, %v12982_v12 }
  0xad   : > { %v1278_v2 = vcombine.high %v1256_v39, %v1256_v39  ;;  %v3405_v56 = vcombine.low %v1232_v59, %v1256_v39  ;;  %v4613_v4 = vcombine.low %v4604_v24, %v4611_v32  ;;  %v2618_v10 = vrot.slane %v12431_v55, %v12982_v12  ;;  %v12418_v55 = vld.sshfl [vmem:[%s12990_s16 + $0xb8] sm:$0x1 pattern:$0x75316420] }
  0xae   : > { %v1280_v7 = vcombine.high %v1270_v57, %v1270_v57  ;;  %12636 = vmatmul.mubr.msk.f32.gmra.mxu0 %vm4800_vm2, %v3403_v51  ;;  %v4620_v17 = vrot.slane %v4612_v16, %v12982_v12  ;;  %v2619_v28 = vcombine.high %v458_v33, %v458_v33  ;;  %v2626_v37 = vrot.slane %v458_v33, %v12982_v12 }
  0xaf   : > { %v3406_v21 = vcombine.low %v1270_v57, %v1278_v2  ;;  %v3421_v9 = vrot.slane %v3405_v56, %v12982_v12  ;;  %v4627_v34 = vrot.slane %v4613_v4, %v12982_v12  ;;  %12638 = vmatprep.mubr.msk.f32.mxu0 %vm12884_vm1, %v18226_v5  ;;  %v1249_v38 = vcombine.high %v1247_v48, %v1247_v48  ;;  %v416_v2 = vld [vmem:[%s12990_s16 + $0xc0] sm:$0xff]  ;;  %v13837_v56 = vpop.permute.xlu0 %7577 }
  0xb0   : > { %v3407_v59 = vcombine.low %v1280_v7, %v1263_v46  ;;  %v2633_v52 = vrot.slane %v2619_v28, %v12982_v12  ;;  %v1279_v31 = vcombine.high %v1263_v46, %v1263_v46  ;;  %v2634_v44 = vcombine.high %v2626_v37, %v2626_v37  ;;  %18661 = vst [vmem:[#allocation22_spill] sm:$0xff] %v13837_v56 }
  0xb1   : > { %v3428_v36 = vrot.slane %v3406_v21, %v12982_v12  ;;  %v3436_v14 = vcombine.low %v3414_v6, %v3421_v9  ;;  %v4628_v62 = vcombine.low %v4620_v17, %v4627_v34  ;;  %v2642_v39 = vrot.slane %v2626_v37, %v12982_v12 }
  0xb2   : > { %v3435_v29 = vrot.slane %v3407_v59, %v12982_v12  ;;  %v2635_v32 = vcombine.high %v2633_v52, %v2633_v52  ;;  %v2649_v57 = vrot.slane %v2633_v52, %v12982_v12  ;;  %v1277_v48 = vrot.slane %v1249_v38, %v12982_v12 }
  0xb3   : > { %v3444_v24 = vrot.slane %v3436_v14, %v12982_v12  ;;  %12711 = vmatmul.mubr.msk.f32.gmra.mxu1 %vm4800_vm2, %v4628_v62  ;;  %v2656_v51 = vrot.slane %v2634_v44, %v12982_v12  ;;  %v2664_v46 = vcombine.high %v2642_v39, %v2642_v39  ;;  %v4629_v16 = vcombine.low %v2618_v10, %v2642_v39 }
  0xb4   : > { %v3437_v33 = vcombine.low %v3428_v36, %v3435_v29  ;;  %12713 = vmatprep.mubr.msk.f32.mxu1 %vm12884_vm1, %v18226_v5  ;;  %v2663_v4 = vrot.slane %v2635_v32, %v12982_v12  ;;  %v2665_v7 = vcombine.high %v2649_v57, %v2649_v57  ;;  %v1281_v6 = vcombine.high %v1277_v48, %v1277_v48  ;;  %v12432_v36 = vld.sshfl [vmem:[%s12990_s16 + $0x218] sm:$0x1 pattern:$0x75316420]  ;;  %v460_v29 = vld [vmem:[%s12990_s16 + $0x220] sm:$0xff] }
  0xb5   : > { %v1295_v17 = vrot.slane %v12418_v55, %v12982_v12  ;;  %v2666_v9 = vcombine.high %v2656_v51, %v2656_v51  ;;  %v4630_v28 = vcombine.low %v2656_v51, %v2664_v46  ;;  %v4639_v10 = vrot.slane %v4629_v16, %v12982_v12  ;;  %v13852_v51 = vpop.permute.xlu1 %7477  ;;  %v13858_v46 = vpop.permute.xlu0 %7553 }
  0xb6   : > { %v3451_v21 = vrot.slane %v3437_v33, %v12982_v12  ;;  %v4632_v34 = vcombine.low %v2663_v4, %v2665_v7  ;;  %v1303_v59 = vrot.slane %v416_v2, %v12982_v12  ;;  %v3453_v37 = vcombine.low %v1277_v48, %v1279_v31  ;;  %18662 = vst [vmem:[#allocation23_spill] sm:$0xff] %v13858_v46 }
  0xb7   : > { %v3454_v38 = vcombine.low %v1281_v6, %v1295_v17  ;;  %v4631_v52 = vcombine.low %v2666_v9, %v2649_v57  ;;  %v4646_v62 = vrot.slane %v4630_v28, %v12982_v12  ;;  %v2667_v44 = vcombine.high %v2663_v4, %v2663_v4 }
  0xb8   : > { %v3452_v14 = vcombine.low %v3444_v24, %v3451_v21  ;;  %v4660_v39 = vrot.slane %v4632_v34, %v12982_v12  ;;  %v1311_v55 = vcombine.high %v1303_v59, %v1303_v59  ;;  %v1319_v32 = vrot.slane %v1303_v59, %v12982_v12 }
  0xb9   : > { %v3463_v33 = vrot.slane %v3453_v37, %v12982_v12  ;;  %v4653_v31 = vrot.slane %v4631_v52, %v12982_v12  ;;  %v4661_v48 = vcombine.low %v4639_v10, %v4646_v62  ;;  %v3470_v24 = vrot.slane %v3454_v38, %v12982_v12  ;;  %v12419_v38 = vld.sshfl [vmem:[%s12990_s16 + $0xc8] sm:$0x1 pattern:$0x75316420] }
  0xba   : > { %12639 = vmatmul.mubr.msk.f32.gmra.mxu0 %vm4800_vm2, %v3452_v14  ;;  %v2681_v57 = vrot.slane %v12432_v36, %v12982_v12  ;;  %v1333_v16 = vrot.slane %v1311_v55, %v12982_v12  ;;  %v2682_v4 = vcombine.high %v460_v29, %v460_v29  ;;  %v2689_v7 = vrot.slane %v460_v29, %v12982_v12  ;;  %v13875_v29 = vld.sshfl [vmem:[%s12990_s16 + $0x228] sm:$0x1 pattern:$0x75316420] }
  0xbb   : > { %12641 = vmatprep.mubr.msk.f32.mxu0 %vm12884_vm1, %v18226_v5  ;;  %v1296_v6 = vcombine.high %v416_v2, %v416_v2  ;;  %v4662_v17 = vcombine.low %v4653_v31, %v4660_v39  ;;  %v4669_v21 = vrot.slane %v4661_v48, %v12982_v12  ;;  %v3485_v9 = vcombine.low %v3463_v33, %v3470_v24  ;;  %v13872_v2 = vld [vmem:[%s12990_s16 + $0xd0] sm:$0xff]  ;;  %v13882_v33 = vpop.permute.xlu1 %7545 }
  0xbc   : > { %v4678_v28 = vcombine.low %v2667_v44, %v2681_v57  ;;  %v3455_v10 = vcombine.low %v1319_v32, %v1333_v16  ;;  %v12448_v34 = vcombine.high %v1319_v32, %v1333_v16  ;;  %v2696_v59 = vrot.slane %v2682_v4, %v12982_v12  ;;  %18663 = vst [vmem:[#allocation24_spill] sm:$0xff] %v13882_v33  ;;  %v13887_v16 = vpop.permute.xlu0 %7489 }
  0xbd   : > { %v2697_v37 = vcombine.high %v2689_v7, %v2689_v7  ;;  %v4676_v36 = vrot.slane %v4662_v17, %v12982_v12  ;;  %v3493_v14 = vrot.slane %v3485_v9, %v12982_v12  ;;  %v2705_v52 = vrot.slane %v2689_v7, %v12982_v12  ;;  %18664 = vst [vmem:[#allocation25_spill] sm:$0xff] %v13887_v16 }
  0xbe   : > { %v4688_v62 = vrot.slane %v4678_v28, %v12982_v12  ;;  %v3477_v44 = vrot.slane %v3455_v10, %v12982_v12  ;;  %v3484_v39 = vrot.slane %v12448_v34, %v12982_v12  ;;  %v2698_v55 = vcombine.high %v2696_v59, %v2696_v59 }
  0xbf   : > { %v13880_v32 = vrot.slane %v2696_v59, %v12982_v12  ;;  %v4677_v31 = vcombine.low %v4669_v21, %v4676_v36  ;;  %v2719_v48 = vrot.slane %v2697_v37, %v12982_v12  ;;  %v1310_v24 = vrot.slane %v1296_v6, %v12982_v12  ;;  %v462_v36 = vld [vmem:[%s12990_s16 + $0x230] sm:$0xff] }
  0xc0   : > { %v1358_v57 = vrot.slane %v12419_v38, %v12982_v12  ;;  %v3486_v4 = vcombine.low %v3477_v44, %v3484_v39  ;;  %v2726_v7 = vrot.slane %v2698_v55, %v12982_v12  ;;  %v1366_v17 = vrot.slane %v13872_v2, %v12982_v12  ;;  %v13909_v40 = vpop.permute.xlu0 %7497 }
  0xc1   : > { %v2744_v9 = vrot.slane %v13875_v29, %v12982_v12  ;;  %12714 = vmatmul.mubr.msk.f32.gmra.mxu1 %vm4800_vm2, %v4677_v31  ;;  %v4679_v21 = vcombine.low %v2705_v52, %v2719_v48  ;;  %v12470_v28 = vcombine.high %v2705_v52, %v2719_v48  ;;  %v1312_v10 = vcombine.high %v1310_v24, %v1310_v24 }
  0xc2   : > { %v1326_v6 = vrot.slane %v1310_v24, %v12982_v12  ;;  %12716 = vmatprep.mubr.msk.f32.mxu1 %vm12884_vm1, %v18226_v5  ;;  %v3500_v34 = vrot.slane %v3486_v4, %v12982_v12  ;;  %v4681_v59 = vcombine.low %v13880_v32, %v2726_v7  ;;  %v1374_v37 = vcombine.high %v1366_v17, %v1366_v17  ;;  %v13907_v4 = vpop.permute.xlu1 %7481 }
  0xc3   : > { %v1382_v38 = vrot.slane %v1366_v17, %v12982_v12  ;;  %v4695_v29 = vrot.slane %v4679_v21, %v12982_v12  ;;  %v4702_v44 = vrot.slane %v12470_v28, %v12982_v12  ;;  %v1340_v52 = vrot.slane %v1312_v10, %v12982_v12  ;;  %18665 = vst [vmem:[#allocation26_spill] sm:$0xff] %v13909_v40 }
  0xc4   : > { %v2745_v39 = vcombine.high %v462_v36, %v462_v36  ;;  %v3501_v55 = vcombine.low %v3493_v14, %v3500_v34  ;;  %v4709_v31 = vrot.slane %v4681_v59, %v12982_v12  ;;  %v1396_v48 = vrot.slane %v1374_v37, %v12982_v12 }
  0xc5   : > { %v1404_v24 = vcombine.high %v1382_v38, %v1382_v38  ;;  %v4710_v18 = vcombine.low %v4688_v62, %v4695_v29  ;;  %v3502_v1 = vcombine.low %v1326_v6, %v1340_v52  ;;  %v12449_v23 = vcombine.high %v1326_v6, %v1340_v52 }
  0xc6   : > { %v3504_v17 = vcombine.low %v1358_v57, %v1382_v38  ;;  %12642 = vmatmul.mubr.msk.f32.gmra.mxu0 %vm4800_vm2, %v3501_v55  ;;  %v4711_v21 = vcombine.low %v4702_v44, %v4709_v31  ;;  %v2752_v10 = vrot.slane %v462_v36, %v12982_v12  ;;  %v13914_v14 = vrot.slane %v2745_v39, %v12982_v12  ;;  %v12420_v31 = vld.sshfl [vmem:[%s12990_s16 + $0xd8] sm:$0x1 pattern:$0x75316420] }
  0xc7   : > { %v3505_v28 = vcombine.low %v1396_v48, %v1404_v24  ;;  %v4718_v34 = vrot.slane %v4710_v18, %v12982_v12  ;;  %12644 = vmatprep.mubr.msk.f32.mxu0 %vm12884_vm1, %v18226_v5  ;;  %v3512_v62 = vrot.slane %v3502_v1, %v12982_v12  ;;  %v3519_v57 = vrot.slane %v12449_v23, %v12982_v12  ;;  %v13934_v24 = vpop.permute.xlu1 %7549 }
  0xc8   : > { %18666 = vst [vmem:[#allocation27_spill] sm:$0xff] %v13914_v14  ;;  %v3526_v6 = vrot.slane %v3504_v17, %v12982_v12  ;;  %v4725_v59 = vrot.slane %v4711_v21, %v12982_v12  ;;  %v2760_v38 = vcombine.high %v2752_v10, %v2752_v10  ;;  %v2768_v36 = vrot.slane %v2752_v10, %v12982_v12  ;;  %v420_v10 = vld [vmem:[%s12990_s16 + $0xe0] sm:$0xff] }
  0xc9   : > { %v3533_v37 = vrot.slane %v3505_v28, %v12982_v12  ;;  %v3534_v29 = vcombine.low %v3512_v62, %v3519_v57  ;;  %v13927_v18 = vrot.slane %v13914_v14, %v12982_v12  ;;  %v12471_v44 = vcombine.high %v13880_v32, %v2726_v7  ;;  %18668 = vst [vmem:[#allocation29_spill] sm:$0xff] %v13934_v24  ;;  %v13940_v32 = vpop.permute.xlu0 %7501 }
  0xca   : > { %v1359_v23 = vcombine.high %v13872_v2, %v13872_v2  ;;  %v4726_v1 = vcombine.low %v4718_v34, %v4725_v59  ;;  %v2782_v39 = vrot.slane %v2760_v38, %v12982_v12  ;;  %v2790_v55 = vcombine.high %v2768_v36, %v2768_v36  ;;  %18669 = vst [vmem:[#allocation30_spill] sm:$0xff] %v13940_v32 }
  0xcb   : > { %18667 = vst [vmem:[#allocation28_spill] sm:$0xff] %v13927_v18  ;;  %v3535_v52 = vcombine.low %v3526_v6, %v3533_v37  ;;  %v3542_v17 = vrot.slane %v3534_v29, %v12982_v12  ;;  %v4728_v21 = vcombine.low %v2744_v9, %v2768_v36  ;;  %v4737_v28 = vrot.slane %v12471_v44, %v12982_v12 }
  0xcc   : > { %v1373_v62 = vrot.slane %v1359_v23, %v12982_v12  ;;  %12717 = vmatmul.mubr.msk.f32.gmra.mxu1 %vm4800_vm2, %v4726_v1  ;;  %v2792_v7 = vcombine.high %v2782_v39, %v2782_v39  ;;  %v4729_v34 = vcombine.low %v2782_v39, %v2790_v55  ;;  %v1406_v57 = vcombine.high %v1396_v48, %v1396_v48  ;;  %v12421_v39 = vld.sshfl [vmem:[%s12990_s16 + $0xe8] sm:$0x1 pattern:$0x75316420] }
  0xcd   : > { %v3549_v2 = vrot.slane %v3535_v52, %v12982_v12  ;;  %12719 = vmatprep.mubr.msk.f32.mxu1 %vm12884_vm1, %v18226_v5  ;;  %v4744_v9 = vrot.slane %v4728_v21, %v12982_v12  ;;  %v1421_v37 = vrot.slane %v12420_v31, %v12982_v12  ;;  %v1429_v44 = vrot.slane %v420_v10, %v12982_v12 }
  0xce   : > { %v1375_v6 = vcombine.high %v1373_v62, %v1373_v62  ;;  %v1389_v59 = vrot.slane %v1373_v62, %v12982_v12  ;;  %v4730_v36 = vcombine.low %v2792_v7, %v13927_v18  ;;  %v4751_v29 = vrot.slane %v4729_v34, %v12982_v12 }
  0xcf   : > { %v3550_v38 = vcombine.low %v3542_v17, %v3549_v2  ;;  %v4759_v23 = vcombine.low %v4737_v28, %v4744_v9  ;;  %v1437_v21 = vcombine.high %v1429_v44, %v1429_v44  ;;  %v1445_v31 = vrot.slane %v1429_v44, %v12982_v12  ;;  %v422_v17 = vld [vmem:[%s12990_s16 + $0xf0] sm:$0xff]  ;;  %v13958_v2 = vpop.permute.xlu1 %7493  ;;  %v13964_v9 = vpop.permute.xlu0 %7581 }
  0xd0   : > { %v1403_v48 = vrot.slane %v1375_v6, %v12982_v12  ;;  %v1405_v1 = vcombine.high %v1389_v59, %v1389_v59  ;;  %v3551_v52 = vcombine.low %v1406_v57, %v1389_v59  ;;  %v4758_v55 = vrot.slane %v4730_v36, %v12982_v12  ;;  %18670 = vst [vmem:[#allocation31_spill] sm:$0xff] %v13958_v2 }
  0xd1   : > { %12645 = vmatmul.mubr.msk.f32.gmra.mxu0 %vm4800_vm2, %v3550_v38  ;;  %v1422_v62 = vcombine.high %v420_v10, %v420_v10  ;;  %v4767_v7 = vrot.slane %v4759_v23, %v12982_v12  ;;  %18671 = vst [vmem:[#allocation32_spill] sm:$0xff] %v13964_v9  ;;  %v1459_v59 = vrot.slane %v1437_v21, %v12982_v12 }
  0xd2   : > { %12647 = vmatprep.mubr.msk.f32.mxu0 %vm12884_vm1, %v18226_v5  ;;  %v1407_v28 = vcombine.high %v1403_v48, %v1403_v48  ;;  %v3552_v34 = vcombine.low %v1403_v48, %v1405_v1  ;;  %v3561_v57 = vrot.slane %v3551_v52, %v12982_v12  ;;  %v4760_v6 = vcombine.low %v4751_v29, %v4758_v55 }
  0xd3   : > { %v1436_v38 = vrot.slane %v1422_v62, %v12982_v12  ;;  %v1484_v10 = vrot.slane %v12421_v39, %v12982_v12  ;;  %v1492_v23 = vrot.slane %v422_v17, %v12982_v12  ;;  %v1485_v0 = vcombine.high %v422_v17, %v422_v17 }
  0xd4   : > { %v3553_v36 = vcombine.low %v1407_v28, %v1421_v37  ;;  %v3568_v44 = vrot.slane %v3552_v34, %v12982_v12  ;;  %v4774_v50 = vrot.slane %v4760_v6, %v12982_v12  ;;  %v3554_v48 = vcombine.low %v1445_v31, %v1459_v59  ;;  %v13978_v34 = vpop.permute.xlu1 %7585 }
  0xd5   : > { %v1438_v1 = vcombine.high %v1436_v38, %v1436_v38  ;;  %v1452_v52 = vrot.slane %v1436_v38, %v12982_v12  ;;  %v1508_v21 = vrot.slane %v1492_v23, %v12982_v12  ;;  %v12450_v62 = vcombine.high %v1445_v31, %v1459_v59  ;;  %18672 = vst [vmem:[#allocation33_spill] sm:$0xff] %v13978_v34  ;;  %v12422_v59 = vld.sshfl [vmem:[%s12990_s16 + $0xf8] sm:$0x1 pattern:$0x75316420] }
  0xd6   : > { %v3575_v29 = vrot.slane %v3553_v36, %v12982_v12  ;;  %v3583_v55 = vcombine.low %v3561_v57, %v3568_v44  ;;  %v4775_v39 = vcombine.low %v4767_v7, %v4774_v50  ;;  %v3582_v37 = vrot.slane %v3554_v48, %v12982_v12  ;;  %v13982_v57 = vpop.permute.xlu0 %7509 }
  0xd7   : > { %v1466_v28 = vrot.slane %v1438_v1, %v12982_v12  ;;  %v1499_v17 = vrot.slane %v1485_v0, %v12982_v12  ;;  %v3603_v5 = vcombine.low %v1484_v10, %v1508_v21  ;;  %v3610_v38 = vrot.slane %v12450_v62, %v12982_v12  ;;  %18673 = vst [vmem:[#allocation34_spill] sm:$0xff] %v13982_v57 }
  0xd8   : > { %v3591_v6 = vrot.slane %v3583_v55, %v12982_v12  ;;  %v1500_v36 = vcombine.high %v1492_v23, %v1492_v23  ;;  %12720 = vmatmul.mubr.msk.f32.gmra.mxu1 %vm4800_vm2, %v4775_v39  ;;  %v3584_v50 = vcombine.low %v3575_v29, %v3582_v37  ;;  %v1530_v10 = vcombine.high %v1508_v21, %v1508_v21  ;;  %v424_v39 = vld [vmem:[%s12990_s16 + $0x100] sm:$0xff] }
  0xd9   : > { %v3601_v31 = vcombine.low %v1452_v52, %v1466_v28  ;;  %v12451_v7 = vcombine.high %v1452_v52, %v1466_v28  ;;  %v1501_v44 = vcombine.high %v1499_v17, %v1499_v17  ;;  %v3631_v0 = vrot.slane %v3603_v5, %v12982_v12 }
  0xda   : > { %v1515_v48 = vrot.slane %v1499_v17, %v12982_v12  ;;  %v1522_v1 = vrot.slane %v1500_v36, %v12982_v12  ;;  %v18674_v55 = vmov 0.0   ;;  %v3598_v23 = vrot.slane %v3584_v50, %v12982_v12  ;;  %v14000_v50 = vpop.permute.xlu1 %7641  ;;  %v14003_v49 = vpop.permute.xlu0 %7589 }
  0xdb   : > { %12722 = vmatprep.mubr.msk.f32.mxu1 %vm12884_vm1, %v18674_v55  ;;  %v3617_v62 = vrot.slane %v3601_v31, %v12982_v12  ;;  %v3624_v29 = vrot.slane %v12451_v7, %v12982_v12  ;;  %v1529_v52 = vrot.slane %v1501_v44, %v12982_v12  ;;  %v1547_v28 = vrot.slane %v12422_v59, %v12982_v12 }
  0xdc   : > { %v1531_v37 = vcombine.high %v1515_v48, %v1515_v48  ;;  %v1532_v5 = vcombine.high %v1522_v1, %v1522_v1  ;;  %v3649_v17 = vcombine.low %v1522_v1, %v1530_v10  ;;  %v3599_v36 = vcombine.low %v3591_v6, %v3598_v23  ;;  %18675 = vst [vmem:[#allocation35_spill] sm:$0xff] %v14000_v50  ;;  %v426_v1 = vld [vmem:[%s12990_s16 + $0x110] sm:$0xff] }
  0xdd   : > { %v3632_v21 = vcombine.low %v3610_v38, %v3617_v62  ;;  %v3633_v22 = vcombine.low %v3624_v29, %v3631_v0  ;;  %v1533_v13 = vcombine.high %v1529_v52, %v1529_v52  ;;  %v1548_v61 = vcombine.high %v424_v39, %v424_v39  ;;  %18676 = vst [vmem:[#allocation36_spill] sm:$0xff] %v14003_v49  ;;  %v14018_v29 = vld.sshfl [vmem:[%s12990_s16 + $0x118] sm:$0x1 pattern:$0x75316420] }
  0xde   : > { %v3650_v31 = vcombine.low %v1532_v5, %v1515_v48  ;;  %v3651_v7 = vcombine.low %v1529_v52, %v1531_v37  ;;  %v3659_v44 = vrot.slane %v3649_v17, %v12982_v12  ;;  %12648 = vmatmul.mubr.msk.f32.gmra.mxu0 %vm4800_vm2, %v3599_v36  ;;  %v1555_v0 = vrot.slane %v424_v39, %v12982_v12  ;;  %v428_v37 = vld [vmem:[%s12990_s16 + $0x120] sm:$0xff] }
  0xdf   : > { %v3640_v6 = vrot.slane %v3632_v21, %v12982_v12  ;;  %v3647_v38 = vrot.slane %v3633_v22, %v12982_v12  ;;  %v3652_v59 = vcombine.low %v1533_v13, %v1547_v28  ;;  %12650 = vmatprep.mubr.msk.f32.mxu0 %vm12884_vm1, %v18674_v55  ;;  %v1562_v23 = vrot.slane %v1548_v61, %v12982_v12 }
  0xe0   : > { %v3666_v48 = vrot.slane %v3650_v31, %v12982_v12  ;;  %v3673_v10 = vrot.slane %v3651_v7, %v12982_v12  ;;  %v1610_v62 = vrot.slane %v13998_v60, %v12982_v12  ;;  %v1563_v22 = vcombine.high %v1555_v0, %v1555_v0  ;;  %v14029_v7 = vpop.permute.xlu1 %7645 }
  0xe1   : > { %v3648_v52 = vcombine.low %v3640_v6, %v3647_v38  ;;  %v3680_v13 = vrot.slane %v3652_v59, %v12982_v12  ;;  %v1571_v39 = vrot.slane %v1555_v0, %v12982_v12  ;;  %v1564_v28 = vcombine.high %v1562_v23, %v1562_v23  ;;  %18677 = vst [vmem:[#allocation37_spill] sm:$0xff] %v14029_v7  ;;  %v14036_v0 = vpop.permute.xlu0 %7505 }
  0xe2   : > { %v3681_v5 = vcombine.low %v3659_v44, %v3666_v48  ;;  %v1578_v17 = vrot.slane %v1562_v23, %v12982_v12  ;;  %v1611_v36 = vcombine.high %v426_v1, %v426_v1  ;;  %v1585_v21 = vrot.slane %v1563_v22, %v12982_v12  ;;  %18678 = vst [vmem:[#allocation38_spill] sm:$0xff] %v14036_v0 }
  0xe3   : > { %12651 = vmatmul.mubr.msk.f32.gmra.mxu0 %vm4800_vm2, %v3648_v52  ;;  %v3682_v61 = vcombine.low %v3673_v10, %v3680_v13  ;;  %v1618_v60 = vrot.slane %v426_v1, %v12982_v12  ;;  %v1673_v31 = vrot.slane %v14018_v29, %v12982_v12  ;;  %v1592_v6 = vrot.slane %v1564_v28, %v12982_v12 }
  0xe4   : > { %12653 = vmatprep.mubr.msk.f32.mxu0 %vm12884_vm1, %v18674_v55  ;;  %v3689_v44 = vrot.slane %v3681_v5, %v12982_v12  ;;  %v1625_v38 = vrot.slane %v1611_v36, %v12982_v12  ;;  %v1674_v59 = vcombine.high %v428_v37, %v428_v37  ;;  %v3698_v1 = vcombine.low %v1571_v39, %v1585_v21 }
  0xe5   : > { %v3696_v48 = vrot.slane %v3682_v61, %v12982_v12  ;;  %v12452_v10 = vcombine.high %v1571_v39, %v1585_v21  ;;  %v1626_v23 = vcombine.high %v1618_v60, %v1618_v60  ;;  %v14039_v29 = vpop.f32.mrf.mxu0  ;;  %v3700_v52 = vcombine.low %v1578_v17, %v1592_v6 }
  0xe6   : > { %v12453_v13 = vcombine.high %v1578_v17, %v1592_v6  ;;  %v1627_v22 = vcombine.high %v1625_v38, %v1625_v38  ;;  %v1634_v11 = vrot.slane %v1618_v60, %v12982_v12  ;;  %v14042_v5 = vpop.f32.mrf.mxu1  ;;  %v3708_v36 = vrot.slane %v3698_v1, %v12982_v12 }
  0xe7   : > { %v3697_v28 = vcombine.low %v3689_v44, %v3696_v48  ;;  %v3715_v45 = vrot.slane %v12452_v10, %v12982_v12  ;;  %v1641_v19 = vrot.slane %v1625_v38, %v12982_v12  ;;  %v12604_v61 = vpop.f32.mrf.mxu0  ;;  %v3722_v39 = vrot.slane %v3700_v52, %v12982_v12  ;;  %v14052_v10 = vpop.permute.xlu1 %7557 }
  0xe8   : > { %v3729_v21 = vrot.slane %v12453_v13, %v12982_v12  ;;  %v1648_v3 = vrot.slane %v1626_v23, %v12982_v12  ;;  %v1655_v17 = vrot.slane %v1627_v22, %v12982_v12  ;;  %v12679_v6 = vpop.f32.mrf.mxu1  ;;  %v1656_v44 = vcombine.high %v1634_v11, %v1634_v11  ;;  %18679 = vst [vmem:[#allocation39_spill] sm:$0xff] %v14052_v10  ;;  %v14057_v22 = vpop.permute.xlu0 %7513 }
  0xe9   : > { %12654 = vmatmul.mubr.msk.f32.gmra.mxu0 %vm4800_vm2, %v3697_v28  ;;  %v3730_v60 = vcombine.low %v3708_v36, %v3715_v45  ;;  %v1657_v48 = vcombine.high %v1641_v19, %v1641_v19  ;;  %v3747_v1 = vcombine.low %v1610_v62, %v1634_v11  ;;  %v1681_v23 = vrot.slane %v428_v37, %v12982_v12 }
  0xea   : > { %12656 = vmatprep.mubr.msk.f32.mxu0 %vm12884_vm1, %v18674_v55  ;;  %v3731_v38 = vcombine.low %v3722_v39, %v3729_v21  ;;  %v1658_v52 = vcombine.high %v1648_v3, %v1648_v3  ;;  %v1659_v13 = vcombine.high %v1655_v17, %v1655_v17  ;;  %18680 = vst [vmem:[#allocation40_spill] sm:$0xff] %v14057_v22  ;;  %v12870_v39 = vld.sshfl [vmem:[%s12990_s16 + $0x128] sm:$0x1 pattern:$0x75316420] }
  0xeb   : > { %v3738_v28 = vrot.slane %v3730_v60, %v12982_v12  ;;  %v3748_v45 = vcombine.low %v1648_v3, %v1656_v44  ;;  %v3750_v36 = vcombine.low %v1655_v17, %v1657_v48  ;;  %v3757_v11 = vrot.slane %v3747_v1, %v12982_v12 }
  0xec   : > { %v3745_v62 = vrot.slane %v3731_v38, %v12982_v12  ;;  %v3749_v61 = vcombine.low %v1658_v52, %v1641_v19  ;;  %v1688_v6 = vrot.slane %v1674_v59, %v12982_v12  ;;  %v1689_v27 = vcombine.high %v1681_v23, %v1681_v23  ;;  %v14076_v38 = vpop.permute.xlu1 %7593 }
  0xed   : > { %v3764_v21 = vrot.slane %v3748_v45, %v12982_v12  ;;  %v3778_v41 = vrot.slane %v3750_v36, %v12982_v12  ;;  %v1697_v37 = vrot.slane %v1681_v23, %v12982_v12  ;;  %v3796_v54 = vcombine.low %v1659_v13, %v1673_v31  ;;  %v14070_v3 = vpop.f32.mrf.mxu0  ;;  %18681 = vst [vmem:[#allocation41_spill] sm:$0xff] %v14076_v38  ;;  %v14084_v45 = vpop.permute.xlu0 %7517 }
  0xee   : > { %v3746_v17 = vcombine.low %v3738_v28, %v3745_v62  ;;  %v3771_v60 = vrot.slane %v3749_v61, %v12982_v12  ;;  %v1690_v44 = vcombine.high %v1688_v6, %v1688_v6  ;;  %v1704_v19 = vrot.slane %v1688_v6, %v12982_v12  ;;  %18682 = vst [vmem:[#allocation42_spill] sm:$0xff] %v14084_v45 }
  0xef   : > { %v3779_v59 = vcombine.low %v3757_v11, %v3764_v21  ;;  %v1711_v48 = vrot.slane %v1689_v27, %v12982_v12  ;;  %v3806_v1 = vrot.slane %v3796_v54, %v12982_v12  ;;  %v12607_v52 = vpop.f32.mrf.mxu0  ;;  %v1737_v23 = vcombine.high %v14068_v47, %v14068_v47 }
  0xf0   : > { %12657 = vmatmul.mubr.msk.f32.gmra.mxu0 %vm4800_vm2, %v3746_v17  ;;  %v3780_v31 = vcombine.low %v3771_v60, %v3778_v41  ;;  %v1718_v13 = vrot.slane %v1690_v44, %v12982_v12  ;;  %v1744_v28 = vrot.slane %v14068_v47, %v12982_v12  ;;  %v1736_v11 = vrot.slane %v12870_v39, %v12982_v12  ;;  %v14099_v14 = vpop.permute.xlu1 %7561 }
  0xf1   : > { %12659 = vmatprep.mubr.msk.f32.mxu0 %vm12884_vm1, %v18674_v55  ;;  %v3787_v27 = vrot.slane %v3779_v59, %v12982_v12  ;;  %v3797_v54 = vcombine.low %v1697_v37, %v1711_v48  ;;  %v12454_v36 = vcombine.high %v1697_v37, %v1711_v48  ;;  %v1751_v61 = vrot.slane %v1737_v23, %v12982_v12 }
  0xf2   : > { %v3794_v41 = vrot.slane %v3780_v31, %v12982_v12  ;;  %v3799_v62 = vcombine.low %v1704_v19, %v1718_v13  ;;  %v1752_v6 = vcombine.high %v1744_v28, %v1744_v28  ;;  %v1760_v60 = vrot.slane %v1744_v28, %v12982_v12  ;;  %18683 = vst [vmem:[#allocation43_spill] sm:$0xff] %v14099_v14 }
  0xf3   : > { %v3813_v21 = vrot.slane %v3797_v54, %v12982_v12  ;;  %v3820_v17 = vrot.slane %v12454_v36, %v12982_v12  ;;  %v12455_v44 = vcombine.high %v1704_v19, %v1718_v13  ;;  %v1767_v37 = vrot.slane %v1751_v61, %v12982_v12 }
  0xf4   : > { %v3795_v52 = vcombine.low %v3787_v27, %v3794_v41  ;;  %v3827_v59 = vrot.slane %v3799_v62, %v12982_v12  ;;  %v1774_v39 = vrot.slane %v1752_v6, %v12982_v12  ;;  %v1782_v31 = vcombine.high %v1760_v60, %v1760_v60  ;;  %v14108_v27 = vpop.permute.xlu0 %7597 }
  0xf5   : > { %v3828_v48 = vcombine.low %v3806_v1, %v3813_v21  ;;  %v3846_v18 = vcombine.low %v1736_v11, %v1760_v60  ;;  %v3855_v23 = vrot.slane %v12455_v44, %v12982_v12  ;;  %v14103_v13 = vsub.s32 3, %v12966_v8  ;;  %18686 = vst [vmem:[#allocation46_spill] sm:$0xff] %v14108_v27  ;;  %v12808_v21 = vld [vmem:[%s18216_s2] sm:$0xff]  ;;  %v431_v44 = vld [vmem:[%s12990_s16 + $0x138] sm:$0x1] }
  0xf6   : > { %12660 = vmatmul.mubr.msk.f32.gmra.mxu0 %vm4800_vm2, %v3795_v52  ;;  %v3829_v54 = vcombine.low %v3820_v17, %v3827_v59  ;;  %v1784_v19 = vcombine.high %v1774_v39, %v1774_v39  ;;  %v14106_v28 = vsub.s32 5, %v12966_v8  ;;  %v3847_v36 = vcombine.low %v1774_v39, %v1782_v31  ;;  %v432_v52 = vld [vmem:[%s12990_s16 + $0x140] sm:$0xff] }
  0xf7   : > { %18684 = vst [vmem:[#allocation44_spill] sm:$0xff] %v14103_v13  ;;  %12662 = vmatprep.mubr.msk.f32.mxu0 %vm12884_vm1, %v18674_v55  ;;  %v3836_v1 = vrot.slane %v3828_v48, %v12982_v12  ;;  %v3862_v11 = vrot.slane %v3846_v18, %v12982_v12  ;;  %v1753_v41 = vcombine.high %v1751_v61, %v1751_v61 }
  0xf8   : > { %18685 = vst [vmem:[#allocation45_spill] sm:$0xff] %v14106_v28  ;;  %v3843_v62 = vrot.slane %v3829_v54, %v12982_v12  ;;  %v3848_v6 = vcombine.low %v1784_v19, %v1767_v37  ;;  %v14119_v17 = vrot.slane %v12808_v21, %v14103_v13  ;;  %v14122_v60 = vrot.slane %v12808_v21, %v14106_v28  ;;  %v14126_v59 = vpop.f32.mrf.mxu1 }
  0xf9   : > { %v3869_v18 = vrot.slane %v3847_v36, %v12982_v12  ;;  %v3877_v61 = vcombine.low %v3855_v23, %v3862_v11  ;;  %v1781_v39 = vrot.slane %v1753_v41, %v12982_v12  ;;  %v1783_v48 = vcombine.high %v1767_v37, %v1767_v37  ;;  %v12809_v36 = vld [vmem:[%s12990_s16 + $0x68] sm:$0x1] }
  0xfa   : > { %18687 = vst [vmem:[#allocation47_spill] sm:$0xff] %v14119_v17  ;;  %18688 = vst [vmem:[#allocation48_spill] sm:$0xff] %v14122_v60  ;;  %v3844_v31 = vcombine.low %v3836_v1, %v3843_v62  ;;  %v3876_v54 = vrot.slane %v3848_v6, %v12982_v12  ;;  %v14133_v19 = vmul.f32 %v14119_v17, %v14068_v47  ;;  %v12682_v38 = vpop.f32.mrf.mxu1  ;;  %v12871_v41 = vld.sshfl [vmem:[%s12990_s16 + $0x148] sm:$0x1 pattern:$0x75316420]  ;;  %v14148_v62 = vpop.permute.xlu1 %7601 }
  0xfb   : > { %v14137_v21 = vmul.f32 %v14122_v60, %v14068_v47  ;;  %v14139_v34 = vpop.f32.mrf.mxu0  ;;  %v14143_v23 = vmul.f32 %v12809_v36, %v13100_v42  ;;  %v1785_v37 = vcombine.high %v1781_v39, %v1781_v39  ;;  %v1792_v1 = vrot.slane %v431_v44, %v12982_v12  ;;  %18692 = vst [vmem:[#allocation52_spill] sm:$0xff] %v14148_v62  ;;  %v434_v17 = vld [vmem:[%s12990_s16 + $0x150] sm:$0xff]  ;;  %v14154_v36 = vpop.permute.xlu0 %7525 }
  0xfc   : > { %18689 = vst [vmem:[#allocation49_spill] sm:$0xff] %v14133_v19  ;;  %v1807_v11 = vrot.slane %v432_v52, %v12982_v12  ;;  %12663 = vmatmul.mubr.msk.f32.gmra.mxu0 %vm4800_vm2, %v3844_v31  ;;  %v3878_v47 = vcombine.low %v3869_v18, %v3876_v54  ;;  %v3885_v38 = vrot.slane %v3877_v61, %v12982_v12  ;;  %18693 = vst [vmem:[#allocation53_spill] sm:$0xff] %v14154_v36  ;;  %v12872_v31 = vld.sshfl [vmem:[%s12990_s16 + $0x158] sm:$0x1 pattern:$0x75316420] }
  0xfd   : > { %18690 = vst [vmem:[#allocation50_spill] sm:$0xff] %v14137_v21  ;;  %18691 = vst [vmem:[#allocation51_spill] sm:$0xff] %v14143_v23  ;;  %v3894_v19 = vcombine.low %v1781_v39, %v1783_v48  ;;  %v12610_v23 = vpop.f32.mrf.mxu0  ;;  %12665 = vmatprep.mubr.msk.f32.mxu0 %vm12884_vm1, %v18674_v55  ;;  %v1799_v42 = vrot.slane %v1792_v1, %v12982_v12  ;;  %v1800_v14 = vcombine.high %v432_v52, %v432_v52 }
  0xfe   : > { %v1815_v56 = vcombine.high %v1807_v11, %v1807_v11  ;;  %v1823_v62 = vrot.slane %v1807_v11, %v12982_v12  ;;  %v3892_v18 = vrot.slane %v3878_v47, %v12982_v12  ;;  %v14164_v39 = vmul.f32 %v14122_v60, %v431_v44 }
  0xff   : > { %v3904_v61 = vrot.slane %v3894_v19, %v12982_v12  ;;  %v3895_v54 = vcombine.low %v1785_v37, %v1799_v42  ;;  %v1814_v23 = vrot.slane %v1800_v14, %v12982_v12  ;;  %v1870_v6 = vrot.slane %v434_v17, %v12982_v12  ;;  %v14171_v19 = vpop.permute.xlu1 %7649  ;;  %v14177_v37 = vpop.permute.xlu0 %7605 }
 0x100   : > { %18694 = vst [vmem:[#allocation54_spill] sm:$0xff] %v14164_v39  ;;  %v1837_v48 = vrot.slane %v1815_v56, %v12982_v12  ;;  %v3893_v1 = vcombine.low %v3885_v38, %v3892_v18  ;;  %v1862_v21 = vrot.slane %v12871_v41, %v12982_v12  ;;  %v1863_v11 = vcombine.high %v434_v17, %v434_v17 }
 0x101   : > { %v3911_v47 = vrot.slane %v3895_v54, %v12982_v12  ;;  %v1816_v46 = vcombine.high %v1814_v23, %v1814_v23  ;;  %18695 = vst [vmem:[#allocation55_spill] sm:$0xff] %v14171_v19  ;;  %v1830_v56 = vrot.slane %v1814_v23, %v12982_v12  ;;  %v1878_v42 = vcombine.high %v1870_v6, %v1870_v6 }
 0x102   : > { %v3896_v52 = vcombine.low %v1823_v62, %v1837_v48  ;;  %v12456_v10 = vcombine.high %v1823_v62, %v1837_v48  ;;  %12666 = vmatmul.mubr.msk.f32.gmra.mxu0 %vm4800_vm2, %v3893_v1  ;;  %v1886_v14 = vrot.slane %v1870_v6, %v12982_v12  ;;  %v1877_v44 = vrot.slane %v1863_v11, %v12982_v12 }
 0x103   : > { %18696 = vst [vmem:[#allocation56_spill] sm:$0xff] %v14177_v37  ;;  %12668 = vmatprep.mubr.msk.f32.mxu0 %vm12884_vm1, %v18674_v55  ;;  %v3926_v62 = vcombine.low %v3904_v61, %v3911_v47  ;;  %v1844_v38 = vrot.slane %v1816_v46, %v12982_v12  ;;  %v1900_v48 = vrot.slane %v1878_v42, %v12982_v12 }
 0x104   : > { %v3918_v17 = vrot.slane %v3896_v52, %v12982_v12  ;;  %v3925_v41 = vrot.slane %v12456_v10, %v12982_v12  ;;  %v14184_v18 = vpop.f32.mrf.mxu1  ;;  %v1908_v54 = vcombine.high %v1886_v14, %v1886_v14  ;;  %v3945_v6 = vcombine.low %v1862_v21, %v1886_v14  ;;  %v14194_v14 = vpop.permute.xlu1 %7653 }
 0x105   : > { %18697 = vst [vmem:[#allocation57_spill] sm:$0xff] %v14184_v18  ;;  %v1879_v23 = vcombine.high %v1877_v44, %v1877_v44  ;;  %v3934_v11 = vrot.slane %v3926_v62, %v12982_v12  ;;  %v3943_v60 = vcombine.low %v1830_v56, %v1844_v38  ;;  %v12457_v39 = vcombine.high %v1830_v56, %v1844_v38  ;;  %v14198_v62 = vpop.permute.xlu0 %7521 }
 0x106   : > { %v3927_v1 = vcombine.low %v3918_v17, %v3925_v41  ;;  %v12685_v24 = vpop.f32.mrf.mxu1  ;;  %v3946_v33 = vcombine.low %v1900_v48, %v1908_v54  ;;  %v3967_v52 = vrot.slane %v3945_v6, %v12982_v12  ;;  %v1893_v10 = vrot.slane %v1877_v44, %v12982_v12  ;;  %18698 = vst [vmem:[#allocation58_spill] sm:$0xff] %v14194_v14 }
 0x107   : > { %v1907_v46 = vrot.slane %v1879_v23, %v12982_v12  ;;  %v3953_v47 = vrot.slane %v3943_v60, %v12982_v12  ;;  %v3960_v21 = vrot.slane %v12457_v39, %v12982_v12  ;;  %v1910_v42 = vcombine.high %v1900_v48, %v1900_v48  ;;  %18699 = vst [vmem:[#allocation59_spill] sm:$0xff] %v14198_v62 }
 0x108   : > { %v3941_v61 = vrot.slane %v3927_v1, %v12982_v12  ;;  %v3974_v17 = vrot.slane %v3946_v33, %v12982_v12  ;;  %v1909_v56 = vcombine.high %v1893_v10, %v1893_v10  ;;  %v1925_v41 = vrot.slane %v12872_v31, %v12982_v12 }
 0x109   : > { %v1911_v24 = vcombine.high %v1907_v46, %v1907_v46  ;;  %v3975_v38 = vcombine.low %v3953_v47, %v3960_v21  ;;  %v3992_v54 = vcombine.low %v1910_v42, %v1893_v10  ;;  %v3995_v6 = vcombine.low %v13027_v35, %v13038_v43 }
 0x10a   : > { %v3942_v44 = vcombine.low %v3934_v11, %v3941_v61  ;;  %v3976_v60 = vcombine.low %v3967_v52, %v3974_v17  ;;  %v3993_v23 = vcombine.low %v1907_v46, %v1909_v56  ;;  %v14227_v56 = vpop.permute.xlu1 %7565  ;;  %v7694_v42 = vrot.slane %v13744_v63, %v14106_v28 }
 0x10b   : > { %v3994_v39 = vcombine.low %v1911_v24, %v1925_v41  ;;  %v14204_v1 = vpop.f32.mrf.mxu0  ;;  %v3983_v33 = vrot.slane %v3975_v38, %v12982_v12  ;;  %v4002_v31 = vrot.slane %v3992_v54, %v12982_v12  ;;  %v4023_v11 = vrot.slane %v3995_v6, %v12982_v12  ;;  %18701 = vst [vmem:[#allocation61_spill] sm:$0xff] %v14227_v56  ;;  %v14232_v24 = vld [vmem:[%s18219_s5] ss:$0 sm:$0xff]  ;;  %v14236_v6 = vpop.permute.xlu0 %7529 }
 0x10c   : > { %18700 = vst [vmem:[#allocation60_spill] sm:$0xff] %v14204_v1  ;;  %12669 = vmatmul.mubr.msk.f32.gmra.mxu0 %vm4800_vm2, %v3942_v44  ;;  %v3990_v35 = vrot.slane %v3976_v60, %v12982_v12  ;;  %v4009_v43 = vrot.slane %v3993_v23, %v12982_v12  ;;  %18702 = vst [vmem:[#allocation62_spill] sm:$0xff] %v14236_v6 }
 0x10d   : > { %12671 = vmatprep.mubr.msk.f32.mxu0 %vm12884_vm1, %v18674_v55  ;;  %v4016_v52 = vrot.slane %v3994_v39, %v12982_v12  ;;  %v12613_v61 = vpop.f32.mrf.mxu0 }
 0x10e   : > { %v3991_v41 = vcombine.low %v3983_v33, %v3990_v35  ;;  %v4024_v44 = vcombine.low %v4002_v31, %v4009_v43  ;;  %v4954_v35 = vadd.f32 %v14232_v24, %v14039_v29  ;;  %v7674_v43 = vrot.slane %v13744_v63, %v13754_v58  ;;  %v14275_v21 = vpop.permute.xlu1 %7609 }
 0x10f   : > { %v4025_v38 = vcombine.low %v4016_v52, %v4023_v11  ;;  %v14252_v11 = vld [vmem:[%s18220_s6] sm:$0xff]  ;;  %v7678_v52 = vrot.slane %v13744_v63, %v13194_v20  ;;  %18705 = vst [vmem:[#allocation65_spill] sm:$0xff] %v14275_v21  ;;  %v14278_v61 = vsub.s32 7, %v12966_v8 }
 0x110   : > { %12672 = vmatmul.mubr.msk.f32.gmra.mxu0 %vm4800_vm2, %v3991_v41  ;;  %v4032_v33 = vrot.slane %v4024_v44, %v12982_v12  ;;  %v7682_v41 = vrot.slane %v13744_v63, %v13086_v30  ;;  %v7686_v44 = vrot.slane %v13744_v63, %v14103_v13  ;;  %v5156_v60 = vmax.f32 %v4954_v35, 0.0 }
 0x111   : > { %v4039_v31 = vrot.slane %v4025_v38, %v12982_v12  ;;  %12674 = vmatprep.mubr.msk.f32.mxu0 %vm12884_vm1, %v18674_v55  ;;  %v7690_v38 = vrot.slane %v13744_v63, %v13126_v25  ;;  %v14273_v55 = vsub.s32 6, %v12966_v8  ;;  %18706 = vst [vmem:[#allocation66_spill] sm:$0xff] %v14278_v61  ;;  %v9428_v39 = vrot.slane %v14252_v11, %v13754_v58 }
 0x112   : > { %v14268_v23 = vpop.f32.mrf.mxu1  ;;  %v9905_v54 = vrot.slane %v14252_v11, %v13086_v30  ;;  %v5236_v35 = vcombine.high %v5156_v60, %v5156_v60  ;;  %v5243_v17 = vrot.slane %v5156_v60, %v12982_v12  ;;  %v7702_v46 = vrot.slane %v13744_v63, %v14278_v61 }
 0x113   : > { %18703 = vst [vmem:[#allocation63_spill] sm:$0xff] %v14268_v23  ;;  %v4040_v29 = vcombine.low %v4032_v33, %v4039_v31  ;;  %18704 = vst [vmem:[#allocation64_spill] sm:$0xff] %v14273_v55  ;;  %v5079_v33 = vadd.f32 %v14232_v24, %v14042_v5  ;;  %v7698_v47 = vrot.slane %v13744_v63, %v14273_v55 }
 0x114   : > { %v12688_v31 = vpop.f32.mrf.mxu1  ;;  %v9430_v10 = vcombine.high %v9428_v39, %v9428_v39  ;;  %v9437_v48 = vrot.slane %v9428_v39, %v12982_v12  ;;  %v9907_v37 = vcombine.high %v9905_v54, %v9905_v54  ;;  %v5250_v5 = vrot.slane %v5236_v35, %v12982_v12 }
 0x115   : > { %12675 = vmatmul.mubr.msk.f32.gmra.mxu0 %vm4800_vm2, %v4040_v29  ;;  %v5251_v31 = vcombine.high %v5243_v17, %v5243_v17  ;;  %v5259_v29 = vrot.slane %v5243_v17, %v12982_v12  ;;  %v9914_v60 = vrot.slane %v9905_v54, %v12982_v12 }
 0x116   : > { %v9444_v49 = vrot.slane %v9430_v10, %v12982_v12  ;;  %v9445_v9 = vcombine.high %v9437_v48, %v9437_v48  ;;  %v14302_v8 = vrot.slane %v9437_v48, %v12982_v12  ;;  %v9921_v63 = vrot.slane %v9907_v37, %v12982_v12 }
 0x117   : > { %v14298_v27 = vpop.f32.mrf.mxu0  ;;  %v5252_v56 = vcombine.high %v5250_v5, %v5250_v5  ;;  %v5266_v39 = vrot.slane %v5250_v5, %v12982_v12  ;;  %v5273_v35 = vrot.slane %v5251_v31, %v12982_v12  ;;  %v5281_v53 = vcombine.high %v5259_v29, %v5259_v29 }
 0x118   : > { %18707 = vst [vmem:[#allocation67_spill] sm:$0xff] %v14298_v27  ;;  %18708 = vst [vmem:[#allocation68_spill] sm:$0xff] %v14302_v8  ;;  %v9116_v17 = vmul.f32 %v7674_v43, %v5259_v29  ;;  %v9446_v6 = vcombine.high %v9444_v49, %v9444_v49  ;;  %v14308_v54 = vrot.slane %v9444_v49, %v12982_v12 }
 0x119   : > { %v12616_v14 = vpop.f32.mrf.mxu0  ;;  %v14311_v10 = vrot.slane %v9445_v9, %v12982_v12  ;;  %v5280_v48 = vrot.slane %v5252_v56, %v12982_v12  ;;  %v5282_v62 = vcombine.high %v5266_v39, %v5266_v39  ;;  %v5283_v19 = vcombine.high %v5273_v35, %v5273_v35  ;;  %v14321_v9 = vpop.permute.xlu1 %7569 }
 0x11a   : > { %18709 = vst [vmem:[#allocation69_spill] sm:$0xff] %v14308_v54  ;;  %v9117_v37 = vmul.f32 %v7678_v52, %v5273_v35  ;;  %v9118_v36 = vmul.f32 %v7682_v41, %v5281_v53  ;;  %v9120_v22 = vmul.f32 %v7690_v38, %v5266_v39  ;;  %v14315_v5 = vrot.slane %v9446_v6, %v12982_v12 }
 0x11b   : > { %18710 = vst [vmem:[#allocation70_spill] sm:$0xff] %v14311_v10  ;;  %v14319_v14 = vcombine.high %v14302_v8, %v14302_v8  ;;  %v5284_v43 = vcombine.high %v5280_v48, %v5280_v48  ;;  %v9119_v49 = vmul.f32 %v7686_v44, %v5283_v19  ;;  %v9121_v31 = vmul.f32 %v7694_v42, %v5280_v48 }
 0x11c   : > { %18711 = vst [vmem:[#allocation71_spill] sm:$0xff] %v14315_v5  ;;  %v9122_v29 = vmul.f32 %v7698_v47, %v5282_v62  ;;  %18713 = vst [vmem:[#allocation73_spill] sm:$0xff] %v14321_v9  ;;  %v14325_v56 = vcombine.high %v14308_v54, %v14308_v54  ;;  %v14329_v53 = vcombine.high %v14311_v10, %v14311_v10 }
 0x11d   : > { %18712 = vst [vmem:[#allocation72_spill] sm:$0xff] %v14319_v14  ;;  %v14332_v6 = vmul.f32 %v14302_v8, %v9116_v17  ;;  %v14335_v52 = vmul.f32 %v14311_v10, %v9117_v37  ;;  %v14337_v41 = vpop.f32.mrf.mxu1  ;;  %v14339_v19 = vmul.f32 %v7702_v46, %v5284_v43  ;;  %v14342_v62 = vmul.f32 %v14319_v14, %v9118_v36 }
 0x11e   : > { %18714 = vst [vmem:[#allocation74_spill] sm:$0xff] %v14325_v56  ;;  %18715 = vst [vmem:[#allocation75_spill] sm:$0xff] %v14329_v53  ;;  %v14345_v47 = vmul.f32 %v14308_v54, %v9120_v22  ;;  %v14348_v42 = vmul.f32 %v14315_v5, %v9121_v31  ;;  %v14351_v44 = vmul.f32 %v14329_v53, %v9119_v49  ;;  %v5181_v43 = vmax.f32 %v5079_v33, 0.0 }
 0x11f   : > { %18716 = vst [vmem:[#allocation76_spill] sm:$0xff] %v14332_v6  ;;  %18717 = vst [vmem:[#allocation77_spill] sm:$0xff] %v14335_v52  ;;  %v14354_v38 = vmul.f32 %v14325_v56, %v9122_v29  ;;  %v9922_v39 = vcombine.high %v9914_v60, %v9914_v60  ;;  %v9923_v35 = vcombine.high %v9921_v63, %v9921_v63  ;;  %v12691_v17 = vpop.f32.mrf.mxu1  ;;  %v14384_v56 = vpop.permute.xlu1 %7617 }
 0x120   : > { %18718 = vst [vmem:[#allocation78_spill] sm:$0xff] %v14337_v41  ;;  %18719 = vst [vmem:[#allocation79_spill] sm:$0xff] %v14339_v19  ;;  %v14357_v46 = vrot.slane %v9914_v60, %v12982_v12  ;;  %v14360_v48 = vrot.slane %v9921_v63, %v12982_v12  ;;  %v8442_v9 = vrot.slane %v14275_v21, %v14103_v13 }
 0x121   : > { %18720 = vst [vmem:[#allocation80_spill] sm:$0xff] %v14342_v62  ;;  %18721 = vst [vmem:[#allocation81_spill] sm:$0xff] %v14345_v47  ;;  %v14365_v54 = vrot.slane %v9922_v39, %v12982_v12  ;;  %v14368_v19 = vrot.slane %v9923_v35, %v12982_v12  ;;  %v8450_v60 = vrot.slane %v14275_v21, %v14106_v28 }
 0x122   : > { %18722 = vst [vmem:[#allocation82_spill] sm:$0xff] %v14348_v42  ;;  %18723 = vst [vmem:[#allocation83_spill] sm:$0xff] %v14351_v44  ;;  %v14376_v63 = vcombine.high %v14357_v46, %v14357_v46  ;;  %v14379_v33 = vmul.f32 %v14357_v46, %v9117_v37  ;;  %v14382_v17 = vmul.f32 %v14360_v48, %v9121_v31 }
 0x123   : > { %18724 = vst [vmem:[#allocation84_spill] sm:$0xff] %v14354_v38  ;;  %18725 = vst [vmem:[#allocation85_spill] sm:$0xff] %v14357_v46  ;;  %v8446_v38 = vrot.slane %v14275_v21, %v13126_v25  ;;  %v6457_v39 = vcombine.high %v5181_v43, %v5181_v43  ;;  %v14388_v35 = vcombine.high %v14365_v54, %v14365_v54 }
 0x124   : > { %18726 = vst [vmem:[#allocation86_spill] sm:$0xff] %v14360_v48  ;;  %18727 = vst [vmem:[#allocation87_spill] sm:$0xff] %v14365_v54  ;;  %v14391_v53 = vmul.f32 %v14365_v54, %v9118_v36  ;;  %v14394_v14 = vmul.f32 %v14368_v19, %v9122_v29  ;;  %v6464_v10 = vrot.slane %v5181_v43, %v12982_v12  ;;  %v14397_v37 = vpop.f32.mrf.mxu0 }
 0x125   : > { %18728 = vst [vmem:[#allocation88_spill] sm:$0xff] %v14368_v19  ;;  %18729 = vst [vmem:[#allocation89_spill] sm:$0xff] %v14376_v63  ;;  %v14400_v31 = vmul.f32 %v14376_v63, %v9119_v49  ;;  %v8466_v48 = vrot.slane %v14384_v56, %v13754_v58  ;;  %v14408_v36 = vmul.f32 %v14388_v35, %v9120_v22 }
 0x126   : > { %18730 = vst [vmem:[#allocation90_spill] sm:$0xff] %v14379_v33  ;;  %18731 = vst [vmem:[#allocation91_spill] sm:$0xff] %v14382_v17  ;;  %v6471_v17 = vrot.slane %v6457_v39, %v12982_v12  ;;  %v8458_v33 = vrot.slane %v14275_v21, %v14278_v61  ;;  %v6472_v29 = vcombine.high %v6464_v10, %v6464_v10  ;;  %v12619_v54 = vpop.f32.mrf.mxu0 }
 0x127   : > { %18732 = vst [vmem:[#allocation92_spill] sm:$0xff] %v14388_v35  ;;  %18733 = vst [vmem:[#allocation93_spill] sm:$0xff] %v14391_v53  ;;  %v10115_v43 = vrot.slane %v14252_v11, %v14103_v13  ;;  %v10591_v39 = vrot.slane %v14252_v11, %v14106_v28  ;;  %v8454_v63 = vrot.slane %v14275_v21, %v14273_v55 }
 0x128   : > { %18734 = vst [vmem:[#allocation94_spill] sm:$0xff] %v14394_v14  ;;  %18735 = vst [vmem:[#allocation95_spill] sm:$0xff] %v14397_v37  ;;  %v6480_v14 = vrot.slane %v6464_v10, %v12982_v12  ;;  %v6473_v49 = vcombine.high %v6471_v17, %v6471_v17  ;;  %v6494_v46 = vrot.slane %v6472_v29, %v12982_v12 }
 0x129   : > { %18736 = vst [vmem:[#allocation96_spill] sm:$0xff] %v14400_v31  ;;  %18737 = vst [vmem:[#allocation97_spill] sm:$0xff] %v14408_v36  ;;  %v6487_v31 = vrot.slane %v6471_v17, %v12982_v12  ;;  %v18738_v35 = vrot.slane %v14275_v21, %v13086_v30  ;;  %v10117_v5 = vcombine.high %v10115_v43, %v10115_v43 }
 0x12a   : > { %v6502_v22 = vcombine.high %v6480_v14, %v6480_v14  ;;  %v6501_v36 = vrot.slane %v6473_v49, %v12982_v12  ;;  %v10124_v54 = vrot.slane %v10115_v43, %v12982_v12  ;;  %v10593_v53 = vcombine.high %v10591_v39, %v10591_v39 }
 0x12b   : > { %v9307_v10 = vmul.f32 %v18738_v35, %v6480_v14  ;;  %v10600_v42 = vrot.slane %v10591_v39, %v12982_v12  ;;  %v6504_v44 = vcombine.high %v6494_v46, %v6494_v46  ;;  %v9308_v17 = vmul.f32 %v8442_v9, %v6494_v46  ;;  %v14429_v14 = vpop.f32.mrf.mxu1 }
 0x12c   : > { %v9309_v47 = vmul.f32 %v8446_v38, %v6502_v22  ;;  %v10131_v62 = vrot.slane %v10117_v5, %v12982_v12  ;;  %v6505_v52 = vcombine.high %v6501_v36, %v6501_v36  ;;  %v9312_v29 = vmul.f32 %v8458_v33, %v6501_v36  ;;  %18740 = vst [vmem:[#allocation99_spill] sm:$0xff] %v14429_v14 }
 0x12d   : > { %v10132_v6 = vcombine.high %v10124_v54, %v10124_v54  ;;  %v14427_v7 = vrot.slane %v10124_v54, %v12982_v12  ;;  %v9310_v35 = vmul.f32 %v8450_v60, %v6504_v44  ;;  %v10607_v39 = vrot.slane %v10593_v53, %v12982_v12  ;;  %v12694_v46 = vpop.f32.mrf.mxu1 }
 0x12e   : > { %v10133_v49 = vcombine.high %v10131_v62, %v10131_v62  ;;  %v14432_v43 = vrot.slane %v10131_v62, %v12982_v12  ;;  %v9314_v21 = vmul.f32 %v8466_v48, %v6505_v52  ;;  %v10608_v38 = vcombine.high %v10600_v42, %v10600_v42 }
 0x12f   : > { %18739 = vst [vmem:[#allocation98_spill] sm:$0xff] %v14427_v7  ;;  %v14436_v9 = vrot.slane %v10132_v6, %v12982_v12  ;;  %v14440_v5 = vcombine.high %v14427_v7, %v14427_v7  ;;  %v14449_v62 = vrot.slane %v10600_v42, %v12982_v12  ;;  %v14452_v53 = vrot.slane %v10607_v39, %v12982_v12 }
 0x130   : > { %18741 = vst [vmem:[#allocation100_spill] sm:$0xff] %v14432_v43  ;;  %v14443_v33 = vrot.slane %v10133_v49, %v12982_v12  ;;  %v14446_v44 = vmul.f32 %v14432_v43, %v9309_v47  ;;  %v14462_v48 = vmul.f32 %v14427_v7, %v9314_v21  ;;  %v14465_v60 = vrot.slane %v10608_v38, %v12982_v12 }
 0x131   : > { %18742 = vst [vmem:[#allocation101_spill] sm:$0xff] %v14436_v9  ;;  %18743 = vst [vmem:[#allocation102_spill] sm:$0xff] %v14440_v5  ;;  %v14456_v6 = vcombine.high %v14436_v9, %v14436_v9  ;;  %v14459_v52 = vmul.f32 %v14440_v5, %v9307_v10  ;;  %v14476_v22 = vcombine.high %v14449_v62, %v14449_v62  ;;  %v14495_v7 = vpop.f32.mrf.mxu0 }
 0x132   : > { %18744 = vst [vmem:[#allocation103_spill] sm:$0xff] %v14443_v33  ;;  %18745 = vst [vmem:[#allocation104_spill] sm:$0xff] %v14446_v44  ;;  %v14469_v42 = vcombine.high %v14443_v33, %v14443_v33  ;;  %v14472_v36 = vmul.f32 %v14443_v33, %v9310_v35  ;;  %v14480_v54 = vcombine.high %v14452_v53, %v14452_v53  ;;  %v7614_v44 = vpop.permute.xlu0 %7613 }
 0x133   : > { %18746 = vst [vmem:[#allocation105_spill] sm:$0xff] %v14449_v62  ;;  %18747 = vst [vmem:[#allocation106_spill] sm:$0xff] %v14452_v53  ;;  %v14483_v21 = vmul.f32 %v14456_v6, %v9308_v17  ;;  %v14487_v49 = vcombine.high %v14465_v60, %v14465_v60  ;;  %v14490_v38 = vmul.f32 %v14465_v60, %v9307_v10 }
 0x134   : > { %18748 = vst [vmem:[#allocation107_spill] sm:$0xff] %v14456_v6  ;;  %18749 = vst [vmem:[#allocation108_spill] sm:$0xff] %v14459_v52  ;;  %v14493_v46 = vmul.f32 %v14452_v53, %v9310_v35  ;;  %v14498_v52 = vmul.f32 %v14469_v42, %v9312_v29  ;;  %v8462_v10 = vrot.slane %v7614_v44, %v13754_v58 }
 0x135   : > { %18750 = vst [vmem:[#allocation109_spill] sm:$0xff] %v14462_v48  ;;  %18751 = vst [vmem:[#allocation110_spill] sm:$0xff] %v14465_v60  ;;  %v14501_v48 = vmul.f32 %v14476_v22, %v9308_v17  ;;  %v14507_v45 = vmul.f32 %v14487_v49, %v9309_v47  ;;  %v9311_v35 = vmul.f32 %v8454_v63, %v6487_v31  ;;  %v12515_v17 = vld [vmem:[%s18220_s6 + $0x8] ss:$0 sm:$0xff] }
 0x136   : > { %18752 = vst [vmem:[#allocation111_spill] sm:$0xff] %v14469_v42  ;;  %18753 = vst [vmem:[#allocation112_spill] sm:$0xff] %v14472_v36  ;;  %v14504_v36 = vmul.f32 %v14480_v54, %v9312_v29  ;;  %v4959_v29 = vadd.f32 %v14232_v24, %v14070_v3  ;;  %v7710_v47 = vrot.slane %v13852_v51, %v13754_v58 }
 0x137   : > { %18754 = vst [vmem:[#allocation113_spill] sm:$0xff] %v14476_v22  ;;  %18755 = vst [vmem:[#allocation114_spill] sm:$0xff] %v14480_v54  ;;  %v7714_v44 = vrot.slane %v13852_v51, %v13194_v20  ;;  %v11286_v40 = vrot.slane %v12515_v17, %v12982_v12 }
 0x138   : > { %18756 = vst [vmem:[#allocation115_spill] sm:$0xff] %v14483_v21  ;;  %18757 = vst [vmem:[#allocation116_spill] sm:$0xff] %v14487_v49  ;;  %v6503_v21 = vcombine.high %v6487_v31, %v6487_v31  ;;  %v5157_v3 = vmax.f32 %v4959_v29, 0.0 }
 0x139   : > { %18758 = vst [vmem:[#allocation117_spill] sm:$0xff] %v14490_v38  ;;  %18759 = vst [vmem:[#allocation118_spill] sm:$0xff] %v14493_v46  ;;  %v14512_v38 = vcombine.high %v14432_v43, %v14432_v43  ;;  %v12622_v46 = vpop.f32.mrf.mxu0 }
 0x13a   : > { %18760 = vst [vmem:[#allocation119_spill] sm:$0xff] %v14495_v7  ;;  %18761 = vst [vmem:[#allocation120_spill] sm:$0xff] %v14498_v52  ;;  %v10609_v52 = vcombine.high %v10607_v39, %v10607_v39  ;;  %v9313_v63 = vmul.f32 %v8462_v10, %v6503_v21  ;;  %v7718_v39 = vrot.slane %v13852_v51, %v13086_v30 }
 0x13b   : > { %18762 = vst [vmem:[#allocation121_spill] sm:$0xff] %v14501_v48  ;;  %18763 = vst [vmem:[#allocation122_spill] sm:$0xff] %v14504_v36  ;;  %v14524_v31 = vmul.f32 %v14512_v38, %v9311_v35  ;;  %v7722_v46 = vrot.slane %v13852_v51, %v14103_v13  ;;  %v7726_v48 = vrot.slane %v13852_v51, %v13126_v25 }
 0x13c   : > { %18764 = vst [vmem:[#allocation123_spill] sm:$0xff] %v14507_v45  ;;  %18765 = vst [vmem:[#allocation124_spill] sm:$0xff] %v14512_v38  ;;  %v14531_v36 = vrot.slane %v10609_v52, %v12982_v12  ;;  %v7730_v45 = vrot.slane %v13852_v51, %v14106_v28  ;;  %v7734_v21 = vrot.slane %v13852_v51, %v14273_v55  ;;  %v14545_v52 = vpop.f32.mrf.mxu1 }
 0x13d   : > { %18766 = vst [vmem:[#allocation125_spill] sm:$0xff] %v14524_v31  ;;  %v14541_v10 = vcombine.high %v14368_v19, %v14368_v19  ;;  %v10801_v31 = vrot.slane %v14252_v11, %v14273_v55  ;;  %v11279_v7 = vcombine.high %v12515_v17, %v12515_v17  ;;  %18768 = vst [vmem:[#allocation127_spill] sm:$0xff] %v14545_v52 }
 0x13e   : > { %18767 = vst [vmem:[#allocation126_spill] sm:$0xff] %v14531_v36  ;;  %v14549_v29 = vcombine.high %v14531_v36, %v14531_v36  ;;  %v14552_v0 = vmul.f32 %v14531_v36, %v9311_v35  ;;  %v5285_v50 = vcombine.high %v5157_v3, %v5157_v3  ;;  %v5292_v14 = vrot.slane %v5157_v3, %v12982_v12  ;;  %v12697_v37 = vpop.f32.mrf.mxu1 }
 0x13f   : > { %v10803_v57 = vcombine.high %v10801_v31, %v10801_v31  ;;  %v10810_v19 = vrot.slane %v10801_v31, %v12982_v12  ;;  %v11293_v11 = vrot.slane %v11279_v7, %v12982_v12  ;;  %v11294_v31 = vcombine.high %v11286_v40, %v11286_v40 }
 0x140   : > { %18769 = vst [vmem:[#allocation128_spill] sm:$0xff] %v14549_v29  ;;  %18770 = vst [vmem:[#allocation129_spill] sm:$0xff] %v14552_v0  ;;  %v14559_v52 = vmul.f32 %v14549_v29, %v9313_v63  ;;  %v5299_v41 = vrot.slane %v5285_v50, %v12982_v12  ;;  %v5300_v32 = vcombine.high %v5292_v14, %v5292_v14 }
 0x141   : > { %v5308_v35 = vrot.slane %v5292_v14, %v12982_v12  ;;  %v14564_v0 = vrot.slane %v10803_v57, %v12982_v12  ;;  %v10818_v3 = vcombine.high %v10810_v19, %v10810_v19  ;;  %v14567_v27 = vrot.slane %v10810_v19, %v12982_v12 }
 0x142   : > { %18771 = vst [vmem:[#allocation130_spill] sm:$0xff] %v14559_v52  ;;  %v5301_v17 = vcombine.high %v5299_v41, %v5299_v41  ;;  %v5315_v7 = vrot.slane %v5299_v41, %v12982_v12  ;;  %v5322_v37 = vrot.slane %v5300_v32, %v12982_v12  ;;  %v14571_v52 = vpop.f32.mrf.mxu0  ;;  %v18774_v50 = vrot.slane %v13801_v26, %v13754_v58 }
 0x143   : > { %18772 = vst [vmem:[#allocation131_spill] sm:$0xff] %v14567_v27  ;;  %v5330_v63 = vcombine.high %v5308_v35, %v5308_v35  ;;  %18773 = vst [vmem:[#allocation132_spill] sm:$0xff] %v14571_v52  ;;  %v14580_v19 = vrot.slane %v14564_v0, %v12982_v12  ;;  %v14583_v16 = vrot.slane %v10818_v3, %v12982_v12 }
 0x144   : > { %v9124_v14 = vmul.f32 %v18774_v50, %v5308_v35  ;;  %v5329_v41 = vrot.slane %v5301_v17, %v12982_v12  ;;  %v5331_v32 = vcombine.high %v5315_v7, %v5315_v7  ;;  %v5332_v23 = vcombine.high %v5322_v37, %v5322_v37  ;;  %v12625_v52 = vpop.f32.mrf.mxu0 }
 0x145   : > { %18775 = vst [vmem:[#allocation133_spill] sm:$0xff] %v14580_v19  ;;  %18776 = vst [vmem:[#allocation134_spill] sm:$0xff] %v14583_v16  ;;  %v9125_v2 = vmul.f32 %v7710_v47, %v5322_v37  ;;  %v14586_v1 = vmul.f32 %v7714_v44, %v5330_v63  ;;  %v14588_v26 = vmul.f32 %v7722_v46, %v5315_v7 }
 0x146   : > { %v14591_v35 = vmul.f32 %v14541_v10, %v9124_v14  ;;  %v14595_v50 = vcombine.high %v14583_v16, %v14583_v16  ;;  %v5333_v57 = vcombine.high %v5329_v41, %v5329_v41  ;;  %v14597_v3 = vmul.f32 %v7718_v39, %v5332_v23  ;;  %v14649_v14 = vpop.f32.mrf.mxu1 }
 0x147   : > { %18777 = vst [vmem:[#allocation135_spill] sm:$0xff] %v14586_v1  ;;  %18778 = vst [vmem:[#allocation136_spill] sm:$0xff] %v14588_v26  ;;  %v14599_v18 = vmul.f32 %v7726_v48, %v5329_v41  ;;  %v14601_v17 = vmul.f32 %v7730_v45, %v5331_v32  ;;  %v14604_v47 = vmul.f32 %v14302_v8, %v9125_v2 }
 0x148   : > { %18779 = vst [vmem:[#allocation137_spill] sm:$0xff] %v14591_v35  ;;  %18780 = vst [vmem:[#allocation138_spill] sm:$0xff] %v14595_v50  ;;  %v14607_v44 = vmul.f32 %v14567_v27, %v9125_v2  ;;  %v14611_v46 = vmul.f32 %v14595_v50, %v14588_v26  ;;  %v11295_v52 = vcombine.high %v11293_v11, %v11293_v11 }
 0x149   : > { %18781 = vst [vmem:[#allocation139_spill] sm:$0xff] %v14597_v3  ;;  %18782 = vst [vmem:[#allocation140_spill] sm:$0xff] %v14599_v18  ;;  %v14613_v7 = vmul.f32 %v7734_v21, %v5333_v57  ;;  %v14617_v23 = vmul.f32 %v14580_v19, %v14599_v18  ;;  %v14620_v45 = vrot.slane %v11286_v40, %v12982_v12 }
 0x14a   : > { %18783 = vst [vmem:[#allocation141_spill] sm:$0xff] %v14601_v17  ;;  %18784 = vst [vmem:[#allocation142_spill] sm:$0xff] %v14604_v47  ;;  %v14623_v48 = vrot.slane %v11293_v11, %v12982_v12  ;;  %v14626_v2 = vrot.slane %v11294_v31, %v12982_v12  ;;  %v14629_v39 = vrot.slane %v11295_v52, %v12982_v12 }
 0x14b   : > { %18785 = vst [vmem:[#allocation143_spill] sm:$0xff] %v14607_v44  ;;  %18786 = vst [vmem:[#allocation144_spill] sm:$0xff] %v14611_v46  ;;  %v5084_v21 = vadd.f32 %v14232_v24, %v14126_v59  ;;  %v8470_v37 = vrot.slane %v14384_v56, %v13194_v20  ;;  %v14637_v63 = vcombine.high %v14620_v45, %v14620_v45  ;;  %v7622_v44 = vpop.permute.xlu0 %7621 }
 0x14c   : > { %18787 = vst [vmem:[#allocation145_spill] sm:$0xff] %v14613_v7  ;;  %18788 = vst [vmem:[#allocation146_spill] sm:$0xff] %v14617_v23  ;;  %v14641_v40 = vmul.f32 %v14620_v45, %v14586_v1  ;;  %v14645_v11 = vmul.f32 %v14623_v48, %v14601_v17  ;;  %v8474_v31 = vrot.slane %v14384_v56, %v13086_v30  ;;  %v12700_v23 = vpop.f32.mrf.mxu1 }
 0x14d   : > { %18789 = vst [vmem:[#allocation147_spill] sm:$0xff] %v14620_v45  ;;  %18790 = vst [vmem:[#allocation148_spill] sm:$0xff] %v14623_v48  ;;  %v14653_v59 = vcombine.high %v14626_v2, %v14626_v2  ;;  %v14657_v57 = vmul.f32 %v14626_v2, %v14597_v3  ;;  %v5182_v41 = vmax.f32 %v5084_v21, 0.0  ;;  %v8478_v32 = vrot.slane %v14384_v56, %v14103_v13 }
 0x14e   : > { %18791 = vst [vmem:[#allocation149_spill] sm:$0xff] %v14626_v2  ;;  %18792 = vst [vmem:[#allocation150_spill] sm:$0xff] %v14629_v39  ;;  %v14663_v52 = vmul.f32 %v14637_v63, %v14588_v26  ;;  %v8494_v17 = vrot.slane %v14384_v56, %v14278_v61  ;;  %v8498_v7 = vrot.slane %v7622_v44, %v13754_v58 }
 0x14f   : > { %18793 = vst [vmem:[#allocation151_spill] sm:$0xff] %v14637_v63  ;;  %18794 = vst [vmem:[#allocation152_spill] sm:$0xff] %v14641_v40  ;;  %v8486_v40 = vrot.slane %v14384_v56, %v14106_v28  ;;  %v14673_v21 = vmul.f32 %v14653_v59, %v14599_v18  ;;  %v6513_v46 = vrot.slane %v5182_v41, %v12982_v12 }
 0x150   : > { %18795 = vst [vmem:[#allocation153_spill] sm:$0xff] %v14645_v11  ;;  %18796 = vst [vmem:[#allocation154_spill] sm:$0xff] %v14649_v14  ;;  %v8482_v11 = vrot.slane %v14384_v56, %v13126_v25  ;;  %v4964_v35 = vadd.f32 %v14232_v24, %v14139_v34  ;;  %v7738_v47 = vrot.slane %v13852_v51, %v14278_v61 }
 0x151   : > { %18797 = vst [vmem:[#allocation155_spill] sm:$0xff] %v14653_v59  ;;  %18798 = vst [vmem:[#allocation156_spill] sm:$0xff] %v14657_v57  ;;  %v6506_v57 = vcombine.high %v5182_v41, %v5182_v41  ;;  %v6521_v18 = vcombine.high %v6513_v46, %v6513_v46  ;;  %v6529_v41 = vrot.slane %v6513_v46, %v12982_v12 }
 0x152   : > { %18799 = vst [vmem:[#allocation157_spill] sm:$0xff] %v14663_v52  ;;  %18800 = vst [vmem:[#allocation158_spill] sm:$0xff] %v14673_v21  ;;  %v8490_v52 = vrot.slane %v14384_v56, %v14273_v55  ;;  %v14689_v56 = vpop.f32.mrf.mxu0  ;;  %v5158_v44 = vmax.f32 %v4964_v35, 0.0  ;;  %v7766_v34 = vrot.slane %v13817_v15, %v14106_v28 }
 0x153   : > { %v6520_v21 = vrot.slane %v6506_v57, %v12982_v12  ;;  %18801 = vst [vmem:[#allocation159_spill] sm:$0xff] %v14689_v56  ;;  %v6543_v46 = vrot.slane %v6521_v18, %v12982_v12  ;;  %v6551_v1 = vcombine.high %v6529_v41, %v6529_v41  ;;  %v9315_v26 = vmul.f32 %v8470_v37, %v6529_v41  ;;  %v14709_v37 = vpop.permute.xlu1 %7657 }
 0x154   : > { %v12628_v14 = vpop.f32.mrf.mxu0  ;;  %v5334_v16 = vcombine.high %v5158_v44, %v5158_v44  ;;  %v5341_v35 = vrot.slane %v5158_v44, %v12982_v12  ;;  %18804 = vst [vmem:[#allocation162_spill] sm:$0xff] %v14709_v37 }
 0x155   : > { %v6522_v3 = vcombine.high %v6520_v21, %v6520_v21  ;;  %v6536_v57 = vrot.slane %v6520_v21, %v12982_v12  ;;  %v6553_v19 = vcombine.high %v6543_v46, %v6543_v46  ;;  %v9316_v51 = vmul.f32 %v8474_v31, %v6543_v46 }
 0x156   : > { %v9317_v61 = vmul.f32 %v8478_v32, %v6551_v1  ;;  %v14703_v23 = vmul.f32 %v14436_v9, %v9315_v26  ;;  %v14706_v21 = vmul.f32 %v14449_v62, %v9315_v26  ;;  %v18815_v46 = vcombine.high %v14564_v0, %v14564_v0  ;;  %v14765_v0 = vpop.f32.mrf.mxu0 }
 0x157   : > { %v6552_v56 = vcombine.high %v6536_v57, %v6536_v57  ;;  %v9319_v55 = vmul.f32 %v8486_v40, %v6536_v57  ;;  %v6550_v18 = vrot.slane %v6522_v3, %v12982_v12  ;;  %v9318_v14 = vmul.f32 %v8482_v11, %v6553_v19  ;;  %v14742_v57 = vpop.f32.mrf.mxu1  ;;  %18821 = vst [vmem:[#allocation178_spill] sm:$0xff] %v14765_v0  ;;  %v14939_v0 = vpop.permute.xlu0 %7665 }
 0x158   : > { %18802 = vst [vmem:[#allocation160_spill] sm:$0xff] %v14703_v23  ;;  %18803 = vst [vmem:[#allocation161_spill] sm:$0xff] %v14706_v21  ;;  %v14712_v44 = vmul.f32 %v14440_v5, %v9316_v51  ;;  %v14715_v28 = vmul.f32 %v14456_v6, %v9317_v61  ;;  %v14721_v40 = vmul.f32 %v14465_v60, %v9316_v51 }
 0x159   : > { %v9321_v41 = vmul.f32 %v8494_v17, %v6552_v56  ;;  %v14718_v1 = vmul.f32 %v14443_v33, %v9319_v55  ;;  %v14724_v26 = vmul.f32 %v14476_v22, %v9317_v61  ;;  %v14727_v3 = vmul.f32 %v14452_v53, %v9319_v55  ;;  %v18855_v33 = vld [vmem:[#allocation60_spill] sm:$0xff]  ;;  %18868 = vst [vmem:[#allocation207_spill] sm:$0xff] %v14939_v0 }
 0x15a   : > { %18805 = vst [vmem:[#allocation163_spill] sm:$0xff] %v14712_v44  ;;  %18806 = vst [vmem:[#allocation164_spill] sm:$0xff] %v14715_v28  ;;  %v14730_v19 = vmul.f32 %v14432_v43, %v9318_v14  ;;  %v14736_v11 = vmul.f32 %v14487_v49, %v9318_v14  ;;  %v6554_v32 = vcombine.high %v6550_v18, %v6550_v18  ;;  %v12703_v49 = vpop.f32.mrf.mxu1  ;;  %v18860_v44 = vld [vmem:[#allocation63_spill] sm:$0xff] }
 0x15b   : > { %18807 = vst [vmem:[#allocation165_spill] sm:$0xff] %v14718_v1  ;;  %18808 = vst [vmem:[#allocation166_spill] sm:$0xff] %v14721_v40  ;;  %v14733_v17 = vmul.f32 %v14469_v42, %v9321_v41  ;;  %v14739_v31 = vmul.f32 %v14480_v54, %v9321_v41  ;;  %v9320_v56 = vmul.f32 %v8490_v52, %v6550_v18 }
 0x15c   : > { %18809 = vst [vmem:[#allocation167_spill] sm:$0xff] %v14724_v26  ;;  %18810 = vst [vmem:[#allocation168_spill] sm:$0xff] %v14727_v3  ;;  %v5348_v61 = vrot.slane %v5334_v16, %v12982_v12  ;;  %v5349_v51 = vcombine.high %v5341_v35, %v5341_v35  ;;  %v5357_v55 = vrot.slane %v5341_v35, %v12982_v12 }
 0x15d   : > { %18811 = vst [vmem:[#allocation169_spill] sm:$0xff] %v14730_v19  ;;  %18812 = vst [vmem:[#allocation170_spill] sm:$0xff] %v14733_v17  ;;  %v14749_v53 = vrot.slane %v18815_v46, %v12982_v12  ;;  %v14753_v14 = vcombine.high %v14567_v27, %v14567_v27  ;;  %v14757_v52 = vcombine.high %v14623_v48, %v14623_v48  ;;  %v14767_v46 = vpop.permute.xlu1 %7661 }
 0x15e   : > { %18813 = vst [vmem:[#allocation171_spill] sm:$0xff] %v14736_v11  ;;  %18814 = vst [vmem:[#allocation172_spill] sm:$0xff] %v14739_v31  ;;  %v9322_v16 = vmul.f32 %v8498_v7, %v6554_v32  ;;  %v14760_v18 = vmul.f32 %v14512_v38, %v9320_v56  ;;  %v14763_v35 = vmul.f32 %v14531_v36, %v9320_v56  ;;  %v12631_v36 = vpop.f32.mrf.mxu0  ;;  %v18854_v38 = vld [vmem:[#allocation66_spill] sm:$0xff] }
 0x15f   : > { %18816 = vst [vmem:[#allocation173_spill] sm:$0xff] %v14749_v53  ;;  %18817 = vst [vmem:[#allocation174_spill] sm:$0xff] %v14753_v14  ;;  %v5350_v41 = vcombine.high %v5348_v61, %v5348_v61  ;;  %v5364_v22 = vrot.slane %v5348_v61, %v12982_v12  ;;  %v5371_v60 = vrot.slane %v5349_v51, %v12982_v12 }
 0x160   : > { %18818 = vst [vmem:[#allocation175_spill] sm:$0xff] %v14757_v52  ;;  %18819 = vst [vmem:[#allocation176_spill] sm:$0xff] %v14760_v18  ;;  %v5379_v31 = vcombine.high %v5357_v55, %v5357_v55  ;;  %v14771_v3 = vmul.f32 %v7738_v47, %v5357_v55  ;;  %v14774_v7 = vmul.f32 %v14549_v29, %v9322_v16 }
 0x161   : > { %18820 = vst [vmem:[#allocation177_spill] sm:$0xff] %v14763_v35  ;;  %18822 = vst [vmem:[#allocation179_spill] sm:$0xff] %v14767_v46  ;;  %v5378_v32 = vrot.slane %v5350_v41, %v12982_v12  ;;  %v14779_v56 = vcombine.high %v14749_v53, %v14749_v53  ;;  %v14783_v49 = vcombine.high %v14629_v39, %v14629_v39 }
 0x162   : > { %18823 = vst [vmem:[#allocation180_spill] sm:$0xff] %v14771_v3  ;;  %18824 = vst [vmem:[#allocation181_spill] sm:$0xff] %v14774_v7  ;;  %v5380_v61 = vcombine.high %v5364_v22, %v5364_v22  ;;  %v5381_v35 = vcombine.high %v5371_v60, %v5371_v60  ;;  %v18826_v47 = vrot.slane %v13907_v4, %v13754_v58 }
 0x163   : > { %18825 = vst [vmem:[#allocation182_spill] sm:$0xff] %v14779_v56  ;;  %v18827_v55 = vrot.slane %v13817_v15, %v13754_v58  ;;  %v5382_v41 = vcombine.high %v5378_v32, %v5378_v32  ;;  %v18828_v7 = vrot.slane %v13817_v15, %v13086_v30  ;;  %v18830_v26 = vrot.slane %v13817_v15, %v14103_v13 }
 0x164   : > { %v9133_v51 = vmul.f32 %v18826_v47, %v5371_v60  ;;  %v14803_v40 = vmul.f32 %v14779_v56, %v14771_v3  ;;  %v18833_v4 = vrot.slane %v13817_v15, %v13194_v20  ;;  %v7774_v43 = vrot.slane %v13817_v15, %v18854_v38 }
 0x165   : > { %v9134_v16 = vmul.f32 %v18827_v55, %v5379_v31  ;;  %v14794_v11 = vmul.f32 %v18828_v7, %v5364_v22  ;;  %v14799_v36 = vmul.f32 %v18830_v26, %v5378_v32  ;;  %v18835_v31 = vrot.slane %v13817_v15, %v13126_v25 }
 0x166   : > { %18832 = vst [vmem:[#allocation185_spill] sm:$0xff] %v14803_v40  ;;  %v14808_v60 = vmul.f32 %v18833_v4, %v5381_v35  ;;  %v14819_v26 = vmul.f32 %v14541_v10, %v9133_v51  ;;  %v14821_v7 = vmul.f32 %v7766_v34, %v5382_v41  ;;  %v14839_v4 = vmul.f32 %v14783_v49, %v9133_v51  ;;  %v14849_v41 = vpop.permute.xlu1 %7625  ;;  %v18853_v40 = vld [vmem:[#allocation64_spill] sm:$0xff] }
 0x167   : > { %18829 = vst [vmem:[#allocation183_spill] sm:$0xff] %v14794_v11  ;;  %18831 = vst [vmem:[#allocation184_spill] sm:$0xff] %v14799_v36  ;;  %v14813_v47 = vmul.f32 %v18835_v31, %v5380_v61  ;;  %v14816_v22 = vmul.f32 %v14302_v8, %v9134_v16  ;;  %v14824_v32 = vmul.f32 %v14567_v27, %v9134_v16  ;;  %v14851_v31 = vpop.f32.mrf.mxu1 }
 0x168   : > { %18834 = vst [vmem:[#allocation186_spill] sm:$0xff] %v14808_v60  ;;  %18838 = vst [vmem:[#allocation189_spill] sm:$0xff] %v14819_v26  ;;  %v14828_v35 = vmul.f32 %v14753_v14, %v14794_v11  ;;  %v14832_v55 = vmul.f32 %v14595_v50, %v14799_v36  ;;  %v14836_v61 = vmul.f32 %v14757_v52, %v14771_v3 }
 0x169   : > { %18836 = vst [vmem:[#allocation187_spill] sm:$0xff] %v14813_v47  ;;  %18837 = vst [vmem:[#allocation188_spill] sm:$0xff] %v14816_v22  ;;  %v14843_v34 = vmul.f32 %v14620_v45, %v14808_v60  ;;  %v14847_v16 = vmul.f32 %v14626_v2, %v14794_v11  ;;  %v14855_v26 = vmul.f32 %v14637_v63, %v14799_v36 }
 0x16a   : > { %18839 = vst [vmem:[#allocation190_spill] sm:$0xff] %v14821_v7  ;;  %18840 = vst [vmem:[#allocation191_spill] sm:$0xff] %v14824_v32  ;;  %v14859_v51 = vmul.f32 %v14653_v59, %v14813_v47  ;;  %v12706_v47 = vpop.f32.mrf.mxu1  ;;  %v18852_v32 = vld [vmem:[#allocation45_spill] sm:$0xff]  ;;  %v8526_v23 = vrot.slane %v14849_v41, %v18853_v40  ;;  %v5094_v21 = vadd.f32 %v14232_v24, %v18860_v44 }
 0x16b   : > { %18841 = vst [vmem:[#allocation192_spill] sm:$0xff] %v14828_v35  ;;  %18842 = vst [vmem:[#allocation193_spill] sm:$0xff] %v14832_v55  ;;  %v4969_v55 = vadd.f32 %v14232_v24, %v18855_v33  ;;  %v7770_v35 = vrot.slane %v13817_v15, %v18853_v40  ;;  %v18856_v47 = vld [vmem:[#allocation31_spill] sm:$0xff]  ;;  %v18857_v15 = vld [vmem:[#allocation133_spill] sm:$0xff] }
 0x16c   : > { %18843 = vst [vmem:[#allocation194_spill] sm:$0xff] %v14836_v61  ;;  %18844 = vst [vmem:[#allocation195_spill] sm:$0xff] %v14839_v4  ;;  %v18851_v4 = vld [vmem:[#allocation57_spill] sm:$0xff]  ;;  %v7786_v5 = vrot.slane %v18856_v47, %v13194_v20  ;;  %v7794_v33 = vrot.slane %v18856_v47, %v14103_v13  ;;  %v7798_v1 = vrot.slane %v18856_v47, %v13126_v25 }
 0x16d   : > { %18845 = vst [vmem:[#allocation196_spill] sm:$0xff] %v14843_v34  ;;  %18846 = vst [vmem:[#allocation197_spill] sm:$0xff] %v14847_v16  ;;  %v5089_v61 = vadd.f32 %v14232_v24, %v18851_v4  ;;  %v8502_v34 = vrot.slane %v14849_v41, %v13754_v58  ;;  %v8530_v16 = vrot.slane %v14849_v41, %v18854_v38  ;;  %v5159_v17 = vmax.f32 %v4969_v55, 0.0  ;;  %v14906_v55 = vpop.permute.xlu1 %7633 }
 0x16e   : > { %18847 = vst [vmem:[#allocation198_spill] sm:$0xff] %v14849_v41  ;;  %18848 = vst [vmem:[#allocation199_spill] sm:$0xff] %v14851_v31  ;;  %v14898_v18 = vcombine.high %v18857_v15, %v18857_v15 }
 0x16f   : > { %18849 = vst [vmem:[#allocation200_spill] sm:$0xff] %v14855_v26  ;;  %18850 = vst [vmem:[#allocation201_spill] sm:$0xff] %v14859_v51  ;;  %v8518_v26 = vrot.slane %v14849_v41, %v13126_v25  ;;  %v5183_v51 = vmax.f32 %v5089_v61, 0.0  ;;  %v7782_v61 = vrot.slane %v18856_v47, %v13754_v58  ;;  %v7790_v41 = vrot.slane %v18856_v47, %v13086_v30 }
 0x170   : > { %18858 = vst [vmem:[#allocation57_spill] sm:$0xff] %v14898_v18  ;;  %18861 = vst [vmem:[#allocation31_spill] sm:$0xff] %v14906_v55  ;;  %v5383_v7 = vcombine.high %v5159_v17, %v5159_v17  ;;  %v5390_v22 = vrot.slane %v5159_v17, %v12982_v12 }
 0x171   : > { %v6555_v6 = vcombine.high %v5183_v51, %v5183_v51  ;;  %v6562_v4 = vrot.slane %v5183_v51, %v12982_v12 }
 0x172   : > { %v5397_v17 = vrot.slane %v5383_v7, %v12982_v12  ;;  %v5398_v46 = vcombine.high %v5390_v22, %v5390_v22  ;;  %v5406_v36 = vrot.slane %v5390_v22, %v12982_v12 }
 0x173   : > { %v6569_v19 = vrot.slane %v6555_v6, %v12982_v12  ;;  %v6570_v51 = vcombine.high %v6562_v4, %v6562_v4  ;;  %v14902_v28 = vrot.slane %v6562_v4, %v12982_v12 }
 0x174   : > { %v5399_v31 = vcombine.high %v5397_v17, %v5397_v17  ;;  %v5413_v44 = vrot.slane %v5397_v17, %v12982_v12  ;;  %v14937_v22 = vmul.f32 %v7770_v35, %v5406_v36  ;;  %v14944_v17 = vpop.f32.mrf.mxu0 }
 0x175   : > { %18859 = vst [vmem:[#allocation60_spill] sm:$0xff] %v14902_v28  ;;  %v6571_v60 = vcombine.high %v6569_v19, %v6569_v19  ;;  %v6585_v6 = vrot.slane %v6569_v19, %v12982_v12  ;;  %v14915_v4 = vrot.slane %v6570_v51, %v12982_v12  ;;  %v14920_v3 = vmul.f32 %v8502_v34, %v14902_v28 }
 0x176   : > { %v5420_v34 = vrot.slane %v5398_v46, %v12982_v12  ;;  %18867 = vst [vmem:[#allocation206_spill] sm:$0xff] %v14937_v22  ;;  %v5427_v19 = vrot.slane %v5399_v31, %v12982_v12  ;;  %18870 = vst [vmem:[#allocation209_spill] sm:$0xff] %v14944_v17 }
 0x177   : > { %18862 = vst [vmem:[#allocation63_spill] sm:$0xff] %v14915_v4  ;;  %18863 = vst [vmem:[#allocation202_spill] sm:$0xff] %v14920_v3  ;;  %v14925_v37 = vrot.slane %v6571_v60, %v12982_v12  ;;  %v6601_v11 = vcombine.high %v6585_v6, %v6585_v6  ;;  %v14929_v51 = vmul.f32 %v8518_v26, %v6585_v6  ;;  %v5184_v60 = vmax.f32 %v5094_v21, 0.0  ;;  %v18872_v4 = vld [vmem:[#allocation25_spill] sm:$0xff] }
 0x178   : > { %v5428_v3 = vcombine.high %v5406_v36, %v5406_v36  ;;  %v5429_v26 = vcombine.high %v5413_v44, %v5413_v44  ;;  %v5430_v6 = vcombine.high %v5420_v34, %v5420_v34  ;;  %v14955_v21 = vmul.f32 %v14898_v18, %v14937_v22 }
 0x179   : > { %18864 = vst [vmem:[#allocation203_spill] sm:$0xff] %v14925_v37  ;;  %18865 = vst [vmem:[#allocation204_spill] sm:$0xff] %v14929_v51  ;;  %v6603_v7 = vcombine.high %v14925_v37, %v14925_v37  ;;  %v14935_v28 = vmul.f32 %v8526_v23, %v6601_v11  ;;  %v14942_v51 = vmul.f32 %v7774_v43, %v5420_v34  ;;  %v12634_v34 = vpop.f32.mrf.mxu0 }
 0x17a   : > { %v18873_v37 = vrot.slane %v18872_v4, %v13754_v58  ;;  %v14951_v11 = vmul.f32 %v7786_v5, %v5413_v44  ;;  %18875 = vst [vmem:[#allocation211_spill] sm:$0xff] %v14955_v21  ;;  %v5431_v36 = vcombine.high %v5427_v19, %v5427_v19  ;;  %v9143_v35 = vmul.f32 %v7782_v61, %v5430_v6  ;;  %v18880_v5 = vld [vmem:[#allocation134_spill] sm:$0xff]  ;;  %v15003_v6 = vpop.f32.mrf.mxu1 }
 0x17b   : > { %18866 = vst [vmem:[#allocation205_spill] sm:$0xff] %v14935_v28  ;;  %18869 = vst [vmem:[#allocation208_spill] sm:$0xff] %v14942_v51  ;;  %v14946_v46 = vmul.f32 %v8530_v16, %v6603_v7  ;;  %v14957_v31 = vmul.f32 %v7790_v41, %v5427_v19  ;;  %v14959_v43 = vmul.f32 %v7794_v33, %v5429_v26 }
 0x17c   : > { %v9142_v23 = vmul.f32 %v18873_v37, %v5428_v3  ;;  %18874 = vst [vmem:[#allocation25_spill] sm:$0xff] %v14951_v11  ;;  %v14966_v4 = vmul.f32 %v14779_v56, %v14942_v51  ;;  %v14970_v37 = vmul.f32 %v18880_v5, %v14951_v11  ;;  %v14974_v3 = vmul.f32 %v14629_v39, %v14937_v22 }
 0x17d   : > { %18871 = vst [vmem:[#allocation210_spill] sm:$0xff] %v14946_v46  ;;  %18876 = vst [vmem:[#allocation212_spill] sm:$0xff] %v14957_v31  ;;  %v14976_v41 = vmul.f32 %v7798_v1, %v5431_v36  ;;  %v14979_v61 = vmul.f32 %v14302_v8, %v9143_v35  ;;  %v14982_v33 = vmul.f32 %v14567_v27, %v9143_v35 }
 0x17e   : > { %18877 = vst [vmem:[#allocation213_spill] sm:$0xff] %v14959_v43  ;;  %v14962_v16 = vmul.f32 %v14541_v10, %v9142_v23  ;;  %18879 = vst [vmem:[#allocation215_spill] sm:$0xff] %v14966_v4  ;;  %v14986_v44 = vmul.f32 %v14753_v14, %v14957_v31  ;;  %v14990_v19 = vmul.f32 %v14757_v52, %v14942_v51 }
 0x17f   : > { %18881 = vst [vmem:[#allocation216_spill] sm:$0xff] %v14970_v37  ;;  %18882 = vst [vmem:[#allocation217_spill] sm:$0xff] %v14974_v3  ;;  %v14993_v7 = vmul.f32 %v14783_v49, %v9142_v23  ;;  %v14997_v1 = vmul.f32 %v14620_v45, %v14951_v11  ;;  %v15001_v26 = vmul.f32 %v14626_v2, %v14957_v31  ;;  %v7630_v3 = vpop.permute.xlu0 %7629 }
 0x180   : > { %18878 = vst [vmem:[#allocation214_spill] sm:$0xff] %v14962_v16  ;;  %18883 = vst [vmem:[#allocation218_spill] sm:$0xff] %v14976_v41  ;;  %v15007_v36 = vmul.f32 %v14637_v63, %v14959_v43  ;;  %v6604_v35 = vcombine.high %v5184_v60, %v5184_v60  ;;  %v6611_v34 = vrot.slane %v5184_v60, %v12982_v12  ;;  %v12709_v43 = vpop.f32.mrf.mxu1 }
 0x181   : > { %18884 = vst [vmem:[#allocation219_spill] sm:$0xff] %v14979_v61  ;;  %18885 = vst [vmem:[#allocation220_spill] sm:$0xff] %v14982_v33  ;;  %v8550_v23 = vrot.slane %v14906_v55, %v14103_v13  ;;  %v8542_v37 = vrot.slane %v14906_v55, %v13194_v20  ;;  %v18893_v33 = vld [vmem:[#allocation67_spill] sm:$0xff]  ;;  %v7802_v4 = vrot.slane %v18856_v47, %v18852_v32 }
 0x182   : > { %18886 = vst [vmem:[#allocation221_spill] sm:$0xff] %v14986_v44  ;;  %18887 = vst [vmem:[#allocation222_spill] sm:$0xff] %v14990_v19  ;;  %v8534_v19 = vrot.slane %v7630_v3, %v13754_v58  ;;  %v6619_v44 = vcombine.high %v6611_v34, %v6611_v34  ;;  %v6627_v60 = vrot.slane %v6611_v34, %v12982_v12 }
 0x183   : > { %18888 = vst [vmem:[#allocation223_spill] sm:$0xff] %v14993_v7  ;;  %18889 = vst [vmem:[#allocation224_spill] sm:$0xff] %v14997_v1  ;;  %v8558_v7 = vrot.slane %v14906_v55, %v18852_v32  ;;  %v4974_v1 = vadd.f32 %v14232_v24, %v18893_v33  ;;  %v7806_v21 = vrot.slane %v18856_v47, %v18853_v40  ;;  %v18895_v33 = vld [vmem:[#allocation30_spill] sm:$0xff] }
 0x184   : > { %18890 = vst [vmem:[#allocation225_spill] sm:$0xff] %v15001_v26  ;;  %18891 = vst [vmem:[#allocation226_spill] sm:$0xff] %v15003_v6  ;;  %v8562_v26 = vrot.slane %v14906_v55, %v18853_v40  ;;  %v7810_v43 = vrot.slane %v18856_v47, %v18854_v38  ;;  %v15033_v34 = vrot.slane %v6619_v44, %v12982_v12 }
 0x185   : > { %18892 = vst [vmem:[#allocation227_spill] sm:$0xff] %v15007_v36  ;;  %v6618_v36 = vrot.slane %v6604_v35, %v12982_v12  ;;  %v6649_v46 = vcombine.high %v6627_v60, %v6627_v60  ;;  %v9331_v28 = vmul.f32 %v8534_v19, %v6627_v60  ;;  %v5160_v41 = vmax.f32 %v4974_v1, 0.0 }
 0x186   : > { %18894 = vst [vmem:[#allocation67_spill] sm:$0xff] %v15033_v34  ;;  %v7818_v16 = vrot.slane %v18895_v33, %v13754_v58  ;;  %v7822_v61 = vrot.slane %v18895_v33, %v13194_v20  ;;  %v7830_v47 = vrot.slane %v18895_v33, %v14103_v13 }
 0x187   : > { %v6620_v3 = vcombine.high %v6618_v36, %v6618_v36  ;;  %v6634_v35 = vrot.slane %v6618_v36, %v12982_v12  ;;  %v9333_v44 = vmul.f32 %v8542_v37, %v6649_v46  ;;  %v15047_v51 = vmul.f32 %v14549_v29, %v9331_v28 }
 0x188   : > { %v5432_v19 = vcombine.high %v5160_v41, %v5160_v41  ;;  %v5439_v1 = vrot.slane %v5160_v41, %v12982_v12 }
 0x189   : > { %v15040_v31 = vrot.slane %v6620_v3, %v12982_v12  ;;  %v6650_v11 = vcombine.high %v6634_v35, %v6634_v35  ;;  %v15044_v36 = vmul.f32 %v8550_v23, %v6634_v35  ;;  %18898 = vst [vmem:[#allocation229_spill] sm:$0xff] %v15047_v51  ;;  %v7826_v3 = vrot.slane %v18895_v33, %v13086_v30 }
 0x18a   : > { %v15059_v23 = vmul.f32 %v14436_v9, %v9333_v44  ;;  %v15062_v28 = vmul.f32 %v14449_v62, %v9333_v44  ;;  %v5446_v46 = vrot.slane %v5432_v19, %v12982_v12  ;;  %v5447_v37 = vcombine.high %v5439_v1, %v5439_v1  ;;  %v18904_v44 = vld [vmem:[#allocation95_spill] sm:$0xff]  ;;  %v15076_v19 = vpop.f32.mrf.mxu0 }
 0x18b   : > { %18896 = vst [vmem:[#allocation30_spill] sm:$0xff] %v15040_v31  ;;  %18897 = vst [vmem:[#allocation228_spill] sm:$0xff] %v15044_v36  ;;  %v6652_v60 = vcombine.high %v15040_v31, %v15040_v31  ;;  %v15052_v22 = vmul.f32 %v8558_v7, %v6650_v11  ;;  %v5455_v11 = vrot.slane %v5439_v1, %v12982_v12  ;;  %v18903_v7 = vld [vmem:[#allocation78_spill] sm:$0xff] }
 0x18c   : > { %18900 = vst [vmem:[#allocation231_spill] sm:$0xff] %v15059_v23  ;;  %18901 = vst [vmem:[#allocation232_spill] sm:$0xff] %v15062_v28  ;;  %v5099_v35 = vadd.f32 %v14232_v24, %v18903_v7  ;;  %v8566_v51 = vrot.slane %v14906_v55, %v18854_v38  ;;  %v5462_v36 = vrot.slane %v5446_v46, %v12982_v12 }
 0x18d   : > { %18899 = vst [vmem:[#allocation230_spill] sm:$0xff] %v15052_v22  ;;  %v15065_v41 = vmul.f32 %v8562_v26, %v6652_v60  ;;  %v5448_v22 = vcombine.high %v5446_v46, %v5446_v46  ;;  %v5469_v23 = vrot.slane %v5447_v37, %v12982_v12  ;;  %v4979_v28 = vadd.f32 %v14232_v24, %v18904_v44  ;;  %v12637_v46 = vpop.f32.mrf.mxu0 }
 0x18e   : > { %18905 = vst [vmem:[#allocation78_spill] sm:$0xff] %v15076_v19  ;;  %v5477_v26 = vcombine.high %v5455_v11, %v5455_v11  ;;  %v15078_v60 = vmul.f32 %v7802_v4, %v5455_v11  ;;  %v5185_v1 = vmax.f32 %v5099_v35, 0.0  ;;  %v7834_v7 = vrot.slane %v18895_v33, %v13126_v25  ;;  %v18911_v35 = vld [vmem:[#allocation26_spill] sm:$0xff] }
 0x18f   : > { %18902 = vst [vmem:[#allocation233_spill] sm:$0xff] %v15065_v41  ;;  %v5476_v62 = vrot.slane %v5448_v22, %v12982_v12  ;;  %v5478_v41 = vcombine.high %v5462_v36, %v5462_v36  ;;  %v5479_v31 = vcombine.high %v5469_v23, %v5469_v23  ;;  %v15083_v55 = vmul.f32 %v7806_v21, %v5469_v23 }
 0x190   : > { %18906 = vst [vmem:[#allocation95_spill] sm:$0xff] %v15078_v60  ;;  %v15085_v37 = vmul.f32 %v7810_v43, %v5477_v26  ;;  %v9152_v34 = vmul.f32 %v7818_v16, %v5462_v36  ;;  %v15089_v24 = vmul.f32 %v14749_v53, %v15078_v60  ;;  %v15093_v4 = vmul.f32 %v14623_v48, %v15078_v60 }
 0x191   : > { %18907 = vst [vmem:[#allocation234_spill] sm:$0xff] %v15083_v55  ;;  %v5480_v11 = vcombine.high %v5476_v62, %v5476_v62  ;;  %v18912_v22 = vrot.slane %v18911_v35, %v13754_v58  ;;  %v15098_v9 = vmul.f32 %v7822_v61, %v5476_v62  ;;  %v15100_v21 = vmul.f32 %v7826_v3, %v5478_v41 }
 0x192   : > { %18908 = vst [vmem:[#allocation235_spill] sm:$0xff] %v15085_v37  ;;  %18909 = vst [vmem:[#allocation236_spill] sm:$0xff] %v15089_v24  ;;  %v15103_v43 = vmul.f32 %v14302_v8, %v9152_v34  ;;  %v15107_v16 = vmul.f32 %v14898_v18, %v15083_v55  ;;  %v15110_v36 = vmul.f32 %v14567_v27, %v9152_v34  ;;  %v5161_v46 = vmax.f32 %v4979_v28, 0.0 }
 0x193   : > { %18910 = vst [vmem:[#allocation237_spill] sm:$0xff] %v15093_v4  ;;  %v9151_v44 = vmul.f32 %v18912_v22, %v5479_v31  ;;  %18913 = vst [vmem:[#allocation26_spill] sm:$0xff] %v15098_v9  ;;  %v15114_v23 = vmul.f32 %v14629_v39, %v15083_v55  ;;  %v15116_v26 = vmul.f32 %v7830_v47, %v5480_v11 }
 0x194   : > { %18914 = vst [vmem:[#allocation238_spill] sm:$0xff] %v15100_v21  ;;  %18915 = vst [vmem:[#allocation239_spill] sm:$0xff] %v15103_v43  ;;  %v15123_v31 = vmul.f32 %v18880_v5, %v15098_v9  ;;  %v15127_v61 = vmul.f32 %v14757_v52, %v15085_v37  ;;  %v15134_v3 = vmul.f32 %v14620_v45, %v15098_v9 }
 0x195   : > { %18916 = vst [vmem:[#allocation240_spill] sm:$0xff] %v15107_v16  ;;  %18917 = vst [vmem:[#allocation241_spill] sm:$0xff] %v15110_v36  ;;  %v15119_v62 = vmul.f32 %v14541_v10, %v9151_v44  ;;  %v15130_v34 = vmul.f32 %v14783_v49, %v9151_v44  ;;  %v15138_v47 = vmul.f32 %v14626_v2, %v15100_v21  ;;  %v18927_v44 = vld [vmem:[#allocation99_spill] sm:$0xff] }
 0x196   : > { %18918 = vst [vmem:[#allocation242_spill] sm:$0xff] %v15114_v23  ;;  %18919 = vst [vmem:[#allocation243_spill] sm:$0xff] %v15116_v26  ;;  %v15141_v41 = vrot.slane %v5185_v1, %v12982_v12  ;;  %v7838_v11 = vrot.slane %v18895_v33, %v18852_v32  ;;  %v7842_v35 = vrot.slane %v18895_v33, %v18853_v40 }
 0x197   : > { %18920 = vst [vmem:[#allocation244_spill] sm:$0xff] %v15119_v62  ;;  %18921 = vst [vmem:[#allocation245_spill] sm:$0xff] %v15123_v31  ;;  %v7846_v22 = vrot.slane %v18895_v33, %v18854_v38  ;;  %v5488_v62 = vrot.slane %v5161_v46, %v12982_v12  ;;  %v15163_v33 = vld [vmem:[%s18219_s5] ss:$0 sm:$0xff]  ;;  %v18928_v31 = vld [vmem:[#allocation35_spill] sm:$0xff] }
 0x198   : > { %18922 = vst [vmem:[#allocation246_spill] sm:$0xff] %v15127_v61  ;;  %18923 = vst [vmem:[#allocation247_spill] sm:$0xff] %v15130_v34  ;;  %v5481_v61 = vcombine.high %v5161_v46, %v5161_v46  ;;  %v5104_v4 = vadd.f32 %v15163_v33, %v18927_v44  ;;  %v8578_v16 = vrot.slane %v18928_v31, %v13194_v20  ;;  %v15197_v44 = vpop.permute.xlu1 %7669 }
 0x199   : > { %18924 = vst [vmem:[#allocation248_spill] sm:$0xff] %v15134_v3  ;;  %18925 = vst [vmem:[#allocation249_spill] sm:$0xff] %v15138_v47  ;;  %v6667_v3 = vrot.slane %v15141_v41, %v12982_v12  ;;  %v18926_v47 = vld [vmem:[#allocation34_spill] sm:$0xff]  ;;  %v5496_v26 = vcombine.high %v5488_v62, %v5488_v62  ;;  %v5504_v43 = vrot.slane %v5488_v62, %v12982_v12 }
 0x19a   : > { %v7854_v1 = vrot.slane %v18926_v47, %v13754_v58  ;;  %v7858_v28 = vrot.slane %v18926_v47, %v13194_v20  ;;  %v7862_v34 = vrot.slane %v18926_v47, %v13086_v30  ;;  %v5495_v24 = vrot.slane %v5481_v61, %v12982_v12  ;;  %18933 = vst [vmem:[#allocation251_spill] sm:$0xff] %v15197_v44 }
 0x19b   : > { %v9339_v23 = vmul.f32 %v8566_v51, %v6667_v3  ;;  %v5186_v21 = vmax.f32 %v5104_v4, 0.0  ;;  %v5518_v61 = vrot.slane %v5496_v26, %v12982_v12  ;;  %v5526_v37 = vcombine.high %v5504_v43, %v5504_v43 }
 0x19c   : > { %v5497_v36 = vcombine.high %v5495_v24, %v5495_v24  ;;  %v5511_v46 = vrot.slane %v5495_v24, %v12982_v12  ;;  %v15187_v62 = vmul.f32 %v7834_v7, %v5504_v43  ;;  %v18936_v43 = vld [vmem:[#allocation38_spill] sm:$0xff] }
 0x19d   : > { %v15176_v9 = vmul.f32 %v14469_v42, %v9339_v23  ;;  %v15179_v51 = vmul.f32 %v14480_v54, %v9339_v23  ;;  %v6675_v4 = vcombine.high %v5186_v21, %v5186_v21  ;;  %v15193_v23 = vld [vmem:[%s18220_s6] sm:$0xff]  ;;  %v5528_v26 = vcombine.high %v5518_v61, %v5518_v61 }
 0x19e   : > { %18931 = vst [vmem:[#allocation35_spill] sm:$0xff] %v15187_v62  ;;  %18932 = vst [vmem:[#allocation250_spill] sm:$0xff] %v15193_v23  ;;  %v10325_v3 = vrot.slane %v15193_v23, %v13126_v25  ;;  %v5525_v24 = vrot.slane %v5497_v36, %v12982_v12  ;;  %v15200_v54 = vmul.f32 %v7838_v11, %v5518_v61 }
 0x19f   : > { %18929 = vst [vmem:[#allocation34_spill] sm:$0xff] %v15176_v9  ;;  %18930 = vst [vmem:[#allocation99_spill] sm:$0xff] %v15179_v51  ;;  %v6682_v9 = vrot.slane %v5186_v21, %v12982_v12  ;;  %v5527_v51 = vcombine.high %v5511_v46, %v5511_v46  ;;  %v15202_v7 = vmul.f32 %v7842_v35, %v5526_v37  ;;  %v15219_v37 = vpop.permute.xlu0 %7533 }
 0x1a0   : > { %18934 = vst [vmem:[#allocation252_spill] sm:$0xff] %v15200_v54  ;;  %v18937_v21 = vrot.slane %v18936_v43, %v13754_v58  ;;  %v15209_v55 = vmul.f32 %v18857_v15, %v15187_v62  ;;  %v15213_v60 = vmul.f32 %v14653_v59, %v15187_v62  ;;  %v5529_v44 = vcombine.high %v5525_v24, %v5525_v24 }
 0x1a1   : > { %18935 = vst [vmem:[#allocation253_spill] sm:$0xff] %v15202_v7  ;;  %v15215_v36 = vmul.f32 %v7846_v22, %v5528_v26  ;;  %v9161_v0 = vmul.f32 %v7854_v1, %v5525_v24  ;;  %v15217_v11 = vmul.f32 %v7858_v28, %v5527_v51  ;;  %18942 = vst [vmem:[#allocation257_spill] sm:$0xff] %v15219_v37  ;;  %v15248_v26 = vpop.f32.mrf.mxu1 }
 0x1a2   : > { %v9160_v42 = vmul.f32 %v18937_v21, %v5511_v46  ;;  %18938 = vst [vmem:[#allocation38_spill] sm:$0xff] %v15209_v55  ;;  %18939 = vst [vmem:[#allocation254_spill] sm:$0xff] %v15213_v60  ;;  %v15226_v46 = vmul.f32 %v14749_v53, %v15200_v54  ;;  %v15230_v61 = vmul.f32 %v14623_v48, %v15200_v54  ;;  %v18972_v54 = vld [vmem:[#allocation37_spill] sm:$0xff] }
 0x1a3   : > { %18940 = vst [vmem:[#allocation255_spill] sm:$0xff] %v15215_v36  ;;  %18941 = vst [vmem:[#allocation256_spill] sm:$0xff] %v15217_v11  ;;  %v15234_v22 = vmul.f32 %v14629_v39, %v15202_v7  ;;  %v15236_v1 = vmul.f32 %v7862_v34, %v5529_v44  ;;  %v15239_v28 = vmul.f32 %v14302_v8, %v9161_v0 }
 0x1a4   : > { %v15222_v35 = vmul.f32 %v14541_v10, %v9160_v42  ;;  %18944 = vst [vmem:[#allocation259_spill] sm:$0xff] %v15226_v46  ;;  %18945 = vst [vmem:[#allocation260_spill] sm:$0xff] %v15230_v61  ;;  %v15242_v51 = vmul.f32 %v14567_v27, %v9161_v0  ;;  %v15246_v24 = vmul.f32 %v18880_v5, %v15217_v11 }
 0x1a5   : > { %18946 = vst [vmem:[#allocation261_spill] sm:$0xff] %v15234_v22  ;;  %18947 = vst [vmem:[#allocation262_spill] sm:$0xff] %v15236_v1  ;;  %v15252_v43 = vmul.f32 %v14757_v52, %v15215_v36  ;;  %v15255_v21 = vmul.f32 %v14783_v49, %v9160_v42  ;;  %v15259_v34 = vmul.f32 %v14620_v45, %v15217_v11 }
 0x1a6   : > { %18943 = vst [vmem:[#allocation258_spill] sm:$0xff] %v15222_v35  ;;  %18948 = vst [vmem:[#allocation263_spill] sm:$0xff] %v15239_v28  ;;  %v6689_v0 = vrot.slane %v6675_v4, %v12982_v12  ;;  %v15264_v44 = vmul.f32 %v14626_v2, %v15236_v1  ;;  %v6690_v22 = vcombine.high %v6682_v9, %v6682_v9  ;;  %v15281_v28 = vpop.permute.xlu0 %7537 }
 0x1a7   : > { %18949 = vst [vmem:[#allocation264_spill] sm:$0xff] %v15242_v51  ;;  %18950 = vst [vmem:[#allocation265_spill] sm:$0xff] %v15246_v24  ;;  %v10327_v60 = vcombine.high %v10325_v3, %v10325_v3  ;;  %v10334_v61 = vrot.slane %v10325_v3, %v12982_v12  ;;  %v7638_v24 = vpop.permute.xlu1 %7637  ;;  %v12712_v51 = vpop.f32.mrf.mxu1  ;;  %v8598_v36 = vrot.slane %v18928_v31, %v18853_v40 }
 0x1a8   : > { %18951 = vst [vmem:[#allocation266_spill] sm:$0xff] %v15248_v26  ;;  %18952 = vst [vmem:[#allocation267_spill] sm:$0xff] %v15252_v43  ;;  %v6691_v43 = vcombine.high %v6689_v0, %v6689_v0  ;;  %v6698_v42 = vrot.slane %v6689_v0, %v12982_v12  ;;  %v8570_v4 = vrot.slane %v7638_v24, %v13754_v58 }
 0x1a9   : > { %18953 = vst [vmem:[#allocation268_spill] sm:$0xff] %v15255_v21  ;;  %18954 = vst [vmem:[#allocation269_spill] sm:$0xff] %v15259_v34  ;;  %v18956_v21 = vcombine.high %v15141_v41, %v15141_v41  ;;  %v6705_v46 = vrot.slane %v6690_v22, %v12982_v12  ;;  %v10342_v9 = vcombine.high %v10334_v61, %v10334_v61 }
 0x1aa   : > { %18955 = vst [vmem:[#allocation270_spill] sm:$0xff] %v15264_v44  ;;  %v15275_v44 = vrot.slane %v10327_v60, %v12982_v12  ;;  %v15278_v3 = vrot.slane %v10334_v61, %v12982_v12  ;;  %v6712_v51 = vrot.slane %v6691_v43, %v12982_v12  ;;  %v6713_v55 = vcombine.high %v6698_v42, %v6698_v42 }
 0x1ab   : > { %v6674_v34 = vrot.slane %v18956_v21, %v12982_v12  ;;  %v9342_v0 = vmul.f32 %v8578_v16, %v6698_v42  ;;  %18957 = vst [vmem:[#allocation271_spill] sm:$0xff] %v15281_v28  ;;  %v6714_v41 = vcombine.high %v6705_v46, %v6705_v46  ;;  %v15288_v22 = vrot.slane %v10342_v9, %v12982_v12 }
 0x1ac   : > { %v15285_v24 = vrot.slane %v15275_v44, %v12982_v12  ;;  %v15292_v60 = vcombine.high %v15278_v3, %v15278_v3  ;;  %v6715_v61 = vcombine.high %v6712_v51, %v6712_v51  ;;  %v18958_v43 = vrot.slane %v18928_v31, %v13086_v30 }
 0x1ad   : > { %v9340_v35 = vmul.f32 %v8570_v4, %v6674_v34  ;;  %v18959_v21 = vrot.slane %v18928_v31, %v14103_v13  ;;  %v18961_v42 = vrot.slane %v18928_v31, %v13754_v58  ;;  %v15308_v9 = vcombine.high %v15288_v22, %v15288_v22 }
 0x1ae   : > { %v9343_v16 = vmul.f32 %v18958_v43, %v6712_v51  ;;  %v15311_v1 = vmul.f32 %v15288_v22, %v9342_v0  ;;  %v7870_v51 = vrot.slane %v18926_v47, %v13126_v25  ;;  %v8606_v62 = vrot.slane %v18972_v54, %v13754_v58 }
 0x1af   : > { %v9344_v46 = vmul.f32 %v18959_v21, %v6713_v55  ;;  %v15301_v34 = vmul.f32 %v14549_v29, %v9340_v35  ;;  %v9341_v4 = vmul.f32 %v18961_v42, %v6714_v41  ;;  %v18963_v55 = vrot.slane %v18928_v31, %v13126_v25  ;;  %v18965_v21 = vld [vmem:[#allocation119_spill] sm:$0xff] }
 0x1b0   : > { %18962 = vst [vmem:[#allocation273_spill] sm:$0xff] %v15311_v1  ;;  %v15319_v35 = vmul.f32 %v15292_v60, %v9343_v16  ;;  %v4984_v41 = vadd.f32 %v15163_v33, %v18965_v21  ;;  %v7866_v42 = vrot.slane %v18926_v47, %v14103_v13  ;;  %v15335_v16 = vpop.f32.mrf.mxu0  ;;  %v7878_v1 = vrot.slane %v18926_v47, %v18853_v40 }
 0x1b1   : > { %18960 = vst [vmem:[#allocation272_spill] sm:$0xff] %v15301_v34  ;;  %v9345_v43 = vmul.f32 %v18963_v55, %v6715_v61  ;;  %v15326_v29 = vmul.f32 %v15278_v3, %v9341_v4  ;;  %v15329_v0 = vmul.f32 %v15308_v9, %v9344_v46  ;;  %v7874_v61 = vrot.slane %v18926_v47, %v18852_v32  ;;  %v18970_v46 = vld [vmem:[#allocation42_spill] sm:$0xff] }
 0x1b2   : > { %18964 = vst [vmem:[#allocation274_spill] sm:$0xff] %v15319_v35  ;;  %18968 = vst [vmem:[#allocation276_spill] sm:$0xff] %v15335_v16  ;;  %v5162_v21 = vmax.f32 %v4984_v41, 0.0  ;;  %v7882_v4 = vrot.slane %v18926_v47, %v18854_v38  ;;  %v7890_v34 = vrot.slane %v18970_v46, %v13754_v58  ;;  %v8602_v47 = vrot.slane %v18928_v31, %v18854_v38 }
 0x1b3   : > { %18966 = vst [vmem:[#allocation119_spill] sm:$0xff] %v15326_v29  ;;  %18967 = vst [vmem:[#allocation275_spill] sm:$0xff] %v15329_v0  ;;  %v15338_v55 = vmul.f32 %v15285_v24, %v9345_v43  ;;  %v7894_v0 = vrot.slane %v18970_v46, %v13194_v20  ;;  %v18971_v29 = vld [vmem:[#allocation127_spill] sm:$0xff]  ;;  %v8594_v43 = vrot.slane %v18928_v31, %v18852_v32 }
 0x1b4   : > { %v5109_v35 = vadd.f32 %v15163_v33, %v18971_v29  ;;  %v5530_v41 = vcombine.high %v5162_v21, %v5162_v21  ;;  %v5537_v11 = vrot.slane %v5162_v21, %v12982_v12  ;;  %v8610_v29 = vrot.slane %v18972_v54, %v13194_v20 }
 0x1b5   : > { %18969 = vst [vmem:[#allocation277_spill] sm:$0xff] %v15338_v55  ;;  %v12640_v55 = vpop.f32.mrf.mxu0  ;;  %v8614_v16 = vrot.slane %v18972_v54, %v13086_v30  ;;  %v8618_v19 = vrot.slane %v18972_v54, %v14103_v13  ;;  %v15372_v6 = vcombine.high %v15285_v24, %v15285_v24 }
 0x1b6   : > { %v5187_v7 = vmax.f32 %v5109_v35, 0.0  ;;  %v5544_v55 = vrot.slane %v5530_v41, %v12982_v12  ;;  %v5545_v26 = vcombine.high %v5537_v11, %v5537_v11  ;;  %v5553_v21 = vrot.slane %v5537_v11, %v12982_v12 }
 0x1b7   : > { %v10343_v35 = vcombine.high %v15275_v44, %v15275_v44  ;;  %18973 = vst [vmem:[#allocation42_spill] sm:$0xff] %v15372_v6 }
 0x1b8   : > { %v6716_v28 = vcombine.high %v5187_v7, %v5187_v7  ;;  %v6723_v31 = vrot.slane %v5187_v7, %v12982_v12  ;;  %v5546_v23 = vcombine.high %v5544_v55, %v5544_v55  ;;  %v5560_v17 = vrot.slane %v5544_v55, %v12982_v12 }
 0x1b9   : > { %v5567_v41 = vrot.slane %v5545_v26, %v12982_v12  ;;  %v5575_v52 = vcombine.high %v5553_v21, %v5553_v21  ;;  %v15376_v11 = vmul.f32 %v7866_v42, %v5553_v21  ;;  %v18980_v21 = vld [vmem:[#allocation40_spill] sm:$0xff] }
 0x1ba   : > { %v6730_v39 = vrot.slane %v6716_v28, %v12982_v12  ;;  %v6731_v48 = vcombine.high %v6723_v31, %v6723_v31  ;;  %v6739_v7 = vrot.slane %v6723_v31, %v12982_v12  ;;  %v5574_v59 = vrot.slane %v5546_v23, %v12982_v12 }
 0x1bb   : > { %18974 = vst [vmem:[#allocation127_spill] sm:$0xff] %v15376_v11  ;;  %v5576_v44 = vcombine.high %v5560_v17, %v5560_v17  ;;  %v5577_v63 = vcombine.high %v5567_v41, %v5567_v41  ;;  %v15381_v2 = vmul.f32 %v7870_v51, %v5567_v41  ;;  %v15383_v45 = vmul.f32 %v7874_v61, %v5575_v52 }
 0x1bc   : > { %v15385_v37 = vmul.f32 %v7882_v4, %v5560_v17  ;;  %v15389_v26 = vmul.f32 %v14595_v50, %v15376_v11  ;;  %v6732_v42 = vcombine.high %v6730_v39, %v6730_v39  ;;  %v5578_v55 = vcombine.high %v5574_v59, %v5574_v59 }
 0x1bd   : > { %18975 = vst [vmem:[#allocation37_spill] sm:$0xff] %v15381_v2  ;;  %18976 = vst [vmem:[#allocation278_spill] sm:$0xff] %v15383_v45  ;;  %v15391_v28 = vmul.f32 %v7878_v1, %v5577_v63  ;;  %v18981_v31 = vrot.slane %v18980_v21, %v13754_v58  ;;  %v9170_v5 = vmul.f32 %v7890_v34, %v5576_v44  ;;  %v15417_v34 = vpop.f32.mrf.mxu1 }
 0x1be   : > { %18977 = vst [vmem:[#allocation279_spill] sm:$0xff] %v15385_v37  ;;  %18978 = vst [vmem:[#allocation280_spill] sm:$0xff] %v15389_v26  ;;  %v15398_v51 = vmul.f32 %v14749_v53, %v15383_v45  ;;  %v15402_v52 = vmul.f32 %v14779_v56, %v15385_v37  ;;  %v6746_v17 = vrot.slane %v6730_v39, %v12982_v12 }
 0x1bf   : > { %18979 = vst [vmem:[#allocation281_spill] sm:$0xff] %v15391_v28  ;;  %v9169_v23 = vmul.f32 %v18981_v31, %v5574_v59  ;;  %v6753_v61 = vrot.slane %v6731_v48, %v12982_v12  ;;  %v15406_v4 = vmul.f32 %v7894_v0, %v5578_v55  ;;  %v15409_v63 = vmul.f32 %v14302_v8, %v9170_v5  ;;  %v12715_v8 = vpop.f32.mrf.mxu1 }
 0x1c0   : > { %18982 = vst [vmem:[#allocation40_spill] sm:$0xff] %v15398_v51  ;;  %18983 = vst [vmem:[#allocation282_spill] sm:$0xff] %v15402_v52  ;;  %v15415_v1 = vmul.f32 %v14567_v27, %v9170_v5  ;;  %v6760_v39 = vrot.slane %v6732_v42, %v12982_v12  ;;  %v6761_v44 = vcombine.high %v6739_v7, %v6739_v7 }
 0x1c1   : > { %18984 = vst [vmem:[#allocation283_spill] sm:$0xff] %v15406_v4  ;;  %18985 = vst [vmem:[#allocation284_spill] sm:$0xff] %v15409_v63  ;;  %v15412_v59 = vmul.f32 %v14541_v10, %v9169_v23  ;;  %v15420_v41 = vmul.f32 %v14783_v49, %v9169_v23  ;;  %v6762_v48 = vcombine.high %v6746_v17, %v6746_v17 }
 0x1c2   : > { %18987 = vst [vmem:[#allocation286_spill] sm:$0xff] %v15415_v1  ;;  %18988 = vst [vmem:[#allocation287_spill] sm:$0xff] %v15417_v34  ;;  %v9346_v0 = vmul.f32 %v8594_v43, %v6739_v7  ;;  %v9347_v55 = vmul.f32 %v8598_v36, %v6753_v61  ;;  %v9349_v21 = vmul.f32 %v8606_v62, %v6746_v17 }
 0x1c3   : > { %18986 = vst [vmem:[#allocation285_spill] sm:$0xff] %v15412_v59  ;;  %18989 = vst [vmem:[#allocation288_spill] sm:$0xff] %v15420_v41  ;;  %v15424_v31 = vrot.slane %v10343_v35, %v12982_v12  ;;  %v6763_v52 = vcombine.high %v6760_v39, %v6760_v39  ;;  %v9348_v51 = vmul.f32 %v8602_v47, %v6761_v44 }
 0x1c4   : > { %v9350_v5 = vmul.f32 %v8610_v29, %v6760_v39  ;;  %v9351_v1 = vmul.f32 %v8614_v16, %v6762_v48  ;;  %v15434_v42 = vmul.f32 %v15372_v6, %v9347_v55  ;;  %v15437_v62 = vmul.f32 %v15278_v3, %v9349_v21  ;;  %v18997_v16 = vld [vmem:[#allocation132_spill] sm:$0xff]  ;;  %v19000_v39 = vld [vmem:[#allocation53_spill] sm:$0xff]  ;;  %v19001_v48 = vld [vmem:[#allocation154_spill] sm:$0xff] }
 0x1c5   : > { %18990 = vst [vmem:[#allocation289_spill] sm:$0xff] %v15424_v31  ;;  %v15428_v26 = vcombine.high %v15424_v31, %v15424_v31  ;;  %v15431_v23 = vmul.f32 %v15424_v31, %v9346_v0  ;;  %v9352_v36 = vmul.f32 %v8618_v19, %v6763_v52  ;;  %v4989_v47 = vadd.f32 %v15163_v33, %v18997_v16 }
 0x1c6   : > { %18993 = vst [vmem:[#allocation292_spill] sm:$0xff] %v15434_v42  ;;  %18994 = vst [vmem:[#allocation293_spill] sm:$0xff] %v15437_v62  ;;  %v15440_v8 = vmul.f32 %v15288_v22, %v9350_v5  ;;  %v15443_v43 = vmul.f32 %v15292_v60, %v9351_v1  ;;  %v7898_v35 = vrot.slane %v18970_v46, %v13086_v30 }
 0x1c7   : > { %18991 = vst [vmem:[#allocation290_spill] sm:$0xff] %v15428_v26  ;;  %18992 = vst [vmem:[#allocation291_spill] sm:$0xff] %v15431_v23  ;;  %v15448_v29 = vmul.f32 %v15428_v26, %v9348_v51  ;;  %v7902_v7 = vrot.slane %v18970_v46, %v14103_v13  ;;  %v7906_v19 = vrot.slane %v18970_v46, %v13126_v25  ;;  %v5163_v17 = vmax.f32 %v4989_v47, 0.0  ;;  %v19003_v23 = vld [vmem:[#allocation159_spill] sm:$0xff] }
 0x1c8   : > { %18995 = vst [vmem:[#allocation294_spill] sm:$0xff] %v15440_v8  ;;  %18996 = vst [vmem:[#allocation295_spill] sm:$0xff] %v15443_v43  ;;  %v15457_v52 = vmul.f32 %v15308_v9, %v9352_v36  ;;  %v7910_v61 = vrot.slane %v18970_v46, %v18852_v32  ;;  %v7914_v51 = vrot.slane %v18970_v46, %v18853_v40 }
 0x1c9   : > { %18998 = vst [vmem:[#allocation132_spill] sm:$0xff] %v15448_v29  ;;  %v7918_v1 = vrot.slane %v18970_v46, %v18854_v38  ;;  %v7926_v44 = vrot.slane %v19000_v39, %v13754_v58  ;;  %v5114_v0 = vadd.f32 %v15163_v33, %v19001_v48  ;;  %v8622_v55 = vrot.slane %v18972_v54, %v13126_v25 }
 0x1ca   : > { %18999 = vst [vmem:[#allocation296_spill] sm:$0xff] %v15457_v52  ;;  %v5579_v21 = vcombine.high %v5163_v17, %v5163_v17  ;;  %v5586_v5 = vrot.slane %v5163_v17, %v12982_v12  ;;  %v8626_v36 = vrot.slane %v18972_v54, %v18852_v32  ;;  %v8630_v16 = vrot.slane %v18972_v54, %v18853_v40  ;;  %v19002_v52 = vld [vmem:[#allocation55_spill] sm:$0xff] }
 0x1cb   : > { %v5188_v47 = vmax.f32 %v5114_v0, 0.0  ;;  %v8634_v46 = vrot.slane %v18972_v54, %v18854_v38  ;;  %v8638_v43 = vrot.slane %v19002_v52, %v13754_v58  ;;  %v8642_v48 = vrot.slane %v19002_v52, %v13194_v20 }
 0x1cc   : > { %v5593_v62 = vrot.slane %v5579_v21, %v12982_v12  ;;  %v5594_v8 = vcombine.high %v5586_v5, %v5586_v5  ;;  %v5602_v17 = vrot.slane %v5586_v5, %v12982_v12  ;;  %v8646_v29 = vrot.slane %v19002_v52, %v13086_v30 }
 0x1cd   : > { %v6764_v42 = vcombine.high %v5188_v47, %v5188_v47  ;;  %v6771_v0 = vrot.slane %v5188_v47, %v12982_v12  ;;  %v4994_v54 = vadd.f32 %v15163_v33, %v19003_v23 }
 0x1ce   : > { %v5595_v59 = vcombine.high %v5593_v62, %v5593_v62  ;;  %v5609_v63 = vrot.slane %v5593_v62, %v12982_v12  ;;  %v5616_v21 = vrot.slane %v5594_v8, %v12982_v12  ;;  %v5624_v4 = vcombine.high %v5602_v17, %v5602_v17 }
 0x1cf   : > { %v15493_v37 = vmul.f32 %v7898_v35, %v5602_v17  ;;  %v6778_v5 = vrot.slane %v6764_v42, %v12982_v12  ;;  %v6779_v28 = vcombine.high %v6771_v0, %v6771_v0  ;;  %v6787_v45 = vrot.slane %v6771_v0, %v12982_v12  ;;  %v15508_v35 = vpop.f32.mrf.mxu0 }
 0x1d0   : > { %v5623_v47 = vrot.slane %v5595_v59, %v12982_v12  ;;  %v5625_v2 = vcombine.high %v5609_v63, %v5609_v63  ;;  %v5626_v23 = vcombine.high %v5616_v21, %v5616_v21  ;;  %v15498_v11 = vmul.f32 %v7902_v7, %v5616_v21  ;;  %19009 = vst [vmem:[#allocation298_spill] sm:$0xff] %v15508_v35  ;;  %v19012_v59 = vld [vmem:[#allocation59_spill] sm:$0xff] }
 0x1d1   : > { %19004 = vst [vmem:[#allocation53_spill] sm:$0xff] %v15493_v37  ;;  %v15500_v41 = vmul.f32 %v7906_v19, %v5624_v4  ;;  %v15502_v34 = vmul.f32 %v7914_v51, %v5609_v63  ;;  %v15506_v62 = vmul.f32 %v14753_v14, %v15493_v37  ;;  %v6780_v8 = vcombine.high %v6778_v5, %v6778_v5 }
 0x1d2   : > { %19005 = vst [vmem:[#allocation154_spill] sm:$0xff] %v15498_v11  ;;  %v5627_v42 = vcombine.high %v5623_v47, %v5623_v47  ;;  %v15510_v17 = vmul.f32 %v7910_v61, %v5626_v23  ;;  %v15512_v0 = vmul.f32 %v7918_v1, %v5623_v47  ;;  %v19013_v7 = vrot.slane %v19012_v59, %v13754_v58  ;;  %v12643_v61 = vpop.f32.mrf.mxu0 }
 0x1d3   : > { %19006 = vst [vmem:[#allocation55_spill] sm:$0xff] %v15500_v41  ;;  %19007 = vst [vmem:[#allocation159_spill] sm:$0xff] %v15502_v34  ;;  %v15519_v4 = vmul.f32 %v18857_v15, %v15500_v41  ;;  %v15523_v63 = vmul.f32 %v14898_v18, %v15502_v34  ;;  %v6794_v19 = vrot.slane %v6778_v5, %v12982_v12  ;;  %v5164_v34 = vmax.f32 %v4994_v54, 0.0 }
 0x1d4   : > { %19008 = vst [vmem:[#allocation297_spill] sm:$0xff] %v15506_v62  ;;  %19010 = vst [vmem:[#allocation299_spill] sm:$0xff] %v15510_v17  ;;  %v9178_v21 = vmul.f32 %v19013_v7, %v5625_v2  ;;  %v6801_v51 = vrot.slane %v6779_v28, %v12982_v12  ;;  %v15527_v23 = vmul.f32 %v7926_v44, %v5627_v42 }
 0x1d5   : > { %19011 = vst [vmem:[#allocation300_spill] sm:$0xff] %v15512_v0  ;;  %19014 = vst [vmem:[#allocation59_spill] sm:$0xff] %v15519_v4  ;;  %v6808_v47 = vrot.slane %v6780_v8, %v12982_v12  ;;  %v6809_v59 = vcombine.high %v6787_v45, %v6787_v45  ;;  %v6810_v7 = vcombine.high %v6794_v19, %v6794_v19 }
 0x1d6   : > { %19015 = vst [vmem:[#allocation301_spill] sm:$0xff] %v15523_v63  ;;  %19016 = vst [vmem:[#allocation302_spill] sm:$0xff] %v15527_v23  ;;  %v15530_v1 = vmul.f32 %v14541_v10, %v9178_v21  ;;  %v15533_v2 = vmul.f32 %v14783_v49, %v9178_v21  ;;  %v6811_v4 = vcombine.high %v6801_v51, %v6801_v51 }
 0x1d7   : > { %v9353_v62 = vmul.f32 %v8622_v55, %v6787_v45  ;;  %v6812_v63 = vcombine.high %v6808_v47, %v6808_v47  ;;  %v9354_v0 = vmul.f32 %v8626_v36, %v6801_v51  ;;  %v9357_v5 = vmul.f32 %v8638_v43, %v6808_v47 }
 0x1d8   : > { %19017 = vst [vmem:[#allocation303_spill] sm:$0xff] %v15530_v1  ;;  %19018 = vst [vmem:[#allocation304_spill] sm:$0xff] %v15533_v2  ;;  %v9355_v28 = vmul.f32 %v8630_v16, %v6809_v59  ;;  %v9356_v61 = vmul.f32 %v8634_v46, %v6811_v4  ;;  %v9358_v44 = vmul.f32 %v8642_v48, %v6810_v7  ;;  %v15545_v2 = vpop.f32.mrf.mxu1 }
 0x1d9   : > { %v15537_v42 = vmul.f32 %v15285_v24, %v9353_v62  ;;  %v9359_v23 = vmul.f32 %v8646_v29, %v6812_v63  ;;  %v15540_v21 = vmul.f32 %v15424_v31, %v9354_v0  ;;  %v15543_v8 = vmul.f32 %v15278_v3, %v9357_v5  ;;  %19022 = vst [vmem:[#allocation308_spill] sm:$0xff] %v15545_v2 }
 0x1da   : > { %v5628_v19 = vcombine.high %v5164_v34, %v5164_v34  ;;  %v15548_v45 = vmul.f32 %v15372_v6, %v9355_v28  ;;  %v15551_v43 = vmul.f32 %v15428_v26, %v9356_v61  ;;  %v15554_v55 = vmul.f32 %v15288_v22, %v9358_v44  ;;  %v12718_v54 = vpop.f32.mrf.mxu1 }
 0x1db   : > { %19019 = vst [vmem:[#allocation305_spill] sm:$0xff] %v15537_v42  ;;  %19020 = vst [vmem:[#allocation306_spill] sm:$0xff] %v15540_v21  ;;  %v5635_v29 = vrot.slane %v5164_v34, %v12982_v12  ;;  %v15558_v36 = vmul.f32 %v15292_v60, %v9359_v23  ;;  %v7934_v46 = vrot.slane %v19000_v39, %v13086_v30 }
 0x1dc   : > { %19021 = vst [vmem:[#allocation307_spill] sm:$0xff] %v15543_v8  ;;  %19023 = vst [vmem:[#allocation309_spill] sm:$0xff] %v15548_v45  ;;  %v5642_v16 = vrot.slane %v5628_v19, %v12982_v12  ;;  %v7938_v48 = vrot.slane %v19000_v39, %v14103_v13  ;;  %v7942_v4 = vrot.slane %v19000_v39, %v13126_v25  ;;  %v19042_v8 = vld [vmem:[#allocation58_spill] sm:$0xff] }
 0x1dd   : > { %19024 = vst [vmem:[#allocation310_spill] sm:$0xff] %v15551_v43  ;;  %19025 = vst [vmem:[#allocation311_spill] sm:$0xff] %v15554_v55  ;;  %v5643_v62 = vcombine.high %v5635_v29, %v5635_v29  ;;  %v5651_v0 = vrot.slane %v5635_v29, %v12982_v12  ;;  %v7946_v34 = vrot.slane %v19000_v39, %v18852_v32  ;;  %v19045_v45 = vld [vmem:[#allocation178_spill] sm:$0xff] }
 0x1de   : > { %19026 = vst [vmem:[#allocation312_spill] sm:$0xff] %v15558_v36  ;;  %v5644_v63 = vcombine.high %v5642_v16, %v5642_v16  ;;  %v5658_v51 = vrot.slane %v5642_v16, %v12982_v12  ;;  %v7950_v23 = vrot.slane %v19000_v39, %v18853_v40  ;;  %v7954_v47 = vrot.slane %v19000_v39, %v18854_v38 }
 0x1df   : > { %v5665_v59 = vrot.slane %v5643_v62, %v12982_v12  ;;  %v5673_v7 = vcombine.high %v5651_v0, %v5651_v0  ;;  %v19027_v5 = vrot.slane %v19000_v39, %v13194_v20  ;;  %v5119_v61 = vadd.f32 %v15163_v33, %v14742_v57  ;;  %v19032_v39 = vld [vmem:[#allocation134_spill] sm:$0xff] }
 0x1e0   : > { %v5672_v44 = vrot.slane %v5644_v63, %v12982_v12  ;;  %v5674_v19 = vcombine.high %v5658_v51, %v5658_v51  ;;  %v15584_v29 = vmul.f32 %v7946_v34, %v5658_v51  ;;  %v8650_v16 = vrot.slane %v19002_v52, %v14103_v13 }
 0x1e1   : > { %v15579_v28 = vmul.f32 %v19027_v5, %v5651_v0  ;;  %v5675_v54 = vcombine.high %v5665_v59, %v5665_v59  ;;  %v15588_v36 = vmul.f32 %v7934_v46, %v5665_v59  ;;  %v15590_v62 = vmul.f32 %v7938_v48, %v5673_v7  ;;  %v19039_v59 = vld [vmem:[#allocation62_spill] sm:$0xff] }
 0x1e2   : > { %19029 = vst [vmem:[#allocation314_spill] sm:$0xff] %v15584_v29  ;;  %v5676_v5 = vcombine.high %v5672_v44, %v5672_v44  ;;  %v15596_v55 = vmul.f32 %v7950_v23, %v5672_v44  ;;  %v15598_v57 = vmul.f32 %v7954_v47, %v5674_v19  ;;  %v15602_v34 = vmul.f32 %v14749_v53, %v15584_v29 }
 0x1e3   : > { %19028 = vst [vmem:[#allocation313_spill] sm:$0xff] %v15579_v28  ;;  %19030 = vst [vmem:[#allocation315_spill] sm:$0xff] %v15588_v36  ;;  %v15594_v0 = vmul.f32 %v19032_v39, %v15579_v28  ;;  %v15604_v63 = vmul.f32 %v7942_v4, %v5675_v54  ;;  %v15608_v46 = vmul.f32 %v14595_v50, %v15590_v62  ;;  %v5189_v48 = vmax.f32 %v5119_v61, 0.0 }
 0x1e4   : > { %19031 = vst [vmem:[#allocation316_spill] sm:$0xff] %v15590_v62  ;;  %19034 = vst [vmem:[#allocation318_spill] sm:$0xff] %v15596_v55  ;;  %v8654_v51 = vrot.slane %v19002_v52, %v13126_v25  ;;  %v19040_v23 = vrot.slane %v19039_v59, %v13754_v58  ;;  %v15617_v47 = vmul.f32 %v14779_v56, %v15598_v57 }
 0x1e5   : > { %19033 = vst [vmem:[#allocation317_spill] sm:$0xff] %v15594_v0  ;;  %19035 = vst [vmem:[#allocation319_spill] sm:$0xff] %v15598_v57  ;;  %v8658_v4 = vrot.slane %v19002_v52, %v18852_v32  ;;  %v8662_v44 = vrot.slane %v19002_v52, %v18853_v40  ;;  %v6813_v19 = vcombine.high %v5189_v48, %v5189_v48 }
 0x1e6   : > { %19036 = vst [vmem:[#allocation320_spill] sm:$0xff] %v15602_v34  ;;  %19037 = vst [vmem:[#allocation321_spill] sm:$0xff] %v15604_v63  ;;  %v9187_v7 = vmul.f32 %v19040_v23, %v5676_v5  ;;  %v6820_v61 = vrot.slane %v5189_v48, %v12982_v12  ;;  %v8666_v54 = vrot.slane %v19002_v52, %v18854_v38 }
 0x1e7   : > { %19038 = vst [vmem:[#allocation322_spill] sm:$0xff] %v15608_v46  ;;  %19041 = vst [vmem:[#allocation62_spill] sm:$0xff] %v15617_v47  ;;  %v8670_v59 = vrot.slane %v19042_v8, %v13754_v58  ;;  %v8674_v43 = vrot.slane %v19042_v8, %v13194_v20  ;;  %v4999_v21 = vadd.f32 %v15163_v33, %v19045_v45  ;;  %v19046_v47 = vld [vmem:[#allocation257_spill] sm:$0xff] }
 0x1e8   : > { %v15629_v5 = vmul.f32 %v14541_v10, %v9187_v7  ;;  %v15632_v23 = vmul.f32 %v14783_v49, %v9187_v7  ;;  %v6827_v48 = vrot.slane %v6813_v19, %v12982_v12  ;;  %v6828_v42 = vcombine.high %v6820_v61, %v6820_v61 }
 0x1e9   : > { %v6836_v52 = vrot.slane %v6820_v61, %v12982_v12  ;;  %v7962_v34 = vrot.slane %v19046_v47, %v13754_v58  ;;  %v5165_v46 = vmax.f32 %v4999_v21, 0.0  ;;  %v7966_v10 = vrot.slane %v19046_v47, %v13194_v20  ;;  %v15650_v61 = vpop.f32.mrf.mxu0 }
 0x1ea   : > { %19043 = vst [vmem:[#allocation58_spill] sm:$0xff] %v15629_v5  ;;  %19044 = vst [vmem:[#allocation323_spill] sm:$0xff] %v15632_v23  ;;  %v7970_v7 = vrot.slane %v19046_v47, %v13086_v30  ;;  %v7974_v23 = vrot.slane %v19046_v47, %v14103_v13  ;;  %v6829_v0 = vcombine.high %v6827_v48, %v6827_v48 }
 0x1eb   : > { %v6843_v45 = vrot.slane %v6827_v48, %v12982_v12  ;;  %v6850_v19 = vrot.slane %v6828_v42, %v12982_v12  ;;  %v6858_v5 = vcombine.high %v6836_v52, %v6836_v52  ;;  %19047 = vst [vmem:[#allocation178_spill] sm:$0xff] %v15650_v61  ;;  %v9360_v57 = vmul.f32 %v8650_v16, %v6836_v52  ;;  %v12646_v56 = vpop.f32.mrf.mxu0 }
 0x1ec   : > { %v5677_v55 = vcombine.high %v5165_v46, %v5165_v46  ;;  %v5684_v21 = vrot.slane %v5165_v46, %v12982_v12  ;;  %v7978_v29 = vrot.slane %v19046_v47, %v13126_v25  ;;  %v6857_v63 = vrot.slane %v6829_v0, %v12982_v12 }
 0x1ed   : > { %v6859_v62 = vcombine.high %v6843_v45, %v6843_v45  ;;  %v6860_v36 = vcombine.high %v6850_v19, %v6850_v19  ;;  %v9361_v28 = vmul.f32 %v8654_v51, %v6850_v19  ;;  %v9362_v1 = vmul.f32 %v8658_v4, %v6858_v5 }
 0x1ee   : > { %v9364_v48 = vmul.f32 %v8666_v54, %v6843_v45  ;;  %v15657_v42 = vmul.f32 %v15308_v9, %v9360_v57  ;;  %v5691_v17 = vrot.slane %v5677_v55, %v12982_v12  ;;  %v6861_v16 = vcombine.high %v6857_v63, %v6857_v63 }
 0x1ef   : > { %v9363_v52 = vmul.f32 %v8662_v44, %v6860_v36  ;;  %v9365_v41 = vmul.f32 %v8670_v59, %v6859_v62  ;;  %v15661_v46 = vmul.f32 %v15285_v24, %v9361_v28  ;;  %v15664_v11 = vmul.f32 %v15424_v31, %v9362_v1 }
 0x1f0   : > { %19048 = vst [vmem:[#allocation257_spill] sm:$0xff] %v15657_v42  ;;  %v15667_v0 = vmul.f32 %v15428_v26, %v9364_v48  ;;  %v5692_v56 = vcombine.high %v5684_v21, %v5684_v21  ;;  %v5693_v51 = vcombine.high %v5691_v17, %v5691_v17  ;;  %v9366_v4 = vmul.f32 %v8674_v43, %v6861_v16 }
 0x1f1   : > { %19049 = vst [vmem:[#allocation324_spill] sm:$0xff] %v15661_v46  ;;  %19050 = vst [vmem:[#allocation325_spill] sm:$0xff] %v15664_v11  ;;  %v15670_v57 = vmul.f32 %v15372_v6, %v9363_v52  ;;  %v15673_v55 = vmul.f32 %v15278_v3, %v9365_v41  ;;  %v5700_v36 = vrot.slane %v5684_v21, %v12982_v12  ;;  %v15688_v52 = vpop.f32.mrf.mxu1 }
 0x1f2   : > { %19051 = vst [vmem:[#allocation326_spill] sm:$0xff] %v15667_v0  ;;  %v5707_v28 = vrot.slane %v5691_v17, %v12982_v12  ;;  %v5714_v62 = vrot.slane %v5692_v56, %v12982_v12  ;;  %v5721_v1 = vrot.slane %v5693_v51, %v12982_v12  ;;  %v7982_v63 = vrot.slane %v19046_v47, %v18852_v32 }
 0x1f3   : > { %19052 = vst [vmem:[#allocation327_spill] sm:$0xff] %v15670_v57  ;;  %19053 = vst [vmem:[#allocation328_spill] sm:$0xff] %v15673_v55  ;;  %v15682_v44 = vmul.f32 %v15288_v22, %v9366_v4  ;;  %v5722_v43 = vcombine.high %v5700_v36, %v5700_v36  ;;  %v7986_v54 = vrot.slane %v19046_v47, %v18853_v40 }
 0x1f4   : > { %v7990_v41 = vrot.slane %v19046_v47, %v18854_v38  ;;  %v5723_v59 = vcombine.high %v5707_v28, %v5707_v28  ;;  %v5724_v5 = vcombine.high %v5714_v62, %v5714_v62  ;;  %v5725_v17 = vcombine.high %v5721_v1, %v5721_v1  ;;  %19055 = vst [vmem:[#allocation330_spill] sm:$0xff] %v15688_v52  ;;  %v15961_v52 = vld [vmem:[%s18219_s5] ss:$0 sm:$0xff] }
 0x1f5   : > { %19054 = vst [vmem:[#allocation329_spill] sm:$0xff] %v15682_v44  ;;  %v9188_v45 = vmul.f32 %v7962_v34, %v5700_v36  ;;  %v9189_v19 = vmul.f32 %v7966_v10, %v5714_v62  ;;  %v9190_v21 = vmul.f32 %v7970_v7, %v5722_v43  ;;  %v9192_v48 = vmul.f32 %v7978_v29, %v5707_v28  ;;  %v12721_v10 = vpop.f32.mrf.mxu1  ;;  %v19064_v36 = vld [vmem:[#allocation147_spill] sm:$0xff]  ;;  %v19066_v62 = vld [vmem:[#allocation149_spill] sm:$0xff] }
 0x1f6   : > { %v9193_v16 = vmul.f32 %v7982_v63, %v5721_v1  ;;  %v9191_v56 = vmul.f32 %v7974_v23, %v5724_v5  ;;  %v9194_v51 = vmul.f32 %v7986_v54, %v5723_v59  ;;  %v15690_v4 = vmul.f32 %v7990_v41, %v5725_v17  ;;  %v19068_v63 = vld [vmem:[#allocation151_spill] sm:$0xff]  ;;  %v19072_v59 = vld [vmem:[#allocation148_spill] sm:$0xff]  ;;  %v19074_v17 = vld [vmem:[#allocation150_spill] sm:$0xff] }
 0x1f7   : > { %v15693_v44 = vmul.f32 %v14567_v27, %v9188_v45  ;;  %v15696_v55 = vmul.f32 %v19032_v39, %v9189_v19  ;;  %v15699_v47 = vmul.f32 %v14753_v14, %v9190_v21  ;;  %v15702_v34 = vmul.f32 %v18857_v15, %v9192_v48  ;;  %v19070_v54 = vld [vmem:[#allocation155_spill] sm:$0xff] }
 0x1f8   : > { %19056 = vst [vmem:[#allocation331_spill] sm:$0xff] %v15690_v4  ;;  %v15705_v29 = vmul.f32 %v14749_v53, %v9193_v16  ;;  %v15708_v23 = vmul.f32 %v14595_v50, %v9191_v56  ;;  %v15711_v7 = vmul.f32 %v14898_v18, %v9194_v51  ;;  %v15714_v28 = vmul.f32 %v19064_v36, %v9189_v19  ;;  %v19076_v10 = vld [vmem:[#allocation175_spill] sm:$0xff]  ;;  %v15778_v36 = vpop.f32.mrf.mxu0 }
 0x1f9   : > { %19057 = vst [vmem:[#allocation332_spill] sm:$0xff] %v15693_v44  ;;  %19058 = vst [vmem:[#allocation333_spill] sm:$0xff] %v15696_v55  ;;  %v15717_v1 = vmul.f32 %v19066_v62, %v9190_v21  ;;  %v15720_v43 = vmul.f32 %v19068_v63, %v9191_v56  ;;  %v15723_v41 = vmul.f32 %v19070_v54, %v9192_v48  ;;  %v19078_v19 = vld [vmem:[#allocation199_spill] sm:$0xff] }
 0x1fa   : > { %19059 = vst [vmem:[#allocation334_spill] sm:$0xff] %v15699_v47  ;;  %19060 = vst [vmem:[#allocation335_spill] sm:$0xff] %v15702_v34  ;;  %v15726_v5 = vmul.f32 %v19072_v59, %v9193_v16  ;;  %v15729_v45 = vmul.f32 %v19074_v17, %v9194_v51  ;;  %v15733_v0 = vmul.f32 %v19076_v10, %v15690_v4  ;;  %v19080_v4 = vld [vmem:[#allocation209_spill] sm:$0xff]  ;;  %v19082_v34 = vld [vmem:[#allocation250_spill] sm:$0xff]  ;;  %v12649_v63 = vpop.f32.mrf.mxu0 }
 0x1fb   : > { %19061 = vst [vmem:[#allocation336_spill] sm:$0xff] %v15705_v29  ;;  %19062 = vst [vmem:[#allocation337_spill] sm:$0xff] %v15708_v23  ;;  %v5124_v21 = vadd.f32 %v15163_v33, %v19078_v19  ;;  %v8678_v56 = vrot.slane %v19042_v8, %v13086_v30  ;;  %v8682_v48 = vrot.slane %v19042_v8, %v14103_v13  ;;  %v19079_v19 = vld [vmem:[#allocation162_spill] sm:$0xff] }
 0x1fc   : > { %19063 = vst [vmem:[#allocation338_spill] sm:$0xff] %v15711_v7  ;;  %19065 = vst [vmem:[#allocation339_spill] sm:$0xff] %v15714_v28  ;;  %v8686_v16 = vrot.slane %v19042_v8, %v13126_v25  ;;  %v8690_v51 = vrot.slane %v19042_v8, %v18852_v32  ;;  %v8694_v57 = vrot.slane %v19042_v8, %v18853_v40  ;;  %v19083_v47 = vld [vmem:[#allocation226_spill] sm:$0xff] }
 0x1fd   : > { %19067 = vst [vmem:[#allocation340_spill] sm:$0xff] %v15717_v1  ;;  %19069 = vst [vmem:[#allocation341_spill] sm:$0xff] %v15720_v43  ;;  %v8698_v11 = vrot.slane %v19042_v8, %v18854_v38  ;;  %v5190_v46 = vmax.f32 %v5124_v21, 0.0  ;;  %v8702_v42 = vrot.slane %v19079_v19, %v13754_v58  ;;  %v9638_v23 = vrot.slane %v19082_v34, %v13194_v20 }
 0x1fe   : > { %19071 = vst [vmem:[#allocation342_spill] sm:$0xff] %v15723_v41  ;;  %19073 = vst [vmem:[#allocation343_spill] sm:$0xff] %v15726_v5  ;;  %v5129_v55 = vadd.f32 %v15163_v33, %v19083_v47 }
 0x1ff   : > { %19075 = vst [vmem:[#allocation344_spill] sm:$0xff] %v15729_v45  ;;  %19077 = vst [vmem:[#allocation345_spill] sm:$0xff] %v15733_v0  ;;  %v5004_v0 = vadd.f32 %v15163_v33, %v19080_v4  ;;  %v19081_v45 = vld [vmem:[#allocation20_spill] sm:$0xff]  ;;  %v6862_v21 = vcombine.high %v5190_v46, %v5190_v46  ;;  %v6869_v28 = vrot.slane %v5190_v46, %v12982_v12 }
 0x200   : > { %v7998_v5 = vrot.slane %v19081_v45, %v13754_v58  ;;  %v8002_v41 = vrot.slane %v19081_v45, %v13194_v20  ;;  %v8006_v43 = vrot.slane %v19081_v45, %v13086_v30  ;;  %v8010_v1 = vrot.slane %v19081_v45, %v14103_v13  ;;  %19084 = vst [vmem:[#allocation199_spill] sm:$0xff] %v15778_v36 }
 0x201   : > { %v8014_v8 = vrot.slane %v19081_v45, %v13126_v25  ;;  %v5166_v7 = vmax.f32 %v5004_v0, 0.0  ;;  %v8018_v4 = vrot.slane %v19081_v45, %v18852_v32  ;;  %v8022_v29 = vrot.slane %v19081_v45, %v18853_v40 }
 0x202   : > { %v6876_v27 = vrot.slane %v6862_v21, %v12982_v12  ;;  %v6877_v62 = vcombine.high %v6869_v28, %v6869_v28  ;;  %v6885_v46 = vrot.slane %v6869_v28, %v12982_v12  ;;  %v9640_v50 = vcombine.high %v9638_v23, %v9638_v23 }
 0x203   : > { %v5726_v0 = vcombine.high %v5166_v7, %v5166_v7  ;;  %v5733_v53 = vrot.slane %v5166_v7, %v12982_v12  ;;  %v9647_v39 = vrot.slane %v9638_v23, %v12982_v12  ;;  %v5191_v37 = vmax.f32 %v5129_v55, 0.0 }
 0x204   : > { %v6878_v10 = vcombine.high %v6876_v27, %v6876_v27  ;;  %v6892_v47 = vrot.slane %v6876_v27, %v12982_v12  ;;  %v6899_v17 = vrot.slane %v6877_v62, %v12982_v12  ;;  %v6907_v44 = vcombine.high %v6885_v46, %v6885_v46 }
 0x205   : > { %v9367_v59 = vmul.f32 %v8678_v56, %v6885_v46  ;;  %v5740_v21 = vrot.slane %v5726_v0, %v12982_v12  ;;  %v5741_v54 = vcombine.high %v5733_v53, %v5733_v53  ;;  %v5749_v28 = vrot.slane %v5733_v53, %v12982_v12 }
 0x206   : > { %v6906_v7 = vrot.slane %v6878_v10, %v12982_v12  ;;  %v6908_v18 = vcombine.high %v6899_v17, %v6899_v17  ;;  %v9368_v23 = vmul.f32 %v8682_v48, %v6899_v17  ;;  %v9369_v55 = vmul.f32 %v8686_v16, %v6907_v44 }
 0x207   : > { %v9371_v15 = vmul.f32 %v8694_v57, %v6892_v47  ;;  %v15786_v14 = vmul.f32 %v15292_v60, %v9367_v59  ;;  %v5742_v27 = vcombine.high %v5740_v21, %v5740_v21  ;;  %v5756_v62 = vrot.slane %v5740_v21, %v12982_v12 }
 0x208   : > { %v6909_v36 = vcombine.high %v6906_v7, %v6906_v7  ;;  %v9370_v56 = vmul.f32 %v8690_v51, %v6908_v18  ;;  %v9372_v46 = vmul.f32 %v8698_v11, %v6906_v7  ;;  %v15790_v0 = vmul.f32 %v15308_v9, %v9368_v23  ;;  %v19091_v51 = vld [vmem:[#allocation271_spill] sm:$0xff] }
 0x209   : > { %19085 = vst [vmem:[#allocation162_spill] sm:$0xff] %v15786_v14  ;;  %v15793_v53 = vmul.f32 %v15285_v24, %v9369_v55  ;;  %v15796_v63 = vmul.f32 %v15372_v6, %v9371_v15  ;;  %v5763_v57 = vrot.slane %v5741_v54, %v12982_v12  ;;  %v5770_v44 = vrot.slane %v5742_v27, %v12982_v12 }
 0x20a   : > { %19086 = vst [vmem:[#allocation209_spill] sm:$0xff] %v15790_v0  ;;  %v9373_v59 = vmul.f32 %v8702_v42, %v6909_v36  ;;  %v15801_v17 = vmul.f32 %v15424_v31, %v9370_v56  ;;  %v15804_v18 = vmul.f32 %v15428_v26, %v9372_v46  ;;  %v5771_v11 = vcombine.high %v5749_v28, %v5749_v28 }
 0x20b   : > { %19087 = vst [vmem:[#allocation20_spill] sm:$0xff] %v15793_v53  ;;  %19088 = vst [vmem:[#allocation250_spill] sm:$0xff] %v15796_v63  ;;  %v5772_v10 = vcombine.high %v5756_v62, %v5756_v62  ;;  %v5773_v48 = vcombine.high %v5763_v57, %v5763_v57  ;;  %v5774_v16 = vcombine.high %v5770_v44, %v5770_v44 }
 0x20c   : > { %19089 = vst [vmem:[#allocation226_spill] sm:$0xff] %v15801_v17  ;;  %19090 = vst [vmem:[#allocation346_spill] sm:$0xff] %v15804_v18  ;;  %v19092_v47 = vrot.slane %v19091_v51, %v13754_v58  ;;  %v15810_v21 = vmul.f32 %v15278_v3, %v9373_v59  ;;  %v9197_v54 = vmul.f32 %v7998_v5, %v5763_v57  ;;  %v19103_v51 = vld [vmem:[#allocation76_spill] sm:$0xff] }
 0x20d   : > { %v9198_v7 = vmul.f32 %v8002_v41, %v5771_v11  ;;  %v9200_v42 = vmul.f32 %v8010_v1, %v5756_v62  ;;  %v9199_v36 = vmul.f32 %v8006_v43, %v5773_v48  ;;  %v9201_v23 = vmul.f32 %v8014_v8, %v5770_v44 }
 0x20e   : > { %v9196_v15 = vmul.f32 %v19092_v47, %v5749_v28  ;;  %19093 = vst [vmem:[#allocation271_spill] sm:$0xff] %v15810_v21  ;;  %v9202_v55 = vmul.f32 %v8018_v4, %v5772_v10  ;;  %v9203_v27 = vmul.f32 %v8022_v29, %v5774_v16  ;;  %v9654_v56 = vrot.slane %v9640_v50, %v12982_v12  ;;  %v15819_v28 = vpop.f32.mrf.mxu0 }
 0x20f   : > { %v9655_v46 = vcombine.high %v9647_v39, %v9647_v39  ;;  %v15814_v63 = vrot.slane %v9647_v39, %v12982_v12  ;;  %19096 = vst [vmem:[#allocation349_spill] sm:$0xff] %v15819_v28  ;;  %v6910_v59 = vcombine.high %v5191_v37, %v5191_v37  ;;  %v6917_v5 = vrot.slane %v5191_v37, %v12982_v12 }
 0x210   : > { %v15817_v18 = vmul.f32 %v14783_v49, %v9196_v15  ;;  %v8710_v1 = vrot.slane %v19079_v19, %v13086_v30  ;;  %v8714_v29 = vrot.slane %v19079_v19, %v14103_v13  ;;  %v9656_v43 = vcombine.high %v9654_v56, %v9654_v56  ;;  %v12652_v41 = vpop.f32.mrf.mxu0 }
 0x211   : > { %19094 = vst [vmem:[#allocation347_spill] sm:$0xff] %v15814_v63  ;;  %v15827_v50 = vrot.slane %v9654_v56, %v12982_v12  ;;  %v15830_v39 = vrot.slane %v9655_v46, %v12982_v12  ;;  %v15834_v49 = vcombine.high %v15814_v63, %v15814_v63  ;;  %v9697_v37 = vmul.f32 %v15814_v63, %v9197_v54 }
 0x212   : > { %19095 = vst [vmem:[#allocation348_spill] sm:$0xff] %v15817_v18  ;;  %v6924_v8 = vrot.slane %v6910_v59, %v12982_v12  ;;  %v6925_v4 = vcombine.high %v6917_v5, %v6917_v5  ;;  %v6933_v62 = vrot.slane %v6917_v5, %v12982_v12  ;;  %v15840_v57 = vrot.slane %v9656_v43, %v12982_v12  ;;  %v19106_v59 = vld [vmem:[#allocation77_spill] sm:$0xff]  ;;  %v19107_v43 = vld [vmem:[#allocation80_spill] sm:$0xff] }
 0x213   : > { %19097 = vst [vmem:[#allocation350_spill] sm:$0xff] %v15827_v50  ;;  %19098 = vst [vmem:[#allocation351_spill] sm:$0xff] %v15830_v39  ;;  %v15844_v44 = vcombine.high %v15827_v50, %v15827_v50  ;;  %v15848_v11 = vcombine.high %v15830_v39, %v15830_v39  ;;  %v9698_v10 = vmul.f32 %v15830_v39, %v9198_v7  ;;  %v19109_v7 = vld [vmem:[#allocation81_spill] sm:$0xff] }
 0x214   : > { %19099 = vst [vmem:[#allocation352_spill] sm:$0xff] %v15834_v49  ;;  %19100 = vst [vmem:[#allocation353_spill] sm:$0xff] %v15840_v57  ;;  %v9699_v48 = vmul.f32 %v15834_v49, %v9199_v36  ;;  %v9701_v16 = vmul.f32 %v15827_v50, %v9201_v23  ;;  %v15854_v47 = vadd.f32 %v9697_v37, %v19103_v51  ;;  %v19111_v51 = vld [vmem:[#allocation83_spill] sm:$0xff] }
 0x215   : > { %19101 = vst [vmem:[#allocation354_spill] sm:$0xff] %v15844_v44  ;;  %19102 = vst [vmem:[#allocation355_spill] sm:$0xff] %v15848_v11  ;;  %v6926_v15 = vcombine.high %v6924_v8, %v6924_v8  ;;  %v9700_v54 = vmul.f32 %v15848_v11, %v9200_v42  ;;  %v9702_v56 = vmul.f32 %v15840_v57, %v9202_v55  ;;  %v19112_v42 = vld [vmem:[#allocation82_spill] sm:$0xff]  ;;  %v19114_v55 = vld [vmem:[#allocation93_spill] sm:$0xff] }
 0x216   : > { %19104 = vst [vmem:[#allocation76_spill] sm:$0xff] %v15854_v47  ;;  %v15859_v46 = vmul.f32 %v15844_v44, %v9203_v27  ;;  %v9762_v5 = vadd.f32 %v9698_v10, %v19106_v59  ;;  %v15863_v41 = vadd.f32 %v9699_v48, %v19107_v43  ;;  %v15866_v36 = vadd.f32 %v9701_v16, %v19109_v7  ;;  %v19116_v7 = vld [vmem:[#allocation97_spill] sm:$0xff] }
 0x217   : > { %v6940_v23 = vrot.slane %v6924_v8, %v12982_v12  ;;  %v6947_v37 = vrot.slane %v6925_v4, %v12982_v12  ;;  %v9764_v21 = vadd.f32 %v9700_v54, %v19111_v51  ;;  %v15872_v17 = vadd.f32 %v9702_v56, %v19112_v42  ;;  %v19138_v47 = vld [vmem:[#allocation69_spill] sm:$0xff] }
 0x218   : > { %19105 = vst [vmem:[#allocation356_spill] sm:$0xff] %v15859_v46  ;;  %19108 = vst [vmem:[#allocation77_spill] sm:$0xff] %v15863_v41  ;;  %v15875_v27 = vadd.f32 %v19114_v55, %v9762_v5  ;;  %v6954_v10 = vrot.slane %v6926_v15, %v12982_v12  ;;  %v6955_v59 = vcombine.high %v6933_v62, %v6933_v62  ;;  %v19137_v41 = vld [vmem:[#allocation140_spill] sm:$0xff] }
 0x219   : > { %19110 = vst [vmem:[#allocation80_spill] sm:$0xff] %v15866_v36  ;;  %19113 = vst [vmem:[#allocation81_spill] sm:$0xff] %v15872_v17  ;;  %v6956_v48 = vcombine.high %v6940_v23, %v6940_v23  ;;  %v6957_v43 = vcombine.high %v6947_v37, %v6947_v37  ;;  %v8718_v16 = vrot.slane %v19079_v19, %v13126_v25 }
 0x21a   : > { %19115 = vst [vmem:[#allocation83_spill] sm:$0xff] %v15875_v27  ;;  %v15881_v8 = vadd.f32 %v19116_v7, %v9764_v21  ;;  %v8722_v4 = vrot.slane %v19079_v19, %v18852_v32  ;;  %v8726_v54 = vrot.slane %v19079_v19, %v18853_v40  ;;  %v8730_v56 = vrot.slane %v19079_v19, %v18854_v38  ;;  %v19119_v7 = vld [vmem:[#allocation78_spill] sm:$0xff] }
 0x21b   : > { %v19118_v15 = vrot.slane %v19079_v19, %v13194_v20  ;;  %v9375_v51 = vmul.f32 %v8710_v1, %v6947_v37  ;;  %v9376_v42 = vmul.f32 %v8714_v29, %v6955_v59  ;;  %v9377_v55 = vmul.f32 %v8718_v16, %v6957_v43  ;;  %v19127_v37 = vld [vmem:[#allocation24_spill] sm:$0xff]  ;;  %v19128_v16 = vld [vmem:[#allocation71_spill] sm:$0xff] }
 0x21c   : > { %19117 = vst [vmem:[#allocation82_spill] sm:$0xff] %v15881_v8  ;;  %v9378_v53 = vmul.f32 %v8722_v4, %v6940_v23  ;;  %v9379_v0 = vmul.f32 %v8726_v54, %v6954_v10  ;;  %v9380_v21 = vmul.f32 %v8730_v56, %v6956_v48  ;;  %v5009_v14 = vadd.f32 %v15163_v33, %v19119_v7  ;;  %v19130_v54 = vld [vmem:[#allocation135_spill] sm:$0xff]  ;;  %v19131_v56 = vld [vmem:[#allocation70_spill] sm:$0xff] }
 0x21d   : > { %v9374_v5 = vmul.f32 %v19118_v15, %v6933_v62  ;;  %v15898_v46 = vmul.f32 %v15292_v60, %v9375_v51  ;;  %v15901_v18 = vmul.f32 %v15308_v9, %v9376_v42  ;;  %v15904_v19 = vmul.f32 %v15285_v24, %v9377_v55  ;;  %v19133_v51 = vld [vmem:[#allocation72_spill] sm:$0xff]  ;;  %v19136_v8 = vld [vmem:[#allocation79_spill] sm:$0xff] }
 0x21e   : > { %v15907_v1 = vmul.f32 %v15424_v31, %v9378_v53  ;;  %v15910_v29 = vmul.f32 %v15372_v6, %v9379_v0  ;;  %v15913_v33 = vmul.f32 %v15428_v26, %v9380_v21  ;;  %v5167_v62 = vmax.f32 %v5009_v14, 0.0 }
 0x21f   : > { %v15895_v17 = vmul.f32 %v15288_v22, %v9374_v5  ;;  %19121 = vst [vmem:[#allocation97_spill] sm:$0xff] %v15898_v46  ;;  %19122 = vst [vmem:[#allocation78_spill] sm:$0xff] %v15901_v18  ;;  %v8026_v23 = vrot.slane %v19081_v45, %v18854_v38  ;;  %v8030_v10 = vrot.slane %v19127_v37, %v13754_v58  ;;  %v19132_v5 = vld [vmem:[#allocation139_spill] sm:$0xff]  ;;  %v19141_v18 = vld [vmem:[#allocation89_spill] sm:$0xff] }
 0x220   : > { %19123 = vst [vmem:[#allocation357_spill] sm:$0xff] %v15904_v19  ;;  %19124 = vst [vmem:[#allocation358_spill] sm:$0xff] %v15907_v1  ;;  %v8034_v59 = vrot.slane %v19127_v37, %v13194_v20  ;;  %v8038_v53 = vrot.slane %v19127_v37, %v13086_v30  ;;  %v5775_v48 = vcombine.high %v5167_v62, %v5167_v62 }
 0x221   : > { %19120 = vst [vmem:[#allocation93_spill] sm:$0xff] %v15895_v17  ;;  %19125 = vst [vmem:[#allocation359_spill] sm:$0xff] %v15910_v29  ;;  %v5782_v0 = vrot.slane %v5167_v62, %v12982_v12  ;;  %v8042_v43 = vrot.slane %v19127_v37, %v14103_v13  ;;  %v8046_v14 = vrot.slane %v19127_v37, %v13126_v25  ;;  %v19134_v62 = vld [vmem:[#allocation136_spill] sm:$0xff]  ;;  %v19135_v17 = vld [vmem:[#allocation75_spill] sm:$0xff] }
 0x222   : > { %19126 = vst [vmem:[#allocation360_spill] sm:$0xff] %v15913_v33  ;;  %v8050_v45 = vrot.slane %v19127_v37, %v18852_v32  ;;  %v15932_v4 = vcombine.high %v19128_v16, %v19128_v16  ;;  %v9496_v15 = vmul.f32 %v19131_v56, %v19130_v54  ;;  %v9497_v42 = vmul.f32 %v19133_v51, %v19132_v5  ;;  %v19140_v5 = vld [vmem:[#allocation85_spill] sm:$0xff] }
 0x223   : > { %v5789_v55 = vrot.slane %v5775_v48, %v12982_v12  ;;  %v5790_v21 = vcombine.high %v5782_v0, %v5782_v0  ;;  %v5798_v7 = vrot.slane %v5782_v0, %v12982_v12  ;;  %v9498_v27 = vmul.f32 %v19135_v17, %v19134_v62 }
 0x224   : > { %19129 = vst [vmem:[#allocation24_spill] sm:$0xff] %v15932_v4  ;;  %v9494_v36 = vmul.f32 %v15932_v4, %v19136_v8  ;;  %v9499_v46 = vmul.f32 %v19138_v47, %v19137_v41  ;;  %v15948_v29 = vcombine.high %v15840_v57, %v15840_v57  ;;  %v9972_v19 = vmul.f32 %v19140_v5, %v19130_v54  ;;  %v19142_v47 = vld [vmem:[#allocation266_spill] sm:$0xff] }
 0x225   : > { %v5791_v48 = vcombine.high %v5789_v55, %v5789_v55  ;;  %v5805_v28 = vrot.slane %v5789_v55, %v12982_v12  ;;  %v5812_v0 = vrot.slane %v5790_v21, %v12982_v12  ;;  %v5820_v33 = vcombine.high %v5798_v7, %v5798_v7 }
 0x226   : > { %19139 = vst [vmem:[#allocation136_spill] sm:$0xff] %v15948_v29  ;;  %v9204_v1 = vmul.f32 %v8026_v23, %v5798_v7  ;;  %v9974_v8 = vmul.f32 %v19141_v18, %v19134_v62  ;;  %v11011_v41 = vrot.slane %v19082_v34, %v18854_v38  ;;  %v5134_v54 = vadd.f32 %v15961_v52, %v19142_v47 }
 0x227   : > { %v5819_v55 = vrot.slane %v5791_v48, %v12982_v12  ;;  %v5821_v61 = vcombine.high %v5805_v28, %v5805_v28  ;;  %v5822_v21 = vcombine.high %v5812_v0, %v5812_v0  ;;  %v9205_v2 = vmul.f32 %v8030_v10, %v5820_v33  ;;  %v19143_v10 = vld [vmem:[#allocation142_spill] sm:$0xff] }
 0x228   : > { %v9207_v23 = vmul.f32 %v8038_v53, %v5805_v28  ;;  %v9704_v7 = vmul.f32 %v15948_v29, %v9204_v1  ;;  %v11013_v62 = vcombine.high %v11011_v41, %v11011_v41  ;;  %v11020_v18 = vrot.slane %v11011_v41, %v12982_v12 }
 0x229   : > { %v5823_v34 = vcombine.high %v5819_v55, %v5819_v55  ;;  %v9206_v5 = vmul.f32 %v8034_v59, %v5822_v21  ;;  %v9208_v16 = vmul.f32 %v8042_v43, %v5819_v55  ;;  %v9209_v35 = vmul.f32 %v8046_v14, %v5821_v61  ;;  %v19144_v59 = vld [vmem:[#allocation137_spill] sm:$0xff] }
 0x22a   : > { %v9705_v44 = vmul.f32 %v15814_v63, %v9205_v2  ;;  %v9707_v17 = vmul.f32 %v15834_v49, %v9207_v23  ;;  %v9768_v47 = vadd.f32 %v9704_v7, %v9494_v36  ;;  %v11027_v48 = vrot.slane %v11013_v62, %v12982_v12 }
 0x22b   : > { %v9210_v51 = vmul.f32 %v8050_v45, %v5823_v34  ;;  %v9706_v33 = vmul.f32 %v15830_v39, %v9206_v5  ;;  %v9708_v28 = vmul.f32 %v15848_v11, %v9208_v16  ;;  %v9709_v1 = vmul.f32 %v15827_v50, %v9209_v35 }
 0x22c   : > { %v9769_v41 = vadd.f32 %v9705_v44, %v19143_v10  ;;  %v9771_v53 = vadd.f32 %v9707_v17, %v9497_v42  ;;  %v15976_v43 = vadd.f32 %v19144_v59, %v9768_v47  ;;  %v11028_v61 = vcombine.high %v11020_v18, %v11020_v18 }
 0x22d   : > { %v15979_v14 = vmul.f32 %v15840_v57, %v9210_v51  ;;  %v15981_v36 = vadd.f32 %v9706_v33, %v9496_v15  ;;  %v15983_v0 = vadd.f32 %v9708_v28, %v9498_v27  ;;  %v15985_v45 = vadd.f32 %v9709_v1, %v9499_v46  ;;  %v19155_v27 = vld [vmem:[#allocation179_spill] sm:$0xff] }
 0x22e   : > { %19145 = vst [vmem:[#allocation266_spill] sm:$0xff] %v15976_v43  ;;  %v15987_v55 = vadd.f32 %v9972_v19, %v9769_v41  ;;  %v15989_v21 = vadd.f32 %v9974_v8, %v9771_v53  ;;  %v11029_v7 = vcombine.high %v11027_v48, %v11027_v48  ;;  %v15992_v17 = vrot.slane %v11020_v18, %v12982_v12 }
 0x22f   : > { %19146 = vst [vmem:[#allocation142_spill] sm:$0xff] %v15979_v14  ;;  %19147 = vst [vmem:[#allocation137_spill] sm:$0xff] %v15981_v36  ;;  %v15995_v44 = vrot.slane %v11027_v48, %v12982_v12  ;;  %v15998_v42 = vrot.slane %v11028_v61, %v12982_v12  ;;  %v5192_v15 = vmax.f32 %v5134_v54, 0.0  ;;  %v8734_v62 = vrot.slane %v19155_v27, %v13754_v58  ;;  %v16055_v36 = vpop.f32.mrf.mxu0 }
 0x230   : > { %19148 = vst [vmem:[#allocation361_spill] sm:$0xff] %v15983_v0  ;;  %19149 = vst [vmem:[#allocation362_spill] sm:$0xff] %v15985_v45  ;;  %v16003_v46 = vrot.slane %v11029_v7, %v12982_v12  ;;  %v16007_v8 = vcombine.high %v15992_v17, %v15992_v17  ;;  %v16010_v18 = vmul.f32 %v15992_v17, %v9205_v2 }
 0x231   : > { %19150 = vst [vmem:[#allocation363_spill] sm:$0xff] %v15987_v55  ;;  %19151 = vst [vmem:[#allocation364_spill] sm:$0xff] %v15989_v21  ;;  %v8738_v19 = vrot.slane %v19155_v27, %v13194_v20  ;;  %v16016_v34 = vcombine.high %v15998_v42, %v15998_v42  ;;  %v16019_v54 = vmul.f32 %v15998_v42, %v9206_v5 }
 0x232   : > { %19152 = vst [vmem:[#allocation365_spill] sm:$0xff] %v15992_v17  ;;  %19153 = vst [vmem:[#allocation366_spill] sm:$0xff] %v15995_v44  ;;  %v16022_v47 = vmul.f32 %v15995_v44, %v9209_v35  ;;  %v6958_v48 = vcombine.high %v5192_v15, %v5192_v15  ;;  %v16025_v33 = vmul.f32 %v16007_v8, %v9207_v23 }
 0x233   : > { %19154 = vst [vmem:[#allocation367_spill] sm:$0xff] %v15998_v42  ;;  %19156 = vst [vmem:[#allocation179_spill] sm:$0xff] %v16003_v46  ;;  %v16028_v2 = vmul.f32 %v16003_v46, %v9210_v51  ;;  %v6965_v28 = vrot.slane %v5192_v15, %v12982_v12  ;;  %v8742_v1 = vrot.slane %v19155_v27, %v13086_v30  ;;  %v19165_v15 = vld [vmem:[#allocation276_spill] sm:$0xff] }
 0x234   : > { %19157 = vst [vmem:[#allocation368_spill] sm:$0xff] %v16007_v8  ;;  %19158 = vst [vmem:[#allocation369_spill] sm:$0xff] %v16010_v18  ;;  %v16034_v10 = vmul.f32 %v16016_v34, %v9208_v16  ;;  %v6972_v5 = vrot.slane %v6958_v48, %v12982_v12  ;;  %v8746_v35 = vrot.slane %v19155_v27, %v14103_v13 }
 0x235   : > { %19159 = vst [vmem:[#allocation370_spill] sm:$0xff] %v16016_v34  ;;  %19160 = vst [vmem:[#allocation371_spill] sm:$0xff] %v16019_v54  ;;  %v8750_v23 = vrot.slane %v19155_v27, %v13126_v25  ;;  %v6973_v41 = vcombine.high %v6965_v28, %v6965_v28  ;;  %v6981_v51 = vrot.slane %v6965_v28, %v12982_v12 }
 0x236   : > { %19161 = vst [vmem:[#allocation372_spill] sm:$0xff] %v16022_v47  ;;  %19162 = vst [vmem:[#allocation373_spill] sm:$0xff] %v16025_v33  ;;  %v8754_v53 = vrot.slane %v19155_v27, %v18852_v32  ;;  %v8758_v59 = vrot.slane %v19155_v27, %v18853_v40  ;;  %v6974_v61 = vcombine.high %v6972_v5, %v6972_v5 }
 0x237   : > { %19163 = vst [vmem:[#allocation374_spill] sm:$0xff] %v16028_v2  ;;  %19164 = vst [vmem:[#allocation375_spill] sm:$0xff] %v16034_v10  ;;  %v6988_v16 = vrot.slane %v6972_v5, %v12982_v12  ;;  %v8762_v7 = vrot.slane %v19155_v27, %v18854_v38  ;;  %v5014_v48 = vadd.f32 %v15961_v52, %v19165_v15 }
 0x238   : > { %v6995_v45 = vrot.slane %v6973_v41, %v12982_v12  ;;  %v7003_v14 = vcombine.high %v6981_v51, %v6981_v51  ;;  %v9381_v2 = vmul.f32 %v8734_v62, %v6981_v51  ;;  %v8054_v28 = vrot.slane %v19127_v37, %v18853_v40  ;;  %19166 = vst [vmem:[#allocation276_spill] sm:$0xff] %v16055_v36  ;;  %v12655_v51 = vpop.f32.mrf.mxu0  ;;  %v19181_v36 = vld [vmem:[#allocation72_spill] sm:$0xff] }
 0x239   : > { %v7002_v21 = vrot.slane %v6974_v61, %v12982_v12  ;;  %v7004_v55 = vcombine.high %v6988_v16, %v6988_v16  ;;  %v9385_v43 = vmul.f32 %v8750_v23, %v6988_v16  ;;  %v5168_v0 = vmax.f32 %v5014_v48, 0.0 }
 0x23a   : > { %v7005_v5 = vcombine.high %v6995_v45, %v6995_v45  ;;  %v9382_v54 = vmul.f32 %v8738_v19, %v6995_v45  ;;  %v9383_v27 = vmul.f32 %v8742_v1, %v7003_v14  ;;  %v16058_v47 = vmul.f32 %v15278_v3, %v9381_v2  ;;  %v19174_v2 = vld [vmem:[#allocation29_spill] sm:$0xff] }
 0x23b   : > { %v7006_v15 = vcombine.high %v7002_v21, %v7002_v21  ;;  %v9386_v41 = vmul.f32 %v8754_v53, %v7002_v21  ;;  %v9387_v10 = vmul.f32 %v8758_v59, %v7004_v55  ;;  %v16061_v62 = vmul.f32 %v15285_v24, %v9385_v43 }
 0x23c   : > { %19167 = vst [vmem:[#allocation376_spill] sm:$0xff] %v16058_v47  ;;  %v9384_v33 = vmul.f32 %v8746_v35, %v7005_v5  ;;  %v16064_v61 = vmul.f32 %v15288_v22, %v9382_v54  ;;  %v16067_v23 = vmul.f32 %v15292_v60, %v9383_v27  ;;  %v5824_v16 = vcombine.high %v5168_v0, %v5168_v0 }
 0x23d   : > { %19168 = vst [vmem:[#allocation377_spill] sm:$0xff] %v16061_v62  ;;  %v9388_v45 = vmul.f32 %v8762_v7, %v7006_v15  ;;  %v16070_v14 = vmul.f32 %v15424_v31, %v9386_v41  ;;  %v16073_v19 = vmul.f32 %v15372_v6, %v9387_v10  ;;  %v5831_v55 = vrot.slane %v5168_v0, %v12982_v12  ;;  %v19176_v15 = vld [vmem:[#allocation145_spill] sm:$0xff]  ;;  %v19177_v41 = vld [vmem:[#allocation74_spill] sm:$0xff] }
 0x23e   : > { %19169 = vst [vmem:[#allocation378_spill] sm:$0xff] %v16064_v61  ;;  %19170 = vst [vmem:[#allocation379_spill] sm:$0xff] %v16067_v23  ;;  %v16077_v43 = vmul.f32 %v15308_v9, %v9384_v33  ;;  %v5838_v21 = vrot.slane %v5824_v16, %v12982_v12  ;;  %v8058_v54 = vrot.slane %v19127_v37, %v18854_v38  ;;  %v19182_v23 = vld [vmem:[#allocation184_spill] sm:$0xff]  ;;  %v19185_v6 = vld [vmem:[#allocation86_spill] sm:$0xff] }
 0x23f   : > { %19171 = vst [vmem:[#allocation380_spill] sm:$0xff] %v16070_v14  ;;  %19172 = vst [vmem:[#allocation381_spill] sm:$0xff] %v16073_v19  ;;  %v8062_v1 = vrot.slane %v19174_v2, %v13754_v58  ;;  %v16085_v35 = vmul.f32 %v15428_v26, %v9388_v45  ;;  %v5839_v53 = vcombine.high %v5831_v55, %v5831_v55  ;;  %v19184_v26 = vld [vmem:[#allocation354_spill] sm:$0xff] }
 0x240   : > { %19173 = vst [vmem:[#allocation382_spill] sm:$0xff] %v16077_v43  ;;  %v5847_v10 = vrot.slane %v5831_v55, %v12982_v12  ;;  %v8066_v0 = vrot.slane %v19174_v2, %v13194_v20  ;;  %v5840_v59 = vcombine.high %v5838_v21, %v5838_v21  ;;  %v5854_v33 = vrot.slane %v5838_v21, %v12982_v12  ;;  %v19178_v21 = vld [vmem:[#allocation180_spill] sm:$0xff]  ;;  %v19179_v43 = vld [vmem:[#allocation186_spill] sm:$0xff] }
 0x241   : > { %19175 = vst [vmem:[#allocation29_spill] sm:$0xff] %v16085_v35  ;;  %v8070_v7 = vrot.slane %v19174_v2, %v13086_v30  ;;  %v8074_v37 = vrot.slane %v19174_v2, %v14103_v13  ;;  %v5861_v48 = vrot.slane %v5839_v53, %v12982_v12  ;;  %v8078_v5 = vrot.slane %v19174_v2, %v13126_v25  ;;  %v19180_v53 = vld [vmem:[#allocation183_spill] sm:$0xff] }
 0x242   : > { %v9211_v27 = vmul.f32 %v8054_v28, %v5847_v10  ;;  %v9501_v51 = vmul.f32 %v19177_v41, %v19176_v15  ;;  %v5868_v16 = vrot.slane %v5840_v59, %v12982_v12  ;;  %v5869_v45 = vcombine.high %v5854_v33, %v5854_v33  ;;  %v19183_v15 = vld [vmem:[#allocation75_spill] sm:$0xff] }
 0x243   : > { %v9214_v55 = vmul.f32 %v8066_v0, %v5854_v33  ;;  %v9502_v18 = vmul.f32 %v15932_v4, %v19178_v21  ;;  %v5870_v35 = vcombine.high %v5861_v48, %v5861_v48  ;;  %v9212_v14 = vmul.f32 %v8058_v54, %v5861_v48 }
 0x244   : > { %v9504_v61 = vmul.f32 %v19131_v56, %v19179_v43  ;;  %v9505_v19 = vmul.f32 %v19181_v36, %v19180_v53  ;;  %v5871_v62 = vcombine.high %v5868_v16, %v5868_v16  ;;  %v9215_v28 = vmul.f32 %v8070_v7, %v5868_v16 }
 0x245   : > { %v9216_v10 = vmul.f32 %v8074_v37, %v5869_v45  ;;  %v9506_v47 = vmul.f32 %v19183_v15, %v19182_v23  ;;  %v9213_v59 = vmul.f32 %v8062_v1, %v5870_v35  ;;  %v9711_v0 = vmul.f32 %v19184_v26, %v9211_v27  ;;  %v19191_v23 = vld [vmem:[#allocation188_spill] sm:$0xff] }
 0x246   : > { %v9712_v33 = vmul.f32 %v15948_v29, %v9212_v14  ;;  %v9714_v57 = vmul.f32 %v15830_v39, %v9214_v55  ;;  %v9217_v54 = vmul.f32 %v8078_v5, %v5871_v62  ;;  %v9715_v48 = vmul.f32 %v15834_v49, %v9215_v28 }
 0x247   : > { %v9716_v43 = vmul.f32 %v15848_v11, %v9216_v10  ;;  %v16116_v31 = vcombine.high %v19185_v6, %v19185_v6  ;;  %v9713_v7 = vmul.f32 %v15814_v63, %v9213_v59  ;;  %v9775_v37 = vadd.f32 %v9711_v0, %v9501_v51  ;;  %v19193_v6 = vld [vmem:[#allocation87_spill] sm:$0xff] }
 0x248   : > { %v16119_v16 = vadd.f32 %v9712_v33, %v9502_v18  ;;  %v9778_v1 = vadd.f32 %v9714_v57, %v9504_v61  ;;  %v16122_v35 = vmul.f32 %v15827_v50, %v9217_v54  ;;  %v16124_v45 = vadd.f32 %v9715_v48, %v9505_v19  ;;  %v19205_v0 = vld [vmem:[#allocation287_spill] sm:$0xff]  ;;  %v19214_v50 = vld [vmem:[#allocation212_spill] sm:$0xff] }
 0x249   : > { %19186 = vst [vmem:[#allocation180_spill] sm:$0xff] %v16116_v31  ;;  %v16126_v62 = vadd.f32 %v9716_v43, %v9506_v47  ;;  %v9978_v5 = vmul.f32 %v16116_v31, %v19178_v21  ;;  %v16131_v15 = vadd.f32 %v9713_v7, %v19191_v23  ;;  %v9981_v11 = vmul.f32 %v19193_v6, %v19180_v53  ;;  %v19213_v31 = vld [vmem:[#allocation25_spill] sm:$0xff] }
 0x24a   : > { %19187 = vst [vmem:[#allocation183_spill] sm:$0xff] %v16119_v16  ;;  %19188 = vst [vmem:[#allocation383_spill] sm:$0xff] %v16122_v35  ;;  %v16137_v18 = vcombine.high %v15995_v44, %v15995_v44  ;;  %v16141_v57 = vcombine.high %v16003_v46, %v16003_v46  ;;  %v16146_v47 = vmul.f32 %v15992_v17, %v9213_v59  ;;  %v19208_v35 = vld [vmem:[#allocation23_spill] sm:$0xff]  ;;  %v19209_v16 = vld [vmem:[#allocation190_spill] sm:$0xff] }
 0x24b   : > { %19189 = vst [vmem:[#allocation384_spill] sm:$0xff] %v16124_v45  ;;  %19190 = vst [vmem:[#allocation385_spill] sm:$0xff] %v16126_v62  ;;  %v16143_v61 = vadd.f32 %v9978_v5, %v9775_v37  ;;  %v16149_v19 = vmul.f32 %v15998_v42, %v9214_v55  ;;  %v16152_v23 = vmul.f32 %v16007_v8, %v9215_v28  ;;  %v19206_v28 = vld [vmem:[#allocation207_spill] sm:$0xff]  ;;  %v19207_v37 = vld [vmem:[#allocation298_spill] sm:$0xff] }
 0x24c   : > { %19192 = vst [vmem:[#allocation188_spill] sm:$0xff] %v16131_v15  ;;  %19194 = vst [vmem:[#allocation386_spill] sm:$0xff] %v16137_v18  ;;  %v16154_v43 = vadd.f32 %v9981_v11, %v9778_v1  ;;  %v16157_v51 = vmul.f32 %v16137_v18, %v9211_v27  ;;  %v16160_v21 = vmul.f32 %v16141_v57, %v9212_v14 }
 0x24d   : > { %19195 = vst [vmem:[#allocation387_spill] sm:$0xff] %v16141_v57  ;;  %19196 = vst [vmem:[#allocation388_spill] sm:$0xff] %v16143_v61  ;;  %v16163_v53 = vmul.f32 %v16016_v34, %v9216_v10  ;;  %v16166_v59 = vmul.f32 %v15995_v44, %v9217_v54  ;;  %v5139_v55 = vadd.f32 %v15961_v52, %v19205_v0 }
 0x24e   : > { %19197 = vst [vmem:[#allocation389_spill] sm:$0xff] %v16146_v47  ;;  %19198 = vst [vmem:[#allocation390_spill] sm:$0xff] %v16149_v19  ;;  %v8766_v33 = vrot.slane %v19206_v28, %v13754_v58  ;;  %v8770_v11 = vrot.slane %v19206_v28, %v13194_v20  ;;  %v8774_v27 = vrot.slane %v19206_v28, %v13086_v30  ;;  %v19212_v47 = vld [vmem:[#allocation208_spill] sm:$0xff] }
 0x24f   : > { %19199 = vst [vmem:[#allocation391_spill] sm:$0xff] %v16152_v23  ;;  %19200 = vst [vmem:[#allocation392_spill] sm:$0xff] %v16154_v43  ;;  %v8778_v14 = vrot.slane %v19206_v28, %v14103_v13  ;;  %v8782_v10 = vrot.slane %v19206_v28, %v13126_v25  ;;  %v8786_v54 = vrot.slane %v19206_v28, %v18852_v32  ;;  %v5193_v48 = vmax.f32 %v5139_v55, 0.0  ;;  %v19216_v25 = vld [vmem:[#allocation85_spill] sm:$0xff] }
 0x250   : > { %19201 = vst [vmem:[#allocation393_spill] sm:$0xff] %v16157_v51  ;;  %19202 = vst [vmem:[#allocation394_spill] sm:$0xff] %v16160_v21  ;;  %v8790_v7 = vrot.slane %v19206_v28, %v18853_v40  ;;  %v5019_v1 = vadd.f32 %v15961_v52, %v19207_v37  ;;  %v8082_v5 = vrot.slane %v19174_v2, %v18852_v32  ;;  %v16233_v28 = vpop.f32.mrf.mxu0 }
 0x251   : > { %19203 = vst [vmem:[#allocation395_spill] sm:$0xff] %v16163_v53  ;;  %19204 = vst [vmem:[#allocation396_spill] sm:$0xff] %v16166_v59  ;;  %v8086_v0 = vrot.slane %v19174_v2, %v18853_v40  ;;  %v8090_v62 = vrot.slane %v19174_v2, %v18854_v38  ;;  %v8094_v59 = vrot.slane %v19208_v35, %v13754_v58  ;;  %v19210_v53 = vld [vmem:[#allocation71_spill] sm:$0xff]  ;;  %v19211_v2 = vld [vmem:[#allocation206_spill] sm:$0xff] }
 0x252   : > { %v8098_v55 = vrot.slane %v19208_v35, %v13194_v20  ;;  %v7007_v43 = vcombine.high %v5193_v48, %v5193_v48  ;;  %v7014_v61 = vrot.slane %v5193_v48, %v12982_v12  ;;  %v5169_v45 = vmax.f32 %v5019_v1, 0.0  ;;  %19217 = vst [vmem:[#allocation287_spill] sm:$0xff] %v16233_v28 }
 0x253   : > { %v8102_v37 = vrot.slane %v19208_v35, %v13086_v30  ;;  %v8106_v15 = vrot.slane %v19208_v35, %v14103_v13  ;;  %v16203_v23 = vmul.f32 %v19210_v53, %v19209_v16  ;;  %v16207_v19 = vmul.f32 %v19177_v41, %v19211_v2  ;;  %v19215_v41 = vld [vmem:[#allocation88_spill] sm:$0xff] }
 0x254   : > { %v16211_v21 = vmul.f32 %v15932_v4, %v19212_v47  ;;  %v7021_v48 = vrot.slane %v7007_v43, %v12982_v12  ;;  %v7022_v1 = vcombine.high %v7014_v61, %v7014_v61  ;;  %v7030_v51 = vrot.slane %v7014_v61, %v12982_v12 }
 0x255   : > { %v5872_v44 = vcombine.high %v5169_v45, %v5169_v45  ;;  %v5879_v6 = vrot.slane %v5169_v45, %v12982_v12  ;;  %v9512_v16 = vmul.f32 %v19131_v56, %v19213_v31  ;;  %v9513_v53 = vmul.f32 %v19181_v36, %v19214_v50 }
 0x256   : > { %v9985_v40 = vmul.f32 %v19215_v41, %v19211_v2  ;;  %v7023_v35 = vcombine.high %v7021_v48, %v7021_v48  ;;  %v7037_v47 = vrot.slane %v7021_v48, %v12982_v12  ;;  %v7044_v43 = vrot.slane %v7022_v1, %v12982_v12 }
 0x257   : > { %v7052_v4 = vcombine.high %v7030_v51, %v7030_v51  ;;  %v5886_v61 = vrot.slane %v5872_v44, %v12982_v12  ;;  %v5887_v32 = vcombine.high %v5879_v6, %v5879_v6  ;;  %v5895_v45 = vrot.slane %v5879_v6, %v12982_v12  ;;  %v11607_v6 = vld [vmem:[%s18223_s9] sm:$0xf] }
 0x258   : > { %v9988_v56 = vmul.f32 %v19216_v25, %v19213_v31  ;;  %v7051_v13 = vrot.slane %v7023_v35, %v12982_v12  ;;  %v7053_v50 = vcombine.high %v7037_v47, %v7037_v47  ;;  %v7054_v36 = vcombine.high %v7044_v43, %v7044_v43  ;;  %12725 = vmatprep.subr.msk.mxu1 %vm4883_vm0, %v11607_v6  ;;  %v19263_v25 = vld [vmem:[#allocation74_spill] sm:$0xff] }
 0x259   : > { %v9389_v30 = vmul.f32 %v8766_v33, %v7044_v43  ;;  %v9390_v2 = vmul.f32 %v8770_v11, %v7052_v4  ;;  %v9392_v41 = vmul.f32 %v8778_v14, %v7037_v47  ;;  %v5888_v20 = vcombine.high %v5886_v61, %v5886_v61  ;;  %v19223_v33 = vld [vmem:[#allocation289_spill] sm:$0xff]  ;;  %12726 = vmatpush3.msk.msra.mxu1 %vm4883_vm0, %v11607_v6  ;;  %v12658_v11 = vpop.f32.mrf.mxu0 }
 0x25a   : > { %v5902_v48 = vrot.slane %v5886_v61, %v12982_v12  ;;  %v7055_v1 = vcombine.high %v7051_v13, %v7051_v13  ;;  %v9391_v51 = vmul.f32 %v8774_v27, %v7054_v36  ;;  %v9393_v58 = vmul.f32 %v8782_v10, %v7051_v13  ;;  %v19225_v10 = vld [vmem:[#allocation42_spill] sm:$0xff]  ;;  %v19227_v61 = vld [vmem:[#allocation308_spill] sm:$0xff] }
 0x25b   : > { %v9394_v44 = vmul.f32 %v8786_v54, %v7053_v50  ;;  %v16236_v31 = vmul.f32 %v15278_v3, %v9389_v30  ;;  %v16239_v35 = vmul.f32 %v15288_v22, %v9390_v2  ;;  %v16242_v4 = vmul.f32 %v15308_v9, %v9392_v41 }
 0x25c   : > { %v5909_v47 = vrot.slane %v5887_v32, %v12982_v12  ;;  %v9395_v13 = vmul.f32 %v8790_v7, %v7055_v1  ;;  %v16247_v50 = vmul.f32 %v15292_v60, %v9391_v51  ;;  %v16250_v36 = vmul.f32 %v15285_v24, %v9393_v58 }
 0x25d   : > { %19218 = vst [vmem:[#allocation298_spill] sm:$0xff] %v16236_v31  ;;  %19219 = vst [vmem:[#allocation206_spill] sm:$0xff] %v16239_v35  ;;  %v16253_v30 = vmul.f32 %v19223_v33, %v9394_v44  ;;  %v5916_v41 = vrot.slane %v5888_v20, %v12982_v12  ;;  %v5917_v27 = vcombine.high %v5895_v45, %v5895_v45  ;;  %v19260_v31 = vld [vmem:[#allocation95_spill] sm:$0xff] }
 0x25e   : > { %19220 = vst [vmem:[#allocation25_spill] sm:$0xff] %v16242_v4  ;;  %19221 = vst [vmem:[#allocation397_spill] sm:$0xff] %v16247_v50  ;;  %v5918_v14 = vcombine.high %v5902_v48, %v5902_v48  ;;  %v9218_v32 = vmul.f32 %v8082_v5, %v5895_v45  ;;  %v16258_v54 = vmul.f32 %v19225_v10, %v9395_v13 }
 0x25f   : > { %19222 = vst [vmem:[#allocation398_spill] sm:$0xff] %v16250_v36  ;;  %19224 = vst [vmem:[#allocation289_spill] sm:$0xff] %v16253_v30  ;;  %v9219_v7 = vmul.f32 %v8086_v0, %v5909_v47  ;;  %v9221_v43 = vmul.f32 %v8094_v59, %v5902_v48  ;;  %v5144_v58 = vadd.f32 %v15961_v52, %v19227_v61  ;;  %v19228_v36 = vld [vmem:[#allocation353_spill] sm:$0xff] }
 0x260   : > { %19226 = vst [vmem:[#allocation399_spill] sm:$0xff] %v16258_v54  ;;  %v5919_v2 = vcombine.high %v5916_v41, %v5916_v41  ;;  %v9220_v1 = vmul.f32 %v8090_v62, %v5917_v27  ;;  %v9222_v51 = vmul.f32 %v8098_v55, %v5916_v41  ;;  %v9223_v44 = vmul.f32 %v8102_v37, %v5918_v14  ;;  %v19231_v37 = vld [vmem:[#allocation219_spill] sm:$0xff]  ;;  %v19259_v54 = vld [vmem:[#allocation69_spill] sm:$0xff] }
 0x261   : > { %v9718_v6 = vmul.f32 %v19228_v36, %v9218_v32  ;;  %v9719_v11 = vmul.f32 %v19184_v26, %v9219_v7  ;;  %v9721_v20 = vmul.f32 %v15814_v63, %v9221_v43  ;;  %v16266_v5 = vmul.f32 %v16003_v46, %v9218_v32  ;;  %v19233_v41 = vld [vmem:[#allocation355_spill] sm:$0xff] }
 0x262   : > { %v9224_v45 = vmul.f32 %v8106_v15, %v5919_v2  ;;  %v9720_v0 = vmul.f32 %v15948_v29, %v9220_v1  ;;  %v9722_v59 = vmul.f32 %v15830_v39, %v9222_v51  ;;  %v9723_v48 = vmul.f32 %v15834_v49, %v9223_v44 }
 0x263   : > { %19229 = vst [vmem:[#allocation308_spill] sm:$0xff] %v16266_v5  ;;  %v9782_v62 = vadd.f32 %v9718_v6, %v16203_v23  ;;  %v16273_v55 = vadd.f32 %v9719_v11, %v16207_v19  ;;  %v9785_v47 = vadd.f32 %v9721_v20, %v19231_v37  ;;  %v16277_v13 = vmul.f32 %v16137_v18, %v9219_v7  ;;  %v19241_v7 = vld [vmem:[#allocation214_spill] sm:$0xff]  ;;  %v19248_v20 = vld [vmem:[#allocation251_spill] sm:$0xff]  ;;  %v19252_v37 = vld [vmem:[#allocation5_spill] sm:$0xff] }
 0x264   : > { %v16280_v27 = vmul.f32 %v19233_v41, %v9224_v45  ;;  %v9784_v15 = vadd.f32 %v9720_v0, %v16211_v21  ;;  %v16283_v14 = vadd.f32 %v9722_v59, %v9512_v16  ;;  %v16285_v32 = vadd.f32 %v9723_v48, %v9513_v53  ;;  %v19246_v21 = vld [vmem:[#allocation207_spill] sm:$0xff]  ;;  %v19249_v0 = vld [vmem:[#allocation8_spill] sm:$0xff]  ;;  %v19262_v41 = vld [vmem:[#allocation234_spill] sm:$0xff] }
 0x265   : > { %19230 = vst [vmem:[#allocation400_spill] sm:$0xff] %v16273_v55  ;;  %19232 = vst [vmem:[#allocation219_spill] sm:$0xff] %v16277_v13  ;;  %v16287_v61 = vadd.f32 %v9985_v40, %v9782_v62  ;;  %v16289_v23 = vadd.f32 %v9988_v56, %v9785_v47  ;;  %v16292_v19 = vmul.f32 %v16141_v57, %v9220_v1  ;;  %v5194_v56 = vmax.f32 %v5144_v58, 0.0  ;;  %v19247_v1 = vld [vmem:[#allocation18_spill] sm:$0xff]  ;;  %v19250_v48 = vld [vmem:[#allocation3_spill] sm:$0xff] }
 0x266   : > { %19234 = vst [vmem:[#allocation401_spill] sm:$0xff] %v16280_v27  ;;  %19235 = vst [vmem:[#allocation402_spill] sm:$0xff] %v16283_v14  ;;  %v16295_v2 = vmul.f32 %v15992_v17, %v9221_v43  ;;  %v16298_v6 = vadd.f32 %v19241_v7, %v9784_v15  ;;  %v16301_v11 = vmul.f32 %v15998_v42, %v9222_v51  ;;  %v19251_v62 = vld [vmem:[#allocation44_spill] sm:$0xff]  ;;  %v19253_v47 = vld [vmem:[#allocation45_spill] sm:$0xff] }
 0x267   : > { %19236 = vst [vmem:[#allocation403_spill] sm:$0xff] %v16285_v32  ;;  %19237 = vst [vmem:[#allocation404_spill] sm:$0xff] %v16287_v61  ;;  %v16304_v16 = vmul.f32 %v16007_v8, %v9223_v44  ;;  %v16307_v40 = vmul.f32 %v16016_v34, %v9224_v45  ;;  %v8794_v53 = vrot.slane %v19246_v21, %v18854_v38  ;;  %v19254_v21 = vld [vmem:[#allocation178_spill] sm:$0xff]  ;;  %v19255_v27 = vld [vmem:[#allocation23_spill] sm:$0xff] }
 0x268   : > { %19238 = vst [vmem:[#allocation405_spill] sm:$0xff] %v16289_v23  ;;  %19239 = vst [vmem:[#allocation406_spill] sm:$0xff] %v16292_v19  ;;  %v8798_v43 = vrot.slane %v19248_v20, %v19247_v1  ;;  %v8802_v59 = vrot.slane %v19248_v20, %v19249_v0  ;;  %v8806_v51 = vrot.slane %v19248_v20, %v19250_v48  ;;  %v19257_v55 = vld [vmem:[#allocation39_spill] sm:$0xff]  ;;  %v19258_v13 = vld [vmem:[#allocation218_spill] sm:$0xff] }
 0x269   : > { %19240 = vst [vmem:[#allocation407_spill] sm:$0xff] %v16295_v2  ;;  %19242 = vst [vmem:[#allocation214_spill] sm:$0xff] %v16298_v6  ;;  %v8810_v44 = vrot.slane %v19248_v20, %v19251_v62  ;;  %v8814_v45 = vrot.slane %v19248_v20, %v19252_v37  ;;  %v8818_v58 = vrot.slane %v19248_v20, %v19253_v47  ;;  %v19256_v6 = vld [vmem:[#allocation64_spill] sm:$0xff] }
 0x26a   : > { %19243 = vst [vmem:[#allocation408_spill] sm:$0xff] %v16301_v11  ;;  %19244 = vst [vmem:[#allocation409_spill] sm:$0xff] %v16304_v16  ;;  %v7056_v15 = vcombine.high %v5194_v56, %v5194_v56  ;;  %v7063_v7 = vrot.slane %v5194_v56, %v12982_v12  ;;  %v5024_v32 = vadd.f32 %v15961_v52, %v19254_v21 }
 0x26b   : > { %19245 = vst [vmem:[#allocation410_spill] sm:$0xff] %v16307_v40  ;;  %v8110_v40 = vrot.slane %v19255_v27, %v19252_v37  ;;  %v8114_v23 = vrot.slane %v19255_v27, %v19253_v47  ;;  %v8118_v61 = vrot.slane %v19255_v27, %v19256_v6  ;;  %v8122_v14 = vrot.slane %v19255_v27, %v18854_v38  ;;  %v19261_v27 = vld [vmem:[#allocation71_spill] sm:$0xff] }
 0x26c   : > { %v8126_v16 = vrot.slane %v19257_v55, %v19247_v1  ;;  %v7070_v56 = vrot.slane %v7056_v15, %v12982_v12  ;;  %v7071_v5 = vcombine.high %v7063_v7, %v7063_v7  ;;  %v7079_v21 = vrot.slane %v7063_v7, %v12982_v12 }
 0x26d   : > { %v5170_v11 = vmax.f32 %v5024_v32, 0.0  ;;  %v8130_v2 = vrot.slane %v19257_v55, %v19249_v0  ;;  %v8134_v19 = vrot.slane %v19257_v55, %v19250_v48  ;;  %v9515_v50 = vmul.f32 %v19259_v54, %v19258_v13 }
 0x26e   : > { %v9516_v28 = vmul.f32 %v19261_v27, %v19260_v31  ;;  %v7072_v30 = vcombine.high %v7070_v56, %v7070_v56  ;;  %v7086_v4 = vrot.slane %v7070_v56, %v12982_v12  ;;  %v7093_v15 = vrot.slane %v7071_v5, %v12982_v12  ;;  %v19264_v27 = vld [vmem:[#allocation290_spill] sm:$0xff] }
 0x26f   : > { %v7101_v35 = vcombine.high %v7079_v21, %v7079_v21  ;;  %v9396_v7 = vmul.f32 %v8794_v53, %v7079_v21  ;;  %v5920_v32 = vcombine.high %v5170_v11, %v5170_v11  ;;  %v5927_v34 = vrot.slane %v5170_v11, %v12982_v12 }
 0x270   : > { %v9517_v10 = vmul.f32 %v19263_v25, %v19262_v41  ;;  %v7100_v48 = vrot.slane %v7072_v30, %v12982_v12  ;;  %v7102_v0 = vcombine.high %v7086_v4, %v7086_v4  ;;  %v7103_v13 = vcombine.high %v7093_v15, %v7093_v15 }
 0x271   : > { %v9397_v54 = vmul.f32 %v8798_v43, %v7101_v35  ;;  %v9399_v1 = vmul.f32 %v8806_v51, %v7086_v4  ;;  %v16353_v47 = vmul.f32 %v19264_v27, %v9396_v7  ;;  %v5934_v56 = vrot.slane %v5920_v32, %v12982_v12  ;;  %v19276_v32 = vld [vmem:[#allocation238_spill] sm:$0xff] }
 0x272   : > { %v5935_v5 = vcombine.high %v5927_v34, %v5927_v34  ;;  %v7104_v37 = vcombine.high %v7100_v48, %v7100_v48  ;;  %v9398_v53 = vmul.f32 %v8802_v59, %v7103_v13  ;;  %v9400_v21 = vmul.f32 %v8810_v44, %v7100_v48  ;;  %v19272_v59 = vld [vmem:[#allocation235_spill] sm:$0xff]  ;;  %v19274_v44 = vld [vmem:[#allocation26_spill] sm:$0xff] }
 0x273   : > { %19265 = vst [vmem:[#allocation207_spill] sm:$0xff] %v16353_v47  ;;  %v9401_v55 = vmul.f32 %v8814_v45, %v7102_v0  ;;  %v16357_v11 = vmul.f32 %v15278_v3, %v9397_v54  ;;  %v16360_v41 = vmul.f32 %v15292_v60, %v9399_v1  ;;  %v5936_v30 = vcombine.high %v5934_v56, %v5934_v56 }
 0x274   : > { %v5943_v35 = vrot.slane %v5927_v34, %v12982_v12  ;;  %v9402_v4 = vmul.f32 %v8818_v58, %v7104_v37  ;;  %v16364_v43 = vmul.f32 %v15288_v22, %v9398_v53  ;;  %v16367_v51 = vmul.f32 %v15308_v9, %v9400_v21  ;;  %v19273_v22 = vld [vmem:[#allocation24_spill] sm:$0xff]  ;;  %v19275_v9 = vld [vmem:[#allocation70_spill] sm:$0xff] }
 0x275   : > { %19266 = vst [vmem:[#allocation251_spill] sm:$0xff] %v16357_v11  ;;  %19267 = vst [vmem:[#allocation178_spill] sm:$0xff] %v16360_v41  ;;  %v16370_v13 = vmul.f32 %v15285_v24, %v9401_v55  ;;  %v5950_v0 = vrot.slane %v5934_v56, %v12982_v12  ;;  %v5957_v3 = vrot.slane %v5935_v5, %v12982_v12  ;;  %v19277_v56 = vld [vmem:[#allocation72_spill] sm:$0xff]  ;;  %v19278_v53 = vld [vmem:[#allocation350_spill] sm:$0xff] }
 0x276   : > { %19268 = vst [vmem:[#allocation23_spill] sm:$0xff] %v16364_v43  ;;  %19269 = vst [vmem:[#allocation95_spill] sm:$0xff] %v16367_v51  ;;  %v5964_v60 = vrot.slane %v5936_v30, %v12982_v12  ;;  %v5965_v54 = vcombine.high %v5943_v35, %v5943_v35  ;;  %v16376_v1 = vmul.f32 %v19223_v33, %v9402_v4  ;;  %v19286_v51 = vld [vmem:[#allocation243_spill] sm:$0xff]  ;;  %v19287_v43 = vld [vmem:[#allocation89_spill] sm:$0xff] }
 0x277   : > { %19270 = vst [vmem:[#allocation290_spill] sm:$0xff] %v16370_v13  ;;  %v9225_v34 = vmul.f32 %v8110_v40, %v5943_v35  ;;  %v9518_v48 = vmul.f32 %v19273_v22, %v19272_v59  ;;  %v9520_v37 = vmul.f32 %v19275_v9, %v19274_v44  ;;  %v5966_v45 = vcombine.high %v5950_v0, %v5950_v0 }
 0x278   : > { %19271 = vst [vmem:[#allocation411_spill] sm:$0xff] %v16376_v1  ;;  %v5967_v24 = vcombine.high %v5957_v3, %v5957_v3  ;;  %v5968_v55 = vcombine.high %v5964_v60, %v5964_v60  ;;  %v9226_v58 = vmul.f32 %v8114_v23, %v5957_v3  ;;  %v9227_v15 = vmul.f32 %v8118_v61, %v5965_v54  ;;  %v19279_v1 = vld [vmem:[#allocation86_spill] sm:$0xff]  ;;  %v19283_v54 = vld [vmem:[#allocation180_spill] sm:$0xff] }
 0x279   : > { %v9229_v7 = vmul.f32 %v8126_v16, %v5964_v60  ;;  %v9521_v5 = vmul.f32 %v19277_v56, %v19276_v32  ;;  %v9725_v21 = vmul.f32 %v19278_v53, %v9225_v34  ;;  %v9230_v30 = vmul.f32 %v8130_v2, %v5966_v45 }
 0x27a   : > { %v9228_v33 = vmul.f32 %v8122_v14, %v5967_v24  ;;  %v9231_v40 = vmul.f32 %v8134_v19, %v5968_v55  ;;  %v9726_v35 = vmul.f32 %v19228_v36, %v9226_v58  ;;  %v9727_v4 = vmul.f32 %v19184_v26, %v9227_v15  ;;  %v19281_v19 = vld [vmem:[#allocation239_spill] sm:$0xff] }
 0x27b   : > { %v9729_v44 = vmul.f32 %v15814_v63, %v9229_v7  ;;  %v9789_v0 = vadd.f32 %v9725_v21, %v9515_v50  ;;  %v9992_v23 = vmul.f32 %v19279_v1, %v19260_v31  ;;  %v9730_v16 = vmul.f32 %v15830_v39, %v9230_v30  ;;  %v19284_v50 = vld [vmem:[#allocation87_spill] sm:$0xff] }
 0x27c   : > { %v9728_v61 = vmul.f32 %v15948_v29, %v9228_v33  ;;  %v9731_v3 = vmul.f32 %v15834_v49, %v9231_v40  ;;  %v16393_v60 = vadd.f32 %v9726_v35, %v9516_v28  ;;  %v9791_v14 = vadd.f32 %v9727_v4, %v9517_v10  ;;  %v19290_v10 = vld [vmem:[#allocation366_spill] sm:$0xff] }
 0x27d   : > { %v16396_v2 = vadd.f32 %v9729_v44, %v19281_v19  ;;  %v9994_v45 = vmul.f32 %v19283_v54, %v19272_v59  ;;  %v9997_v24 = vmul.f32 %v19284_v50, %v19276_v32  ;;  %v9794_v31 = vadd.f32 %v9730_v16, %v9520_v37 }
 0x27e   : > { %19280 = vst [vmem:[#allocation412_spill] sm:$0xff] %v16393_v60  ;;  %v16402_v55 = vadd.f32 %v9728_v61, %v9518_v48  ;;  %v9795_v21 = vadd.f32 %v9731_v3, %v9521_v5  ;;  %v9998_v13 = vmul.f32 %v19287_v43, %v19286_v51  ;;  %v16406_v41 = vadd.f32 %v9992_v23, %v9789_v0  ;;  %v19303_v3 = vld [vmem:[#allocation5_spill] sm:$0xff] }
 0x27f   : > { %19282 = vst [vmem:[#allocation239_spill] sm:$0xff] %v16396_v2  ;;  %v16408_v28 = vadd.f32 %v9994_v45, %v9791_v14  ;;  %v16411_v44 = vmul.f32 %v19290_v10, %v9225_v34  ;;  %v16414_v35 = vmul.f32 %v16003_v46, %v9226_v58  ;;  %v16416_v4 = vadd.f32 %v9997_v24, %v9794_v31  ;;  %v19300_v58 = vld [vmem:[#allocation330_spill] sm:$0xff]  ;;  %v19304_v14 = vld [vmem:[#allocation45_spill] sm:$0xff]  ;;  %v19310_v2 = vld [vmem:[#allocation35_spill] sm:$0xff] }
 0x280   : > { %19285 = vst [vmem:[#allocation413_spill] sm:$0xff] %v16402_v55  ;;  %19288 = vst [vmem:[#allocation414_spill] sm:$0xff] %v16406_v41  ;;  %v16418_v19 = vadd.f32 %v9998_v13, %v9795_v21  ;;  %v16421_v48 = vmul.f32 %v16137_v18, %v9227_v15  ;;  %v16424_v37 = vmul.f32 %v16141_v57, %v9228_v33  ;;  %v19301_v33 = vld [vmem:[#allocation199_spill] sm:$0xff]  ;;  %v19305_v21 = vld [vmem:[#allocation18_spill] sm:$0xff] }
 0x281   : > { %19289 = vst [vmem:[#allocation415_spill] sm:$0xff] %v16408_v28  ;;  %19291 = vst [vmem:[#allocation416_spill] sm:$0xff] %v16411_v44  ;;  %v16427_v5 = vmul.f32 %v15992_v17, %v9229_v7  ;;  %v16430_v0 = vmul.f32 %v15998_v42, %v9230_v30  ;;  %v16433_v34 = vmul.f32 %v16007_v8, %v9231_v40  ;;  %v19302_v7 = vld [vmem:[#allocation39_spill] sm:$0xff]  ;;  %v19311_v55 = vld [vmem:[#allocation69_spill] sm:$0xff] }
 0x282   : > { %19292 = vst [vmem:[#allocation417_spill] sm:$0xff] %v16414_v35  ;;  %19293 = vst [vmem:[#allocation418_spill] sm:$0xff] %v16416_v4  ;;  %v5149_v23 = vadd.f32 %v15961_v52, %v19300_v58  ;;  %v8822_v13 = vrot.slane %v19248_v20, %v19256_v6  ;;  %v8826_v15 = vrot.slane %v19248_v20, %v18854_v38  ;;  %v19306_v58 = vld [vmem:[#allocation43_spill] sm:$0xff] }
 0x283   : > { %19294 = vst [vmem:[#allocation419_spill] sm:$0xff] %v16418_v19  ;;  %19295 = vst [vmem:[#allocation420_spill] sm:$0xff] %v16421_v48  ;;  %v5029_v61 = vadd.f32 %v15961_v52, %v19301_v33  ;;  %v8138_v16 = vrot.slane %v19302_v7, %v19251_v62  ;;  %v8142_v40 = vrot.slane %v19302_v7, %v19303_v3  ;;  %v19309_v28 = vld [vmem:[#allocation75_spill] sm:$0xff] }
 0x284   : > { %19296 = vst [vmem:[#allocation421_spill] sm:$0xff] %v16424_v37  ;;  %19297 = vst [vmem:[#allocation422_spill] sm:$0xff] %v16427_v5  ;;  %v5195_v30 = vmax.f32 %v5149_v23, 0.0  ;;  %v8146_v45 = vrot.slane %v19302_v7, %v19304_v14  ;;  %v8150_v24 = vrot.slane %v19302_v7, %v19256_v6  ;;  %v8154_v20 = vrot.slane %v19302_v7, %v18854_v38  ;;  %v16457_v23 = vpop.f32.mrf.mxu0  ;;  %v19313_v37 = vld [vmem:[#allocation71_spill] sm:$0xff]  ;;  %v19314_v5 = vld [vmem:[#allocation253_spill] sm:$0xff] }
 0x285   : > { %19298 = vst [vmem:[#allocation423_spill] sm:$0xff] %v16430_v0  ;;  %19299 = vst [vmem:[#allocation424_spill] sm:$0xff] %v16433_v34  ;;  %v5171_v31 = vmax.f32 %v5029_v61, 0.0  ;;  %v8158_v33 = vrot.slane %v19306_v58, %v19305_v21  ;;  %v19307_v34 = vld [vmem:[#allocation8_spill] sm:$0xff]  ;;  %v9522_v41 = vmul.f32 %v19309_v28, %v19286_v51  ;;  %v9523_v60 = vmul.f32 %v19311_v55, %v19310_v2  ;;  %v19315_v35 = vld [vmem:[#allocation255_spill] sm:$0xff] }
 0x286   : > { %v8162_v32 = vrot.slane %v19306_v58, %v19307_v34  ;;  %19308 = vst [vmem:[#allocation330_spill] sm:$0xff] %v16457_v23  ;;  %v7111_v4 = vrot.slane %v5195_v30, %v12982_v12  ;;  %v19312_v61 = vld [vmem:[#allocation252_spill] sm:$0xff]  ;;  %v9525_v48 = vmul.f32 %v19263_v25, %v19314_v5  ;;  %v9526_v59 = vmul.f32 %v19273_v22, %v19315_v35  ;;  %v12661_v23 = vpop.f32.mrf.mxu0 }
 0x287   : > { %v9524_v44 = vmul.f32 %v19313_v37, %v19312_v61  ;;  %v5969_v7 = vcombine.high %v5171_v31, %v5171_v31  ;;  %v5976_v0 = vrot.slane %v5171_v31, %v12982_v12  ;;  %v19316_v51 = vld [vmem:[#allocation256_spill] sm:$0xff]  ;;  %v10000_v43 = vmul.f32 %v19279_v1, %v19312_v61 }
 0x288   : > { %v7112_v30 = vcombine.high %v7111_v4, %v7111_v4  ;;  %v7119_v11 = vrot.slane %v7111_v4, %v12982_v12  ;;  %v9528_v47 = vmul.f32 %v19275_v9, %v19316_v51  ;;  %v19317_v34 = vld [vmem:[#allocation92_spill] sm:$0xff]  ;;  %v10002_v9 = vmul.f32 %v19283_v54, %v19315_v35 }
 0x289   : > { %v9999_v8 = vmul.f32 %v19317_v34, %v19310_v2  ;;  %v5983_v49 = vrot.slane %v5969_v7, %v12982_v12  ;;  %v5984_v19 = vcombine.high %v5976_v0, %v5976_v0  ;;  %v5992_v31 = vrot.slane %v5976_v0, %v12982_v12  ;;  %v19318_v25 = vld [vmem:[#allocation88_spill] sm:$0xff]  ;;  %v19319_v0 = vld [vmem:[#allocation42_spill] sm:$0xff] }
 0x28a   : > { %v7126_v22 = vrot.slane %v7112_v30, %v12982_v12  ;;  %v9403_v23 = vmul.f32 %v8822_v13, %v7119_v11  ;;  %v10001_v4 = vmul.f32 %v19318_v25, %v19314_v5  ;;  %v19321_v30 = vld [vmem:[#allocation85_spill] sm:$0xff] }
 0x28b   : > { %v5985_v37 = vcombine.high %v5983_v49, %v5983_v49  ;;  %v5999_v2 = vrot.slane %v5983_v49, %v12982_v12  ;;  %v6006_v7 = vrot.slane %v5984_v19, %v12982_v12  ;;  %v6014_v34 = vcombine.high %v5992_v31, %v5992_v31  ;;  %v19323_v19 = vld [vmem:[#allocation355_spill] sm:$0xff] }
 0x28c   : > { %v9404_v55 = vmul.f32 %v8826_v15, %v7126_v22  ;;  %v16488_v28 = vmul.f32 %v19319_v0, %v9403_v23  ;;  %v9232_v61 = vmul.f32 %v8138_v16, %v5992_v31  ;;  %v10004_v11 = vmul.f32 %v19321_v30, %v19316_v51  ;;  %v19324_v0 = vld [vmem:[#allocation262_spill] sm:$0xff] }
 0x28d   : > { %v6013_v13 = vrot.slane %v5985_v37, %v12982_v12  ;;  %v6015_v5 = vcombine.high %v5999_v2, %v5999_v2  ;;  %v6016_v25 = vcombine.high %v6006_v7, %v6006_v7  ;;  %v9233_v1 = vmul.f32 %v8142_v40, %v6006_v7 }
 0x28e   : > { %19320 = vst [vmem:[#allocation199_spill] sm:$0xff] %v16488_v28  ;;  %v16494_v35 = vmul.f32 %v19264_v27, %v9404_v55  ;;  %v9234_v49 = vmul.f32 %v8146_v45, %v6014_v34  ;;  %v9236_v54 = vmul.f32 %v8154_v20, %v5999_v2  ;;  %v9732_v56 = vmul.f32 %v19323_v19, %v9232_v61  ;;  %v19328_v28 = vld [vmem:[#allocation258_spill] sm:$0xff] }
 0x28f   : > { %v6017_v22 = vcombine.high %v6013_v13, %v6013_v13  ;;  %v9235_v15 = vmul.f32 %v8150_v24, %v6016_v25  ;;  %v9237_v23 = vmul.f32 %v8158_v33, %v6015_v5  ;;  %v9733_v16 = vmul.f32 %v19278_v53, %v9233_v1  ;;  %v19325_v5 = vld [vmem:[#allocation370_spill] sm:$0xff]  ;;  %v19327_v13 = vld [vmem:[#allocation263_spill] sm:$0xff] }
 0x290   : > { %19322 = vst [vmem:[#allocation39_spill] sm:$0xff] %v16494_v35  ;;  %v9734_v31 = vmul.f32 %v19228_v36, %v9234_v49  ;;  %v9736_v51 = vmul.f32 %v15948_v29, %v9236_v54  ;;  %v9796_v37 = vadd.f32 %v9732_v56, %v9522_v41  ;;  %v10005_v40 = vmul.f32 %v19284_v50, %v19324_v0 }
 0x291   : > { %v9238_v7 = vmul.f32 %v8162_v32, %v6017_v22  ;;  %v9735_v27 = vmul.f32 %v19184_v26, %v9235_v15  ;;  %v9737_v55 = vmul.f32 %v15814_v63, %v9237_v23  ;;  %v9797_v34 = vadd.f32 %v9733_v16, %v9523_v60  ;;  %v19329_v22 = vld [vmem:[#allocation115_spill] sm:$0xff]  ;;  %v19332_v16 = vld [vmem:[#allocation112_spill] sm:$0xff] }
 0x292   : > { %v9798_v45 = vadd.f32 %v9734_v31, %v9524_v44  ;;  %v9800_v20 = vadd.f32 %v9736_v51, %v9526_v59  ;;  %v10063_v25 = vadd.f32 %v9999_v8, %v9796_v37  ;;  %v16505_v24 = vmul.f32 %v19325_v5, %v9232_v61  ;;  %v19331_v44 = vld [vmem:[#allocation104_spill] sm:$0xff]  ;;  %v19334_v37 = vld [vmem:[#allocation78_spill] sm:$0xff] }
 0x293   : > { %v9738_v33 = vmul.f32 %v15830_v39, %v9238_v7  ;;  %v9799_v2 = vadd.f32 %v9735_v27, %v9525_v48  ;;  %v9801_v41 = vadd.f32 %v9737_v55, %v19327_v13  ;;  %v10064_v56 = vadd.f32 %v10000_v43, %v9797_v34  ;;  %v19333_v51 = vld [vmem:[#allocation120_spill] sm:$0xff]  ;;  %v19348_v13 = vld [vmem:[#allocation3_spill] sm:$0xff] }
 0x294   : > { %19326 = vst [vmem:[#allocation43_spill] sm:$0xff] %v16505_v24  ;;  %v10065_v35 = vadd.f32 %v10001_v4, %v9798_v45  ;;  %v10067_v32 = vadd.f32 %v19328_v28, %v9800_v20  ;;  %v10273_v50 = vadd.f32 %v19329_v22, %v10063_v25  ;;  %v16512_v63 = vmul.f32 %v19290_v10, %v9233_v1  ;;  %v19337_v4 = vld [vmem:[#allocation125_spill] sm:$0xff]  ;;  %v19341_v45 = vld [vmem:[#allocation360_spill] sm:$0xff] }
 0x295   : > { %v9802_v60 = vadd.f32 %v9738_v33, %v9528_v47  ;;  %v10066_v59 = vadd.f32 %v10002_v9, %v9799_v2  ;;  %v10068_v8 = vadd.f32 %v10004_v11, %v9801_v41  ;;  %v10274_v61 = vadd.f32 %v19331_v44, %v10064_v56  ;;  %v19338_v1 = vld [vmem:[#allocation109_spill] sm:$0xff]  ;;  %v19340_v9 = vld [vmem:[#allocation358_spill] sm:$0xff] }
 0x296   : > { %19330 = vst [vmem:[#allocation35_spill] sm:$0xff] %v16512_v63  ;;  %v10275_v31 = vadd.f32 %v19332_v16, %v10065_v35  ;;  %v10277_v48 = vadd.f32 %v19333_v51, %v10067_v32  ;;  %v10483_v27 = vadd.f32 %v19334_v37, %v10273_v50  ;;  %v16519_v43 = vmul.f32 %v16003_v46, %v9234_v49  ;;  %v16536_v49 = vpop.f32.mrf.mxu0  ;;  %v19351_v16 = vld [vmem:[#allocation127_spill] sm:$0xff]  ;;  %v19354_v37 = vld [vmem:[#allocation69_spill] sm:$0xff]  ;;  %v19363_v63 = vld [vmem:[#allocation86_spill] sm:$0xff] }
 0x297   : > { %v16521_v28 = vadd.f32 %v10005_v40, %v9802_v60  ;;  %v10276_v55 = vadd.f32 %v19337_v4, %v10066_v59  ;;  %v10278_v34 = vadd.f32 %v19338_v1, %v10068_v8  ;;  %v16526_v47 = vmul.f32 %v16137_v18, %v9235_v15  ;;  %19344 = vst [vmem:[#allocation263_spill] sm:$0xff] %v16536_v49  ;;  %v19345_v40 = vld [vmem:[#allocation376_spill] sm:$0xff]  ;;  %v19347_v15 = vld [vmem:[#allocation349_spill] sm:$0xff]  ;;  %v19355_v1 = vld [vmem:[#allocation278_spill] sm:$0xff] }
 0x298   : > { %19335 = vst [vmem:[#allocation252_spill] sm:$0xff] %v16519_v43  ;;  %v10485_v11 = vadd.f32 %v19340_v9, %v10275_v31  ;;  %v10487_v35 = vadd.f32 %v19341_v45, %v10277_v48  ;;  %v16531_v20 = vmul.f32 %v16141_v57, %v9236_v54  ;;  %v16534_v50 = vmul.f32 %v15992_v17, %v9237_v23  ;;  %v19349_v60 = vld [vmem:[#allocation61_spill] sm:$0xff]  ;;  %v19350_v8 = vld [vmem:[#allocation72_spill] sm:$0xff]  ;;  %v19352_v31 = vld [vmem:[#allocation75_spill] sm:$0xff] }
 0x299   : > { %19336 = vst [vmem:[#allocation256_spill] sm:$0xff] %v16521_v28  ;;  %19339 = vst [vmem:[#allocation42_spill] sm:$0xff] %v16526_v47  ;;  %v16539_v25 = vadd.f32 %v19345_v40, %v10278_v34  ;;  %v16542_v33 = vmul.f32 %v15998_v42, %v9238_v7  ;;  %v5034_v2 = vadd.f32 %v15961_v52, %v19347_v15  ;;  %v12664_v7 = vpop.f32.mrf.mxu0  ;;  %v19353_v48 = vld [vmem:[#allocation37_spill] sm:$0xff]  ;;  %v19356_v34 = vld [vmem:[#allocation71_spill] sm:$0xff] }
 0x29a   : > { %19342 = vst [vmem:[#allocation262_spill] sm:$0xff] %v16531_v20  ;;  %19343 = vst [vmem:[#allocation370_spill] sm:$0xff] %v16534_v50  ;;  %v8166_v41 = vrot.slane %v19306_v58, %v19348_v13  ;;  %v8170_v54 = vrot.slane %v19306_v58, %v19251_v62  ;;  %v8174_v23 = vrot.slane %v19306_v58, %v19303_v3  ;;  %v19357_v45 = vld [vmem:[#allocation281_spill] sm:$0xff]  ;;  %v19358_v40 = vld [vmem:[#allocation74_spill] sm:$0xff] }
 0x29b   : > { %19346 = vst [vmem:[#allocation258_spill] sm:$0xff] %v16542_v33  ;;  %v8178_v56 = vrot.slane %v19306_v58, %v19304_v14  ;;  %v8182_v32 = vrot.slane %v19306_v58, %v19256_v6  ;;  %v5172_v22 = vmax.f32 %v5034_v2, 0.0  ;;  %v8186_v52 = vrot.slane %v19306_v58, %v18854_v38  ;;  %v19359_v7 = vld [vmem:[#allocation279_spill] sm:$0xff]  ;;  %v19360_v33 = vld [vmem:[#allocation24_spill] sm:$0xff]  ;;  %v19361_v47 = vld [vmem:[#allocation89_spill] sm:$0xff] }
 0x29c   : > { %v8190_v59 = vrot.slane %v19349_v60, %v19305_v21  ;;  %v9529_v44 = vmul.f32 %v19350_v8, %v19324_v0  ;;  %v9530_v51 = vmul.f32 %v19352_v31, %v19351_v16  ;;  %v9531_v4 = vmul.f32 %v19354_v37, %v19353_v48  ;;  %v19362_v50 = vld [vmem:[#allocation92_spill] sm:$0xff]  ;;  %v19367_v37 = vld [vmem:[#allocation419_spill] sm:$0xff]  ;;  %v19369_v8 = vld [vmem:[#allocation357_spill] sm:$0xff] }
 0x29d   : > { %v9532_v9 = vmul.f32 %v19356_v34, %v19355_v1  ;;  %v9533_v15 = vmul.f32 %v19358_v40, %v19357_v45  ;;  %v6018_v2 = vcombine.high %v5172_v22, %v5172_v22  ;;  %v6025_v58 = vrot.slane %v5172_v22, %v12982_v12  ;;  %v19364_v21 = vld [vmem:[#allocation88_spill] sm:$0xff]  ;;  %v19366_v34 = vld [vmem:[#allocation283_spill] sm:$0xff] }
 0x29e   : > { %v9534_v20 = vmul.f32 %v19360_v33, %v19359_v7  ;;  %v10006_v24 = vmul.f32 %v19361_v47, %v19351_v16  ;;  %v10007_v43 = vmul.f32 %v19362_v50, %v19353_v48  ;;  %v10008_v49 = vmul.f32 %v19363_v63, %v19355_v1  ;;  %v19365_v28 = vld [vmem:[#allocation180_spill] sm:$0xff]  ;;  %v19370_v63 = vld [vmem:[#allocation359_spill] sm:$0xff]  ;;  %v19377_v16 = vld [vmem:[#allocation122_spill] sm:$0xff] }
 0x29f   : > { %v10009_v42 = vmul.f32 %v19364_v21, %v19357_v45  ;;  %v10010_v39 = vmul.f32 %v19365_v28, %v19359_v7  ;;  %v6032_v22 = vrot.slane %v6018_v2, %v12982_v12  ;;  %v6033_v40 = vcombine.high %v6025_v58, %v6025_v58  ;;  %v19368_v31 = vld [vmem:[#allocation108_spill] sm:$0xff]  ;;  %v19371_v14 = vld [vmem:[#allocation123_spill] sm:$0xff]  ;;  %v19373_v7 = vld [vmem:[#allocation118_spill] sm:$0xff] }
 0x2a0   : > { %v6041_v33 = vrot.slane %v6025_v58, %v12982_v12  ;;  %v10012_v47 = vmul.f32 %v19321_v30, %v19366_v34  ;;  %v10272_v50 = vadd.f32 %v19368_v31, %v19367_v37  ;;  %v10484_v38 = vadd.f32 %v19369_v8, %v10274_v61  ;;  %v19372_v58 = vld [vmem:[#allocation97_spill] sm:$0xff] }
 0x2a1   : > { %v10486_v6 = vadd.f32 %v19370_v63, %v10276_v55  ;;  %v10749_v21 = vadd.f32 %v19371_v14, %v10483_v27  ;;  %v6034_v3 = vcombine.high %v6032_v22, %v6032_v22  ;;  %v6048_v28 = vrot.slane %v6032_v22, %v12982_v12  ;;  %v19374_v34 = vld [vmem:[#allocation129_spill] sm:$0xff]  ;;  %v19375_v14 = vld [vmem:[#allocation352_spill] sm:$0xff] }
 0x2a2   : > { %v6055_v2 = vrot.slane %v6033_v40, %v12982_v12  ;;  %v6063_v62 = vcombine.high %v6041_v33, %v6041_v33  ;;  %v9239_v13 = vmul.f32 %v8166_v41, %v6041_v33  ;;  %v10482_v60 = vadd.f32 %v19372_v58, %v10272_v50  ;;  %v19376_v37 = vld [vmem:[#allocation121_spill] sm:$0xff] }
 0x2a3   : > { %v10750_v30 = vadd.f32 %v19373_v7, %v10484_v38  ;;  %v10751_v1 = vadd.f32 %v19374_v34, %v10485_v11  ;;  %v6062_v31 = vrot.slane %v6034_v3, %v12982_v12  ;;  %v9243_v55 = vmul.f32 %v8182_v32, %v6048_v28  ;;  %v19378_v34 = vld [vmem:[#allocation130_spill] sm:$0xff]  ;;  %v19380_v7 = vld [vmem:[#allocation347_spill] sm:$0xff] }
 0x2a4   : > { %v6064_v61 = vcombine.high %v6055_v2, %v6055_v2  ;;  %v9240_v8 = vmul.f32 %v8170_v54, %v6055_v2  ;;  %v9241_v63 = vmul.f32 %v8174_v23, %v6063_v62  ;;  %v9739_v27 = vmul.f32 %v19375_v14, %v9239_v13 }
 0x2a5   : > { %v10748_v22 = vadd.f32 %v19376_v37, %v10482_v60  ;;  %v10752_v40 = vadd.f32 %v19377_v16, %v10486_v6  ;;  %v6065_v17 = vcombine.high %v6062_v31, %v6062_v31  ;;  %v9244_v41 = vmul.f32 %v8186_v52, %v6062_v31 }
 0x2a6   : > { %v9242_v33 = vmul.f32 %v8178_v56, %v6064_v61  ;;  %v9740_v50 = vmul.f32 %v19323_v19, %v9240_v8  ;;  %v9741_v38 = vmul.f32 %v19278_v53, %v9241_v63  ;;  %v9743_v11 = vmul.f32 %v19184_v26, %v9243_v55  ;;  %v19379_v56 = vld [vmem:[#allocation161_spill] sm:$0xff] }
 0x2a7   : > { %v9803_v3 = vadd.f32 %v9739_v27, %v9529_v44  ;;  %v10753_v54 = vadd.f32 %v19378_v34, %v10487_v35  ;;  %v9245_v62 = vmul.f32 %v8190_v59, %v6065_v17  ;;  %v9744_v23 = vmul.f32 %v15948_v29, %v9244_v41  ;;  %v19381_v35 = vld [vmem:[#allocation163_spill] sm:$0xff]  ;;  %v19382_v59 = vld [vmem:[#allocation174_spill] sm:$0xff]  ;;  %v19383_v34 = vld [vmem:[#allocation284_spill] sm:$0xff] }
 0x2a8   : > { %v9742_v28 = vmul.f32 %v19228_v36, %v9242_v33  ;;  %v9804_v32 = vadd.f32 %v9740_v50, %v9530_v51  ;;  %v9805_v60 = vadd.f32 %v9741_v38, %v9531_v4  ;;  %v9807_v6 = vadd.f32 %v9743_v11, %v9533_v15  ;;  %v19384_v15 = vld [vmem:[#allocation285_spill] sm:$0xff]  ;;  %v19385_v50 = vld [vmem:[#allocation164_spill] sm:$0xff] }
 0x2a9   : > { %v10070_v16 = vadd.f32 %v10006_v24, %v9803_v3  ;;  %v10754_v52 = vadd.f32 %v19379_v56, %v16539_v25  ;;  %v9745_v2 = vmul.f32 %v19380_v7, %v9245_v62  ;;  %v9808_v31 = vadd.f32 %v9744_v23, %v9534_v20  ;;  %v19386_v25 = vld [vmem:[#allocation169_spill] sm:$0xff] }
 0x2aa   : > { %v9806_v58 = vadd.f32 %v9742_v28, %v9532_v9  ;;  %v10071_v61 = vadd.f32 %v10007_v43, %v9804_v32  ;;  %v10072_v44 = vadd.f32 %v10008_v49, %v9805_v60  ;;  %v10074_v27 = vadd.f32 %v10010_v39, %v9807_v6  ;;  %v19387_v9 = vld [vmem:[#allocation176_spill] sm:$0xff]  ;;  %v19388_v43 = vld [vmem:[#allocation379_spill] sm:$0xff]  ;;  %v19389_v39 = vld [vmem:[#allocation133_spill] sm:$0xff] }
 0x2ab   : > { %v10280_v17 = vadd.f32 %v19381_v35, %v10070_v16  ;;  %v10894_v37 = vmul.f32 %v19382_v59, %v19324_v0  ;;  %v9809_v51 = vadd.f32 %v9745_v2, %v19383_v34  ;;  %v10075_v24 = vadd.f32 %v19384_v15, %v9808_v31  ;;  %v19391_v0 = vld [vmem:[#allocation165_spill] sm:$0xff]  ;;  %v19398_v35 = vld [vmem:[#allocation40_spill] sm:$0xff]  ;;  %v19400_v15 = vld [vmem:[#allocation286_spill] sm:$0xff] }
 0x2ac   : > { %v10073_v4 = vadd.f32 %v10009_v42, %v9806_v58  ;;  %v16616_v38 = vadd.f32 %v19385_v50, %v10071_v61  ;;  %v10282_v11 = vadd.f32 %v19386_v25, %v10072_v44  ;;  %v10284_v20 = vadd.f32 %v19387_v9, %v10074_v27  ;;  %v19392_v42 = vld [vmem:[#allocation170_spill] sm:$0xff]  ;;  %v19393_v60 = vld [vmem:[#allocation57_spill] sm:$0xff]  ;;  %v19396_v61 = vld [vmem:[#allocation280_spill] sm:$0xff] }
 0x2ad   : > { %v16621_v49 = vadd.f32 %v19388_v43, %v10280_v17  ;;  %v10896_v3 = vmul.f32 %v19389_v39, %v19353_v48  ;;  %v16625_v28 = vadd.f32 %v10012_v47, %v9809_v51  ;;  %v16631_v32 = vadd.f32 %v19392_v42, %v10075_v24  ;;  %v19394_v16 = vld [vmem:[#allocation377_spill] sm:$0xff]  ;;  %v16642_v47 = vpop.f32.mrf.mxu0  ;;  %v19399_v51 = vld [vmem:[#allocation282_spill] sm:$0xff]  ;;  %v19401_v50 = vld [vmem:[#allocation368_spill] sm:$0xff] }
 0x2ae   : > { %v16628_v23 = vadd.f32 %v19391_v0, %v10073_v4  ;;  %v10898_v6 = vmul.f32 %v19393_v60, %v19357_v45  ;;  %v16636_v56 = vadd.f32 %v19394_v16, %v10282_v11  ;;  %v19395_v2 = vld [vmem:[#allocation381_spill] sm:$0xff]  ;;  %v10958_v31 = vadd.f32 %v10894_v37, %v10748_v22  ;;  %19397 = vst [vmem:[#allocation104_spill] sm:$0xff] %v16642_v47  ;;  %v19407_v16 = vld [vmem:[#allocation148_spill] sm:$0xff] }
 0x2af   : > { %19390 = vst [vmem:[#allocation115_spill] sm:$0xff] %v16625_v28  ;;  %v16639_v58 = vadd.f32 %v19395_v2, %v10284_v20  ;;  %v10959_v44 = vadd.f32 %v19396_v61, %v10749_v21  ;;  %v10960_v27 = vadd.f32 %v10896_v3, %v10750_v30  ;;  %v10961_v17 = vadd.f32 %v19398_v35, %v10751_v1  ;;  %v12667_v20 = vpop.f32.mrf.mxu0  ;;  %v19402_v37 = vld [vmem:[#allocation365_spill] sm:$0xff]  ;;  %v19403_v3 = vld [vmem:[#allocation127_spill] sm:$0xff]  ;;  %v19408_v2 = vld [vmem:[#allocation150_spill] sm:$0xff] }
 0x2b0   : > { %v10962_v34 = vadd.f32 %v10898_v6, %v10752_v40  ;;  %v10963_v4 = vadd.f32 %v19399_v51, %v10753_v54  ;;  %v10964_v24 = vadd.f32 %v19400_v15, %v10754_v52  ;;  %v11104_v25 = vmul.f32 %v19401_v50, %v9239_v13  ;;  %v19404_v52 = vld [vmem:[#allocation151_spill] sm:$0xff]  ;;  %v12517_v13 = vld [vmem:[%s18221_s7] ss:$0 sm:$0xff]  ;;  %v19438_v60 = vld [vmem:[#allocation60_spill] sm:$0xff] }
 0x2b1   : > { %v11105_v11 = vmul.f32 %v19325_v5, %v9240_v8  ;;  %v11106_v9 = vmul.f32 %v19290_v10, %v9241_v63  ;;  %v11107_v22 = vmul.f32 %v16003_v46, %v9242_v33  ;;  %v11108_v21 = vmul.f32 %v16137_v18, %v9243_v55  ;;  %v19405_v55 = vld [vmem:[#allocation155_spill] sm:$0xff] }
 0x2b2   : > { %v11109_v30 = vmul.f32 %v16141_v57, %v9244_v41  ;;  %v11110_v1 = vmul.f32 %v19402_v37, %v9245_v62  ;;  %v11168_v40 = vadd.f32 %v11104_v25, %v10958_v31  ;;  %v11370_v0 = vmul.f32 %v19404_v52, %v19403_v3  ;;  %v19406_v41 = vld [vmem:[#allocation278_spill] sm:$0xff]  ;;  %v19409_v61 = vld [vmem:[#allocation279_spill] sm:$0xff] }
 0x2b3   : > { %v11169_v43 = vadd.f32 %v11105_v11, %v10959_v44  ;;  %v11170_v54 = vadd.f32 %v11106_v9, %v10960_v27  ;;  %v11171_v8 = vadd.f32 %v11107_v22, %v10961_v17  ;;  %v11172_v63 = vadd.f32 %v11108_v21, %v10962_v34  ;;  %v19410_v44 = vld [vmem:[#allocation175_spill] sm:$0xff]  ;;  %v19413_v17 = vld [vmem:[#allocation288_spill] sm:$0xff]  ;;  %v16683_v21 = vld [vmem:[%s18219_s5] ss:$0 sm:$0xff] }
 0x2b4   : > { %v11173_v42 = vadd.f32 %v11109_v30, %v10963_v4  ;;  %v11174_v33 = vadd.f32 %v11110_v1, %v10964_v24  ;;  %v11371_v6 = vmul.f32 %v19405_v55, %v19353_v48  ;;  %v11372_v62 = vmul.f32 %v19407_v16, %v19406_v41  ;;  %v19411_v35 = vld [vmem:[#allocation283_spill] sm:$0xff]  ;;  %19418 = vst [vmem:[#allocation109_spill] sm:$0xff] %v16683_v21  ;;  %v19419_v30 = vld [vmem:[#allocation276_spill] sm:$0xff] }
 0x2b5   : > { %v11373_v31 = vmul.f32 %v19408_v2, %v19357_v45  ;;  %v11374_v27 = vmul.f32 %v19410_v44, %v19409_v61  ;;  %v19412_v51 = vld [vmem:[#allocation147_spill] sm:$0xff]  ;;  %v11434_v25 = vadd.f32 %v11370_v0, %v11168_v40  ;;  %v11485_v4 = vcombine.high %v12517_v13, %v12517_v13  ;;  %v19420_v40 = vld [vmem:[#allocation8_spill] sm:$0xff] }
 0x2b6   : > { %v11376_v15 = vmul.f32 %v19412_v51, %v19411_v35  ;;  %v16670_v34 = vadd.f32 %v19413_v17, %v11173_v42  ;;  %v11435_v24 = vadd.f32 %v11371_v6, %v11169_v43  ;;  %v11436_v11 = vadd.f32 %v11372_v62, %v11170_v54  ;;  %v19421_v43 = vld [vmem:[#allocation61_spill] sm:$0xff]  ;;  %v19422_v3 = vld [vmem:[#allocation3_spill] sm:$0xff]  ;;  %v19429_v17 = vld [vmem:[#allocation66_spill] sm:$0xff] }
 0x2b7   : > { %v16672_v48 = vadd.f32 %v11373_v31, %v11171_v8  ;;  %v11438_v9 = vadd.f32 %v11374_v27, %v11172_v63  ;;  %v11492_v45 = vrot.slane %v12517_v13, %v12982_v12  ;;  %v16678_v22 = vrot.slane %v11485_v4, %v12982_v12  ;;  %v19423_v8 = vld [vmem:[#allocation44_spill] sm:$0xff]  ;;  %v19424_v63 = vld [vmem:[#allocation5_spill] sm:$0xff] }
 0x2b8   : > { %19414 = vst [vmem:[#allocation112_spill] sm:$0xff] %v16670_v34  ;;  %v16674_v20 = vadd.f32 %v11376_v15, %v11174_v33  ;;  %v5039_v1 = vadd.f32 %v16683_v21, %v19419_v30  ;;  %v8194_v54 = vrot.slane %v19421_v43, %v19420_v40  ;;  %v8198_v0 = vrot.slane %v19421_v43, %v19422_v3  ;;  %v19427_v31 = vld [vmem:[#allocation45_spill] sm:$0xff]  ;;  %v19428_v27 = vld [vmem:[#allocation64_spill] sm:$0xff]  ;;  %v19430_v30 = vld [vmem:[#allocation63_spill] sm:$0xff] }
 0x2b9   : > { %19415 = vst [vmem:[#allocation120_spill] sm:$0xff] %v16672_v48  ;;  %19417 = vst [vmem:[#allocation125_spill] sm:$0xff] %v16678_v22  ;;  %v8202_v13 = vrot.slane %v19421_v43, %v19423_v8  ;;  %v8206_v42 = vrot.slane %v19421_v43, %v19424_v63  ;;  %v11500_v33 = vcombine.high %v11492_v45, %v11492_v45 }
 0x2ba   : > { %19416 = vst [vmem:[#allocation78_spill] sm:$0xff] %v16674_v20  ;;  %v16696_v6 = vrot.slane %v11492_v45, %v12982_v12  ;;  %v16700_v41 = vrot.slane %v16678_v22, %v12982_v12  ;;  %v5173_v62 = vmax.f32 %v5039_v1, 0.0  ;;  %v8210_v61 = vrot.slane %v19421_v43, %v19427_v31  ;;  %v19431_v20 = vld [vmem:[#allocation198_spill] sm:$0xff] }
 0x2bb   : > { %v8214_v15 = vrot.slane %v19421_v43, %v19428_v27  ;;  %v8218_v4 = vrot.slane %v19421_v43, %v19429_v17  ;;  %v19432_v34 = vrot.slane %v19431_v20, %v19420_v40  ;;  %v16715_v48 = vrot.slane %v11500_v33, %v12982_v12  ;;  %v19456_v17 = vld [vmem:[#allocation75_spill] sm:$0xff]  ;;  %v19462_v40 = vld [vmem:[#allocation74_spill] sm:$0xff] }
 0x2bc   : > { %19425 = vst [vmem:[#allocation358_spill] sm:$0xff] %v16696_v6  ;;  %19426 = vst [vmem:[#allocation360_spill] sm:$0xff] %v16700_v41  ;;  %v16719_v1 = vcombine.high %v16696_v6, %v16696_v6  ;;  %v16723_v47 = vcombine.high %v16700_v41, %v16700_v41  ;;  %v16726_v51 = vadd.f32 %v16700_v41, %v11436_v11  ;;  %v19451_v41 = vld [vmem:[#allocation70_spill] sm:$0xff] }
 0x2bd   : > { %v16712_v45 = vmul.f32 %v19432_v34, %v19430_v30  ;;  %19434 = vst [vmem:[#allocation349_spill] sm:$0xff] %v16715_v48  ;;  %v6066_v43 = vcombine.high %v5173_v62, %v5173_v62  ;;  %v6073_v37 = vrot.slane %v5173_v62, %v12982_v12  ;;  %v19439_v34 = vcombine.high %v19438_v60, %v19438_v60 }
 0x2be   : > { %19435 = vst [vmem:[#allocation37_spill] sm:$0xff] %v16719_v1  ;;  %19436 = vst [vmem:[#allocation281_spill] sm:$0xff] %v16723_v47  ;;  %v19440_v33 = vrot.slane %v19431_v20, %v19422_v3  ;;  %v19442_v6 = vcombine.high %v19430_v30, %v19430_v30  ;;  %v19443_v59 = vrot.slane %v19431_v20, %v19423_v8  ;;  %v19461_v3 = vld [vmem:[#allocation159_spill] sm:$0xff] }
 0x2bf   : > { %19433 = vst [vmem:[#allocation376_spill] sm:$0xff] %v16712_v45  ;;  %19437 = vst [vmem:[#allocation419_spill] sm:$0xff] %v16726_v51  ;;  %v16747_v11 = vcombine.high %v16715_v48, %v16715_v48  ;;  %v16750_v62 = vadd.f32 %v16719_v1, %v11434_v25  ;;  %v16753_v60 = vadd.f32 %v16723_v47, %v11438_v9  ;;  %v19454_v9 = vld [vmem:[#allocation72_spill] sm:$0xff]  ;;  %v19455_v47 = vld [vmem:[#allocation154_spill] sm:$0xff] }
 0x2c0   : > { %v16735_v39 = vmul.f32 %v19440_v33, %v19439_v34  ;;  %v16743_v28 = vmul.f32 %v19443_v59, %v19442_v6  ;;  %v19448_v34 = vld [vmem:[#allocation203_spill] sm:$0xff]  ;;  %v19449_v33 = vrot.slane %v19431_v20, %v19427_v31  ;;  %v6080_v51 = vrot.slane %v6066_v43, %v12982_v12  ;;  %v19464_v1 = vld [vmem:[#allocation24_spill] sm:$0xff] }
 0x2c1   : > { %19445 = vst [vmem:[#allocation359_spill] sm:$0xff] %v16747_v11  ;;  %19446 = vst [vmem:[#allocation123_spill] sm:$0xff] %v16750_v62  ;;  %v6081_v59 = vcombine.high %v6073_v37, %v6073_v37  ;;  %v6089_v6 = vrot.slane %v6073_v37, %v12982_v12  ;;  %v9536_v7 = vmul.f32 %v19451_v41, %v19411_v35  ;;  %v19453_v62 = vld [vmem:[#allocation53_spill] sm:$0xff]  ;;  %v19457_v20 = vld [vmem:[#allocation55_spill] sm:$0xff] }
 0x2c2   : > { %19441 = vst [vmem:[#allocation108_spill] sm:$0xff] %v16735_v39  ;;  %19444 = vst [vmem:[#allocation357_spill] sm:$0xff] %v16743_v28  ;;  %v16759_v30 = vmul.f32 %v19449_v33, %v19448_v34  ;;  %v16766_v25 = vadd.f32 %v16747_v11, %v11435_v24  ;;  %v9538_v27 = vmul.f32 %v19456_v17, %v19455_v47  ;;  %v19458_v34 = vld [vmem:[#allocation69_spill] sm:$0xff]  ;;  %v19459_v41 = vld [vmem:[#allocation299_spill] sm:$0xff] }
 0x2c3   : > { %19447 = vst [vmem:[#allocation97_spill] sm:$0xff] %v16753_v60  ;;  %v9537_v60 = vmul.f32 %v19454_v9, %v19453_v62  ;;  %v9539_v33 = vmul.f32 %v19458_v34, %v19457_v20  ;;  %v6082_v31 = vcombine.high %v6080_v51, %v6080_v51  ;;  %v6096_v43 = vrot.slane %v6080_v51, %v12982_v12  ;;  %v19460_v24 = vld [vmem:[#allocation71_spill] sm:$0xff]  ;;  %v19463_v11 = vld [vmem:[#allocation300_spill] sm:$0xff] }
 0x2c4   : > { %19450 = vst [vmem:[#allocation118_spill] sm:$0xff] %v16759_v30  ;;  %19452 = vst [vmem:[#allocation129_spill] sm:$0xff] %v16766_v25  ;;  %v6103_v37 = vrot.slane %v6081_v59, %v12982_v12  ;;  %v6111_v63 = vcombine.high %v6089_v6, %v6089_v6  ;;  %v16776_v8 = vmul.f32 %v8194_v54, %v6089_v6  ;;  %v19465_v54 = vld [vmem:[#allocation351_spill] sm:$0xff] }
 0x2c5   : > { %v9540_v25 = vmul.f32 %v19460_v24, %v19459_v41  ;;  %v9541_v9 = vmul.f32 %v19462_v40, %v19461_v3  ;;  %v9542_v17 = vmul.f32 %v19464_v1, %v19463_v11  ;;  %v6110_v21 = vrot.slane %v6082_v31, %v12982_v12  ;;  %v19466_v24 = vld [vmem:[#allocation87_spill] sm:$0xff] }
 0x2c6   : > { %v6112_v34 = vcombine.high %v6096_v43, %v6096_v43  ;;  %v6113_v48 = vcombine.high %v6103_v37, %v6103_v37  ;;  %v16785_v22 = vmul.f32 %v8198_v0, %v6103_v37  ;;  %v16787_v51 = vmul.f32 %v8202_v13, %v6111_v63  ;;  %v19468_v37 = vld [vmem:[#allocation92_spill] sm:$0xff] }
 0x2c7   : > { %v16789_v59 = vmul.f32 %v8210_v61, %v6096_v43  ;;  %v9746_v6 = vmul.f32 %v19465_v54, %v16776_v8  ;;  %v10013_v44 = vmul.f32 %v19466_v24, %v19453_v62  ;;  %v16797_v2 = vmul.f32 %v8214_v15, %v6110_v21  ;;  %v19467_v61 = vld [vmem:[#allocation89_spill] sm:$0xff]  ;;  %v16821_v24 = vpop.f32.mrf.mxu0 }
 0x2c8   : > { %v16795_v40 = vmul.f32 %v8206_v42, %v6113_v48  ;;  %v16799_v1 = vmul.f32 %v8218_v4, %v6112_v34  ;;  %v9747_v0 = vmul.f32 %v19375_v14, %v16785_v22  ;;  %v9748_v13 = vmul.f32 %v19323_v19, %v16787_v51  ;;  %19471 = vst [vmem:[#allocation121_spill] sm:$0xff] %v16821_v24 }
 0x2c9   : > { %v9750_v63 = vmul.f32 %v19228_v36, %v16789_v59  ;;  %v9810_v31 = vadd.f32 %v9746_v6, %v9536_v7  ;;  %v10014_v43 = vmul.f32 %v19467_v61, %v19455_v47  ;;  %v9751_v21 = vmul.f32 %v19184_v26, %v16797_v2  ;;  %v19469_v7 = vld [vmem:[#allocation86_spill] sm:$0xff]  ;;  %v19472_v26 = vld [vmem:[#allocation180_spill] sm:$0xff] }
 0x2ca   : > { %v9749_v48 = vmul.f32 %v19278_v53, %v16795_v40  ;;  %v9752_v42 = vmul.f32 %v15948_v29, %v16799_v1  ;;  %v9811_v15 = vadd.f32 %v9747_v0, %v9537_v60  ;;  %v9812_v4 = vadd.f32 %v9748_v13, %v9538_v27  ;;  %v19470_v53 = vld [vmem:[#allocation88_spill] sm:$0xff] }
 0x2cb   : > { %v9814_v34 = vadd.f32 %v9750_v63, %v9540_v25  ;;  %v10015_v19 = vmul.f32 %v19468_v37, %v19457_v20  ;;  %v10016_v6 = vmul.f32 %v19469_v7, %v19459_v41  ;;  %v9815_v14 = vadd.f32 %v9751_v21, %v9541_v9  ;;  %v19473_v63 = vld [vmem:[#allocation303_spill] sm:$0xff]  ;;  %v19474_v7 = vld [vmem:[#allocation101_spill] sm:$0xff]  ;;  %v12670_v9 = vpop.f32.mrf.mxu0 }
 0x2cc   : > { %v9813_v36 = vadd.f32 %v9749_v48, %v9539_v33  ;;  %v9816_v54 = vadd.f32 %v9752_v42, %v9542_v17  ;;  %v10017_v61 = vmul.f32 %v19470_v53, %v19461_v3  ;;  %v10018_v29 = vmul.f32 %v19472_v26, %v19463_v11  ;;  %v19475_v48 = vld [vmem:[#allocation102_spill] sm:$0xff]  ;;  %v19476_v42 = vld [vmem:[#allocation107_spill] sm:$0xff]  ;;  %v19477_v53 = vld [vmem:[#allocation204_spill] sm:$0xff] }
 0x2cd   : > { %v10077_v60 = vadd.f32 %v10013_v44, %v9810_v31  ;;  %v10078_v27 = vadd.f32 %v10014_v43, %v9811_v15  ;;  %v10079_v25 = vadd.f32 %v10015_v19, %v9812_v4  ;;  %v10223_v33 = vmul.f32 %v19474_v7, %v16712_v45  ;;  %v19478_v26 = vld [vmem:[#allocation100_spill] sm:$0xff]  ;;  %v19479_v19 = vld [vmem:[#allocation103_spill] sm:$0xff]  ;;  %v19480_v31 = vld [vmem:[#allocation205_spill] sm:$0xff] }
 0x2ce   : > { %v10080_v0 = vadd.f32 %v10016_v6, %v9813_v36  ;;  %v10081_v13 = vadd.f32 %v10017_v61, %v9814_v34  ;;  %v10083_v37 = vadd.f32 %v19473_v63, %v9816_v54  ;;  %v10082_v17 = vadd.f32 %v10018_v29, %v9815_v14  ;;  %v19481_v61 = vld [vmem:[#allocation124_spill] sm:$0xff]  ;;  %v19482_v43 = vld [vmem:[#allocation210_spill] sm:$0xff]  ;;  %v19483_v15 = vld [vmem:[#allocation111_spill] sm:$0xff] }
 0x2cf   : > { %v10224_v21 = vmul.f32 %v19475_v48, %v16735_v39  ;;  %v10225_v24 = vmul.f32 %v19476_v42, %v16743_v28  ;;  %v10226_v44 = vmul.f32 %v19478_v26, %v19477_v53  ;;  %v10227_v36 = vmul.f32 %v19479_v19, %v16759_v30  ;;  %v19484_v34 = vld [vmem:[#allocation256_spill] sm:$0xff]  ;;  %v19486_v30 = vld [vmem:[#allocation378_spill] sm:$0xff] }
 0x2d0   : > { %v10228_v54 = vmul.f32 %v19481_v61, %v19480_v31  ;;  %v10229_v4 = vmul.f32 %v19483_v15, %v19482_v43  ;;  %v19485_v29 = vld [vmem:[#allocation160_spill] sm:$0xff]  ;;  %v10287_v6 = vadd.f32 %v10223_v33, %v10077_v60  ;;  %v19487_v31 = vld [vmem:[#allocation382_spill] sm:$0xff] }
 0x2d1   : > { %v10279_v14 = vadd.f32 %v19485_v29, %v19484_v34  ;;  %v16842_v63 = vadd.f32 %v10224_v21, %v10078_v27  ;;  %v10289_v9 = vadd.f32 %v10225_v24, %v10079_v25  ;;  %v16844_v7 = vadd.f32 %v10226_v44, %v10080_v0  ;;  %v19488_v15 = vld [vmem:[#allocation380_spill] sm:$0xff]  ;;  %v19489_v34 = vld [vmem:[#allocation29_spill] sm:$0xff]  ;;  %v19490_v27 = vld [vmem:[#allocation206_spill] sm:$0xff] }
 0x2d2   : > { %v10291_v28 = vadd.f32 %v10227_v36, %v10081_v13  ;;  %v16846_v53 = vadd.f32 %v10228_v54, %v10082_v17  ;;  %v10293_v39 = vadd.f32 %v10229_v4, %v10083_v37  ;;  %v10491_v61 = vadd.f32 %v19487_v31, %v16616_v38  ;;  %v19491_v24 = vld [vmem:[#allocation25_spill] sm:$0xff]  ;;  %v19493_v37 = vld [vmem:[#allocation207_spill] sm:$0xff]  ;;  %v19494_v17 = vld [vmem:[#allocation166_spill] sm:$0xff] }
 0x2d3   : > { %v10489_v45 = vadd.f32 %v19486_v30, %v10279_v14  ;;  %v10493_v43 = vadd.f32 %v19488_v15, %v16628_v23  ;;  %v10495_v60 = vadd.f32 %v19489_v34, %v16631_v32  ;;  %v16856_v33 = vadd.f32 %v19490_v27, %v10287_v6  ;;  %v19492_v0 = vld [vmem:[#allocation289_spill] sm:$0xff]  ;;  %v19495_v21 = vld [vmem:[#allocation167_spill] sm:$0xff]  ;;  %v19497_v32 = vld [vmem:[#allocation168_spill] sm:$0xff] }
 0x2d4   : > { %v16859_v25 = vadd.f32 %v19491_v24, %v10289_v9  ;;  %v16862_v13 = vadd.f32 %v19492_v0, %v10291_v28  ;;  %v16865_v30 = vadd.f32 %v19493_v37, %v10293_v39  ;;  %v10756_v23 = vadd.f32 %v19495_v21, %v16621_v49  ;;  %v19496_v44 = vld [vmem:[#allocation171_spill] sm:$0xff]  ;;  %v19498_v54 = vld [vmem:[#allocation177_spill] sm:$0xff]  ;;  %v19499_v4 = vld [vmem:[#allocation172_spill] sm:$0xff] }
 0x2d5   : > { %v10755_v38 = vadd.f32 %v19494_v17, %v10489_v45  ;;  %v10757_v36 = vadd.f32 %v19496_v44, %v10491_v61  ;;  %v10758_v31 = vadd.f32 %v19497_v32, %v16636_v56  ;;  %v10759_v15 = vadd.f32 %v19498_v54, %v10493_v43  ;;  %v19500_v28 = vld [vmem:[#allocation181_spill] sm:$0xff]  ;;  %v19501_v39 = vld [vmem:[#allocation134_spill] sm:$0xff]  ;;  %v19506_v43 = vld [vmem:[#allocation59_spill] sm:$0xff] }
 0x2d6   : > { %v10760_v29 = vadd.f32 %v19499_v4, %v16639_v58  ;;  %v10761_v14 = vadd.f32 %v19500_v28, %v10495_v60  ;;  %v10901_v6 = vmul.f32 %v19501_v39, %v19411_v35  ;;  %v19502_v45 = vld [vmem:[#allocation138_spill] sm:$0xff]  ;;  %v19503_v49 = vld [vmem:[#allocation173_spill] sm:$0xff]  ;;  %v19508_v21 = vld [vmem:[#allocation367_spill] sm:$0xff]  ;;  %v11112_v54 = vmul.f32 %v19401_v50, %v16785_v22 }
 0x2d7   : > { %v10903_v9 = vmul.f32 %v19502_v45, %v19455_v47  ;;  %v10905_v34 = vmul.f32 %v19503_v49, %v19459_v41  ;;  %v19504_v61 = vld [vmem:[#allocation182_spill] sm:$0xff]  ;;  %v19505_v56 = vld [vmem:[#allocation297_spill] sm:$0xff]  ;;  %v10968_v0 = vadd.f32 %v19506_v43, %v10758_v31  ;;  %v11111_v35 = vmul.f32 %v19508_v21, %v16776_v8  ;;  %v19548_v39 = vld [vmem:[#allocation72_spill] sm:$0xff] }
 0x2d8   : > { %v10907_v27 = vmul.f32 %v19504_v61, %v19463_v11  ;;  %v10966_v24 = vadd.f32 %v19505_v56, %v10756_v23  ;;  %v10965_v37 = vadd.f32 %v10901_v6, %v10755_v38  ;;  %v19507_v17 = vld [vmem:[#allocation301_spill] sm:$0xff]  ;;  %v11113_v4 = vmul.f32 %v19325_v5, %v16787_v51  ;;  %v19547_v61 = vld [vmem:[#allocation315_spill] sm:$0xff] }
 0x2d9   : > { %v10967_v58 = vadd.f32 %v10903_v9, %v10757_v36  ;;  %v10970_v60 = vadd.f32 %v19507_v17, %v10760_v29  ;;  %v10969_v44 = vadd.f32 %v10905_v34, %v10759_v15  ;;  %v11114_v23 = vmul.f32 %v19290_v10, %v16795_v40  ;;  %v19509_v22 = vld [vmem:[#allocation149_spill] sm:$0xff] }
 0x2da   : > { %v10971_v32 = vadd.f32 %v10907_v27, %v10761_v14  ;;  %v11115_v38 = vmul.f32 %v16003_v46, %v16789_v59  ;;  %v11116_v36 = vmul.f32 %v16137_v18, %v16797_v2  ;;  %v11117_v8 = vmul.f32 %v16141_v57, %v16799_v1  ;;  %v19510_v1 = vld [vmem:[#allocation150_spill] sm:$0xff]  ;;  %v19511_v27 = vld [vmem:[#allocation175_spill] sm:$0xff]  ;;  %v19545_v49 = vld [vmem:[#allocation313_spill] sm:$0xff] }
 0x2db   : > { %v11175_v31 = vadd.f32 %v11111_v35, %v10965_v37  ;;  %v11176_v15 = vadd.f32 %v11112_v54, %v10966_v24  ;;  %v11177_v29 = vadd.f32 %v11113_v4, %v10967_v58  ;;  %v11377_v28 = vmul.f32 %v19509_v22, %v19453_v62  ;;  %v19512_v24 = vld [vmem:[#allocation304_spill] sm:$0xff]  ;;  %v19522_v54 = vld [vmem:[#allocation37_spill] sm:$0xff] }
 0x2dc   : > { %v11178_v14 = vadd.f32 %v11114_v23, %v10968_v0  ;;  %v11179_v51 = vadd.f32 %v11115_v38, %v10969_v44  ;;  %v11180_v6 = vadd.f32 %v11116_v36, %v10970_v60  ;;  %v11181_v9 = vadd.f32 %v11117_v8, %v10971_v32  ;;  %v19514_v0 = vld [vmem:[#allocation125_spill] sm:$0xff]  ;;  %v19524_v23 = vld [vmem:[#allocation359_spill] sm:$0xff]  ;;  %v19526_v36 = vld [vmem:[#allocation18_spill] sm:$0xff] }
 0x2dd   : > { %v11378_v40 = vmul.f32 %v19404_v52, %v19455_v47  ;;  %v11379_v59 = vmul.f32 %v19405_v55, %v19457_v20  ;;  %v11380_v2 = vmul.f32 %v19407_v16, %v19459_v41  ;;  %v11381_v34 = vmul.f32 %v19510_v1, %v19461_v3  ;;  %v19518_v3 = vld [vmem:[#allocation349_spill] sm:$0xff]  ;;  %v19560_v1 = vld [vmem:[#allocation87_spill] sm:$0xff]  ;;  %v17005_v55 = vpop.f32.mrf.mxu0 }
 0x2de   : > { %v11382_v56 = vmul.f32 %v19511_v27, %v19463_v11  ;;  %v11441_v62 = vadd.f32 %v11377_v28, %v11175_v31  ;;  %v16915_v43 = vadd.f32 %v19512_v24, %v11181_v9  ;;  %v11501_v37 = vcombine.high %v19514_v0, %v19514_v0  ;;  %v19520_v11 = vld [vmem:[#allocation287_spill] sm:$0xff]  ;;  %v19521_v44 = vld [vmem:[#allocation109_spill] sm:$0xff]  ;;  %v19531_v9 = vld [vmem:[#allocation44_spill] sm:$0xff]  ;;  %19562 = vst [vmem:[#allocation176_spill] sm:$0xff] %v17005_v55 }
 0x2df   : > { %v11442_v47 = vadd.f32 %v11378_v40, %v11176_v15  ;;  %v11443_v58 = vadd.f32 %v11379_v59, %v11177_v29  ;;  %v16919_v17 = vadd.f32 %v11380_v2, %v11178_v14  ;;  %v11445_v20 = vadd.f32 %v11381_v34, %v11179_v51  ;;  %v19527_v8 = vld [vmem:[#allocation73_spill] sm:$0xff]  ;;  %v19528_v15 = vld [vmem:[#allocation8_spill] sm:$0xff]  ;;  %v19530_v51 = vld [vmem:[#allocation3_spill] sm:$0xff]  ;;  %v12673_v57 = vpop.f32.mrf.mxu0 }
 0x2e0   : > { %19513 = vst [vmem:[#allocation122_spill] sm:$0xff] %v16915_v43  ;;  %v16921_v60 = vadd.f32 %v11382_v56, %v11180_v6  ;;  %v16924_v41 = vrot.slane %v11501_v37, %v12982_v12  ;;  %v16927_v35 = vadd.f32 %v19518_v3, %v11441_v62  ;;  %v5044_v32 = vadd.f32 %v19521_v44, %v19520_v11  ;;  %v19532_v59 = vld [vmem:[#allocation5_spill] sm:$0xff]  ;;  %v19534_v62 = vld [vmem:[#allocation64_spill] sm:$0xff]  ;;  %v19535_v0 = vld [vmem:[#allocation66_spill] sm:$0xff] }
 0x2e1   : > { %19515 = vst [vmem:[#allocation130_spill] sm:$0xff] %v16919_v17  ;;  %v16932_v4 = vadd.f32 %v19522_v54, %v11442_v47  ;;  %v16935_v38 = vadd.f32 %v19524_v23, %v11443_v58  ;;  %v8222_v31 = vrot.slane %v19527_v8, %v19526_v36  ;;  %v8226_v29 = vrot.slane %v19527_v8, %v19528_v15  ;;  %v19533_v34 = vld [vmem:[#allocation45_spill] sm:$0xff]  ;;  %v19537_v11 = vld [vmem:[#allocation31_spill] sm:$0xff]  ;;  %v19541_v43 = vld [vmem:[#allocation30_spill] sm:$0xff] }
 0x2e2   : > { %19516 = vst [vmem:[#allocation161_spill] sm:$0xff] %v16921_v60  ;;  %19517 = vst [vmem:[#allocation163_spill] sm:$0xff] %v16924_v41  ;;  %v16942_v28 = vadd.f32 %v16924_v41, %v11445_v20  ;;  %v5174_v14 = vmax.f32 %v5044_v32, 0.0  ;;  %v8230_v6 = vrot.slane %v19527_v8, %v19530_v51  ;;  %v8234_v40 = vrot.slane %v19527_v8, %v19531_v9  ;;  %v19536_v20 = vld [vmem:[#allocation67_spill] sm:$0xff]  ;;  %v19544_v17 = vld [vmem:[#allocation68_spill] sm:$0xff] }
 0x2e3   : > { %19519 = vst [vmem:[#allocation284_spill] sm:$0xff] %v16927_v35  ;;  %19523 = vst [vmem:[#allocation285_spill] sm:$0xff] %v16932_v4  ;;  %v8238_v2 = vrot.slane %v19527_v8, %v19532_v59  ;;  %v8242_v56 = vrot.slane %v19527_v8, %v19533_v34  ;;  %v8246_v24 = vrot.slane %v19527_v8, %v19534_v62  ;;  %v19550_v62 = vld [vmem:[#allocation75_spill] sm:$0xff]  ;;  %v19556_v15 = vld [vmem:[#allocation74_spill] sm:$0xff] }
 0x2e4   : > { %19525 = vst [vmem:[#allocation164_spill] sm:$0xff] %v16935_v38  ;;  %19529 = vst [vmem:[#allocation169_spill] sm:$0xff] %v16942_v28  ;;  %v8250_v37 = vrot.slane %v19527_v8, %v19535_v0  ;;  %v6114_v47 = vcombine.high %v5174_v14, %v5174_v14  ;;  %v6121_v58 = vrot.slane %v5174_v14, %v12982_v12  ;;  %v19543_v14 = vld [vmem:[#allocation302_spill] sm:$0xff]  ;;  %v19554_v9 = vld [vmem:[#allocation71_spill] sm:$0xff] }
 0x2e5   : > { %v19538_v32 = vrot.slane %v19537_v11, %v19526_v36  ;;  %v19539_v4 = vcombine.high %v19536_v20, %v19536_v20  ;;  %v19540_v38 = vrot.slane %v19537_v11, %v19530_v51  ;;  %v19542_v8 = vrot.slane %v19537_v11, %v19532_v59  ;;  %v19551_v11 = vld [vmem:[#allocation321_spill] sm:$0xff]  ;;  %v19553_v59 = vld [vmem:[#allocation314_spill] sm:$0xff]  ;;  %v19557_v36 = vld [vmem:[#allocation319_spill] sm:$0xff] }
 0x2e6   : > { %v9543_v45 = vmul.f32 %v19544_v17, %v19543_v14  ;;  %v6128_v0 = vrot.slane %v6114_v47, %v12982_v12  ;;  %v6129_v23 = vcombine.high %v6121_v58, %v6121_v58  ;;  %v9548_v17 = vmul.f32 %v19554_v9, %v19553_v59  ;;  %v19555_v51 = vld [vmem:[#allocation318_spill] sm:$0xff]  ;;  %v19558_v44 = vld [vmem:[#allocation24_spill] sm:$0xff]  ;;  %v19561_v16 = vld [vmem:[#allocation89_spill] sm:$0xff] }
 0x2e7   : > { %v16961_v28 = vmul.f32 %v19538_v32, %v19536_v20  ;;  %v16969_v35 = vmul.f32 %v19540_v38, %v19539_v4  ;;  %v16975_v60 = vmul.f32 %v19542_v8, %v19541_v43  ;;  %v19546_v32 = vld [vmem:[#allocation70_spill] sm:$0xff]  ;;  %v9545_v20 = vmul.f32 %v19548_v39, %v19547_v61  ;;  %v19549_v38 = vld [vmem:[#allocation316_spill] sm:$0xff]  ;;  %v19552_v43 = vld [vmem:[#allocation69_spill] sm:$0xff] }
 0x2e8   : > { %v9544_v41 = vmul.f32 %v19546_v32, %v19545_v49  ;;  %v6137_v4 = vrot.slane %v6121_v58, %v12982_v12  ;;  %v9546_v34 = vmul.f32 %v19550_v62, %v19549_v38  ;;  %v9547_v8 = vmul.f32 %v19552_v43, %v19551_v11  ;;  %v19559_v62 = vld [vmem:[#allocation85_spill] sm:$0xff]  ;;  %v19569_v57 = vld [vmem:[#allocation355_spill] sm:$0xff] }
 0x2e9   : > { %v9549_v32 = vmul.f32 %v19556_v15, %v19555_v51  ;;  %v9550_v39 = vmul.f32 %v19558_v44, %v19557_v36  ;;  %v6130_v54 = vcombine.high %v6128_v0, %v6128_v0  ;;  %v6144_v47 = vrot.slane %v6128_v0, %v12982_v12 }
 0x2ea   : > { %v6151_v58 = vrot.slane %v6129_v23, %v12982_v12  ;;  %v6159_v3 = vcombine.high %v6137_v4, %v6137_v4  ;;  %v16997_v27 = vmul.f32 %v8222_v31, %v6137_v4  ;;  %v10020_v43 = vmul.f32 %v19559_v62, %v19545_v49  ;;  %v19563_v4 = vld [vmem:[#allocation347_spill] sm:$0xff] }
 0x2eb   : > { %v10021_v9 = vmul.f32 %v19560_v1, %v19547_v61  ;;  %v10022_v15 = vmul.f32 %v19561_v16, %v19549_v38  ;;  %v6158_v44 = vrot.slane %v6130_v54, %v12982_v12  ;;  %v6160_v52 = vcombine.high %v6144_v47, %v6144_v47  ;;  %v19564_v1 = vld [vmem:[#allocation92_spill] sm:$0xff] }
 0x2ec   : > { %v6161_v0 = vcombine.high %v6151_v58, %v6151_v58  ;;  %v17008_v22 = vmul.f32 %v8226_v29, %v6151_v58  ;;  %v17010_v23 = vmul.f32 %v8230_v6, %v6159_v3  ;;  %v17012_v31 = vmul.f32 %v8238_v2, %v6144_v47  ;;  %v19566_v29 = vld [vmem:[#allocation351_spill] sm:$0xff]  ;;  %v19567_v6 = vld [vmem:[#allocation352_spill] sm:$0xff]  ;;  %v19568_v47 = vld [vmem:[#allocation350_spill] sm:$0xff] }
 0x2ed   : > { %v9753_v62 = vmul.f32 %v19563_v4, %v16997_v27  ;;  %v10023_v49 = vmul.f32 %v19564_v1, %v19551_v11  ;;  %v6162_v16 = vcombine.high %v6158_v44, %v6158_v44  ;;  %v17020_v55 = vmul.f32 %v8242_v56, %v6158_v44  ;;  %v19570_v56 = vld [vmem:[#allocation353_spill] sm:$0xff] }
 0x2ee   : > { %v17018_v38 = vmul.f32 %v8234_v40, %v6161_v0  ;;  %v17022_v54 = vmul.f32 %v8246_v24, %v6160_v52  ;;  %v9754_v3 = vmul.f32 %v19566_v29, %v17008_v22  ;;  %v9755_v2 = vmul.f32 %v19567_v6, %v17010_v23  ;;  %v19571_v52 = vld [vmem:[#allocation354_spill] sm:$0xff] }
 0x2ef   : > { %19565 = vst [vmem:[#allocation379_spill] sm:$0xff] %v17020_v55  ;;  %v9757_v58 = vmul.f32 %v19568_v47, %v17012_v31  ;;  %v9817_v4 = vadd.f32 %v9753_v62, %v9543_v45  ;;  %v17030_v12 = vmul.f32 %v8250_v37, %v6162_v16  ;;  %v9758_v44 = vmul.f32 %v19570_v56, %v17020_v55  ;;  %v19572_v6 = vld [vmem:[#allocation86_spill] sm:$0xff]  ;;  %v19573_v47 = vld [vmem:[#allocation136_spill] sm:$0xff] }
 0x2f0   : > { %v9756_v40 = vmul.f32 %v19569_v57, %v17018_v38  ;;  %v9759_v24 = vmul.f32 %v19571_v52, %v17022_v54  ;;  %v9818_v0 = vadd.f32 %v9754_v3, %v9544_v41  ;;  %v9819_v29 = vadd.f32 %v9755_v2, %v9545_v20  ;;  %v19574_v57 = vld [vmem:[#allocation88_spill] sm:$0xff] }
 0x2f1   : > { %v9821_v1 = vadd.f32 %v9757_v58, %v9547_v8  ;;  %v10024_v18 = vmul.f32 %v19572_v6, %v19553_v59  ;;  %v9760_v45 = vmul.f32 %v19573_v47, %v17030_v12  ;;  %v9822_v62 = vadd.f32 %v9758_v44, %v9548_v17  ;;  %v19575_v56 = vld [vmem:[#allocation180_spill] sm:$0xff]  ;;  %v19576_v6 = vld [vmem:[#allocation202_spill] sm:$0xff]  ;;  %v19584_v44 = vld [vmem:[#allocation231_spill] sm:$0xff] }
 0x2f2   : > { %v9820_v16 = vadd.f32 %v9756_v40, %v9546_v34  ;;  %v9823_v37 = vadd.f32 %v9759_v24, %v9549_v32  ;;  %v10025_v46 = vmul.f32 %v19574_v57, %v19555_v51  ;;  %v10026_v55 = vmul.f32 %v19575_v56, %v19557_v36  ;;  %v19577_v59 = vld [vmem:[#allocation98_spill] sm:$0xff] }
 0x2f3   : > { %v10084_v10 = vadd.f32 %v10020_v43, %v9817_v4  ;;  %v10085_v52 = vadd.f32 %v10021_v9, %v9818_v0  ;;  %v9824_v41 = vadd.f32 %v9760_v45, %v9550_v39  ;;  %v10086_v20 = vadd.f32 %v10022_v15, %v9819_v29  ;;  %v19578_v17 = vld [vmem:[#allocation58_spill] sm:$0xff]  ;;  %v19579_v43 = vld [vmem:[#allocation228_spill] sm:$0xff]  ;;  %v19583_v15 = vld [vmem:[#allocation115_spill] sm:$0xff] }
 0x2f4   : > { %v10087_v8 = vadd.f32 %v10023_v49, %v9820_v16  ;;  %v10088_v3 = vadd.f32 %v10024_v18, %v9821_v1  ;;  %v10089_v2 = vadd.f32 %v10025_v46, %v9822_v62  ;;  %v10090_v58 = vadd.f32 %v10026_v55, %v9823_v37  ;;  %v19580_v46 = vld [vmem:[#allocation230_spill] sm:$0xff]  ;;  %v19581_v49 = vld [vmem:[#allocation233_spill] sm:$0xff]  ;;  %v19582_v1 = vld [vmem:[#allocation124_spill] sm:$0xff] }
 0x2f5   : > { %v10222_v47 = vmul.f32 %v19577_v59, %v19576_v6  ;;  %v10230_v34 = vmul.f32 %v19577_v59, %v16961_v28  ;;  %v17051_v32 = vadd.f32 %v19578_v17, %v9824_v41  ;;  %v10232_v40 = vmul.f32 %v19475_v48, %v16969_v35  ;;  %v19585_v62 = vld [vmem:[#allocation298_spill] sm:$0xff]  ;;  %v19586_v41 = vld [vmem:[#allocation397_spill] sm:$0xff]  ;;  %v19628_v48 = vld [vmem:[#allocation155_spill] sm:$0xff] }
 0x2f6   : > { %v10233_v9 = vmul.f32 %v19476_v42, %v19579_v43  ;;  %v10234_v18 = vmul.f32 %v19478_v26, %v16975_v60  ;;  %v10235_v55 = vmul.f32 %v19479_v19, %v19580_v46  ;;  %v10236_v39 = vmul.f32 %v19582_v1, %v19581_v49  ;;  %v19587_v57 = vld [vmem:[#allocation398_spill] sm:$0xff] }
 0x2f7   : > { %v10286_v28 = vadd.f32 %v10222_v47, %v19583_v15  ;;  %v10294_v4 = vadd.f32 %v10230_v34, %v10084_v10  ;;  %v17065_v24 = vadd.f32 %v19584_v44, %v10085_v52  ;;  %v10296_v0 = vadd.f32 %v10232_v40, %v10086_v20  ;;  %v19588_v10 = vld [vmem:[#allocation399_spill] sm:$0xff]  ;;  %v19590_v20 = vld [vmem:[#allocation178_spill] sm:$0xff] }
 0x2f8   : > { %v17067_v29 = vadd.f32 %v10233_v9, %v10087_v8  ;;  %v10298_v6 = vadd.f32 %v10234_v18, %v10088_v3  ;;  %v17069_v45 = vadd.f32 %v10235_v55, %v10089_v2  ;;  %v10300_v16 = vadd.f32 %v10236_v39, %v10090_v58  ;;  %v19589_v52 = vld [vmem:[#allocation251_spill] sm:$0xff]  ;;  %v19591_v3 = vld [vmem:[#allocation290_spill] sm:$0xff]  ;;  %v19593_v9 = vld [vmem:[#allocation376_spill] sm:$0xff] }
 0x2f9   : > { %v10496_v37 = vadd.f32 %v19585_v62, %v10286_v28  ;;  %v10498_v17 = vadd.f32 %v19586_v41, %v16842_v63  ;;  %v10500_v1 = vadd.f32 %v19587_v57, %v16844_v7  ;;  %v10502_v47 = vadd.f32 %v19588_v10, %v16846_v53  ;;  %v19592_v58 = vld [vmem:[#allocation199_spill] sm:$0xff]  ;;  %v19594_v63 = vld [vmem:[#allocation105_spill] sm:$0xff]  ;;  %v19595_v55 = vld [vmem:[#allocation108_spill] sm:$0xff] }
 0x2fa   : > { %v17079_v34 = vadd.f32 %v19589_v52, %v10294_v4  ;;  %v17082_v8 = vadd.f32 %v19590_v20, %v10296_v0  ;;  %v17085_v2 = vadd.f32 %v19591_v3, %v10298_v6  ;;  %v17088_v40 = vadd.f32 %v19592_v58, %v10300_v16  ;;  %v19596_v7 = vld [vmem:[#allocation110_spill] sm:$0xff]  ;;  %v19597_v39 = vld [vmem:[#allocation357_spill] sm:$0xff]  ;;  %v19599_v28 = vld [vmem:[#allocation204_spill] sm:$0xff] }
 0x2fb   : > { %v10698_v18 = vmul.f32 %v19594_v63, %v19593_v9  ;;  %v10699_v57 = vmul.f32 %v19596_v7, %v19595_v55  ;;  %v19598_v53 = vld [vmem:[#allocation113_spill] sm:$0xff]  ;;  %v19600_v4 = vld [vmem:[#allocation116_spill] sm:$0xff]  ;;  %v19601_v0 = vld [vmem:[#allocation118_spill] sm:$0xff] }
 0x2fc   : > { %v10700_v15 = vmul.f32 %v19598_v53, %v19597_v39  ;;  %v10701_v44 = vmul.f32 %v19600_v4, %v19599_v28  ;;  %v19602_v62 = vld [vmem:[#allocation106_spill] sm:$0xff]  ;;  %v19603_v6 = vld [vmem:[#allocation205_spill] sm:$0xff] }
 0x2fd   : > { %v10702_v41 = vmul.f32 %v19602_v62, %v19601_v0  ;;  %v19604_v10 = vld [vmem:[#allocation126_spill] sm:$0xff]  ;;  %v10762_v58 = vadd.f32 %v10698_v18, %v10496_v37  ;;  %v10763_v9 = vadd.f32 %v10699_v57, %v16856_v33  ;;  %v19607_v55 = vld [vmem:[#allocation229_spill] sm:$0xff]  ;;  %v19608_v0 = vld [vmem:[#allocation131_spill] sm:$0xff]  ;;  %v17115_v33 = vpop.f32.mrf.mxu0 }
 0x2fe   : > { %v10703_v52 = vmul.f32 %v19604_v10, %v19603_v6  ;;  %v19605_v16 = vld [vmem:[#allocation210_spill] sm:$0xff]  ;;  %v10769_v56 = vadd.f32 %v19607_v55, %v16865_v30  ;;  %v10764_v19 = vadd.f32 %v10700_v15, %v10498_v17  ;;  %v10765_v39 = vadd.f32 %v10701_v44, %v16859_v25  ;;  %v19610_v37 = vld [vmem:[#allocation133_spill] sm:$0xff]  ;;  %19611 = vst [vmem:[#allocation165_spill] sm:$0xff] %v17115_v33 }
 0x2ff   : > { %v19606_v20 = vld [vmem:[#allocation114_spill] sm:$0xff]  ;;  %v10766_v63 = vadd.f32 %v10702_v41, %v10500_v1  ;;  %v10908_v42 = vmul.f32 %v19608_v0, %v19543_v14  ;;  %v10912_v18 = vmul.f32 %v19610_v37, %v19551_v11  ;;  %v19612_v30 = vld [vmem:[#allocation57_spill] sm:$0xff]  ;;  %v11119_v33 = vmul.f32 %v19508_v21, %v17008_v22 }
 0x300   : > { %v10704_v3 = vmul.f32 %v19606_v20, %v19605_v16  ;;  %v10767_v28 = vadd.f32 %v10703_v52, %v16862_v13  ;;  %v19609_v6 = vld [vmem:[#allocation174_spill] sm:$0xff]  ;;  %v10914_v17 = vmul.f32 %v19612_v30, %v19555_v51  ;;  %v19613_v57 = vld [vmem:[#allocation317_spill] sm:$0xff]  ;;  %v19615_v13 = vld [vmem:[#allocation320_spill] sm:$0xff] }
 0x301   : > { %v10910_v59 = vmul.f32 %v19609_v6, %v19547_v61  ;;  %v10973_v25 = vadd.f32 %v19613_v57, %v10763_v9  ;;  %v19614_v1 = vld [vmem:[#allocation322_spill] sm:$0xff]  ;;  %v10972_v44 = vadd.f32 %v10908_v42, %v10762_v58  ;;  %v10976_v14 = vadd.f32 %v10912_v18, %v10766_v63  ;;  %v19617_v0 = vld [vmem:[#allocation365_spill] sm:$0xff]  ;;  %v19620_v63 = vld [vmem:[#allocation179_spill] sm:$0xff] }
 0x302   : > { %v10768_v26 = vadd.f32 %v10704_v3, %v10502_v47  ;;  %v10975_v15 = vadd.f32 %v19614_v1, %v10765_v39  ;;  %v10977_v47 = vadd.f32 %v19615_v13, %v10767_v28  ;;  %v19616_v52 = vld [vmem:[#allocation62_spill] sm:$0xff]  ;;  %v12676_v3 = vpop.f32.mrf.mxu0  ;;  %v11118_v37 = vmul.f32 %v19617_v0, %v16997_v27  ;;  %v19622_v27 = vld [vmem:[#allocation387_spill] sm:$0xff]  ;;  %v19625_v30 = vld [vmem:[#allocation149_spill] sm:$0xff] }
 0x303   : > { %v10974_v41 = vadd.f32 %v10910_v59, %v10764_v19  ;;  %v10979_v16 = vadd.f32 %v19616_v52, %v10769_v56  ;;  %v11120_v9 = vmul.f32 %v19401_v50, %v17010_v23  ;;  %v11121_v39 = vmul.f32 %v19325_v5, %v17018_v38  ;;  %v19618_v42 = vld [vmem:[#allocation366_spill] sm:$0xff]  ;;  %v19619_v59 = vld [vmem:[#allocation379_spill] sm:$0xff]  ;;  %v19623_v52 = vld [vmem:[#allocation313_spill] sm:$0xff] }
 0x304   : > { %v10978_v55 = vadd.f32 %v10914_v17, %v10768_v26  ;;  %v11122_v19 = vmul.f32 %v19618_v42, %v17012_v31  ;;  %v11123_v56 = vmul.f32 %v19620_v63, %v19619_v59  ;;  %v19621_v26 = vld [vmem:[#allocation386_spill] sm:$0xff]  ;;  %v11125_v28 = vmul.f32 %v19622_v27, %v17030_v12  ;;  %v19624_v3 = vld [vmem:[#allocation147_spill] sm:$0xff]  ;;  %v19626_v20 = vld [vmem:[#allocation316_spill] sm:$0xff] }
 0x305   : > { %v11124_v58 = vmul.f32 %v19621_v26, %v17022_v54  ;;  %v11182_v18 = vadd.f32 %v11118_v37, %v10972_v44  ;;  %v11183_v22 = vadd.f32 %v11119_v33, %v10973_v25  ;;  %v11184_v17 = vadd.f32 %v11120_v9, %v10974_v41  ;;  %v19627_v6 = vld [vmem:[#allocation151_spill] sm:$0xff]  ;;  %v19629_v37 = vld [vmem:[#allocation314_spill] sm:$0xff]  ;;  %v19630_v33 = vld [vmem:[#allocation148_spill] sm:$0xff] }
 0x306   : > { %v11185_v57 = vadd.f32 %v11121_v39, %v10975_v15  ;;  %v11186_v23 = vadd.f32 %v11122_v19, %v10976_v14  ;;  %v11187_v1 = vadd.f32 %v11123_v56, %v10977_v47  ;;  %v11189_v38 = vadd.f32 %v11125_v28, %v10979_v16  ;;  %v19631_v15 = vld [vmem:[#allocation150_spill] sm:$0xff]  ;;  %v19632_v44 = vld [vmem:[#allocation175_spill] sm:$0xff]  ;;  %v17153_v14 = vpop.permute.xlu1 %7573  ;;  %v19642_v28 = vld [vmem:[#allocation37_spill] sm:$0xff] }
 0x307   : > { %v11188_v13 = vadd.f32 %v11124_v58, %v10978_v55  ;;  %v11384_v31 = vmul.f32 %v19624_v3, %v19623_v52  ;;  %v11385_v59 = vmul.f32 %v19625_v30, %v19547_v61  ;;  %v11386_v54 = vmul.f32 %v19627_v6, %v19626_v20  ;;  %v19633_v30 = vld [vmem:[#allocation323_spill] sm:$0xff]  ;;  %v19638_v56 = vld [vmem:[#allocation358_spill] sm:$0xff]  ;;  %v19640_v58 = vld [vmem:[#allocation349_spill] sm:$0xff] }
 0x308   : > { %v11387_v12 = vmul.f32 %v19628_v48, %v19551_v11  ;;  %v11388_v25 = vmul.f32 %v19630_v33, %v19629_v37  ;;  %v11389_v47 = vmul.f32 %v19631_v15, %v19555_v51  ;;  %v11390_v41 = vmul.f32 %v19632_v44, %v19557_v36  ;;  %v19646_v52 = vld [vmem:[#allocation360_spill] sm:$0xff]  ;;  %v19653_v44 = vld [vmem:[#allocation45_spill] sm:$0xff] }
 0x309   : > { %v11448_v16 = vadd.f32 %v11384_v31, %v11182_v18  ;;  %v11449_v55 = vadd.f32 %v11385_v59, %v11183_v22  ;;  %v11450_v61 = vadd.f32 %v11386_v54, %v11184_v17  ;;  %v17156_v9 = vadd.f32 %v19633_v30, %v11189_v38  ;;  %v19644_v22 = vld [vmem:[#allocation330_spill] sm:$0xff]  ;;  %v19645_v17 = vld [vmem:[#allocation109_spill] sm:$0xff]  ;;  %v19650_v31 = vld [vmem:[#allocation3_spill] sm:$0xff] }
 0x30a   : > { %v17158_v20 = vadd.f32 %v11387_v12, %v11185_v57  ;;  %v11452_v11 = vadd.f32 %v11388_v25, %v11186_v23  ;;  %v17160_v39 = vadd.f32 %v11389_v47, %v11187_v1  ;;  %v17162_v19 = vadd.f32 %v11390_v41, %v11188_v13  ;;  %v19648_v23 = vld [vmem:[#allocation18_spill] sm:$0xff]  ;;  %v19649_v13 = vld [vmem:[#allocation8_spill] sm:$0xff]  ;;  %v19652_v25 = vld [vmem:[#allocation5_spill] sm:$0xff] }
 0x30b   : > { %19634 = vst [vmem:[#allocation170_spill] sm:$0xff] %v17156_v9  ;;  %v17165_v51 = vadd.f32 %v19638_v56, %v11448_v16  ;;  %v17168_v36 = vadd.f32 %v19640_v58, %v11449_v55  ;;  %v17171_v18 = vadd.f32 %v19642_v28, %v11450_v61  ;;  %v5049_v38 = vadd.f32 %v19645_v17, %v19644_v22  ;;  %v19651_v12 = vld [vmem:[#allocation44_spill] sm:$0xff]  ;;  %v19655_v61 = vld [vmem:[#allocation23_spill] sm:$0xff]  ;;  %v19662_v28 = vld [vmem:[#allocation333_spill] sm:$0xff] }
 0x30c   : > { %19635 = vst [vmem:[#allocation377_spill] sm:$0xff] %v17158_v20  ;;  %19636 = vst [vmem:[#allocation381_spill] sm:$0xff] %v17160_v39  ;;  %v17176_v57 = vadd.f32 %v19646_v52, %v11452_v11  ;;  %v8254_v1 = vrot.slane %v17153_v14, %v19648_v23  ;;  %v8258_v3 = vrot.slane %v17153_v14, %v19649_v13  ;;  %v19654_v16 = vld [vmem:[#allocation64_spill] sm:$0xff]  ;;  %v19656_v11 = vld [vmem:[#allocation95_spill] sm:$0xff] }
 0x30d   : > { %19637 = vst [vmem:[#allocation280_spill] sm:$0xff] %v17162_v19  ;;  %19639 = vst [vmem:[#allocation40_spill] sm:$0xff] %v17165_v51  ;;  %v8262_v59 = vrot.slane %v17153_v14, %v19650_v31  ;;  %v5175_v54 = vmax.f32 %v5049_v38, 0.0  ;;  %v8266_v37 = vrot.slane %v17153_v14, %v19651_v12  ;;  %v8270_v47 = vrot.slane %v17153_v14, %v19652_v25  ;;  %v19657_v38 = vld [vmem:[#allocation411_spill] sm:$0xff]  ;;  %v19658_v51 = vld [vmem:[#allocation2_spill] sm:$0xff] }
 0x30e   : > { %19641 = vst [vmem:[#allocation282_spill] sm:$0xff] %v17168_v36  ;;  %19643 = vst [vmem:[#allocation286_spill] sm:$0xff] %v17171_v18  ;;  %v8274_v41 = vrot.slane %v17153_v14, %v19653_v44  ;;  %v8278_v55 = vrot.slane %v17153_v14, %v19654_v16  ;;  %v10505_v30 = vadd.f32 %v19655_v61, %v17065_v24 }
 0x30f   : > { %19647 = vst [vmem:[#allocation368_spill] sm:$0xff] %v17176_v57  ;;  %v10507_v22 = vadd.f32 %v19656_v11, %v17067_v29  ;;  %v10509_v57 = vadd.f32 %v19657_v38, %v17069_v45  ;;  %v6163_v18 = vcombine.high %v5175_v54, %v5175_v54  ;;  %v6170_v36 = vrot.slane %v5175_v54, %v19658_v51  ;;  %v19659_v45 = vld [vmem:[#allocation232_spill] sm:$0xff] }
 0x310   : > { %v10707_v9 = vmul.f32 %v19596_v7, %v16969_v35  ;;  %v10708_v19 = vmul.f32 %v19598_v53, %v19579_v43  ;;  %v10709_v39 = vmul.f32 %v19600_v4, %v16975_v60  ;;  %v10710_v24 = vmul.f32 %v19602_v62, %v19580_v46 }
 0x311   : > { %v10711_v29 = vmul.f32 %v19604_v10, %v19581_v49  ;;  %v10770_v61 = vadd.f32 %v19659_v45, %v17079_v34  ;;  %v6177_v54 = vrot.slane %v6163_v18, %v19658_v51  ;;  %v6178_v11 = vcombine.high %v6170_v36, %v6170_v36  ;;  %v19660_v34 = vld [vmem:[#allocation99_spill] sm:$0xff]  ;;  %v19661_v18 = vld [vmem:[#allocation332_spill] sm:$0xff] }
 0x312   : > { %v6186_v35 = vrot.slane %v6170_v36, %v19658_v51  ;;  %v10771_v38 = vadd.f32 %v10707_v9, %v10505_v30  ;;  %v10772_v43 = vadd.f32 %v10708_v19, %v17082_v8  ;;  %v10773_v20 = vadd.f32 %v10709_v39, %v10507_v22  ;;  %v19663_v9 = vld [vmem:[#allocation334_spill] sm:$0xff] }
 0x313   : > { %v10774_v60 = vadd.f32 %v10710_v24, %v17085_v2  ;;  %v10775_v6 = vadd.f32 %v10711_v29, %v10509_v57  ;;  %v6179_v48 = vcombine.high %v6177_v54, %v6177_v54  ;;  %v6193_v46 = vrot.slane %v6177_v54, %v19658_v51  ;;  %v19664_v24 = vld [vmem:[#allocation337_spill] sm:$0xff]  ;;  %v19665_v54 = vld [vmem:[#allocation335_spill] sm:$0xff] }
 0x314   : > { %v6200_v49 = vrot.slane %v6178_v11, %v19658_v51  ;;  %v6208_v52 = vcombine.high %v6186_v35, %v6186_v35  ;;  %v10776_v45 = vadd.f32 %v19660_v34, %v17088_v40  ;;  %v10980_v33 = vadd.f32 %v19661_v18, %v10770_v61  ;;  %v19666_v61 = vld [vmem:[#allocation336_spill] sm:$0xff] }
 0x315   : > { %v10981_v36 = vadd.f32 %v19662_v28, %v10771_v38  ;;  %v10982_v30 = vadd.f32 %v19663_v9, %v10772_v43  ;;  %v6207_v8 = vrot.slane %v6179_v48, %v19658_v51  ;;  %v6209_v39 = vcombine.high %v6193_v46, %v6193_v46  ;;  %v19667_v28 = vld [vmem:[#allocation338_spill] sm:$0xff] }
 0x316   : > { %v6210_v2 = vcombine.high %v6200_v49, %v6200_v49  ;;  %v9261_v19 = vmul.f32 %v8254_v1, %v6200_v49  ;;  %v9262_v57 = vmul.f32 %v8258_v3, %v6208_v52  ;;  %v9264_v22 = vmul.f32 %v8266_v37, %v6193_v46 }
 0x317   : > { %v10983_v29 = vadd.f32 %v19664_v24, %v10773_v20  ;;  %v10984_v11 = vadd.f32 %v19665_v54, %v10774_v60  ;;  %v6211_v35 = vcombine.high %v6207_v8, %v6207_v8  ;;  %v9265_v40 = vmul.f32 %v8270_v47, %v6207_v8  ;;  %v19668_v47 = vld [vmem:[#allocation263_spill] sm:$0xff] }
 0x318   : > { %v9263_v15 = vmul.f32 %v8262_v59, %v6210_v2  ;;  %v9266_v34 = vmul.f32 %v8274_v41, %v6209_v39  ;;  %v10985_v18 = vadd.f32 %v19666_v61, %v10775_v6  ;;  %v10986_v38 = vadd.f32 %v19667_v28, %v10776_v45  ;;  %v19676_v2 = vld [vmem:[#allocation344_spill] sm:$0xff]  ;;  %v19685_v61 = vld [vmem:[#allocation22_spill] sm:$0xff] }
 0x319   : > { %v11126_v43 = vmul.f32 %v19617_v0, %v9261_v19  ;;  %v11127_v48 = vmul.f32 %v19508_v21, %v9262_v57  ;;  %v9267_v9 = vmul.f32 %v8278_v55, %v6211_v35  ;;  %v11129_v1 = vmul.f32 %v19325_v5, %v9264_v22  ;;  %v19669_v55 = vld [vmem:[#allocation339_spill] sm:$0xff]  ;;  %v19680_v22 = vld [vmem:[#allocation345_spill] sm:$0xff]  ;;  %v19684_v35 = vld [vmem:[#allocation66_spill] sm:$0xff] }
 0x31a   : > { %v11128_v52 = vmul.f32 %v19401_v50, %v9263_v15  ;;  %v11130_v20 = vmul.f32 %v19618_v42, %v9265_v40  ;;  %v11131_v3 = vmul.f32 %v19620_v63, %v9266_v34  ;;  %v5054_v6 = vadd.f32 %v19645_v17, %v19668_v47  ;;  %v19670_v50 = vld [vmem:[#allocation340_spill] sm:$0xff]  ;;  %v19671_v42 = vld [vmem:[#allocation341_spill] sm:$0xff]  ;;  %v19673_v63 = vld [vmem:[#allocation342_spill] sm:$0xff] }
 0x31b   : > { %v11190_v59 = vadd.f32 %v11126_v43, %v10980_v33  ;;  %v11191_v37 = vadd.f32 %v11127_v48, %v10981_v36  ;;  %v11132_v41 = vmul.f32 %v19621_v26, %v9267_v9  ;;  %v11193_v0 = vadd.f32 %v11129_v1, %v10983_v29  ;;  %v19674_v36 = vld [vmem:[#allocation343_spill] sm:$0xff] }
 0x31c   : > { %v11192_v60 = vadd.f32 %v11128_v52, %v10982_v30  ;;  %v11194_v46 = vadd.f32 %v11130_v20, %v10984_v11  ;;  %v11195_v21 = vadd.f32 %v11131_v3, %v10985_v18  ;;  %v5176_v5 = vmax.f32 %v5054_v6, 0.0  ;;  %v19682_v29 = vld [vmem:[#allocation359_spill] sm:$0xff]  ;;  %v19686_v3 = vld [vmem:[#allocation76_spill] sm:$0xff] }
 0x31d   : > { %v11456_v49 = vadd.f32 %v19669_v55, %v11190_v59  ;;  %v11457_v15 = vadd.f32 %v19670_v50, %v11191_v37  ;;  %v11196_v45 = vadd.f32 %v11132_v41, %v10986_v38  ;;  %v11459_v33 = vadd.f32 %v19673_v63, %v11193_v0  ;;  %v19687_v59 = vld [vmem:[#allocation90_spill] sm:$0xff]  ;;  %v19689_v0 = vld [vmem:[#allocation96_spill] sm:$0xff] }
 0x31e   : > { %v17239_v8 = vadd.f32 %v19671_v42, %v11192_v60  ;;  %v17243_v39 = vadd.f32 %v19674_v36, %v11194_v46  ;;  %v17246_v26 = vadd.f32 %v19676_v2, %v11195_v21  ;;  %v6212_v57 = vcombine.high %v5176_v5, %v5176_v5  ;;  %v19688_v60 = vld [vmem:[#allocation77_spill] sm:$0xff]  ;;  %v19690_v50 = vld [vmem:[#allocation80_spill] sm:$0xff]  ;;  %v19692_v63 = vld [vmem:[#allocation34_spill] sm:$0xff] }
 0x31f   : > { %v17249_v30 = vadd.f32 %v19638_v56, %v11456_v49  ;;  %v17252_v19 = vadd.f32 %v19640_v58, %v11457_v15  ;;  %v17255_v24 = vadd.f32 %v19680_v22, %v11196_v45  ;;  %v17258_v54 = vadd.f32 %v19682_v29, %v11459_v33  ;;  %v19691_v15 = vld [vmem:[#allocation91_spill] sm:$0xff]  ;;  %v19694_v2 = vld [vmem:[#allocation134_spill] sm:$0xff] }
 0x320   : > { %19672 = vst [vmem:[#allocation127_spill] sm:$0xff] %v17239_v8  ;;  %19675 = vst [vmem:[#allocation278_spill] sm:$0xff] %v17243_v39  ;;  %v6219_v11 = vrot.slane %v5176_v5, %v19658_v51  ;;  %v8282_v40 = vrot.slane %v17153_v14, %v19684_v35  ;;  %v6226_v34 = vrot.slane %v6212_v57, %v19658_v51  ;;  %v19693_v36 = vld [vmem:[#allocation135_spill] sm:$0xff]  ;;  %v19744_v8 = vld [vmem:[#allocation141_spill] sm:$0xff] }
 0x321   : > { %19677 = vst [vmem:[#allocation279_spill] sm:$0xff] %v17246_v26  ;;  %19678 = vst [vmem:[#allocation283_spill] sm:$0xff] %v17249_v30  ;;  %v8286_v18 = vrot.slane %v19685_v61, %v19648_v23  ;;  %v8290_v28 = vrot.slane %v19685_v61, %v19649_v13  ;;  %v8294_v38 = vrot.slane %v19685_v61, %v19650_v31  ;;  %v19715_v26 = vld [vmem:[#allocation163_spill] sm:$0xff] }
 0x322   : > { %19679 = vst [vmem:[#allocation288_spill] sm:$0xff] %v17252_v19  ;;  %19681 = vst [vmem:[#allocation276_spill] sm:$0xff] %v17255_v24  ;;  %v6227_v43 = vcombine.high %v6219_v11, %v6219_v11  ;;  %v6235_v48 = vrot.slane %v6219_v11, %v19658_v51  ;;  %v8298_v9 = vrot.slane %v19685_v61, %v19651_v12  ;;  %v19711_v19 = vld [vmem:[#allocation139_spill] sm:$0xff] }
 0x323   : > { %19683 = vst [vmem:[#allocation61_spill] sm:$0xff] %v17258_v54  ;;  %v8302_v14 = vrot.slane %v19685_v61, %v19652_v25  ;;  %v6228_v52 = vcombine.high %v6226_v34, %v6226_v34  ;;  %v6242_v1 = vrot.slane %v6226_v34, %v19658_v51  ;;  %v8306_v20 = vrot.slane %v19685_v61, %v19653_v44  ;;  %v19695_v34 = vld [vmem:[#allocation102_spill] sm:$0xff] }
 0x324   : > { %v10028_v37 = vadd.f32 %v19687_v59, %v19686_v3  ;;  %v6249_v47 = vrot.slane %v6227_v43, %v19658_v51  ;;  %v6257_v6 = vcombine.high %v6235_v48, %v6235_v48  ;;  %v9268_v41 = vmul.f32 %v8282_v40, %v6235_v48 }
 0x325   : > { %v10030_v46 = vadd.f32 %v19689_v0, %v19688_v60  ;;  %v6256_v21 = vrot.slane %v6228_v52, %v19658_v51  ;;  %v6258_v55 = vcombine.high %v6242_v1, %v6242_v1  ;;  %v9271_v49 = vmul.f32 %v8294_v38, %v6242_v1  ;;  %v19696_v52 = vld [vmem:[#allocation98_spill] sm:$0xff]  ;;  %v19697_v38 = vld [vmem:[#allocation39_spill] sm:$0xff]  ;;  %v19699_v60 = vld [vmem:[#allocation100_spill] sm:$0xff] }
 0x326   : > { %v10032_v5 = vadd.f32 %v19691_v15, %v19690_v50  ;;  %v6259_v45 = vcombine.high %v6249_v47, %v6249_v47  ;;  %v9269_v42 = vmul.f32 %v8286_v18, %v6257_v6  ;;  %v10301_v33 = vadd.f32 %v19692_v63, %v17051_v32  ;;  %v19698_v18 = vld [vmem:[#allocation107_spill] sm:$0xff]  ;;  %v19700_v50 = vld [vmem:[#allocation101_spill] sm:$0xff] }
 0x327   : > { %v10861_v57 = vmul.f32 %v19694_v2, %v19693_v36  ;;  %v6260_v22 = vcombine.high %v6256_v21, %v6256_v21  ;;  %v9272_v11 = vmul.f32 %v8298_v9, %v6256_v21  ;;  %v9273_v40 = vmul.f32 %v8302_v14, %v6258_v55  ;;  %v19701_v9 = vld [vmem:[#allocation105_spill] sm:$0xff]  ;;  %v11606_v36 = vld [vmem:[%s18222_s8] sm:$0xf] }
 0x328   : > { %v10176_v43 = vmul.f32 %v19695_v34, %v9271_v49  ;;  %v9270_v48 = vmul.f32 %v8290_v28, %v6259_v45  ;;  %v10174_v3 = vmul.f32 %v19696_v52, %v9269_v42  ;;  %v10511_v1 = vadd.f32 %v19697_v38, %v10301_v33  ;;  %v19702_v28 = vld [vmem:[#allocation103_spill] sm:$0xff]  ;;  %v19703_v45 = vld [vmem:[#allocation82_spill] sm:$0xff]  ;;  %12739 = vmatprep.subr.msk.mxu1 %vm4883_vm0, %v11606_v36 }
 0x329   : > { %v10651_v59 = vmul.f32 %v19596_v7, %v9271_v49  ;;  %v9274_v47 = vmul.f32 %v8306_v20, %v6260_v22  ;;  %v10177_v6 = vmul.f32 %v19698_v18, %v9272_v11  ;;  %v10178_v32 = vmul.f32 %v19699_v60, %v9273_v40  ;;  %v19704_v49 = vld [vmem:[#allocation274_spill] sm:$0xff] }
 0x32a   : > { %v10240_v0 = vadd.f32 %v10176_v43, %v10030_v46  ;;  %v10175_v15 = vmul.f32 %v19700_v50, %v9270_v48  ;;  %v10238_v63 = vadd.f32 %v10174_v3, %v10028_v37  ;;  %v10650_v14 = vmul.f32 %v19701_v9, %v9270_v48  ;;  %v19705_v46 = vld [vmem:[#allocation83_spill] sm:$0xff] }
 0x32b   : > { %v10652_v21 = vmul.f32 %v19598_v53, %v9272_v11  ;;  %v17300_v55 = vmul.f32 %v19702_v28, %v9274_v47  ;;  %v10241_v42 = vadd.f32 %v10177_v6, %v19703_v45  ;;  %v10242_v33 = vadd.f32 %v10178_v32, %v10032_v5  ;;  %v19706_v43 = vld [vmem:[#allocation119_spill] sm:$0xff]  ;;  %v19708_v6 = vld [vmem:[#allocation277_spill] sm:$0xff] }
 0x32c   : > { %v10450_v20 = vadd.f32 %v19704_v49, %v10240_v0  ;;  %v10239_v22 = vadd.f32 %v10175_v15, %v19705_v46  ;;  %v10448_v37 = vadd.f32 %v19706_v43, %v10238_v63  ;;  %v10653_v48 = vmul.f32 %v19600_v4, %v9273_v40  ;;  %v19707_v3 = vld [vmem:[#allocation275_spill] sm:$0xff]  ;;  %v19709_v0 = vld [vmem:[#allocation272_spill] sm:$0xff]  ;;  %v19710_v49 = vld [vmem:[#allocation273_spill] sm:$0xff] }
 0x32d   : > { %v10654_v11 = vmul.f32 %v19602_v62, %v9274_v47  ;;  %v10451_v38 = vadd.f32 %v19707_v3, %v10241_v42  ;;  %v10452_v5 = vadd.f32 %v19708_v6, %v10242_v33  ;;  %v10777_v45 = vadd.f32 %v19709_v0, %v10511_v1  ;;  %v19712_v15 = vld [vmem:[#allocation174_spill] sm:$0xff]  ;;  %v19713_v63 = vld [vmem:[#allocation331_spill] sm:$0xff]  ;;  %v19720_v0 = vld [vmem:[#allocation104_spill] sm:$0xff] }
 0x32e   : > { %v10716_v32 = vadd.f32 %v10652_v21, %v10450_v20  ;;  %v10449_v54 = vadd.f32 %v19710_v49, %v10239_v22  ;;  %v10714_v30 = vadd.f32 %v10650_v14, %v10448_v37  ;;  %v10862_v46 = vmul.f32 %v19712_v15, %v19711_v19  ;;  %v19714_v43 = vld [vmem:[#allocation182_spill] sm:$0xff]  ;;  %v19717_v33 = vld [vmem:[#allocation143_spill] sm:$0xff]  ;;  %v19718_v14 = vld [vmem:[#allocation144_spill] sm:$0xff] }
 0x32f   : > { %v10923_v40 = vmul.f32 %v19714_v43, %v19713_v63  ;;  %v10717_v24 = vadd.f32 %v10653_v48, %v10451_v38  ;;  %v10718_v47 = vadd.f32 %v10654_v11, %v10452_v5  ;;  %v11133_v36 = vmul.f32 %v19622_v27, %v9268_v41  ;;  %v19719_v3 = vld [vmem:[#allocation146_spill] sm:$0xff]  ;;  %v19721_v41 = vld [vmem:[#allocation369_spill] sm:$0xff] }
 0x330   : > { %v17323_v42 = vcombine.high %v19715_v26, %v19715_v26  ;;  %v10715_v21 = vadd.f32 %v10651_v59, %v10449_v54  ;;  %v10924_v1 = vadd.f32 %v19717_v33, %v10714_v30  ;;  %v10926_v20 = vadd.f32 %v10862_v46, %v10716_v32  ;;  %v19723_v38 = vld [vmem:[#allocation373_spill] sm:$0xff]  ;;  %v19725_v59 = vld [vmem:[#allocation375_spill] sm:$0xff] }
 0x331   : > { %v10987_v22 = vadd.f32 %v10923_v40, %v10777_v45  ;;  %v10927_v37 = vadd.f32 %v19718_v14, %v10717_v24  ;;  %v10928_v6 = vadd.f32 %v19719_v3, %v10718_v47  ;;  %v5059_v49 = vadd.f32 %v19645_v17, %v19720_v0  ;;  %v19727_v24 = vld [vmem:[#allocation372_spill] sm:$0xff]  ;;  %v19729_v46 = vld [vmem:[#allocation371_spill] sm:$0xff]  ;;  %v19731_v47 = vld [vmem:[#allocation33_spill] sm:$0xff] }
 0x332   : > { %19716 = vst [vmem:[#allocation63_spill] sm:$0xff] %v17323_v42  ;;  %v8310_v48 = vrot.slane %v19685_v61, %v19654_v16  ;;  %v10925_v27 = vadd.f32 %v10861_v57, %v10715_v21  ;;  %v17333_v11 = vadd.f32 %v19721_v41, %v10924_v1  ;;  %v17336_v54 = vadd.f32 %v19723_v38, %v10926_v20  ;;  %v19730_v57 = vld [vmem:[#allocation348_spill] sm:$0xff] }
 0x333   : > { %v11197_v30 = vadd.f32 %v11133_v36, %v10987_v22  ;;  %v17339_v5 = vadd.f32 %v19725_v59, %v10927_v37  ;;  %v17342_v32 = vadd.f32 %v19727_v24, %v10928_v6  ;;  %v5177_v45 = vmax.f32 %v5059_v49, 0.0  ;;  %v19735_v6 = vld [vmem:[#allocation84_spill] sm:$0xff] }
 0x334   : > { %19722 = vst [vmem:[#allocation198_spill] sm:$0xff] %v17333_v11  ;;  %19724 = vst [vmem:[#allocation60_spill] sm:$0xff] %v17336_v54  ;;  %v8314_v17 = vrot.slane %v19685_v61, %v19684_v35  ;;  %v11135_v63 = vadd.f32 %v19729_v46, %v10925_v27  ;;  %v8322_v21 = vrot.slane %v19731_v47, %v19648_v23  ;;  %v19732_v61 = vld [vmem:[#allocation156_spill] sm:$0xff]  ;;  %v19746_v54 = vld [vmem:[#allocation137_spill] sm:$0xff] }
 0x335   : > { %19726 = vst [vmem:[#allocation203_spill] sm:$0xff] %v17339_v5  ;;  %19728 = vst [vmem:[#allocation53_spill] sm:$0xff] %v17342_v32  ;;  %v11463_v40 = vadd.f32 %v19730_v57, %v11197_v30  ;;  %v8326_v36 = vrot.slane %v19731_v47, %v19649_v13  ;;  %v6261_v33 = vcombine.high %v5177_v45, %v5177_v45  ;;  %v19736_v0 = vld [vmem:[#allocation356_spill] sm:$0xff]  ;;  %v19737_v30 = vld [vmem:[#allocation79_spill] sm:$0xff] }
 0x336   : > { %v6268_v1 = vrot.slane %v5177_v45, %v19658_v51  ;;  %v8330_v20 = vrot.slane %v19731_v47, %v19650_v31  ;;  %v8334_v22 = vrot.slane %v19731_v47, %v19651_v12  ;;  %v17358_v14 = vadd.f32 %v19732_v61, %v11135_v63  ;;  %v19738_v59 = vld [vmem:[#allocation180_spill] sm:$0xff]  ;;  %v19739_v45 = vld [vmem:[#allocation87_spill] sm:$0xff]  ;;  %v19742_v61 = vld [vmem:[#allocation81_spill] sm:$0xff] }
 0x337   : > { %v17361_v37 = vadd.f32 %v17323_v42, %v11463_v40  ;;  %v8338_v3 = vrot.slane %v19731_v47, %v19652_v25  ;;  %v9767_v49 = vadd.f32 %v19736_v0, %v19735_v6  ;;  %v6275_v27 = vrot.slane %v6261_v33, %v19658_v51  ;;  %v19740_v63 = vld [vmem:[#allocation140_spill] sm:$0xff] }
 0x338   : > { %19733 = vst [vmem:[#allocation154_spill] sm:$0xff] %v17358_v14  ;;  %v6276_v41 = vcombine.high %v6268_v1, %v6268_v1  ;;  %v6284_v38 = vrot.slane %v6268_v1, %v19658_v51  ;;  %v9970_v24 = vmul.f32 %v19738_v59, %v19737_v30  ;;  %v9973_v46 = vmul.f32 %v19739_v45, %v19711_v19  ;;  %v19741_v57 = vld [vmem:[#allocation92_spill] sm:$0xff]  ;;  %v19745_v14 = vld [vmem:[#allocation173_spill] sm:$0xff] }
 0x339   : > { %19734 = vst [vmem:[#allocation55_spill] sm:$0xff] %v17361_v37  ;;  %v9975_v40 = vmul.f32 %v19741_v57, %v19740_v63  ;;  %v19743_v37 = vld [vmem:[#allocation94_spill] sm:$0xff]  ;;  %v10865_v6 = vmul.f32 %v19745_v14, %v19744_v8  ;;  %v6277_v0 = vcombine.high %v6275_v27, %v6275_v27  ;;  %v6291_v33 = vrot.slane %v6275_v27, %v19658_v51  ;;  %v19747_v19 = vld [vmem:[#allocation361_spill] sm:$0xff]  ;;  %v19750_v27 = vld [vmem:[#allocation124_spill] sm:$0xff] }
 0x33a   : > { %v10033_v39 = vadd.f32 %v19743_v37, %v19742_v61  ;;  %v6298_v1 = vrot.slane %v6276_v41, %v19658_v51  ;;  %v6306_v32 = vcombine.high %v6284_v38, %v6284_v38  ;;  %v9275_v5 = vmul.f32 %v8310_v48, %v6284_v38  ;;  %v19748_v61 = vld [vmem:[#allocation32_spill] sm:$0xff] }
 0x33b   : > { %v10034_v30 = vadd.f32 %v9970_v24, %v9767_v49  ;;  %v10037_v11 = vadd.f32 %v9973_v46, %v19746_v54  ;;  %v10039_v15 = vadd.f32 %v9975_v40, %v19747_v19  ;;  %v6305_v63 = vrot.slane %v6277_v0, %v19658_v51  ;;  %v19751_v24 = vld [vmem:[#allocation111_spill] sm:$0xff] }
 0x33c   : > { %v6307_v43 = vcombine.high %v6291_v33, %v6291_v33  ;;  %v6308_v45 = vcombine.high %v6298_v1, %v6298_v1  ;;  %v9276_v37 = vmul.f32 %v8314_v17, %v6298_v1  ;;  %v19749_v59 = vrot.slane %v19748_v61, %v19648_v23  ;;  %v19752_v19 = vld [vmem:[#allocation291_spill] sm:$0xff] }
 0x33d   : > { %v9279_v26 = vmul.f32 %v8326_v36, %v6291_v33  ;;  %v10180_v42 = vmul.f32 %v19750_v27, %v9275_v5  ;;  %v10243_v41 = vadd.f32 %v17300_v55, %v10033_v39  ;;  %v6309_v48 = vcombine.high %v6305_v63, %v6305_v63  ;;  %v19756_v33 = vld [vmem:[#allocation364_spill] sm:$0xff] }
 0x33e   : > { %v9277_v57 = vmul.f32 %v19749_v59, %v6306_v32  ;;  %v9278_v49 = vmul.f32 %v8322_v21, %v6308_v45  ;;  %v9280_v38 = vmul.f32 %v8330_v20, %v6305_v63  ;;  %v9281_v54 = vmul.f32 %v8334_v22, %v6307_v43  ;;  %v19753_v59 = vld [vmem:[#allocation266_spill] sm:$0xff]  ;;  %v19754_v21 = vld [vmem:[#allocation292_spill] sm:$0xff] }
 0x33f   : > { %v10181_v46 = vmul.f32 %v19751_v24, %v9276_v37  ;;  %v10183_v40 = vmul.f32 %v19700_v50, %v9279_v26  ;;  %v10244_v0 = vadd.f32 %v10180_v42, %v10034_v30  ;;  %v10453_v17 = vadd.f32 %v19752_v19, %v10243_v41  ;;  %v19755_v42 = vld [vmem:[#allocation363_spill] sm:$0xff]  ;;  %v19757_v63 = vld [vmem:[#allocation132_spill] sm:$0xff]  ;;  %v19759_v19 = vld [vmem:[#allocation114_spill] sm:$0xff] }
 0x340   : > { %v9282_v1 = vmul.f32 %v8338_v3, %v6309_v48  ;;  %v10182_v61 = vmul.f32 %v19696_v52, %v9278_v49  ;;  %v10184_v32 = vmul.f32 %v19695_v34, %v9280_v38  ;;  %v10185_v36 = vmul.f32 %v19698_v18, %v9281_v54  ;;  %v19758_v48 = vld [vmem:[#allocation294_spill] sm:$0xff] }
 0x341   : > { %v10245_v39 = vadd.f32 %v10181_v46, %v19753_v59  ;;  %v10247_v55 = vadd.f32 %v10183_v40, %v10037_v11  ;;  %v10454_v20 = vadd.f32 %v19754_v21, %v10244_v0  ;;  %v10655_v43 = vmul.f32 %v19604_v10, %v9275_v5  ;;  %v19760_v46 = vld [vmem:[#allocation128_spill] sm:$0xff]  ;;  %v19761_v40 = vld [vmem:[#allocation293_spill] sm:$0xff]  ;;  %v19762_v59 = vld [vmem:[#allocation295_spill] sm:$0xff] }
 0x342   : > { %v17399_v22 = vmul.f32 %v19699_v60, %v9282_v1  ;;  %v10246_v45 = vadd.f32 %v10182_v61, %v19755_v42  ;;  %v10248_v3 = vadd.f32 %v10184_v32, %v19756_v33  ;;  %v10249_v30 = vadd.f32 %v10185_v36, %v10039_v15  ;;  %v19763_v21 = vld [vmem:[#allocation296_spill] sm:$0xff]  ;;  %v19764_v42 = vld [vmem:[#allocation145_spill] sm:$0xff] }
 0x343   : > { %v10455_v41 = vadd.f32 %v19757_v63, %v10245_v39  ;;  %v10457_v49 = vadd.f32 %v19758_v48, %v10247_v55  ;;  %v10656_v25 = vmul.f32 %v19759_v19, %v9276_v37  ;;  %v10657_v11 = vmul.f32 %v19760_v46, %v9277_v57  ;;  %v19765_v57 = vld [vmem:[#allocation57_spill] sm:$0xff]  ;;  %v19766_v48 = vld [vmem:[#allocation186_spill] sm:$0xff] }
 0x344   : > { %v10456_v0 = vadd.f32 %v19761_v40, %v10246_v45  ;;  %v10458_v5 = vadd.f32 %v19762_v59, %v10248_v3  ;;  %v10459_v60 = vadd.f32 %v19763_v21, %v10249_v30  ;;  %v10658_v14 = vmul.f32 %v19701_v9, %v9279_v26 }
 0x345   : > { %v10659_v61 = vmul.f32 %v19596_v7, %v9280_v38  ;;  %v10660_v15 = vmul.f32 %v19598_v53, %v9281_v54  ;;  %v10661_v32 = vmul.f32 %v19600_v4, %v9282_v1  ;;  %v10719_v36 = vadd.f32 %v10655_v43, %v10453_v17  ;;  %v19767_v38 = vld [vmem:[#allocation185_spill] sm:$0xff]  ;;  %v19768_v54 = vld [vmem:[#allocation191_spill] sm:$0xff]  ;;  %v19769_v17 = vld [vmem:[#allocation192_spill] sm:$0xff] }
 0x346   : > { %v10720_v39 = vadd.f32 %v10656_v25, %v10454_v20  ;;  %v10721_v55 = vadd.f32 %v10657_v11, %v10455_v41  ;;  %v10722_v37 = vadd.f32 %v10658_v14, %v10456_v0  ;;  %v10866_v33 = vmul.f32 %v19765_v57, %v19764_v42  ;;  %v19770_v20 = vld [vmem:[#allocation193_spill] sm:$0xff]  ;;  %v19771_v43 = vld [vmem:[#allocation150_spill] sm:$0xff]  ;;  %v19803_v57 = vld [vmem:[#allocation36_spill] sm:$0xff] }
 0x347   : > { %v10723_v45 = vadd.f32 %v10659_v61, %v10457_v49  ;;  %v10724_v63 = vadd.f32 %v10660_v15, %v10458_v5  ;;  %v10725_v3 = vadd.f32 %v10661_v32, %v10459_v60  ;;  %v10869_v30 = vmul.f32 %v19694_v2, %v19766_v48  ;;  %v19772_v49 = vld [vmem:[#allocation374_spill] sm:$0xff]  ;;  %v19773_v60 = vld [vmem:[#allocation393_spill] sm:$0xff] }
 0x348   : > { %v10929_v26 = vadd.f32 %v10865_v6, %v10719_v36  ;;  %v10930_v40 = vadd.f32 %v10866_v33, %v10720_v39  ;;  %v10931_v59 = vadd.f32 %v19767_v38, %v10721_v55  ;;  %v10932_v21 = vadd.f32 %v19768_v54, %v10722_v37  ;;  %v19774_v5 = vld [vmem:[#allocation394_spill] sm:$0xff]  ;;  %v19775_v6 = vld [vmem:[#allocation389_spill] sm:$0xff]  ;;  %v19777_v36 = vld [vmem:[#allocation391_spill] sm:$0xff] }
 0x349   : > { %v10933_v1 = vadd.f32 %v10869_v30, %v10723_v45  ;;  %v10934_v25 = vadd.f32 %v19769_v17, %v10724_v63  ;;  %v10935_v14 = vadd.f32 %v19770_v20, %v10725_v3  ;;  %v11341_v41 = vmul.f32 %v19771_v43, %v19764_v42  ;;  %v19776_v15 = vld [vmem:[#allocation390_spill] sm:$0xff]  ;;  %v19778_v55 = vld [vmem:[#allocation395_spill] sm:$0xff]  ;;  %v19779_v45 = vld [vmem:[#allocation121_spill] sm:$0xff] }
 0x34a   : > { %v11139_v11 = vadd.f32 %v19772_v49, %v10929_v26  ;;  %v11140_v0 = vadd.f32 %v19773_v60, %v10930_v40  ;;  %v11141_v2 = vadd.f32 %v19774_v5, %v10931_v59  ;;  %v11142_v61 = vadd.f32 %v19775_v6, %v10932_v21  ;;  %v17434_v33 = vld [vmem:[%s18219_s5] ss:$0 sm:$0xff]  ;;  %v19783_v40 = vld [vmem:[#allocation195_spill] sm:$0xff]  ;;  %v19785_v59 = vld [vmem:[#allocation196_spill] sm:$0xff] }
 0x34b   : > { %v11143_v32 = vadd.f32 %v19776_v15, %v10933_v1  ;;  %v11144_v39 = vadd.f32 %v19777_v36, %v10934_v25  ;;  %v11145_v37 = vadd.f32 %v19778_v55, %v10935_v14  ;;  %v5064_v63 = vadd.f32 %v17434_v33, %v19779_v45  ;;  %v19781_v30 = vld [vmem:[#allocation194_spill] sm:$0xff]  ;;  %v19786_v21 = vld [vmem:[#allocation197_spill] sm:$0xff]  ;;  %v19787_v17 = vld [vmem:[#allocation200_spill] sm:$0xff] }
 0x34c   : > { %v17438_v3 = vadd.f32 %v11341_v41, %v11139_v11  ;;  %v17441_v26 = vadd.f32 %v19781_v30, %v11140_v0  ;;  %v17444_v38 = vadd.f32 %v19783_v40, %v11141_v2  ;;  %v11408_v54 = vadd.f32 %v19785_v59, %v11142_v61  ;;  %v19788_v20 = vld [vmem:[#allocation201_spill] sm:$0xff]  ;;  %v19795_v59 = vld [vmem:[#allocation71_spill] sm:$0xff] }
 0x34d   : > { %v11409_v1 = vadd.f32 %v19786_v21, %v11143_v32  ;;  %v11410_v25 = vadd.f32 %v19787_v17, %v11144_v39  ;;  %v11411_v14 = vadd.f32 %v19788_v20, %v11145_v37  ;;  %v5178_v43 = vmax.f32 %v5064_v63, 0.0  ;;  %v19791_v5 = vld [vmem:[#allocation37_spill] sm:$0xff]  ;;  %v19796_v21 = vld [vmem:[#allocation86_spill] sm:$0xff]  ;;  %v19797_v20 = vld [vmem:[#allocation88_spill] sm:$0xff] }
 0x34e   : > { %19780 = vst [vmem:[#allocation299_spill] sm:$0xff] %v17438_v3  ;;  %19782 = vst [vmem:[#allocation159_spill] sm:$0xff] %v17441_v26  ;;  %v17451_v49 = vadd.f32 %v19638_v56, %v11408_v54  ;;  %v8342_v41 = vrot.slane %v19731_v47, %v19653_v44  ;;  %v8346_v11 = vrot.slane %v19731_v47, %v19654_v16  ;;  %v19794_v32 = vld [vmem:[#allocation41_spill] sm:$0xff] }
 0x34f   : > { %19784 = vst [vmem:[#allocation300_spill] sm:$0xff] %v17444_v38  ;;  %v8350_v60 = vrot.slane %v19731_v47, %v19684_v35  ;;  %v17460_v0 = vadd.f32 %v19640_v58, %v11409_v1  ;;  %v17463_v2 = vadd.f32 %v19791_v5, %v11410_v25  ;;  %v17466_v6 = vadd.f32 %v19682_v29, %v11411_v14  ;;  %v19801_v38 = vld [vmem:[#allocation89_spill] sm:$0xff] }
 0x350   : > { %19789 = vst [vmem:[#allocation303_spill] sm:$0xff] %v17451_v49  ;;  %v6310_v61 = vcombine.high %v5178_v43, %v5178_v43  ;;  %v6317_v15 = vrot.slane %v5178_v43, %v19658_v51  ;;  %v8358_v36 = vrot.slane %v19794_v32, %v19648_v23  ;;  %v8362_v39 = vrot.slane %v19794_v32, %v19649_v13  ;;  %v19798_v43 = vld [vmem:[#allocation85_spill] sm:$0xff] }
 0x351   : > { %19790 = vst [vmem:[#allocation256_spill] sm:$0xff] %v17460_v0  ;;  %19792 = vst [vmem:[#allocation160_spill] sm:$0xff] %v17463_v2  ;;  %v8366_v47 = vrot.slane %v19794_v32, %v19650_v31  ;;  %v8370_v63 = vrot.slane %v19794_v32, %v19651_v12  ;;  %v9500_v54 = vmul.f32 %v19795_v59, %v19744_v8 }
 0x352   : > { %19793 = vst [vmem:[#allocation378_spill] sm:$0xff] %v17466_v6  ;;  %v6324_v45 = vrot.slane %v6310_v61, %v19658_v51  ;;  %v6325_v30 = vcombine.high %v6317_v15, %v6317_v15  ;;  %v6333_v40 = vrot.slane %v6317_v15, %v19658_v51  ;;  %v9976_v1 = vmul.f32 %v19796_v21, %v19744_v8  ;;  %v19799_v15 = vld [vmem:[#allocation142_spill] sm:$0xff]  ;;  %v19800_v8 = vld [vmem:[#allocation184_spill] sm:$0xff] }
 0x353   : > { %v9977_v14 = vmul.f32 %v19797_v20, %v19764_v42  ;;  %v9980_v61 = vmul.f32 %v19798_v43, %v19766_v48  ;;  %v9774_v2 = vadd.f32 %v19799_v15, %v9500_v54  ;;  %v9982_v29 = vmul.f32 %v19801_v38, %v19800_v8  ;;  %v19802_v42 = vld [vmem:[#allocation362_spill] sm:$0xff]  ;;  %v19805_v54 = vld [vmem:[#allocation183_spill] sm:$0xff]  ;;  %v19808_v43 = vld [vmem:[#allocation384_spill] sm:$0xff] }
 0x354   : > { %v6326_v17 = vcombine.high %v6324_v45, %v6324_v45  ;;  %v6340_v25 = vrot.slane %v6324_v45, %v19658_v51  ;;  %v6347_v37 = vrot.slane %v6325_v30, %v19658_v51  ;;  %v6355_v55 = vcombine.high %v6333_v40, %v6333_v40 }
 0x355   : > { %v9283_v6 = vmul.f32 %v8342_v41, %v6333_v40  ;;  %v10040_v3 = vadd.f32 %v9976_v1, %v19802_v42  ;;  %v10041_v30 = vadd.f32 %v9977_v14, %v9774_v2  ;;  %v19804_v41 = vrot.slane %v19803_v57, %v19648_v23  ;;  %v19810_v14 = vld [vmem:[#allocation392_spill] sm:$0xff] }
 0x356   : > { %v6354_v59 = vrot.slane %v6326_v17, %v19658_v51  ;;  %v6356_v0 = vcombine.high %v6340_v25, %v6340_v25  ;;  %v9287_v49 = vmul.f32 %v8358_v36, %v6340_v25  ;;  %v6357_v45 = vcombine.high %v6347_v37, %v6347_v37  ;;  %v19806_v17 = vld [vmem:[#allocation189_spill] sm:$0xff]  ;;  %v19807_v36 = vld [vmem:[#allocation188_spill] sm:$0xff] }
 0x357   : > { %v9284_v5 = vmul.f32 %v8346_v11, %v6347_v37  ;;  %v9285_v26 = vmul.f32 %v8350_v60, %v6355_v55  ;;  %v10043_v15 = vadd.f32 %v19806_v17, %v19805_v54  ;;  %v10044_v25 = vadd.f32 %v9980_v61, %v19807_v36  ;;  %v19814_v17 = vld [vmem:[#allocation310_spill] sm:$0xff] }
 0x358   : > { %v6358_v58 = vcombine.high %v6354_v59, %v6354_v59  ;;  %v9288_v48 = vmul.f32 %v8362_v39, %v6354_v59  ;;  %v9289_v56 = vmul.f32 %v8366_v47, %v6356_v0  ;;  %v9286_v40 = vmul.f32 %v19804_v41, %v6357_v45  ;;  %v19811_v59 = vld [vmem:[#allocation305_spill] sm:$0xff] }
 0x359   : > { %v10046_v8 = vadd.f32 %v9982_v29, %v19808_v43  ;;  %v10187_v11 = vmul.f32 %v19702_v28, %v9283_v6  ;;  %v10188_v60 = vmul.f32 %v19750_v27, %v9284_v5  ;;  %v10189_v39 = vmul.f32 %v19751_v24, %v9285_v26  ;;  %v19809_v29 = vld [vmem:[#allocation388_spill] sm:$0xff]  ;;  %v19813_v41 = vld [vmem:[#allocation309_spill] sm:$0xff] }
 0x35a   : > { %v9290_v20 = vmul.f32 %v8370_v63, %v6358_v58  ;;  %v10190_v0 = vmul.f32 %v19696_v52, %v9287_v49  ;;  %v10191_v2 = vmul.f32 %v19700_v50, %v9288_v48  ;;  %v10192_v57 = vmul.f32 %v19695_v34, %v9289_v56  ;;  %v19812_v49 = vld [vmem:[#allocation306_spill] sm:$0xff] }
 0x35b   : > { %v10250_v47 = vadd.f32 %v17399_v22, %v10040_v3  ;;  %v10251_v37 = vadd.f32 %v10187_v11, %v10041_v30  ;;  %v10252_v58 = vadd.f32 %v10188_v60, %v19809_v29  ;;  %v10253_v63 = vadd.f32 %v10189_v39, %v10043_v15  ;;  %v19815_v3 = vld [vmem:[#allocation307_spill] sm:$0xff]  ;;  %v19817_v60 = vld [vmem:[#allocation312_spill] sm:$0xff]  ;;  %v19819_v29 = vld [vmem:[#allocation133_spill] sm:$0xff] }
 0x35c   : > { %v17513_v55 = vmul.f32 %v19698_v18, %v9290_v20  ;;  %v10254_v1 = vadd.f32 %v10190_v0, %v10044_v25  ;;  %v10255_v43 = vadd.f32 %v10191_v2, %v19810_v14  ;;  %v10256_v61 = vadd.f32 %v10192_v57, %v10046_v8  ;;  %v19816_v30 = vld [vmem:[#allocation311_spill] sm:$0xff] }
 0x35d   : > { %v10460_v45 = vadd.f32 %v19811_v59, %v10250_v47  ;;  %v10461_v42 = vadd.f32 %v19812_v49, %v10251_v37  ;;  %v10462_v54 = vadd.f32 %v19813_v41, %v10252_v58  ;;  %v10463_v36 = vadd.f32 %v19814_v17, %v10253_v63  ;;  %v19818_v37 = vld [vmem:[#allocation187_spill] sm:$0xff] }
 0x35e   : > { %v10662_v22 = vmul.f32 %v19602_v62, %v9283_v6  ;;  %v10464_v18 = vadd.f32 %v19815_v3, %v10254_v1  ;;  %v10465_v11 = vadd.f32 %v19816_v30, %v10255_v43  ;;  %v10466_v15 = vadd.f32 %v19817_v60, %v10256_v61  ;;  %v19820_v61 = vld [vmem:[#allocation190_spill] sm:$0xff]  ;;  %v19828_v30 = vld [vmem:[#allocation396_spill] sm:$0xff] }
 0x35f   : > { %v10663_v25 = vmul.f32 %v19604_v10, %v9284_v5  ;;  %v10664_v8 = vmul.f32 %v19759_v19, %v9285_v26  ;;  %v10665_v39 = vmul.f32 %v19760_v46, %v9286_v40  ;;  %v10666_v0 = vmul.f32 %v19701_v9, %v9288_v48  ;;  %v19821_v26 = vld [vmem:[#allocation173_spill] sm:$0xff]  ;;  %v19822_v48 = vld [vmem:[#allocation148_spill] sm:$0xff] }
 0x360   : > { %v10667_v2 = vmul.f32 %v19596_v7, %v9289_v56  ;;  %v10668_v57 = vmul.f32 %v19598_v53, %v9290_v20  ;;  %v10726_v47 = vadd.f32 %v10662_v22, %v10460_v45  ;;  %v10872_v58 = vmul.f32 %v19819_v29, %v19818_v37  ;;  %v19823_v56 = vld [vmem:[#allocation211_spill] sm:$0xff]  ;;  %v19826_v22 = vld [vmem:[#allocation216_spill] sm:$0xff] }
 0x361   : > { %v10727_v6 = vadd.f32 %v10663_v25, %v10461_v42  ;;  %v10728_v63 = vadd.f32 %v10664_v8, %v10462_v54  ;;  %v10729_v1 = vadd.f32 %v10665_v39, %v10463_v36  ;;  %v10730_v14 = vadd.f32 %v10666_v0, %v10464_v18  ;;  %v19824_v20 = vld [vmem:[#allocation215_spill] sm:$0xff]  ;;  %v19825_v42 = vld [vmem:[#allocation220_spill] sm:$0xff]  ;;  %v19827_v36 = vld [vmem:[#allocation221_spill] sm:$0xff] }
 0x362   : > { %v10731_v43 = vadd.f32 %v10667_v2, %v10465_v11  ;;  %v10732_v5 = vadd.f32 %v10668_v57, %v10466_v15  ;;  %v10873_v59 = vmul.f32 %v19821_v26, %v19820_v61  ;;  %v10936_v40 = vadd.f32 %v10872_v58, %v10726_v47  ;;  %v19829_v60 = vld [vmem:[#allocation176_spill] sm:$0xff]  ;;  %v19830_v25 = vld [vmem:[#allocation219_spill] sm:$0xff]  ;;  %v19831_v39 = vld [vmem:[#allocation406_spill] sm:$0xff] }
 0x363   : > { %v11348_v49 = vmul.f32 %v19822_v48, %v19820_v61  ;;  %v10938_v41 = vadd.f32 %v19823_v56, %v10728_v63  ;;  %v10939_v45 = vadd.f32 %v19824_v20, %v10729_v1  ;;  %v10940_v17 = vadd.f32 %v19825_v42, %v10730_v14  ;;  %v19832_v2 = vld [vmem:[#allocation407_spill] sm:$0xff]  ;;  %v19834_v47 = vld [vmem:[#allocation408_spill] sm:$0xff]  ;;  %v19839_v26 = vld [vmem:[#allocation222_spill] sm:$0xff] }
 0x364   : > { %v10941_v3 = vadd.f32 %v19826_v22, %v10731_v43  ;;  %v10937_v54 = vadd.f32 %v10873_v59, %v10727_v6  ;;  %v10942_v18 = vadd.f32 %v19827_v36, %v10732_v5  ;;  %v11146_v11 = vadd.f32 %v19828_v30, %v10936_v40  ;;  %v19836_v63 = vld [vmem:[#allocation308_spill] sm:$0xff]  ;;  %v19837_v6 = vld [vmem:[#allocation409_spill] sm:$0xff]  ;;  %v19840_v40 = vld [vmem:[#allocation223_spill] sm:$0xff] }
 0x365   : > { %v5069_v15 = vadd.f32 %v17434_v33, %v19829_v60  ;;  %v11148_v8 = vadd.f32 %v19830_v25, %v10938_v41  ;;  %v11149_v0 = vadd.f32 %v19831_v39, %v10939_v45  ;;  %v17548_v57 = vadd.f32 %v19832_v2, %v10940_v17  ;;  %v19841_v56 = vld [vmem:[#allocation5_spill] sm:$0xff]  ;;  %v19843_v17 = vld [vmem:[#allocation360_spill] sm:$0xff] }
 0x366   : > { %v17551_v58 = vadd.f32 %v19834_v47, %v10941_v3  ;;  %v11147_v1 = vadd.f32 %v19836_v63, %v10937_v54  ;;  %v17555_v14 = vadd.f32 %v19837_v6, %v10942_v18  ;;  %v11412_v43 = vadd.f32 %v11348_v49, %v11146_v11  ;;  %v19842_v45 = vld [vmem:[#allocation217_spill] sm:$0xff]  ;;  %v19846_v18 = vld [vmem:[#allocation63_spill] sm:$0xff]  ;;  %v19849_v47 = vld [vmem:[#allocation52_spill] sm:$0xff] }
 0x367   : > { %19833 = vst [vmem:[#allocation382_spill] sm:$0xff] %v17548_v57  ;;  %v5179_v5 = vmax.f32 %v5069_v15, 0.0  ;;  %v11414_v59 = vadd.f32 %v19839_v26, %v11148_v8  ;;  %v11415_v48 = vadd.f32 %v19840_v40, %v11149_v0  ;;  %v8374_v41 = vrot.slane %v19794_v32, %v19841_v56  ;;  %v19844_v36 = vld [vmem:[#allocation281_spill] sm:$0xff]  ;;  %v19848_v15 = vld [vmem:[#allocation163_spill] sm:$0xff] }
 0x368   : > { %19835 = vst [vmem:[#allocation380_spill] sm:$0xff] %v17551_v58  ;;  %19838 = vst [vmem:[#allocation29_spill] sm:$0xff] %v17555_v14  ;;  %v8378_v20 = vrot.slane %v19794_v32, %v19653_v44  ;;  %v11413_v42 = vadd.f32 %v19842_v45, %v11147_v1  ;;  %v11554_v22 = vadd.f32 %v19843_v17, %v11412_v43  ;;  %v19859_v17 = vld [vmem:[#allocation87_spill] sm:$0xff] }
 0x369   : > { %v6359_v3 = vcombine.high %v5179_v5, %v5179_v5  ;;  %v6366_v54 = vrot.slane %v5179_v5, %v19658_v51  ;;  %v17567_v49 = vadd.f32 %v19844_v36, %v11414_v59  ;;  %v17570_v30 = vadd.f32 %v19846_v18, %v11415_v48  ;;  %v19850_v48 = vld [vmem:[#allocation69_spill] sm:$0xff]  ;;  %v19858_v18 = vld [vmem:[#allocation212_spill] sm:$0xff] }
 0x36a   : > { %v8382_v11 = vrot.slane %v19794_v32, %v19654_v16  ;;  %v8386_v60 = vrot.slane %v19794_v32, %v19684_v35  ;;  %v11555_v25 = vadd.f32 %v19848_v15, %v11413_v42  ;;  %v8394_v63 = vrot.slane %v19849_v47, %v19648_v23  ;;  %v19851_v42 = vld [vmem:[#allocation92_spill] sm:$0xff]  ;;  %v19869_v36 = vld [vmem:[#allocation325_spill] sm:$0xff]  ;;  %v19870_v15 = vld [vmem:[#allocation327_spill] sm:$0xff] }
 0x36b   : > { %19845 = vst [vmem:[#allocation206_spill] sm:$0xff] %v17567_v49  ;;  %19847 = vst [vmem:[#allocation25_spill] sm:$0xff] %v17570_v30  ;;  %v6373_v8 = vrot.slane %v6359_v3, %v19658_v51  ;;  %v6374_v39 = vcombine.high %v6366_v54, %v6366_v54  ;;  %v6382_v0 = vrot.slane %v6366_v54, %v19658_v51 }
 0x36c   : > { %v8398_v1 = vrot.slane %v19849_v47, %v19649_v13  ;;  %v8402_v6 = vrot.slane %v19849_v47, %v19650_v31  ;;  %v11723_v32 = vcombine.low %v11554_v22, %v11555_v25  ;;  %v9507_v45 = vmul.f32 %v19850_v48, %v19818_v37 }
 0x36d   : > { %v6375_v43 = vcombine.high %v6373_v8, %v6373_v8  ;;  %v6389_v5 = vrot.slane %v6373_v8, %v19658_v51  ;;  %v6396_v26 = vrot.slane %v6374_v39, %v19658_v51  ;;  %v6404_v59 = vcombine.high %v6382_v0, %v6382_v0  ;;  %v19853_v8 = vld [vmem:[#allocation46_spill] sm:$0xff] }
 0x36e   : > { %v9291_v40 = vmul.f32 %v8374_v41, %v6382_v0  ;;  %v9983_v3 = vmul.f32 %v19851_v42, %v19818_v37  ;;  %v17594_v54 = vrot.slane %v11723_v32, %v19658_v51  ;;  %v19854_v39 = vrot.slane %v19853_v8, %v19648_v23  ;;  %v19855_v41 = vld [vmem:[#allocation383_spill] sm:$0xff]  ;;  %v19856_v32 = vld [vmem:[#allocation208_spill] sm:$0xff] }
 0x36f   : > { %v6403_v2 = vrot.slane %v6375_v43, %v19658_v51  ;;  %v6405_v31 = vcombine.high %v6389_v5, %v6389_v5  ;;  %v6406_v22 = vcombine.high %v6396_v26, %v6396_v26  ;;  %v9292_v25 = vmul.f32 %v8378_v20, %v6396_v26  ;;  %v19861_v8 = vld [vmem:[#allocation100_spill] sm:$0xff] }
 0x370   : > { %19852 = vst [vmem:[#allocation289_spill] sm:$0xff] %v17594_v54  ;;  %v9293_v14 = vmul.f32 %v8382_v11, %v6404_v59  ;;  %v9295_v58 = vmul.f32 %v19854_v39, %v6389_v5  ;;  %v9781_v0 = vadd.f32 %v19855_v41, %v9507_v45  ;;  %v9984_v37 = vmul.f32 %v19796_v21, %v19820_v61  ;;  %v19857_v54 = vld [vmem:[#allocation180_spill] sm:$0xff]  ;;  %v19860_v11 = vld [vmem:[#allocation385_spill] sm:$0xff]  ;;  %v19865_v41 = vld [vmem:[#allocation214_spill] sm:$0xff] }
 0x371   : > { %v6407_v57 = vcombine.high %v6403_v2, %v6403_v2  ;;  %v9294_v48 = vmul.f32 %v8386_v60, %v6406_v22  ;;  %v9296_v30 = vmul.f32 %v8394_v63, %v6403_v2  ;;  %v9297_v49 = vmul.f32 %v8398_v1, %v6405_v31  ;;  %v19862_v63 = vld [vmem:[#allocation400_spill] sm:$0xff]  ;;  %v19863_v31 = vld [vmem:[#allocation402_spill] sm:$0xff] }
 0x372   : > { %v9986_v43 = vmul.f32 %v19857_v54, %v19856_v32  ;;  %v9989_v20 = vmul.f32 %v19859_v17, %v19858_v18  ;;  %v10047_v26 = vadd.f32 %v9983_v3, %v19860_v11  ;;  %v10194_v5 = vmul.f32 %v19861_v8, %v9291_v40  ;;  %v19864_v3 = vld [vmem:[#allocation404_spill] sm:$0xff] }
 0x373   : > { %v9298_v59 = vmul.f32 %v8402_v6, %v6407_v57  ;;  %v10195_v45 = vmul.f32 %v19702_v28, %v9292_v25  ;;  %v10196_v60 = vmul.f32 %v19750_v27, %v9293_v14  ;;  %v10048_v2 = vadd.f32 %v9984_v37, %v9781_v0  ;;  %v19866_v37 = vld [vmem:[#allocation405_spill] sm:$0xff] }
 0x374   : > { %v10050_v1 = vadd.f32 %v9986_v43, %v19862_v63  ;;  %v10053_v21 = vadd.f32 %v9989_v20, %v19863_v31  ;;  %v10197_v61 = vmul.f32 %v19751_v24, %v9294_v48  ;;  %v10198_v54 = vmul.f32 %v19696_v52, %v9296_v30  ;;  %v19867_v20 = vld [vmem:[#allocation257_spill] sm:$0xff]  ;;  %v19868_v63 = vld [vmem:[#allocation324_spill] sm:$0xff] }
 0x375   : > { %v10199_v17 = vmul.f32 %v19700_v50, %v9297_v49  ;;  %v17617_v18 = vmul.f32 %v19695_v34, %v9298_v59  ;;  %v10257_v57 = vadd.f32 %v17513_v55, %v10047_v26  ;;  %v10258_v6 = vadd.f32 %v10194_v5, %v10048_v2  ;;  %v19871_v55 = vld [vmem:[#allocation326_spill] sm:$0xff]  ;;  %v19872_v5 = vld [vmem:[#allocation328_spill] sm:$0xff] }
 0x376   : > { %v10259_v22 = vadd.f32 %v10195_v45, %v19864_v3  ;;  %v10260_v39 = vadd.f32 %v10196_v60, %v10050_v1  ;;  %v10261_v0 = vadd.f32 %v10197_v61, %v19865_v41  ;;  %v10262_v32 = vadd.f32 %v10198_v54, %v19866_v37  ;;  %v19873_v60 = vld [vmem:[#allocation329_spill] sm:$0xff]  ;;  %v19875_v3 = vld [vmem:[#allocation138_spill] sm:$0xff] }
 0x377   : > { %v10263_v43 = vadd.f32 %v10199_v17, %v10053_v21  ;;  %v10467_v11 = vadd.f32 %v19867_v20, %v10257_v57  ;;  %v10669_v30 = vmul.f32 %v19600_v4, %v9291_v40  ;;  %v10468_v31 = vadd.f32 %v19868_v63, %v10258_v6  ;;  %v19874_v6 = vld [vmem:[#allocation213_spill] sm:$0xff]  ;;  %v19876_v37 = vld [vmem:[#allocation218_spill] sm:$0xff] }
 0x378   : > { %v10469_v34 = vadd.f32 %v19869_v36, %v10259_v22  ;;  %v10470_v50 = vadd.f32 %v19870_v15, %v10260_v39  ;;  %v10471_v26 = vadd.f32 %v19871_v55, %v10261_v0  ;;  %v10472_v45 = vadd.f32 %v19872_v5, %v10262_v32  ;;  %v19878_v32 = vld [vmem:[#allocation182_spill] sm:$0xff]  ;;  %v19882_v63 = vld [vmem:[#allocation245_spill] sm:$0xff] }
 0x379   : > { %v10473_v2 = vadd.f32 %v19873_v60, %v10263_v43  ;;  %v10670_v1 = vmul.f32 %v19602_v62, %v9292_v25  ;;  %v10671_v21 = vmul.f32 %v19604_v10, %v9293_v14  ;;  %v10672_v61 = vmul.f32 %v19759_v19, %v9294_v48  ;;  %v19877_v48 = vld [vmem:[#allocation235_spill] sm:$0xff]  ;;  %v19884_v5 = vld [vmem:[#allocation410_spill] sm:$0xff] }
 0x37a   : > { %v10673_v40 = vmul.f32 %v19760_v46, %v9295_v58  ;;  %v10674_v54 = vmul.f32 %v19701_v9, %v9297_v49  ;;  %v10675_v36 = vmul.f32 %v19596_v7, %v9298_v59  ;;  %v10733_v17 = vadd.f32 %v10669_v30, %v10467_v11  ;;  %v19879_v49 = vld [vmem:[#allocation236_spill] sm:$0xff]  ;;  %v19881_v11 = vld [vmem:[#allocation241_spill] sm:$0xff] }
 0x37b   : > { %v10734_v15 = vadd.f32 %v10670_v1, %v10468_v31  ;;  %v10735_v57 = vadd.f32 %v10671_v21, %v10469_v34  ;;  %v10879_v22 = vmul.f32 %v19875_v3, %v19874_v6  ;;  %v10736_v39 = vadd.f32 %v10672_v61, %v10470_v50  ;;  %v19880_v7 = vld [vmem:[#allocation240_spill] sm:$0xff]  ;;  %v19883_v50 = vld [vmem:[#allocation155_spill] sm:$0xff]  ;;  %v19887_v21 = vld [vmem:[#allocation422_spill] sm:$0xff] }
 0x37c   : > { %v10737_v41 = vadd.f32 %v10673_v40, %v10471_v26  ;;  %v10738_v0 = vadd.f32 %v10674_v54, %v10472_v45  ;;  %v10739_v25 = vadd.f32 %v10675_v36, %v10473_v2  ;;  %v10880_v14 = vmul.f32 %v19819_v29, %v19876_v37  ;;  %v19885_v29 = vld [vmem:[#allocation417_spill] sm:$0xff]  ;;  %v19886_v2 = vld [vmem:[#allocation420_spill] sm:$0xff]  ;;  %v19888_v40 = vld [vmem:[#allocation423_spill] sm:$0xff] }
 0x37d   : > { %v10883_v58 = vmul.f32 %v19878_v32, %v19877_v48  ;;  %v10943_v43 = vadd.f32 %v10879_v22, %v10733_v17  ;;  %v10945_v20 = vadd.f32 %v19879_v49, %v10735_v57  ;;  %v10946_v59 = vadd.f32 %v19880_v7, %v10736_v39  ;;  %v19889_v36 = vld [vmem:[#allocation165_spill] sm:$0xff]  ;;  %v19890_v57 = vld [vmem:[#allocation416_spill] sm:$0xff] }
 0x37e   : > { %v10948_v30 = vadd.f32 %v19881_v11, %v10738_v0  ;;  %v10949_v31 = vadd.f32 %v19882_v63, %v10739_v25  ;;  %v11355_v34 = vmul.f32 %v19883_v50, %v19876_v37  ;;  %v10944_v55 = vadd.f32 %v10880_v14, %v10734_v15  ;;  %v19891_v15 = vld [vmem:[#allocation421_spill] sm:$0xff]  ;;  %v19892_v0 = vld [vmem:[#allocation242_spill] sm:$0xff] }
 0x37f   : > { %v10947_v26 = vadd.f32 %v10883_v58, %v10737_v41  ;;  %v11153_v45 = vadd.f32 %v19884_v5, %v10943_v43  ;;  %v11155_v60 = vadd.f32 %v19885_v29, %v10945_v20  ;;  %v17652_v1 = vadd.f32 %v19886_v2, %v10946_v59  ;;  %v19894_v20 = vld [vmem:[#allocation247_spill] sm:$0xff]  ;;  %v19899_v2 = vld [vmem:[#allocation26_spill] sm:$0xff] }
 0x380   : > { %v17655_v61 = vadd.f32 %v19887_v21, %v10948_v30  ;;  %v17658_v54 = vadd.f32 %v19888_v40, %v10949_v31  ;;  %v5074_v17 = vadd.f32 %v17434_v33, %v19889_v36  ;;  %v11154_v22 = vadd.f32 %v19890_v57, %v10944_v55  ;;  %v19893_v33 = vld [vmem:[#allocation237_spill] sm:$0xff]  ;;  %v19896_v31 = vld [vmem:[#allocation75_spill] sm:$0xff] }
 0x381   : > { %v11157_v39 = vadd.f32 %v19891_v15, %v10947_v26  ;;  %v17664_v41 = vadd.f32 %v11355_v34, %v11153_v45  ;;  %v17667_v25 = vadd.f32 %v19892_v0, %v11155_v60  ;;  %v8406_v48 = vrot.slane %v19849_v47, %v19651_v12  ;;  %v19897_v26 = vld [vmem:[#allocation234_spill] sm:$0xff]  ;;  %v19900_v21 = vld [vmem:[#allocation85_spill] sm:$0xff]  ;;  %v19905_v15 = vld [vmem:[#allocation244_spill] sm:$0xff] }
 0x382   : > { %v5180_v14 = vmax.f32 %v5074_v17, 0.0  ;;  %v8410_v58 = vrot.slane %v19849_v47, %v19841_v56  ;;  %v8414_v43 = vrot.slane %v19849_v47, %v19653_v44  ;;  %v17676_v49 = vadd.f32 %v19893_v33, %v11154_v22  ;;  %v19895_v56 = vld [vmem:[#allocation65_spill] sm:$0xff]  ;;  %v19902_v17 = vld [vmem:[#allocation403_spill] sm:$0xff]  ;;  %v19903_v22 = vld [vmem:[#allocation412_spill] sm:$0xff] }
 0x383   : > { %v17679_v7 = vadd.f32 %v19894_v20, %v11157_v39  ;;  %v8418_v59 = vrot.slane %v19849_v47, %v19654_v16  ;;  %v8422_v11 = vrot.slane %v19849_v47, %v19684_v35  ;;  %v8430_v63 = vrot.slane %v19895_v56, %v19648_v23  ;;  %v19898_v47 = vld [vmem:[#allocation88_spill] sm:$0xff]  ;;  %v19901_v40 = vld [vmem:[#allocation401_spill] sm:$0xff] }
 0x384   : > { %v6408_v30 = vcombine.high %v5180_v14, %v5180_v14  ;;  %v6415_v12 = vrot.slane %v5180_v14, %v19658_v51  ;;  %v8434_v44 = vrot.slane %v19895_v56, %v19649_v13  ;;  %v9514_v50 = vmul.f32 %v19896_v31, %v19874_v6 }
 0x385   : > { %v9990_v34 = vmul.f32 %v19801_v38, %v19874_v6  ;;  %v9991_v55 = vmul.f32 %v19851_v42, %v19876_v37  ;;  %v9993_v5 = vmul.f32 %v19898_v47, %v19897_v26  ;;  %v9996_v13 = vmul.f32 %v19900_v21, %v19899_v2  ;;  %v19904_v6 = vld [vmem:[#allocation413_spill] sm:$0xff]  ;;  %v19907_v2 = vld [vmem:[#allocation107_spill] sm:$0xff] }
 0x386   : > { %v6422_v45 = vrot.slane %v6408_v30, %v19658_v51  ;;  %v6423_v29 = vcombine.high %v6415_v12, %v6415_v12  ;;  %v6431_v60 = vrot.slane %v6415_v12, %v19658_v51  ;;  %v9788_v36 = vadd.f32 %v19901_v40, %v9514_v50  ;;  %v19906_v30 = vld [vmem:[#allocation239_spill] sm:$0xff]  ;;  %v19908_v40 = vld [vmem:[#allocation162_spill] sm:$0xff] }
 0x387   : > { %v10054_v57 = vadd.f32 %v9990_v34, %v19902_v17  ;;  %v10057_v38 = vadd.f32 %v9993_v5, %v19903_v22  ;;  %v10059_v42 = vadd.f32 %v19905_v15, %v19904_v6  ;;  %v10060_v12 = vadd.f32 %v9996_v13, %v19906_v30  ;;  %v19909_v22 = vld [vmem:[#allocation56_spill] sm:$0xff] }
 0x388   : > { %v6424_v37 = vcombine.high %v6422_v45, %v6422_v45  ;;  %v6438_v39 = vrot.slane %v6422_v45, %v19658_v51  ;;  %v6445_v0 = vrot.slane %v6423_v29, %v19658_v51  ;;  %v6453_v14 = vcombine.high %v6431_v60, %v6431_v60 }
 0x389   : > { %v9299_v33 = vmul.f32 %v8406_v48, %v6431_v60  ;;  %v10055_v20 = vadd.f32 %v9991_v55, %v9788_v36  ;;  %v10264_v56 = vadd.f32 %v17617_v18, %v10054_v57  ;;  %v19910_v48 = vrot.slane %v19909_v22, %v19648_v23 }
 0x38a   : > { %v6452_v31 = vrot.slane %v6424_v37, %v19658_v51  ;;  %v6454_v50 = vcombine.high %v6438_v39, %v6438_v39  ;;  %v6455_v34 = vcombine.high %v6445_v0, %v6445_v0  ;;  %v9300_v26 = vmul.f32 %v8410_v58, %v6445_v0  ;;  %v19913_v0 = vld [vmem:[#allocation101_spill] sm:$0xff] }
 0x38b   : > { %v9301_v47 = vmul.f32 %v8414_v43, %v6453_v14  ;;  %v9303_v5 = vmul.f32 %v8422_v11, %v6438_v39  ;;  %v10201_v21 = vmul.f32 %v19907_v2, %v9299_v33  ;;  %v10474_v45 = vadd.f32 %v19908_v40, %v10264_v56  ;;  %v19912_v39 = vld [vmem:[#allocation209_spill] sm:$0xff]  ;;  %v19914_v14 = vld [vmem:[#allocation415_spill] sm:$0xff] }
 0x38c   : > { %v6456_v17 = vcombine.high %v6452_v31, %v6452_v31  ;;  %v9302_v29 = vmul.f32 %v8418_v59, %v6455_v34  ;;  %v9304_v55 = vmul.f32 %v19910_v48, %v6452_v31  ;;  %v9305_v60 = vmul.f32 %v8430_v63, %v6454_v50  ;;  %v19911_v59 = vld [vmem:[#allocation414_spill] sm:$0xff]  ;;  %v19920_v34 = vld [vmem:[#allocation271_spill] sm:$0xff] }
 0x38d   : > { %v10202_v18 = vmul.f32 %v19861_v8, %v9300_v26  ;;  %v10203_v13 = vmul.f32 %v19702_v28, %v9301_v47  ;;  %v10205_v36 = vmul.f32 %v19751_v24, %v9303_v5  ;;  %v10265_v58 = vadd.f32 %v10201_v21, %v10055_v20 }
 0x38e   : > { %v9306_v43 = vmul.f32 %v8434_v44, %v6456_v17  ;;  %v10204_v11 = vmul.f32 %v19750_v27, %v9302_v29  ;;  %v10206_v57 = vmul.f32 %v19696_v52, %v9305_v60  ;;  %v10676_v6 = vmul.f32 %v19598_v53, %v9299_v33  ;;  %v19915_v44 = vld [vmem:[#allocation20_spill] sm:$0xff]  ;;  %v19916_v27 = vld [vmem:[#allocation226_spill] sm:$0xff]  ;;  %v19921_v17 = vld [vmem:[#allocation93_spill] sm:$0xff] }
 0x38f   : > { %v10266_v15 = vadd.f32 %v10202_v18, %v19911_v59  ;;  %v10267_v37 = vadd.f32 %v10203_v13, %v10057_v38  ;;  %v10269_v23 = vadd.f32 %v10205_v36, %v10059_v42  ;;  %v10475_v63 = vadd.f32 %v19912_v39, %v10265_v58  ;;  %v19917_v52 = vld [vmem:[#allocation346_spill] sm:$0xff] }
 0x390   : > { %v10207_v8 = vmul.f32 %v19913_v0, %v9306_v43  ;;  %v10268_v28 = vadd.f32 %v10204_v11, %v19914_v14  ;;  %v10270_v30 = vadd.f32 %v10206_v57, %v10060_v12  ;;  %v10677_v24 = vmul.f32 %v19600_v4, %v9300_v26  ;;  %v19918_v33 = vld [vmem:[#allocation418_spill] sm:$0xff]  ;;  %v19932_v14 = vld [vmem:[#allocation265_spill] sm:$0xff] }
 0x391   : > { %v10476_v20 = vadd.f32 %v19915_v44, %v10266_v15  ;;  %v10477_v56 = vadd.f32 %v19916_v27, %v10267_v37  ;;  %v10479_v31 = vadd.f32 %v19917_v52, %v10269_v23  ;;  %v10678_v53 = vmul.f32 %v19602_v62, %v9301_v47  ;;  %v19919_v42 = vld [vmem:[#allocation250_spill] sm:$0xff]  ;;  %v19930_v15 = vld [vmem:[#allocation259_spill] sm:$0xff]  ;;  %v19931_v23 = vld [vmem:[#allocation264_spill] sm:$0xff] }
 0x392   : > { %v10271_v38 = vadd.f32 %v10207_v8, %v19918_v33  ;;  %v10478_v50 = vadd.f32 %v19919_v42, %v10268_v28  ;;  %v10480_v2 = vadd.f32 %v19920_v34, %v10270_v30  ;;  %v10679_v21 = vmul.f32 %v19604_v10, %v9302_v29  ;;  %v19922_v36 = vld [vmem:[#allocation238_spill] sm:$0xff]  ;;  %v19924_v10 = vld [vmem:[#allocation117_spill] sm:$0xff]  ;;  %v19933_v30 = vld [vmem:[#allocation424_spill] sm:$0xff] }
 0x393   : > { %v10680_v12 = vmul.f32 %v19759_v19, %v9303_v5  ;;  %v10681_v4 = vmul.f32 %v19760_v46, %v9304_v55  ;;  %v10682_v26 = vmul.f32 %v19701_v9, %v9306_v43  ;;  %v10740_v40 = vadd.f32 %v10676_v6, %v10474_v45  ;;  %v19923_v58 = vld [vmem:[#allocation174_spill] sm:$0xff]  ;;  %v19925_v19 = vld [vmem:[#allocation243_spill] sm:$0xff]  ;;  %v19926_v5 = vld [vmem:[#allocation253_spill] sm:$0xff] }
 0x394   : > { %v10481_v22 = vadd.f32 %v19921_v17, %v10271_v38  ;;  %v10741_v48 = vadd.f32 %v10677_v24, %v10475_v63  ;;  %v10742_v60 = vadd.f32 %v10678_v53, %v10476_v20  ;;  %v10743_v62 = vadd.f32 %v10679_v21, %v10477_v56  ;;  %v19927_v9 = vld [vmem:[#allocation57_spill] sm:$0xff]  ;;  %v19928_v55 = vld [vmem:[#allocation255_spill] sm:$0xff]  ;;  %v19929_v6 = vld [vmem:[#allocation38_spill] sm:$0xff] }
 0x395   : > { %v10744_v47 = vadd.f32 %v10680_v12, %v10478_v50  ;;  %v10745_v18 = vadd.f32 %v10681_v4, %v10479_v31  ;;  %v10746_v13 = vadd.f32 %v10682_v26, %v10480_v2  ;;  %v10886_v11 = vmul.f32 %v19923_v58, %v19922_v36  ;;  %v19934_v44 = vld [vmem:[#allocation35_spill] sm:$0xff]  ;;  %v19935_v27 = vld [vmem:[#allocation252_spill] sm:$0xff]  ;;  %v19936_v56 = vld [vmem:[#allocation370_spill] sm:$0xff] }
 0x396   : > { %v10747_v29 = vadd.f32 %v19924_v10, %v10481_v22  ;;  %v10887_v46 = vmul.f32 %v19875_v3, %v19925_v19  ;;  %v10890_v45 = vmul.f32 %v19927_v9, %v19926_v5  ;;  %v10891_v43 = vmul.f32 %v19878_v32, %v19928_v55  ;;  %v12434_v3 = vld.sshfl [vmem:[%s12990_s16 + $0x238] sm:$0x1 pattern:$0x75316420]  ;;  %v19937_v31 = vld [vmem:[#allocation43_spill] sm:$0xff]  ;;  %v19938_v33 = vld [vmem:[#allocation42_spill] sm:$0xff] }
 0x397   : > { %v10950_v57 = vadd.f32 %v10886_v11, %v10740_v40  ;;  %v10952_v59 = vadd.f32 %v19929_v6, %v10742_v60  ;;  %v10953_v37 = vadd.f32 %v19930_v15, %v10743_v62  ;;  %v10956_v39 = vadd.f32 %v19931_v23, %v10746_v13  ;;  %v19939_v42 = vld [vmem:[#allocation262_spill] sm:$0xff]  ;;  %v19940_v34 = vld [vmem:[#allocation151_spill] sm:$0xff]  ;;  %v19941_v21 = vld [vmem:[#allocation260_spill] sm:$0xff] }
 0x398   : > { %v10951_v63 = vadd.f32 %v10887_v46, %v10741_v48  ;;  %v10954_v0 = vadd.f32 %v10890_v45, %v10744_v47  ;;  %v10955_v8 = vadd.f32 %v10891_v43, %v10745_v18  ;;  %v17753_v28 = vadd.f32 %v19932_v14, %v10747_v29  ;;  %v19942_v4 = vld [vmem:[#allocation27_spill] sm:$0xff]  ;;  %v19943_v40 = vld [vmem:[#allocation28_spill] sm:$0xff]  ;;  %v19944_v60 = vld [vmem:[#allocation254_spill] sm:$0xff] }
 0x399   : > { %v11160_v24 = vadd.f32 %v19933_v30, %v10950_v57  ;;  %v11162_v20 = vadd.f32 %v19934_v44, %v10952_v59  ;;  %v17759_v32 = vadd.f32 %v19935_v27, %v10953_v37  ;;  %v17762_v52 = vadd.f32 %v19936_v56, %v10956_v39  ;;  %v19945_v47 = vld [vmem:[#allocation267_spill] sm:$0xff]  ;;  %v19946_v13 = vld [vmem:[#allocation198_spill] sm:$0xff]  ;;  %v19947_v36 = vld [vmem:[#allocation152_spill] sm:$0xff] }
 0x39a   : > { %v11161_v53 = vadd.f32 %v19937_v31, %v10951_v63  ;;  %v11164_v38 = vadd.f32 %v19938_v33, %v10954_v0  ;;  %v17767_v50 = vadd.f32 %v19939_v42, %v10955_v8  ;;  %v11362_v2 = vmul.f32 %v19940_v34, %v19925_v19  ;;  %v19948_v10 = vld [vmem:[#allocation60_spill] sm:$0xff]  ;;  %v19949_v29 = vld [vmem:[#allocation157_spill] sm:$0xff]  ;;  %v19950_v46 = vld [vmem:[#allocation203_spill] sm:$0xff] }
 0x39b   : > { %v17772_v12 = vadd.f32 %v19941_v21, %v11162_v20  ;;  %v2761_v26 = vcombine.high %v19942_v4, %v19942_v4  ;;  %v2791_v17 = vcombine.high %v19943_v40, %v19943_v40  ;;  %v2807_v22 = vrot.slane %v12434_v3, %v19658_v51  ;;  %v19951_v5 = vld [vmem:[#allocation158_spill] sm:$0xff]  ;;  %v19952_v45 = vld [vmem:[#allocation53_spill] sm:$0xff]  ;;  %v19957_v23 = vld [vmem:[#allocation299_spill] sm:$0xff] }
 0x39c   : > { %v17779_v48 = vadd.f32 %v11362_v2, %v11160_v24  ;;  %v17782_v62 = vadd.f32 %v19944_v60, %v11161_v53  ;;  %v17785_v18 = vadd.f32 %v19945_v47, %v11164_v38  ;;  %v11400_v58 = vadd.f32 %v19947_v36, %v19946_v13  ;;  %v19953_v55 = vld [vmem:[#allocation153_spill] sm:$0xff]  ;;  %v19954_v57 = vld [vmem:[#allocation358_spill] sm:$0xff]  ;;  %v19958_v39 = vld [vmem:[#allocation163_spill] sm:$0xff] }
 0x39d   : > { %v2789_v11 = vrot.slane %v2761_v26, %v19658_v51  ;;  %v11402_v19 = vadd.f32 %v19949_v29, %v19948_v10  ;;  %v11403_v9 = vadd.f32 %v19951_v5, %v19950_v46  ;;  %v11404_v43 = vadd.f32 %v19953_v55, %v19952_v45  ;;  %v19955_v59 = vld [vmem:[#allocation154_spill] sm:$0xff]  ;;  %v19956_v15 = vld [vmem:[#allocation349_spill] sm:$0xff]  ;;  %v19959_v0 = vld [vmem:[#allocation159_spill] sm:$0xff] }
 0x39e   : > { %v11542_v6 = vadd.f32 %v19954_v57, %v11400_v58  ;;  %v11543_v37 = vadd.f32 %v19956_v15, %v19955_v59  ;;  %v11547_v63 = vadd.f32 %v19958_v39, %v19957_v23  ;;  %v19960_v8 = vld [vmem:[#allocation281_spill] sm:$0xff]  ;;  %v19962_v20 = vld [vmem:[#allocation359_spill] sm:$0xff]  ;;  %v19963_v56 = vld [vmem:[#allocation360_spill] sm:$0xff] }
 0x39f   : > { %v11548_v14 = vadd.f32 %v19960_v8, %v19959_v0  ;;  %v2793_v3 = vcombine.high %v2789_v11, %v2789_v11  ;;  %v4776_v30 = vcombine.low %v2789_v11, %v2791_v17  ;;  %v19961_v24 = vld [vmem:[#allocation37_spill] sm:$0xff]  ;;  %v11545_v27 = vadd.f32 %v19962_v20, %v11403_v9  ;;  %v19964_v53 = vld [vmem:[#allocation300_spill] sm:$0xff]  ;;  %v19965_v33 = vld [vmem:[#allocation63_spill] sm:$0xff] }
 0x3a0   : > { %v11544_v44 = vadd.f32 %v19961_v24, %v11402_v19  ;;  %v11546_v31 = vadd.f32 %v19963_v56, %v11404_v43  ;;  %v11549_v38 = vadd.f32 %v19965_v33, %v19964_v53  ;;  %v11672_v42 = vcombine.low %v11542_v6, %v11543_v37  ;;  %v19966_v34 = vld [vmem:[#allocation303_spill] sm:$0xff]  ;;  %v19967_v2 = vld [vmem:[#allocation256_spill] sm:$0xff]  ;;  %v19970_v47 = vld [vmem:[#allocation378_spill] sm:$0xff] }
 0x3a1   : > { %v19968_v21 = vcombine.low %v19966_v34, %v19967_v2  ;;  %v4777_v26 = vcombine.low %v2793_v3, %v2807_v22  ;;  %v4784_v40 = vrot.slane %v4776_v30, %v19658_v51  ;;  %v19969_v17 = vld [vmem:[#allocation160_spill] sm:$0xff]  ;;  %v19972_v29 = vld [vmem:[#allocation206_spill] sm:$0xff]  ;;  %v19973_v19 = vld [vmem:[#allocation25_spill] sm:$0xff] }
 0x3a2   : > { %v11673_v60 = vcombine.low %v11544_v44, %v11545_v27  ;;  %v19971_v13 = vcombine.low %v19969_v17, %v19970_v47  ;;  %v11674_v58 = vcombine.low %v11546_v31, %v11547_v63  ;;  %v11675_v11 = vcombine.low %v11548_v14, %v11549_v38  ;;  %v19975_v55 = vld [vmem:[#allocation382_spill] sm:$0xff]  ;;  %v19976_v43 = vld [vmem:[#allocation224_spill] sm:$0xff]  ;;  %v19977_v23 = vld [vmem:[#allocation289_spill] sm:$0xff] }
 0x3a3   : > { %v11731_v4 = vrot.slane %v19968_v21, %v19658_v51  ;;  %v11682_v10 = vrot.slane %v11672_v42, %v19658_v51  ;;  %v19974_v46 = vcombine.low %v19972_v29, %v19973_v19  ;;  %v4791_v9 = vrot.slane %v4777_v26, %v19658_v51  ;;  %v19978_v0 = vld [vmem:[#allocation380_spill] sm:$0xff]  ;;  %v19979_v14 = vld [vmem:[#allocation225_spill] sm:$0xff]  ;;  %v19981_v53 = vld [vmem:[#allocation227_spill] sm:$0xff] }
 0x3a4   : > { %v11738_v36 = vrot.slane %v19971_v13, %v19658_v51  ;;  %v11689_v22 = vrot.slane %v11673_v60, %v19658_v51  ;;  %v11416_v6 = vadd.f32 %v19976_v43, %v19975_v55  ;;  %v11696_v59 = vrot.slane %v11674_v58, %v19658_v51  ;;  %v19980_v31 = vld [vmem:[#allocation29_spill] sm:$0xff]  ;;  %v19982_v2 = vld [vmem:[#allocation246_spill] sm:$0xff] }
 0x3a5   : > { %v11752_v5 = vrot.slane %v19974_v46, %v19658_v51  ;;  %v11703_v37 = vrot.slane %v11675_v11, %v19658_v51  ;;  %v11417_v3 = vadd.f32 %v19979_v14, %v19978_v0  ;;  %v4792_v30 = vcombine.low %v4784_v40, %v4791_v9 }
 0x3a6   : > { %v11753_v45 = vcombine.low %v11731_v4, %v11738_v36  ;;  %v11704_v44 = vcombine.low %v11682_v10, %v11689_v22  ;;  %v11418_v38 = vadd.f32 %v19981_v53, %v19980_v31  ;;  %v11422_v21 = vadd.f32 %v19982_v2, %v17652_v1 }
 0x3a7   : > { %v11754_v63 = vcombine.low %v19977_v23, %v11752_v5  ;;  %v11705_v42 = vcombine.low %v11696_v59, %v11703_v37  ;;  %v11558_v4 = vadd.f32 %v19954_v57, %v11416_v6  ;;  %v4799_v26 = vrot.slane %v4792_v30, %v19658_v51  ;;  %v19983_v5 = vld [vmem:[#allocation248_spill] sm:$0xff] }
 0x3a8   : > { %v11761_v27 = vrot.slane %v11753_v45, %v19658_v51  ;;  %v11712_v60 = vrot.slane %v11704_v44, %v19658_v51  ;;  %v11559_v40 = vadd.f32 %v19956_v15, %v11417_v3  ;;  %v11560_v17 = vadd.f32 %v19961_v24, %v11418_v38  ;;  %v19986_v6 = vld [vmem:[#allocation268_spill] sm:$0xff]  ;;  %v19987_v38 = vld [vmem:[#allocation258_spill] sm:$0xff] }
 0x3a9   : > { %v11768_v34 = vrot.slane %v11754_v63, %v19658_v51  ;;  %v11719_v47 = vrot.slane %v11705_v42, %v19658_v51  ;;  %v11561_v36 = vadd.f32 %v19962_v20, %v17664_v41  ;;  %v11562_v58 = vadd.f32 %v19963_v56, %v17676_v49  ;;  %12723 = vmatmul.mubr.msk.f32.gmra.mxu1 %vm4800_vm2, %v4799_v26  ;;  %v19984_v41 = vld [vmem:[#allocation249_spill] sm:$0xff] }
 0x3aa   : > { %v11563_v1 = vadd.f32 %v19958_v39, %v17667_v25  ;;  %v11564_v11 = vadd.f32 %v19960_v8, %v11422_v21  ;;  %v11565_v10 = vadd.f32 %v19965_v33, %v17679_v7  ;;  %v11770_v29 = vcombine.low %v11558_v4, %v11559_v40  ;;  %v19985_v25 = vld [vmem:[#allocation261_spill] sm:$0xff] }
 0x3ab   : > { %v11769_v13 = vcombine.low %v11761_v27, %v11768_v34  ;;  %v11720_v19 = vcombine.low %v11712_v60, %v11719_v47  ;;  %v11771_v46 = vcombine.low %v11560_v17, %v11561_v36  ;;  %v11424_v9 = vadd.f32 %v19983_v5, %v17655_v61  ;;  %v19988_v34 = vld [vmem:[#allocation269_spill] sm:$0xff]  ;;  %v19989_v60 = vld [vmem:[#allocation270_spill] sm:$0xff]  ;;  %v19990_v47 = vld [vmem:[#allocation120_spill] sm:$0xff] }
 0x3ac   : > { %v11425_v22 = vadd.f32 %v19984_v41, %v17658_v54  ;;  %v11772_v49 = vcombine.low %v11562_v58, %v11563_v1  ;;  %v11773_v45 = vcombine.low %v11564_v11, %v11565_v10  ;;  %v11780_v55 = vrot.slane %v11770_v29, %v19658_v51  ;;  %v19991_v58 = vld [vmem:[#allocation112_spill] sm:$0xff]  ;;  %v19992_v10 = vld [vmem:[#allocation129_spill] sm:$0xff]  ;;  %v19993_v29 = vld [vmem:[#allocation123_spill] sm:$0xff] }
 0x3ad   : > { %v11429_v43 = vadd.f32 %v19985_v25, %v17759_v32  ;;  %12727 = vmatprep.mubr.msk.f32.mxu1 %vm4800_vm2, %v11720_v19  ;;  %v11787_v7 = vrot.slane %v11771_v46, %v19658_v51  ;;  %v11431_v59 = vadd.f32 %v19986_v6, %v17767_v50  ;;  %v11566_v37 = vadd.f32 %v19954_v57, %v11424_v9  ;;  %v12815_v50 = vld [vmem:[%s18222_s8] sm:$0xf]  ;;  %v19994_v46 = vld [vmem:[#allocation419_spill] sm:$0xff] }
 0x3ae   : > { %v11567_v61 = vadd.f32 %v19956_v15, %v11425_v22  ;;  %12728 = vmatmul.mubr.msk.f32.vlgmr.msra.gmra.mxu1 %vm4800_vm2, %v11769_v13  ;;  %v11794_v54 = vrot.slane %v11772_v49, %v19658_v51  ;;  %v11801_v23 = vrot.slane %v11773_v45, %v19658_v51  ;;  %v11568_v32 = vadd.f32 %v19961_v24, %v17779_v48  ;;  %v19995_v9 = vld [vmem:[#allocation78_spill] sm:$0xff]  ;;  %v19996_v45 = vld [vmem:[#allocation97_spill] sm:$0xff] }
 0x3af   : > { %v11569_v63 = vadd.f32 %v19962_v20, %v17782_v62  ;;  %v11802_v0 = vcombine.low %v11780_v55, %v11787_v7  ;;  %12740 = vmatpush3.msk.msra.mxu1 %vm4883_vm0, %v12815_v50  ;;  %v11570_v14 = vadd.f32 %v19963_v56, %v17772_v12  ;;  %v11571_v3 = vadd.f32 %v19958_v39, %v11429_v43  ;;  %v19997_v25 = vld [vmem:[#allocation130_spill] sm:$0xff]  ;;  %v20001_v50 = vld [vmem:[#allocation164_spill] sm:$0xff] }
 0x3b0   : > { %v11572_v30 = vadd.f32 %v19960_v8, %v17785_v18  ;;  %v11803_v44 = vcombine.low %v11794_v54, %v11801_v23  ;;  %v11573_v48 = vadd.f32 %v19965_v33, %v11431_v59  ;;  %v11819_v27 = vcombine.low %v11566_v37, %v11567_v61  ;;  %v19998_v59 = vld [vmem:[#allocation161_spill] sm:$0xff]  ;;  %v19999_v54 = vld [vmem:[#allocation122_spill] sm:$0xff] }
 0x3b1   : > { %v11820_v62 = vcombine.low %v11568_v32, %v11569_v63  ;;  %v11810_v31 = vrot.slane %v11802_v0, %v19658_v51  ;;  %v11821_v53 = vcombine.low %v11570_v14, %v11571_v3  ;;  %v11167_v42 = vadd.f32 %v19987_v38, %v17753_v28  ;;  %v20000_v32 = vld [vmem:[#allocation284_spill] sm:$0xff]  ;;  %v20002_v14 = vld [vmem:[#allocation285_spill] sm:$0xff] }
 0x3b2   : > { %v11432_v2 = vadd.f32 %v19988_v34, %v17762_v52  ;;  %v11817_v12 = vrot.slane %v11803_v44, %v19658_v51  ;;  %v11822_v21 = vcombine.low %v11572_v30, %v11573_v48  ;;  %v11829_v4 = vrot.slane %v11819_v27, %v19658_v51  ;;  %v20003_v30 = vld [vmem:[#allocation169_spill] sm:$0xff] }
 0x3b3   : > { %v11836_v18 = vrot.slane %v11820_v62, %v19658_v51  ;;  %v11843_v26 = vrot.slane %v11821_v53, %v19658_v51  ;;  %v11433_v40 = vadd.f32 %v19989_v60, %v11167_v42  ;;  %v11579_v13 = vadd.f32 %v19958_v39, %v19990_v47  ;;  %v20004_v48 = vld [vmem:[#allocation377_spill] sm:$0xff]  ;;  %v20007_v60 = vld [vmem:[#allocation170_spill] sm:$0xff] }
 0x3b4   : > { %v11574_v17 = vadd.f32 %v19954_v57, %v11432_v2  ;;  %v11818_v28 = vcombine.low %v11810_v31, %v11817_v12  ;;  %v11850_v36 = vrot.slane %v11822_v21, %v19658_v51  ;;  %v11581_v1 = vadd.f32 %v19965_v33, %v19991_v58  ;;  %v20005_v12 = vld [vmem:[#allocation381_spill] sm:$0xff] }
 0x3b5   : > { %v11851_v52 = vcombine.low %v11829_v4, %v11836_v18  ;;  %v11575_v11 = vadd.f32 %v19956_v15, %v11433_v40  ;;  %v11869_v19 = vcombine.low %v19993_v29, %v19992_v10  ;;  %v11870_v5 = vcombine.low %v19994_v46, %v11579_v13  ;;  %v20008_v13 = vld [vmem:[#allocation282_spill] sm:$0xff] }
 0x3b6   : > { %v11582_v41 = vadd.f32 %v19954_v57, %v19995_v9  ;;  %12730 = vmatprep.mubr.msk.f32.mxu1 %vm4800_vm2, %v11818_v28  ;;  %v11852_v22 = vcombine.low %v11843_v26, %v11850_v36  ;;  %v11871_v55 = vcombine.low %v19996_v45, %v11581_v1  ;;  %v11586_v43 = vadd.f32 %v19963_v56, %v19997_v25  ;;  %v20009_v28 = vld [vmem:[#allocation40_spill] sm:$0xff] }
 0x3b7   : > { %v11859_v49 = vrot.slane %v11851_v52, %v19658_v51  ;;  %v11868_v7 = vcombine.low %v11574_v17, %v11575_v11  ;;  %v11885_v15 = vrot.slane %v11869_v19, %v19658_v51  ;;  %v11892_v6 = vrot.slane %v11870_v5, %v19658_v51  ;;  %v20010_v52 = vld [vmem:[#allocation286_spill] sm:$0xff]  ;;  %v20011_v11 = vld [vmem:[#allocation368_spill] sm:$0xff]  ;;  %v20012_v19 = vld [vmem:[#allocation127_spill] sm:$0xff] }
 0x3b8   : > { %v11588_v37 = vadd.f32 %v19960_v8, %v19998_v59  ;;  %v11866_v57 = vrot.slane %v11852_v22, %v19658_v51  ;;  %v11899_v61 = vrot.slane %v11871_v55, %v19658_v51  ;;  %v11589_v23 = vadd.f32 %v19965_v33, %v19999_v54  ;;  %v20013_v55 = vld [vmem:[#allocation278_spill] sm:$0xff]  ;;  %v20016_v59 = vld [vmem:[#allocation288_spill] sm:$0xff] }
 0x3b9   : > { %v11917_v63 = vcombine.low %v11582_v41, %v20000_v32  ;;  %v11878_v0 = vrot.slane %v11868_v7, %v19658_v51  ;;  %v11918_v3 = vcombine.low %v20002_v14, %v20001_v50  ;;  %v11919_v44 = vcombine.low %v11586_v43, %v20003_v30  ;;  %v20014_v43 = vld [vmem:[#allocation279_spill] sm:$0xff] }
 0x3ba   : > { %v11593_v27 = vadd.f32 %v19962_v20, %v20004_v48  ;;  %v11867_v62 = vcombine.low %v11859_v49, %v11866_v57  ;;  %v11901_v31 = vcombine.low %v11892_v6, %v11899_v61  ;;  %v11920_v53 = vcombine.low %v11588_v37, %v11589_v23  ;;  %v20006_v20 = vld [vmem:[#allocation280_spill] sm:$0xff]  ;;  %v20017_v37 = vld [vmem:[#allocation283_spill] sm:$0xff]  ;;  %v20018_v23 = vld [vmem:[#allocation61_spill] sm:$0xff] }
 0x3bb   : > { %v11927_v38 = vrot.slane %v11917_v63, %v19658_v51  ;;  %v11900_v42 = vcombine.low %v11878_v0, %v11885_v15  ;;  %v11934_v34 = vrot.slane %v11918_v3, %v19658_v51  ;;  %v11941_v2 = vrot.slane %v11919_v44, %v19658_v51  ;;  %v20015_v15 = vld [vmem:[#allocation276_spill] sm:$0xff]  ;;  %v12816_v63 = vld [vmem:[%s12990_s16] sm:$0xff]  ;;  %v20019_v0 = vld [vmem:[#allocation19_spill] sm:$0xff] }
 0x3bc   : > { %v11595_v21 = vadd.f32 %v19958_v39, %v20005_v12  ;;  %12731 = vmatmul.mubr.msk.f32.gmra.mxu1 %vm4800_vm2, %v11867_v62  ;;  %v11915_v4 = vrot.slane %v11901_v31, %v19658_v51  ;;  %v11948_v18 = vrot.slane %v11920_v53, %v19658_v51  ;;  %v11596_v26 = vadd.f32 %v19960_v8, %v20006_v20  ;;  %v20020_v3 = vld [vmem:[#allocation55_spill] sm:$0xff]  ;;  %v20021_v48 = vld [vmem:[#allocation17_spill] sm:$0xff]  ;;  %v20022_v62 = vld [vmem:[#allocation4_spill] sm:$0xff] }
 0x3bd   : > { %v11597_v40 = vadd.f32 %v19965_v33, %v20007_v60  ;;  %v11908_v17 = vrot.slane %v11900_v42, %v19658_v51  ;;  %v11949_v47 = vcombine.low %v11927_v38, %v11934_v34  ;;  %v11966_v36 = vcombine.low %v20009_v28, %v20008_v13  ;;  %v20023_v53 = vld [vmem:[#allocation54_spill] sm:$0xff]  ;;  %v20024_v12 = vld [vmem:[#allocation47_spill] sm:$0xff] }
 0x3be   : > { %v11967_v58 = vcombine.low %v20010_v52, %v11593_v27  ;;  %v11950_v1 = vcombine.low %v11941_v2, %v11948_v18  ;;  %v11968_v10 = vcombine.low %v20011_v11, %v11595_v21  ;;  %v11600_v46 = vadd.f32 %v19961_v24, %v20012_v19  ;;  %v12817_v2 = vld [vmem:[%s12990_s16 + $0x120] sm:$0xff]  ;;  %v12819_v28 = vld [vmem:[%s12990_s16 + $0x128] sm:$0x1] }
 0x3bf   : > { %v11969_v29 = vcombine.low %v11596_v26, %v11597_v40  ;;  %v11916_v5 = vcombine.low %v11908_v17, %v11915_v4  ;;  %v11957_v9 = vrot.slane %v11949_v47, %v19658_v51  ;;  %v11976_v33 = vrot.slane %v11966_v36, %v19658_v51  ;;  %v20025_v26 = vld [vmem:[#allocation48_spill] sm:$0xff]  ;;  %v20026_v47 = vld [vmem:[#allocation7_spill] sm:$0xff]  ;;  %v12820_v52 = vld [vmem:[%s18216_s2] sm:$0xff] }
 0x3c0   : > { %v11983_v41 = vrot.slane %v11967_v58, %v19658_v51  ;;  %v11964_v22 = vrot.slane %v11950_v1, %v19658_v51  ;;  %v11990_v49 = vrot.slane %v11968_v10, %v19658_v51  ;;  %v11602_v25 = vadd.f32 %v19963_v56, %v20013_v55  ;;  %v12818_v17 = vld [vmem:[%s12990_s16 + $0x1b0] sm:$0xff]  ;;  %v20027_v1 = vld [vmem:[#allocation6_spill] sm:$0xff]  ;;  %v12823_v55 = vld [vmem:[%s12990_s16 + $0x18] sm:$0x1] }
 0x3c1   : > { %v11997_v45 = vrot.slane %v11969_v29, %v19658_v51  ;;  %12733 = vmatprep.mubr.msk.f32.mxu1 %vm4800_vm2, %v11916_v5  ;;  %v11603_v7 = vadd.f32 %v19958_v39, %v20014_v43  ;;  %v11604_v6 = vadd.f32 %v19960_v8, %v20015_v15  ;;  %v12015_v57 = vcombine.low %v20017_v37, %v20016_v59  ;;  %v17997_v5 = vld [vmem:[%s18216_s2 + $0x8] ss:$0 sm:$0xff]  ;;  %v20031_v43 = vld [vmem:[#allocation10_spill] sm:$0xff] }
 0x3c2   : > { %v11998_v24 = vcombine.low %v11976_v33, %v11983_v41  ;;  %v11965_v61 = vcombine.low %v11957_v9, %v11964_v22  ;;  %v12016_v32 = vcombine.low %v11600_v46, %v20018_v23  ;;  %v9409_v56 = vmul.f32 %v12816_v63, %v20019_v0  ;;  %v12821_v46 = vld [vmem:[%s12990_s16 + $0x10] sm:$0xff]  ;;  %v20032_v37 = vld [vmem:[#allocation50_spill] sm:$0xff] }
 0x3c3   : > { %v11999_v54 = vcombine.low %v11990_v49, %v11997_v45  ;;  %v12017_v14 = vcombine.low %v11602_v25, %v11603_v7  ;;  %v12018_v30 = vcombine.low %v11604_v6, %v20020_v3  ;;  %v12025_v39 = vrot.slane %v12015_v57, %v19658_v51  ;;  %v20029_v49 = vld [vmem:[#allocation51_spill] sm:$0xff] }
 0x3c4   : > { %v12006_v50 = vrot.slane %v11998_v24, %v19658_v51  ;;  %12734 = vmatmul.mubr.msk.f32.gmra.mxu1 %vm4800_vm2, %v11965_v61  ;;  %v12032_v44 = vrot.slane %v12016_v32, %v19658_v51  ;;  %v9627_v27 = vadd.f32 %v20021_v48, %v9409_v56  ;;  %v9829_v31 = vmul.f32 %v12816_v63, %v20022_v62  ;;  %v20030_v24 = vld [vmem:[#allocation21_spill] sm:$0xff]  ;;  %v20036_v48 = vld [vmem:[#allocation14_spill] sm:$0xff] }
 0x3c5   : > { %v12013_v8 = vrot.slane %v11999_v54, %v19658_v51  ;;  %v10552_v38 = vrot.slane %v20023_v53, 1  ;;  %v12039_v42 = vrot.slane %v12017_v14, %v19658_v51  ;;  %v12046_v34 = vrot.slane %v12018_v30, %v19658_v51  ;;  %v12824_v54 = vld [vmem:[%s12990_s16 + $0xa0] sm:$0xff]  ;;  %v20034_v63 = vld [vmem:[#allocation49_spill] sm:$0xff] }
 0x3c6   : > { %v10096_v21 = vmul.f32 %v12817_v2, %v20024_v12  ;;  %v12047_v18 = vcombine.low %v12025_v39, %v12032_v44  ;;  %v9862_v20 = vrot.slane %v9829_v31, 1  ;;  %v10516_v60 = vmul.f32 %v12817_v2, %v20025_v26  ;;  %v12825_v14 = vld [vmem:[%s12990_s16 + $0x20] sm:$0xff]  ;;  %v12826_v39 = vld [vmem:[%s12990_s16 + $0xb0] sm:$0xff] }
 0x3c7   : > { %v12014_v4 = vcombine.low %v12006_v50, %v12013_v8  ;;  %v12048_v40 = vcombine.low %v12039_v42, %v12046_v34  ;;  %v10306_v13 = vmul.f32 %v12818_v17, %v20026_v47  ;;  %v10517_v36 = vmul.f32 %v12819_v28, %v20025_v26  ;;  %v20035_v8 = vld [vmem:[#allocation16_spill] sm:$0xff]  ;;  %v20037_v28 = vld [vmem:[#allocation11_spill] sm:$0xff] }
 0x3c8   : > { %v17984_v58 = vrot.slane %v12820_v52, %v19654_v16  ;;  %v20028_v11 = vrot.slane %v20027_v1, 1  ;;  %v10548_v29 = vrot.slane %v10516_v60, 1  ;;  %v17991_v19 = vrot.slane %v12820_v52, %v19684_v35 }
 0x3c9   : > { %12736 = vmatprep.mubr.msk.f32.mxu1 %vm4800_vm2, %v12014_v4  ;;  %v11202_v16 = vmul.f32 %v17997_v5, %v12821_v46  ;;  %v12055_v9 = vrot.slane %v12047_v18, %v19658_v51  ;;  %v12062_v33 = vrot.slane %v12048_v40, %v19658_v51  ;;  %v10549_v22 = vrot.slane %v10517_v36, 1  ;;  %v12828_v40 = vld [vmem:[%s12990_s16 + $0x148] sm:$0x1] }
 0x3ca   : > { %v9864_v10 = vsel %vm9861_vm3, %v9862_v20, %v20028_v11  ;;  %v9881_v45 = vrot.slane %v20029_v49, 1  ;;  %v10782_v35 = vmul.f32 %v12821_v46, %v17984_v58  ;;  %v11203_v25 = vmul.f32 %v12823_v55, %v17997_v5  ;;  %v12827_v20 = vld [vmem:[%s12990_s16 + $0x140] sm:$0xff]  ;;  %v12829_v11 = vld [vmem:[%s12990_s16 + $0x1d0] sm:$0xff]  ;;  %v20039_v46 = vld [vmem:[#allocation9_spill] sm:$0xff] }
 0x3cb   : > { %v9894_v41 = vadd.f32 %v9864_v10, %v9627_v27  ;;  %v9895_v7 = vadd.f32 %v20031_v43, %v20030_v24  ;;  %v12063_v15 = vcombine.low %v12055_v9, %v12062_v33  ;;  %v11234_v59 = vrot.slane %v11202_v16, 1  ;;  %v12831_v24 = vld [vmem:[%s12990_s16 + $0x38] sm:$0x1]  ;;  %v12856_v49 = vld [vmem:[%s12990_s16 + $0x100] sm:$0xff] }
 0x3cc   : > { %v20033_v57 = vrot.slane %v20032_v37, 1  ;;  %v10550_v61 = vsel %vm9861_vm3, %v10548_v29, %v10549_v22  ;;  %v10992_v23 = vmul.f32 %v12824_v54, %v17991_v19  ;;  %v11235_v32 = vrot.slane %v11203_v25, 1 }
 0x3cd   : > { %v10104_v6 = vadd.f32 %v10096_v21, %v9894_v41  ;;  %v10105_v56 = vadd.f32 %v20034_v63, %v9895_v7  ;;  %12737 = vmatmul.mubr.msk.f32.gmra.mxu1 %vm4800_vm2, %v12063_v15  ;;  %v11204_v3 = vmul.f32 %v12825_v14, %v17997_v5  ;;  %v9411_v30 = vmul.f32 %v12825_v14, %v20019_v0  ;;  %v18044_v7 = vld [vmem:[%s12990_s16 + $0x78] sm:$0x1] }
 0x3ce   : > { %v10553_v51 = vsel %vm9861_vm3, %v20033_v57, %v10552_v38  ;;  %v9621_v44 = vmul.f32 %v12826_v39, %v20035_v8  ;;  %v10783_v31 = vmul.f32 %v12825_v14, %v17984_v58  ;;  %v10993_v53 = vmul.f32 %v12826_v39, %v17991_v19  ;;  %v12833_v57 = vld [vmem:[%s12990_s16 + $0xc0] sm:$0xff] }
 0x3cf   : > { %v10314_v50 = vadd.f32 %v10306_v13, %v10104_v6  ;;  %v10315_v27 = vadd.f32 %v20036_v48, %v10105_v56  ;;  %v9833_v38 = vmul.f32 %v12825_v14, %v20022_v62  ;;  %v11236_v34 = vsel %vm9861_vm3, %v11234_v59, %v11235_v32  ;;  %v18053_v6 = vld [vmem:[%s18217_s3] ss:$0 sm:$0xff] }
 0x3d0   : > { %v11237_v2 = vrot.slane %v11204_v3, 1  ;;  %v9629_v21 = vadd.f32 %v9621_v44, %v9411_v30  ;;  %v10520_v60 = vmul.f32 %v12827_v20, %v20025_v26  ;;  %v10521_v17 = vmul.f32 %v12828_v40, %v20025_v26 }
 0x3d1   : > { %v10580_v42 = vadd.f32 %v10550_v61, %v10314_v50  ;;  %v10581_v4 = vadd.f32 %v10553_v51, %v10315_v27  ;;  %v9868_v18 = vrot.slane %v9833_v38, 1  ;;  %v20038_v36 = vrot.slane %v20037_v28, 1  ;;  %v12835_v38 = vld [vmem:[%s12990_s16 + $0x158] sm:$0x1]  ;;  %v12837_v28 = vld [vmem:[%s12990_s16 + $0x48] sm:$0x1] }
 0x3d2   : > { %v10098_v1 = vmul.f32 %v12827_v20, %v20024_v12  ;;  %v10308_v10 = vmul.f32 %v12829_v11, %v20026_v47  ;;  %v20040_v16 = vrot.slane %v20039_v46, 1  ;;  %v10554_v33 = vrot.slane %v10520_v60, 1  ;;  %v20041_v20 = vld [vmem:[#allocation12_spill] sm:$0xff]  ;;  %v12838_v11 = vld [vmem:[%s12990_s16 + $0x1e0] sm:$0xff] }
 0x3d3   : > { %v10790_v13 = vadd.f32 %v10782_v35, %v10580_v42  ;;  %v11239_v52 = vsel %vm9861_vm3, %v11237_v2, %v20038_v36  ;;  %v10791_v29 = vadd.f32 %v10783_v31, %v10581_v4  ;;  %v10555_v41 = vrot.slane %v10521_v17, 1  ;;  %v12830_v35 = vld [vmem:[%s12990_s16 + $0x30] sm:$0xff]  ;;  %v12836_v4 = vld [vmem:[%s12990_s16 + $0x40] sm:$0xff] }
 0x3d4   : > { %v9870_v9 = vsel %vm9861_vm3, %v9868_v18, %v20040_v16  ;;  %v11206_v25 = vmul.f32 %v12830_v35, %v17997_v5  ;;  %v11207_v43 = vmul.f32 %v12831_v24, %v17997_v5  ;;  %v18048_v15 = vmul.f32 %v18044_v7, %v20022_v62  ;;  %v12834_v31 = vld [vmem:[%s12990_s16 + $0x150] sm:$0xff] }
 0x3d5   : > { %v11000_v22 = vadd.f32 %v10992_v23, %v10790_v13  ;;  %v9896_v55 = vadd.f32 %v9870_v9, %v9629_v21  ;;  %v11001_v59 = vadd.f32 %v10993_v53, %v10791_v29  ;;  %v9412_v37 = vmul.f32 %v12830_v35, %v20019_v0  ;;  %v12839_v16 = vld [vmem:[%s12990_s16 + $0xd0] sm:$0xff] }
 0x3d6   : > { %v9622_v51 = vmul.f32 %v12833_v57, %v20035_v8  ;;  %v11240_v23 = vrot.slane %v11206_v25, 1  ;;  %v11241_v32 = vrot.slane %v11207_v43, 1  ;;  %v10556_v56 = vsel %vm9861_vm3, %v10554_v33, %v10555_v41 }
 0x3d7   : > { %v11266_v61 = vadd.f32 %v11236_v34, %v11000_v22  ;;  %v10106_v54 = vadd.f32 %v10098_v1, %v9896_v55  ;;  %v11267_v63 = vadd.f32 %v11239_v52, %v11001_v59  ;;  %v9835_v14 = vmul.f32 %v12830_v35, %v20022_v62 }
 0x3d8   : > { %v9630_v50 = vadd.f32 %v9622_v51, %v9412_v37  ;;  %v10784_v39 = vmul.f32 %v12830_v35, %v17984_v58  ;;  %v10994_v44 = vmul.f32 %v12833_v57, %v17991_v19  ;;  %v10522_v53 = vmul.f32 %v12834_v31, %v20025_v26  ;;  %v12840_v37 = vld [vmem:[%s12990_s16 + $0x160] sm:$0xff] }
 0x3d9   : > { %v11471_v3 = vadd.f32 %v18053_v6, %v11266_v61  ;;  %v10316_v30 = vadd.f32 %v10308_v10, %v10106_v54  ;;  %v11472_v48 = vadd.f32 %v18053_v6, %v11267_v63  ;;  %v9871_v27 = vrot.slane %v9835_v14, 1  ;;  %v20043_v63 = vld [vmem:[#allocation13_spill] sm:$0xff]  ;;  %v12842_v14 = vld [vmem:[%s12990_s16 + $0x1f0] sm:$0xff] }
 0x3da   : > { %v10523_v42 = vmul.f32 %v12835_v38, %v20025_v26  ;;  %v11242_v2 = vsel %vm9861_vm3, %v11240_v23, %v11241_v32  ;;  %v10099_v21 = vmul.f32 %v12834_v31, %v20024_v12  ;;  %v11208_v18 = vmul.f32 %v12836_v4, %v17997_v5  ;;  %v12841_v23 = vld [vmem:[%s12990_s16 + $0x168] sm:$0x1] }
 0x3db   : > { %12741 = vmatprep.mubr.msk.f32.mxu1 %vm4800_vm2, %v11471_v3  ;;  %v10582_v34 = vadd.f32 %v10556_v56, %v10316_v30  ;;  %v20042_v60 = vrot.slane %v20041_v20, 1  ;;  %v10557_v17 = vrot.slane %v10522_v53, 1  ;;  %v11209_v36 = vmul.f32 %v12837_v28, %v17997_v5 }
 0x3dc   : > { %12742 = vmatmul.mubr.msk.f32.vlgmr.msra.gmra.mxu1 %vm4800_vm2, %v11472_v48  ;;  %v10558_v13 = vrot.slane %v10523_v42, 1  ;;  %v10309_v10 = vmul.f32 %v12838_v11, %v20026_v47  ;;  %v9413_v29 = vmul.f32 %v12836_v4, %v20019_v0  ;;  %v10785_v46 = vmul.f32 %v12836_v4, %v17984_v58  ;;  %v12844_v42 = vld [vmem:[%s12990_s16 + $0x58] sm:$0x1] }
 0x3dd   : > { %v9873_v40 = vsel %vm9861_vm3, %v9871_v27, %v20042_v60  ;;  %v10792_v52 = vadd.f32 %v10784_v39, %v10582_v34  ;;  %v10995_v9 = vmul.f32 %v12839_v16, %v17991_v19  ;;  %v9623_v33 = vmul.f32 %v12839_v16, %v20035_v8  ;;  %v12843_v39 = vld [vmem:[%s12990_s16 + $0x50] sm:$0xff] }
 0x3de   : > { %v9897_v1 = vadd.f32 %v9873_v40, %v9630_v50  ;;  %v9837_v41 = vmul.f32 %v12836_v4, %v20022_v62  ;;  %v10559_v35 = vsel %vm9861_vm3, %v10557_v17, %v10558_v13  ;;  %v11243_v25 = vrot.slane %v11208_v18, 1 }
 0x3df   : > { %v11002_v22 = vadd.f32 %v10994_v44, %v10792_v52  ;;  %v11244_v24 = vrot.slane %v11209_v36, 1  ;;  %v9631_v43 = vadd.f32 %v9623_v33, %v9413_v29  ;;  %v10524_v57 = vmul.f32 %v12840_v37, %v20025_v26  ;;  %v12847_v33 = vld [vmem:[%s12990_s16 + $0x200] sm:$0xff] }
 0x3e0   : > { %v10107_v55 = vadd.f32 %v10099_v21, %v9897_v1  ;;  %v9874_v59 = vrot.slane %v9837_v41, 1  ;;  %v10100_v54 = vmul.f32 %v12840_v37, %v20024_v12  ;;  %v10525_v32 = vmul.f32 %v12841_v23, %v20025_v26  ;;  %v12845_v21 = vld [vmem:[%s12990_s16 + $0xe0] sm:$0xff] }
 0x3e1   : > { %v11268_v51 = vadd.f32 %v11242_v2, %v11002_v22  ;;  %v20044_v56 = vrot.slane %v20043_v63, 1  ;;  %v10310_v3 = vmul.f32 %v12842_v14, %v20026_v47  ;;  %v10560_v30 = vrot.slane %v10524_v57, 1  ;;  %v12848_v22 = vld [vmem:[%s12990_s16 + $0x178] sm:$0x1] }
 0x3e2   : > { %v10317_v61 = vadd.f32 %v10309_v10, %v10107_v55  ;;  %v11210_v44 = vmul.f32 %v12843_v39, %v17997_v5  ;;  %v10561_v53 = vrot.slane %v10525_v32, 1  ;;  %v11245_v38 = vsel %vm9861_vm3, %v11243_v25, %v11244_v24  ;;  %v12846_v10 = vld [vmem:[%s12990_s16 + $0x170] sm:$0xff] }
 0x3e3   : > { %v9876_v50 = vsel %vm9861_vm3, %v9874_v59, %v20044_v56  ;;  %v11473_v48 = vadd.f32 %v18053_v6, %v11268_v51  ;;  %v11211_v34 = vmul.f32 %v12844_v42, %v17997_v5  ;;  %v9414_v2 = vmul.f32 %v12843_v39, %v20019_v0  ;;  %v12849_v51 = vld [vmem:[%s12990_s16 + $0x60] sm:$0xff] }
 0x3e4   : > { %v10583_v27 = vadd.f32 %v10559_v35, %v10317_v61  ;;  %v9898_v31 = vadd.f32 %v9876_v50, %v9631_v43  ;;  %v9624_v4 = vmul.f32 %v12845_v21, %v20035_v8  ;;  %v10786_v60 = vmul.f32 %v12843_v39, %v17984_v58  ;;  %v12851_v50 = vld [vmem:[%s12990_s16 + $0xf0] sm:$0xff] }
 0x3e5   : > { %12744 = vmatprep.mubr.msk.f32.mxu1 %vm4800_vm2, %v11473_v48  ;;  %v9839_v40 = vmul.f32 %v12843_v39, %v20022_v62  ;;  %v10562_v17 = vsel %vm9861_vm3, %v10560_v30, %v10561_v53  ;;  %v10996_v13 = vmul.f32 %v12845_v21, %v17991_v19  ;;  %v11246_v28 = vrot.slane %v11210_v44, 1 }
 0x3e6   : > { %v10793_v18 = vadd.f32 %v10785_v46, %v10583_v27  ;;  %v10108_v20 = vadd.f32 %v10100_v54, %v9898_v31  ;;  %v9632_v36 = vadd.f32 %v9624_v4, %v9414_v2  ;;  %v10526_v29 = vmul.f32 %v12846_v10, %v20025_v26  ;;  %v12850_v54 = vld [vmem:[%s12990_s16 + $0x68] sm:$0x1]  ;;  %v12852_v2 = vld [vmem:[%s12990_s16 + $0x180] sm:$0xff] }
 0x3e7   : > { %v9877_v11 = vrot.slane %v9839_v40, 1  ;;  %v11247_v46 = vrot.slane %v11211_v34, 1  ;;  %v10101_v16 = vmul.f32 %v12846_v10, %v20024_v12  ;;  %v10311_v41 = vmul.f32 %v12847_v33, %v20026_v47 }
 0x3e8   : > { %v11003_v52 = vadd.f32 %v10995_v9, %v10793_v18  ;;  %v10318_v1 = vadd.f32 %v10310_v3, %v10108_v20  ;;  %v10527_v55 = vmul.f32 %v12848_v22, %v20025_v26  ;;  %v20045_v9 = vld [vmem:[#allocation15_spill] sm:$0xff]  ;;  %v10563_v59 = vrot.slane %v10526_v29, 1 }
 0x3e9   : > { %v20046_v24 = vrot.slane %v20045_v9, 1  ;;  %v11212_v61 = vmul.f32 %v12849_v51, %v17997_v5  ;;  %v11213_v23 = vmul.f32 %v12850_v54, %v17997_v5  ;;  %v9415_v56 = vmul.f32 %v12849_v51, %v20019_v0 }
 0x3ea   : > { %v11269_v35 = vadd.f32 %v11245_v38, %v11003_v52  ;;  %v10584_v25 = vadd.f32 %v10562_v17, %v10318_v1  ;;  %v10564_v57 = vrot.slane %v10527_v55, 1  ;;  %v9625_v14 = vmul.f32 %v12851_v50, %v20035_v8 }
 0x3eb   : > { %v9879_v43 = vsel %vm9861_vm3, %v9877_v11, %v20046_v24  ;;  %v11248_v3 = vsel %vm9861_vm3, %v11246_v28, %v11247_v46  ;;  %v11249_v39 = vrot.slane %v11212_v61, 1  ;;  %v11250_v44 = vrot.slane %v11213_v23, 1  ;;  %v12854_v28 = vld [vmem:[%s12990_s16 + $0x70] sm:$0xff] }
 0x3ec   : > { %v9899_v37 = vadd.f32 %v9879_v43, %v9632_v36  ;;  %v11474_v32 = vadd.f32 %v18053_v6, %v11269_v35  ;;  %v10794_v63 = vadd.f32 %v10786_v60, %v10584_v25  ;;  %v10565_v27 = vsel %vm9861_vm3, %v10563_v59, %v10564_v57  ;;  %v12853_v60 = vld [vmem:[%s12990_s16 + $0x188] sm:$0x1]  ;;  %v12857_v57 = vld [vmem:[%s12990_s16 + $0x190] sm:$0xff] }
 0x3ed   : > { %v9633_v31 = vadd.f32 %v9625_v14, %v9415_v56  ;;  %v9841_v53 = vmul.f32 %v12849_v51, %v20022_v62  ;;  %v9884_v38 = vrot.slane %v18048_v15, 1  ;;  %v10787_v34 = vmul.f32 %v12849_v51, %v17984_v58 }
 0x3ee   : > { %v10109_v30 = vadd.f32 %v10101_v16, %v9899_v37  ;;  %12745 = vmatmul.mubr.msk.f32.gmra.mxu1 %vm4800_vm2, %v11474_v32  ;;  %v11004_v48 = vadd.f32 %v10996_v13, %v10794_v63  ;;  %v10528_v21 = vmul.f32 %v12852_v2, %v20025_v26  ;;  %v10997_v18 = vmul.f32 %v12851_v50, %v17991_v19  ;;  %v12855_v16 = vld [vmem:[%s12990_s16 + $0x210] sm:$0xff]  ;;  %v12859_v63 = vld [vmem:[%s12990_s16 + $0x220] sm:$0xff] }
 0x3ef   : > { %v9880_v20 = vrot.slane %v9841_v53, 1  ;;  %v10529_v40 = vmul.f32 %v12853_v60, %v20025_v26  ;;  %v11251_v13 = vsel %vm9861_vm3, %v11249_v39, %v11250_v44  ;;  %v10102_v15 = vmul.f32 %v12852_v2, %v20024_v12  ;;  %v12860_v44 = vld [vmem:[%s12990_s16 + $0x80] sm:$0xff] }
 0x3f0   : > { %v10319_v42 = vadd.f32 %v10311_v41, %v10109_v30  ;;  %v11270_v4 = vadd.f32 %v11248_v3, %v11004_v48  ;;  %v11214_v36 = vmul.f32 %v12854_v28, %v17997_v5  ;;  %v10566_v11 = vrot.slane %v10528_v21, 1 }
 0x3f1   : > { %v9882_v1 = vsel %vm9861_vm3, %v9880_v20, %v9881_v45  ;;  %v10567_v10 = vrot.slane %v10529_v40, 1  ;;  %v10312_v33 = vmul.f32 %v12855_v16, %v20026_v47  ;;  %v9416_v41 = vmul.f32 %v12854_v28, %v20019_v0  ;;  %v12862_v20 = vld [vmem:[%s12990_s16 + $0x110] sm:$0xff] }
 0x3f2   : > { %v10585_v17 = vadd.f32 %v10565_v27, %v10319_v42  ;;  %v11475_v52 = vadd.f32 %v18053_v6, %v11270_v4  ;;  %v9900_v46 = vadd.f32 %v9882_v1, %v9633_v31  ;;  %v10788_v22 = vmul.f32 %v12854_v28, %v17984_v58 }
 0x3f3   : > { %v11215_v55 = vmul.f32 %v18044_v7, %v17997_v5  ;;  %v9626_v45 = vmul.f32 %v12856_v49, %v20035_v8  ;;  %v9843_v35 = vmul.f32 %v12854_v28, %v20022_v62  ;;  %v10998_v24 = vmul.f32 %v12856_v49, %v17991_v19  ;;  %v12858_v62 = vld [vmem:[%s12990_s16 + $0x198] sm:$0x1] }
 0x3f4   : > { %v10795_v29 = vadd.f32 %v10787_v34, %v10585_v17  ;;  %12747 = vmatprep.mubr.msk.f32.mxu1 %vm4800_vm2, %v11475_v52  ;;  %v10110_v9 = vadd.f32 %v10102_v15, %v9900_v46  ;;  %v11252_v43 = vrot.slane %v11214_v36, 1  ;;  %v10568_v0 = vsel %vm9861_vm3, %v10566_v11, %v10567_v10 }
 0x3f5   : > { %v9634_v59 = vadd.f32 %v9626_v45, %v9416_v41  ;;  %v9883_v37 = vrot.slane %v9843_v35, 1  ;;  %v10530_v7 = vmul.f32 %v12857_v57, %v20025_v26  ;;  %v10103_v8 = vmul.f32 %v12857_v57, %v20024_v12  ;;  %v12861_v12 = vld [vmem:[%s12990_s16 + $0x88] sm:$0x1]  ;;  %v12536_v41 = vld [vmem:[%s18224_s10] ss:$0 sm:$0xff] }
 0x3f6   : > { %v11005_v25 = vadd.f32 %v10997_v18, %v10795_v29  ;;  %v10320_v61 = vadd.f32 %v10312_v33, %v10110_v9  ;;  %v10531_v54 = vmul.f32 %v12858_v62, %v20025_v26  ;;  %v11253_v23 = vrot.slane %v11215_v55, 1 }
 0x3f7   : > { %v9885_v32 = vsel %vm9861_vm3, %v9883_v37, %v9884_v38  ;;  %v10313_v56 = vmul.f32 %v12859_v63, %v20026_v47  ;;  %v10569_v50 = vrot.slane %v10530_v7, 1  ;;  %v11216_v48 = vmul.f32 %v12860_v44, %v17997_v5 }
 0x3f8   : > { %v11271_v51 = vadd.f32 %v11251_v13, %v11005_v25  ;;  %v10586_v3 = vadd.f32 %v10568_v0, %v10320_v61  ;;  %v9901_v30 = vadd.f32 %v9885_v32, %v9634_v59  ;;  %v10570_v39 = vrot.slane %v10531_v54, 1 }
 0x3f9   : > { %v11217_v27 = vmul.f32 %v12861_v12, %v17997_v5  ;;  %v11254_v53 = vsel %vm9861_vm3, %v11252_v43, %v11253_v23  ;;  %v10789_v34 = vmul.f32 %v12860_v44, %v17984_v58  ;;  %v11255_v2 = vrot.slane %v11216_v48, 1 }
 0x3fa   : > { %v11476_v14 = vadd.f32 %v18053_v6, %v11271_v51  ;;  %v10796_v26 = vadd.f32 %v10788_v22, %v10586_v3  ;;  %v10111_v31 = vadd.f32 %v10103_v8, %v9901_v30  ;;  %v10571_v47 = vsel %vm9861_vm3, %v10569_v50, %v10570_v39 }
 0x3fb   : > { %v11256_v21 = vrot.slane %v11217_v27, 1  ;;  %v10999_v60 = vmul.f32 %v12862_v20, %v17991_v19 }
 0x3fc   : > { %12748 = vmatmul.mubr.msk.f32.gmra.mxu1 %vm4800_vm2, %v11476_v14  ;;  %v11006_v38 = vadd.f32 %v10998_v24, %v10796_v26  ;;  %v10321_v42 = vadd.f32 %v10313_v56, %v10111_v31 }
 0x3fd   : > { %v11257_v17 = vsel %vm9861_vm3, %v11255_v2, %v11256_v21 }
 0x3fe   : > { %v11272_v4 = vadd.f32 %v11254_v53, %v11006_v38  ;;  %v10587_v18 = vadd.f32 %v10571_v47, %v10321_v42 }
 0x400   : > { %v11477_v5 = vadd.f32 %v18053_v6, %v11272_v4  ;;  %v10797_v40 = vadd.f32 %v10789_v34, %v10587_v18 }
 0x402   : > { %12750 = vmatprep.mubr.msk.f32.mxu1 %vm4800_vm2, %v11477_v5  ;;  %v11007_v13 = vadd.f32 %v10999_v60, %v10797_v40 }
 0x404   : > { %v11273_v15 = vadd.f32 %v11257_v17, %v11007_v13 }
 0x406   : > { %v11478_v58 = vadd.f32 %v18053_v6, %v11273_v15 }
 0x408   : > { %12751 = vmatmul.mubr.msk.f32.gmra.mxu1 %vm4800_vm2, %v11478_v58 }
 0x469   : > { %v5153_v28 = vpop.f32.mrf.mxu1 }
 0x46b   : > { %v12724_v36 = vpop.f32.mrf.mxu1 }
 0x46e   : > { %v12729_v52 = vpop.f32.mrf.mxu1 }
 0x470   : > { %v12149_v1 = vpop.f32.mrf.mxu1 }
 0x47c   : > { %v12732_v19 = vpop.f32.mrf.mxu1 }
 0x47e   : > { %v12159_v11 = vpop.f32.mrf.mxu1 }
 0x484   : > { %v12735_v10 = vpop.f32.mrf.mxu1 }
 0x486   : > { %v12169_v29 = vpop.f32.mrf.mxu1 }
 0x48d   : > { %v12738_v46 = vpop.f32.mrf.mxu1 }
 0x48f   : > { %v12179_v16 = vpop.f32.mrf.mxu1 }
 0x49c   : > { %v12743_v33 = vpop.f32.mrf.mxu1 }
 0x49d   : > { %v12287_v6 = vadd.f32 %v12743_v33, %v12729_v52 }
 0x49e   : > { %v12281_v22 = vpop.f32.mrf.mxu1 }
 0x49f   : > { %v12328_v55 = vadd.f32 %v12536_v41, %v12287_v6  ;;  %v12282_v49 = vadd.f32 %v12281_v22, %v12149_v1 }
 0x4a1   : > { %v12336_v45 = vmax.f32 %v12328_v55, 0.0  ;;  %v12327_v35 = vadd.f32 %v12536_v41, %v12282_v49 }
 0x4a3   : > { %12345 = vst.msk [vmem:[%s18193_s25 + $0x8] sm:$0xff] %vm12343_vm4, %v12336_v45  ;;  %v12335_v25 = vmax.f32 %v12327_v35, 0.0 }
 0x4a5   : > { %12344 = vst.msk [vmem:[%s18193_s25] sm:$0xff] %vm12343_vm4, %v12335_v25 }
 0x4ae   : > { %v12746_v9 = vpop.f32.mrf.mxu1 }
 0x4af   : > { %v12297_v24 = vadd.f32 %v12746_v9, %v12732_v19 }
 0x4b0   : > { %v12291_v43 = vpop.f32.mrf.mxu1 }
 0x4b1   : > { %v12330_v0 = vadd.f32 %v12536_v41, %v12297_v24  ;;  %v12292_v59 = vadd.f32 %v12291_v43, %v12159_v11 }
 0x4b3   : > { %v12338_v37 = vmax.f32 %v12330_v0, 0.0  ;;  %v12329_v57 = vadd.f32 %v12536_v41, %v12292_v59 }
 0x4b5   : > { %12347 = vst.msk [vmem:[%s18193_s25 + $0x18] sm:$0xff] %vm12343_vm4, %v12338_v37  ;;  %v12337_v7 = vmax.f32 %v12329_v57, 0.0 }
 0x4b7   : > { %12346 = vst.msk [vmem:[%s18193_s25 + $0x10] sm:$0xff] %vm12343_vm4, %v12337_v7 }
 0x4bc   : > { %v12749_v51 = vpop.f32.mrf.mxu1 }
 0x4bd   : > { %v12307_v61 = vadd.f32 %v12749_v51, %v12735_v10 }
 0x4be   : > { %v12301_v8 = vpop.f32.mrf.mxu1 }
 0x4bf   : > { %v12332_v62 = vadd.f32 %v12536_v41, %v12307_v61  ;;  %v12302_v54 = vadd.f32 %v12301_v8, %v12169_v29 }
 0x4c1   : > { %v12340_v23 = vmax.f32 %v12332_v62, 0.0  ;;  %v12331_v32 = vadd.f32 %v12536_v41, %v12302_v54 }
 0x4c3   : > { %12349 = vst.msk [vmem:[%s18193_s25 + $0x28] sm:$0xff] %vm12343_vm4, %v12340_v23  ;;  %v12339_v63 = vmax.f32 %v12331_v32, 0.0 }
 0x4c5   : > { %12348 = vst.msk [vmem:[%s18193_s25 + $0x20] sm:$0xff] %vm12343_vm4, %v12339_v63 }
 0x4c8   : > { %v12752_v56 = vpop.f32.mrf.mxu1 }
 0x4c9   : > { %v12317_v50 = vadd.f32 %v12752_v56, %v12738_v46 }
 0x4ca   : > { %v12311_v14 = vpop.f32.mrf.mxu1 }
 0x4cb   : > { %v12334_v3 = vadd.f32 %v12536_v41, %v12317_v50  ;;  %v12312_v30 = vadd.f32 %v12311_v14, %v12179_v16 }
 0x4cd   : > { %v12342_v39 = vmax.f32 %v12334_v3, 0.0  ;;  %v12333_v44 = vadd.f32 %v12536_v41, %v12312_v30 }
 0x4cf   : > { %12351 = vst.msk [vmem:[%s18193_s25 + $0x38] sm:$0xff] %vm12343_vm4, %v12342_v39  ;;  %v12341_v48 = vmax.f32 %v12333_v44, 0.0 }
 0x4d1   : > { %12350 = vst.msk [vmem:[%s18193_s25 + $0x30] sm:$0xff] %vm12343_vm4, %v12341_v48 }
 0x4d2 PF: > { %s21_s17 = sadd.s32 1, %s12879_s17  }
 0x4d3   : > { %p18_p5 = scmp.ge.s32.totalorder %s21_s17, 4  }
 0x4d5   :  { %20 = sbr.rel (!%p18_p5) target bundleno = 1 (0x1), region = 94 }

</bundles_post_ra>
